<compile_context>
chip_gen: v7x
topology: tpu7x:2x2x1
jax: 0.10.0
libtpu: 0.0.40
codegen_flags: <defaults>
</compile_context>

<pallas_src>
import jax
import jax.numpy as jnp
import numpy as np
from jax.experimental import pallas as pl
from jax.experimental.pallas import tpu as pltpu


def _hypernet_kernel(x_ref,
                     w1, b1, w2, b2, w3, b3, w4, b4,
                     w5_ref, b5_ref, wout_ref, bout_ref,
                     out_ref):
    """Single-invocation forward pass; every operand is fully resident in VMEM."""

    def lin_relu(h, w_ref, b_ref):
        y = jnp.dot(h, w_ref[...], preferred_element_type=jnp.float32) + b_ref[...]
        return jnp.maximum(y, 0.0).astype(jnp.bfloat16)

    # Backbone layers 1..4 (bf16 activations, f32 accumulate + bias).
    h = x_ref[...].astype(jnp.bfloat16)
    h = lin_relu(h, w1, b1)
    h = lin_relu(h, w2, b2)
    h = lin_relu(h, w3, b3)
    h = lin_relu(h, w4, b4)

    # Last backbone layer (no ReLU after it in the Sequential). Keep h5 in f32:
    # the extra passes of a mixed/f32 matmul are free on this HBM-bound kernel
    # and avoid rounding the 2048-wide intermediate (and its bias) through bf16.
    h5 = jnp.dot(h, w5_ref[...], preferred_element_type=jnp.float32) + b5_ref[...]

    # Fused head matmul (== torch.cat of all per-head Linear outputs along dim=1),
    # head biases folded straight into the single output store.
    out_ref[...] = (
        jnp.dot(h5, wout_ref[...].astype(jnp.float32),
                preferred_element_type=jnp.float32)
        + bout_ref[...]
    )


def colors_and_points_hypernetwork(x, params, total_out):
    """params = (w1,b1, w2,b2, w3,b3, w4,b4, w5,b5, wout_padded, bout_padded)."""
    (w1, b1, w2, b2, w3, b3, w4, b4, w5, b5, wout, bout) = params
    B = x.shape[0]
    out_pad = wout.shape[1]    # multiple of 128 (lane-dense stores)

    vmem_spec = pl.BlockSpec(memory_space=pltpu.MemorySpace.VMEM)

    out = pl.pallas_call(
        _hypernet_kernel,
        out_shape=jax.ShapeDtypeStruct((B, out_pad), jnp.float32),
        in_specs=[vmem_spec] * 13,          # x + 12 param arrays, whole-array in VMEM
        out_specs=vmem_spec,
        compiler_params=pltpu.CompilerParams(
            vmem_limit_bytes=32 * 1024 * 1024,   # footprint ~16-17 MB; leave headroom
        ),
    )(x, *params)
    return out[:, :total_out]


def prepare_params(backbone_f32, heads_f32, *, lane=128):
    """One-time parameter prep (hoisted out of the per-call path):
    - fuse the output heads into a single (2048, total_out) matmul (== torch.cat dim=1)
    - pad the fused head to a multiple of 128 lanes (lane-dense stores)
    - cast weights to bf16 (HBM-bandwidth win); keep biases f32."""
    w_out = jnp.concatenate([w for (w, _) in heads_f32], axis=1)
    b_out = jnp.concatenate([b for (_, b) in heads_f32], axis=1)
    total_out = int(w_out.shape[1])
    out_pad = ((total_out + lane - 1) // lane) * lane
    pad = out_pad - total_out
    if pad:
        w_out = jnp.pad(w_out, ((0, 0), (0, pad)))
        b_out = jnp.pad(b_out, ((0, 0), (0, pad)))

    params = []
    for (w, b) in backbone_f32:
        params.extend([w.astype(jnp.bfloat16), b.astype(jnp.float32)])
    params.extend([w_out.astype(jnp.bfloat16), b_out.astype(jnp.float32)])
    return tuple(params), total_out


def _torch_linear_init(key, fan_in, fan_out):
    """Deterministic PyTorch-style Linear init: U(-1/sqrt(fan_in), 1/sqrt(fan_in))."""
    kw, kb = jax.random.split(key)
    bound = 1.0 / np.sqrt(fan_in)
    w = jax.random.uniform(kw, (fan_in, fan_out), jnp.float32, -bound, bound)
    b = jax.random.uniform(kb, (1, fan_out), jnp.float32, -bound, bound)
    return w, b


def _reference_forward(x, backbone, heads):
    h = x
    for i, (w, b) in enumerate(backbone):
        h = h @ w + b
        if i < len(backbone) - 1:
            h = jnp.maximum(h, 0.0)
    return jnp.concatenate([h @ w + b for (w, b) in heads], axis=1)


if __name__ == "__main__":
    # --- synthetic config (small but consistent with the module) ----------------
    z_size = 32
    hn_use_bias = True                       # config['model']['CP_HN']['use_bias']
    tn_layer_out_channels = [8, 16, 32]      # config['model']['TN']['layer_out_channels']
    tn_use_bias = 1                          # int(config['model']['TN']['use_bias'])
    target_network_out_ch = [3] + tn_layer_out_channels + [3]   # [3, 8, 16, 32, 3]
    B = 2

    backbone_dims = [z_size, 64, 128, 512, 1024, 2048]
    head_out_dims = [
        (target_network_out_ch[i - 1] + tn_use_bias) * target_network_out_ch[i]
        for i in range(1, len(target_network_out_ch))
    ]                                        # [32, 144, 544, 99] -> total 819

    # --- deterministic parameter init --------------------------------------------
    key = jax.random.PRNGKey(0)
    keys = jax.random.split(key, len(backbone_dims) - 1 + len(head_out_dims) + 1)

    backbone = []
    for i in range(len(backbone_dims) - 1):
        w, b = _torch_linear_init(keys[i], backbone_dims[i], backbone_dims[i + 1])
        if not hn_use_bias:
            b = jnp.zeros_like(b)
        backbone.append((w, b))

    heads = []
    for j, d_out in enumerate(head_out_dims):
        w, b = _torch_linear_init(keys[len(backbone_dims) - 1 + j], 2048, d_out)
        heads.append((w, b))                 # output heads always have bias=True

    # One-time prep: fuse/pad heads, cast weights to bf16 (hoisted out of per-call path).
    flat_params, total_out = prepare_params(backbone, heads)

    # --- input --------------------------------------------------------------------
    x = jax.random.normal(jax.random.PRNGKey(1), (B, z_size), dtype=jnp.float32)

    # --- run kernel & check against pure-JAX f32 reference -------------------------
    out = colors_and_points_hypernetwork(x, flat_params, total_out)
    out = jax.block_until_ready(out)

    ref = jax.block_until_ready(_reference_forward(x, backbone, heads))
    assert out.shape == (B, total_out)
    # bf16 weights on the MXU with f32 accumulation (and an f32 LHS for the final
    # head matmul) -> low-percent-level error vs the f32 reference.
    np.testing.assert_allclose(np.asarray(out), np.asarray(ref), rtol=3e-2, atol=3e-2)

    print("KERNEL_OK")
</pallas_src>

<mosaic_0001>
module attributes {stable_mosaic.version = 11 : i64} {
  func.func @_hypernet_kernel(%arg0: memref<2x32xf32, #tpu.memory_space<vmem>>, %arg1: memref<32x64xbf16, #tpu.memory_space<vmem>>, %arg2: memref<1x64xf32, #tpu.memory_space<vmem>>, %arg3: memref<64x128xbf16, #tpu.memory_space<vmem>>, %arg4: memref<1x128xf32, #tpu.memory_space<vmem>>, %arg5: memref<128x512xbf16, #tpu.memory_space<vmem>>, %arg6: memref<1x512xf32, #tpu.memory_space<vmem>>, %arg7: memref<512x1024xbf16, #tpu.memory_space<vmem>>, %arg8: memref<1x1024xf32, #tpu.memory_space<vmem>>, %arg9: memref<1024x2048xbf16, #tpu.memory_space<vmem>>, %arg10: memref<1x2048xf32, #tpu.memory_space<vmem>>, %arg11: memref<2048x896xbf16, #tpu.memory_space<vmem>>, %arg12: memref<1x896xf32, #tpu.memory_space<vmem>>, %arg13: memref<2x896xf32, #tpu.memory_space<vmem>>) attributes {dimension_semantics = [], scalar_prefetch = 0 : i64, scratch_operands = 0 : i64, tpu.core_type = #tpu.core_type<tc>} {
    %c0 = arith.constant 0 : index
    %c0_0 = arith.constant 0 : index
    %0 = vector.load %arg0[%c0, %c0_0] : memref<2x32xf32, #tpu.memory_space<vmem>>, vector<2x32xf32>
    %1 = arith.truncf %0 : vector<2x32xf32> to vector<2x32xbf16>
    %c0_1 = arith.constant 0 : index
    %c0_2 = arith.constant 0 : index
    %2 = vector.load %arg1[%c0_1, %c0_2] : memref<32x64xbf16, #tpu.memory_space<vmem>>, vector<32x64xbf16>
    %cst = arith.constant dense<0.000000e+00> : vector<2x64xf32>
    %3 = tpu.matmul %1, %2, %cst {dimension_numbers = #tpu.dot_dimension_numbers<[1], [0], [0], [1], [0, 0, 1, 1], [], []>} : vector<2x32xbf16>, vector<32x64xbf16>, vector<2x64xf32> -> vector<2x64xf32>
    %c0_3 = arith.constant 0 : index
    %c0_4 = arith.constant 0 : index
    %4 = vector.load %arg2[%c0_3, %c0_4] : memref<1x64xf32, #tpu.memory_space<vmem>>, vector<1x64xf32>
    %5 = vector.broadcast %4 : vector<1x64xf32> to vector<2x64xf32>
    %6 = arith.addf %3, %5 : vector<2x64xf32>
    %cst_5 = arith.constant 0.000000e+00 : f32
    %7 = vector.broadcast %cst_5 : f32 to vector<2x64xf32>
    %8 = arith.maximumf %6, %7 : vector<2x64xf32>
    %9 = arith.truncf %8 : vector<2x64xf32> to vector<2x64xbf16>
    %c0_6 = arith.constant 0 : index
    %c0_7 = arith.constant 0 : index
    %10 = vector.load %arg3[%c0_6, %c0_7] : memref<64x128xbf16, #tpu.memory_space<vmem>>, vector<64x128xbf16>
    %cst_8 = arith.constant dense<0.000000e+00> : vector<2x128xf32>
    %11 = tpu.matmul %9, %10, %cst_8 {dimension_numbers = #tpu.dot_dimension_numbers<[1], [0], [0], [1], [0, 0, 1, 1], [], []>} : vector<2x64xbf16>, vector<64x128xbf16>, vector<2x128xf32> -> vector<2x128xf32>
    %c0_9 = arith.constant 0 : index
    %c0_10 = arith.constant 0 : index
    %12 = vector.load %arg4[%c0_9, %c0_10] : memref<1x128xf32, #tpu.memory_space<vmem>>, vector<1x128xf32>
    %13 = vector.broadcast %12 : vector<1x128xf32> to vector<2x128xf32>
    %14 = arith.addf %11, %13 : vector<2x128xf32>
    %cst_11 = arith.constant 0.000000e+00 : f32
    %15 = vector.broadcast %cst_11 : f32 to vector<2x128xf32>
    %16 = arith.maximumf %14, %15 : vector<2x128xf32>
    %17 = arith.truncf %16 : vector<2x128xf32> to vector<2x128xbf16>
    %c0_12 = arith.constant 0 : index
    %c0_13 = arith.constant 0 : index
    %18 = vector.load %arg5[%c0_12, %c0_13] : memref<128x512xbf16, #tpu.memory_space<vmem>>, vector<128x512xbf16>
    %cst_14 = arith.constant dense<0.000000e+00> : vector<2x512xf32>
    %19 = tpu.matmul %17, %18, %cst_14 {dimension_numbers = #tpu.dot_dimension_numbers<[1], [0], [0], [1], [0, 0, 1, 1], [], []>} : vector<2x128xbf16>, vector<128x512xbf16>, vector<2x512xf32> -> vector<2x512xf32>
    %c0_15 = arith.constant 0 : index
    %c0_16 = arith.constant 0 : index
    %20 = vector.load %arg6[%c0_15, %c0_16] : memref<1x512xf32, #tpu.memory_space<vmem>>, vector<1x512xf32>
    %21 = vector.broadcast %20 : vector<1x512xf32> to vector<2x512xf32>
    %22 = arith.addf %19, %21 : vector<2x512xf32>
    %cst_17 = arith.constant 0.000000e+00 : f32
    %23 = vector.broadcast %cst_17 : f32 to vector<2x512xf32>
    %24 = arith.maximumf %22, %23 : vector<2x512xf32>
    %25 = arith.truncf %24 : vector<2x512xf32> to vector<2x512xbf16>
    %c0_18 = arith.constant 0 : index
    %c0_19 = arith.constant 0 : index
    %26 = vector.load %arg7[%c0_18, %c0_19] : memref<512x1024xbf16, #tpu.memory_space<vmem>>, vector<512x1024xbf16>
    %cst_20 = arith.constant dense<0.000000e+00> : vector<2x1024xf32>
    %27 = tpu.matmul %25, %26, %cst_20 {dimension_numbers = #tpu.dot_dimension_numbers<[1], [0], [0], [1], [0, 0, 1, 1], [], []>} : vector<2x512xbf16>, vector<512x1024xbf16>, vector<2x1024xf32> -> vector<2x1024xf32>
    %c0_21 = arith.constant 0 : index
    %c0_22 = arith.constant 0 : index
    %28 = vector.load %arg8[%c0_21, %c0_22] : memref<1x1024xf32, #tpu.memory_space<vmem>>, vector<1x1024xf32>
    %29 = vector.broadcast %28 : vector<1x1024xf32> to vector<2x1024xf32>
    %30 = arith.addf %27, %29 : vector<2x1024xf32>
    %cst_23 = arith.constant 0.000000e+00 : f32
    %31 = vector.broadcast %cst_23 : f32 to vector<2x1024xf32>
    %32 = arith.maximumf %30, %31 : vector<2x1024xf32>
    %33 = arith.truncf %32 : vector<2x1024xf32> to vector<2x1024xbf16>
    %c0_24 = arith.constant 0 : index
    %c0_25 = arith.constant 0 : index
    %34 = vector.load %arg9[%c0_24, %c0_25] : memref<1024x2048xbf16, #tpu.memory_space<vmem>>, vector<1024x2048xbf16>
    %cst_26 = arith.constant dense<0.000000e+00> : vector<2x2048xf32>
    %35 = tpu.matmul %33, %34, %cst_26 {dimension_numbers = #tpu.dot_dimension_numbers<[1], [0], [0], [1], [0, 0, 1, 1], [], []>} : vector<2x1024xbf16>, vector<1024x2048xbf16>, vector<2x2048xf32> -> vector<2x2048xf32>
    %c0_27 = arith.constant 0 : index
    %c0_28 = arith.constant 0 : index
    %36 = vector.load %arg10[%c0_27, %c0_28] : memref<1x2048xf32, #tpu.memory_space<vmem>>, vector<1x2048xf32>
    %37 = vector.broadcast %36 : vector<1x2048xf32> to vector<2x2048xf32>
    %38 = arith.addf %35, %37 : vector<2x2048xf32>
    %c0_29 = arith.constant 0 : index
    %c0_30 = arith.constant 0 : index
    %39 = vector.load %arg11[%c0_29, %c0_30] : memref<2048x896xbf16, #tpu.memory_space<vmem>>, vector<2048x896xbf16>
    %40 = arith.extf %39 : vector<2048x896xbf16> to vector<2048x896xf32>
    %cst_31 = arith.constant dense<0.000000e+00> : vector<2x896xf32>
    %41 = tpu.matmul %38, %40, %cst_31 {dimension_numbers = #tpu.dot_dimension_numbers<[1], [0], [0], [1], [0, 0, 1, 1], [], []>} : vector<2x2048xf32>, vector<2048x896xf32>, vector<2x896xf32> -> vector<2x896xf32>
    %c0_32 = arith.constant 0 : index
    %c0_33 = arith.constant 0 : index
    %42 = vector.load %arg12[%c0_32, %c0_33] : memref<1x896xf32, #tpu.memory_space<vmem>>, vector<1x896xf32>
    %43 = vector.broadcast %42 : vector<1x896xf32> to vector<2x896xf32>
    %44 = arith.addf %41, %43 : vector<2x896xf32>
    %c0_34 = arith.constant 0 : index
    %c0_35 = arith.constant 0 : index
    %45 = vector.load %arg13[%c0_34, %c0_35] : memref<2x896xf32, #tpu.memory_space<vmem>>, vector<2x896xf32>
    tpu.vector_store %arg13[%c0_34, %c0_35], %44 {strides = array<i32>} : memref<2x896xf32, #tpu.memory_space<vmem>>, vector<2x896xf32>,
    return
  }
}

</mosaic_0001>

<bundles_post_ra>
// kernel: tpu_custom_call.1
= control target key start
LH: loop header
LB: loop body
LE: loop exit
PB: predicated region body
PF: predicated region fallthrough
CT: control target
= control target key end

     0   :  { %18 = vsyncpa [#allocation3], 0  ;;  %s22169_s0 = inlined_call_operand.hbm [shape: f32[2,32], index: 0, kind: input, shape index: {}]   ;;  %s22170_s1 = inlined_call_operand.hbm [shape: bf16[32,64], index: 1, kind: input, shape index: {}]   ;;  %s22171_s2 = inlined_call_operand.hbm [shape: f32[1,64], index: 2, kind: input, shape index: {}]   ;;  %s22172_s3 = inlined_call_operand.hbm [shape: bf16[64,128], index: 3, kind: input, shape index: {}]   ;;  %s22173_s4 = inlined_call_operand.hbm [shape: f32[1,128], index: 4, kind: input, shape index: {}]   ;;  %s22174_s5 = inlined_call_operand.hbm [shape: bf16[128,512], index: 5, kind: input, shape index: {}]   ;;  %s22175_s6 = inlined_call_operand.hbm [shape: f32[1,512], index: 6, kind: input, shape index: {}]   ;;  %s22176_s7 = inlined_call_operand.hbm [shape: bf16[512,1024], index: 7, kind: input, shape index: {}]   ;;  %s22177_s8 = inlined_call_operand.hbm [shape: f32[1,1024], index: 8, kind: input, shape index: {}]   ;;  %s22178_s9 = inlined_call_operand.hbm [shape: bf16[1024,2048], index: 9, kind: input, shape index: {}]   ;;  %s22179_s10 = inlined_call_operand.hbm [shape: f32[1,2048], index: 10, kind: input, shape index: {}]   ;;  %s22180_s11 = inlined_call_operand.hbm [shape: bf16[2048,896], index: 11, kind: input, shape index: {}]   ;;  %s22181_s12 = inlined_call_operand.hbm [shape: f32[1,896], index: 12, kind: input, shape index: {}]   ;;  %s22182_s13 = inlined_call_operand.hbm [shape: f32[2,896], index: 13, kind: output, shape index: {}]  }
   0x1   :  { %19 = vsyncpa [#allocation6], 0 }
   0x2   :  { %20 = vsyncpa [#allocation9], 0 }
   0x3   :  { %21 = vsyncpa [#allocation12], 0 }
   0x4   :  { %22 = vsyncpa [#allocation15], 0 }
   0x5   :  { %23 = vsyncpa [#allocation18], 0 }
   0x6   :  { %24 = vsyncpa [#allocation21], 0 }
   0x7   :  { %25 = vsyncpa [#allocation4], 0  ;;  %s21502_s25 = smov [#allocation5]   ;;  %s21178_s29 = scalar_lea.hbm %s22170_s1, 256 }
   0x8   :  { %s41_s26 = sshll.u32 %s21502_s25, 4  ;;  %p21179_p0 = scmp.ne.s32.totalorder %s22170_s1, %s21178_s29  ;;  %s42_s26 = int_to_ptr.vmem [resolvable:$true] %s41_s26 }
   0x9   :  { %p21182_p1 = scmp.lt.u32.totalorder %s21178_s29, %s22170_s1 }
   0xb   :  { %p21184_p2 = pnand %p21182_p1, %p21179_p0 }
   0xd   :  { %21187 = shalt.err (!%p21184_p2)
}
   0xe   :  { %s21188_s17 = scalar_lea.vmem %s42_s26, 256  ;;  %p21193_p4 = scmp.lt.s32.totalorder %s42_s26, %s42_s26 }
   0xf   :  { %p21189_p3 = scmp.ne.s32.totalorder %s42_s26, %s21188_s17  ;;  %p21194_p5 = scmp.lt.s32.totalorder %s21188_s17, %s21188_s17 }
  0x11   :  { %p21195_p6 = por %p21194_p5, %p21193_p4 }
  0x13   :  { %p21196_p7 = pnand %p21195_p6, %p21189_p3 }
  0x15   :  { %21199 = shalt.err (!%p21196_p7)
}
  0x16   :  { %s21503_s18 = smov 64   ;;  %s21504_s19 = smov 4  }
  0x17   :  { %47 = dma.hbm_to_vmem [thread:$0]  %s22170_s1, 256, %s42_s26, [#allocation6], %s21503_s18, %s21503_s18, %s21504_s19  }
  0x18   :  { %s21505_s22 = smov [#allocation8]   ;;  %s21506_s24 = smov [#allocation11]  }
  0x19   :  { %s63_s23 = sshll.u32 %s21505_s22, 4  ;;  %s85_s25 = sshll.u32 %s21506_s24, 4  ;;  %s64_s23 = int_to_ptr.vmem [resolvable:$true] %s63_s23  ;;  %s86_s25 = int_to_ptr.vmem [resolvable:$true] %s85_s25 }
  0x1a   :  { %s21200_s29 = scalar_lea.hbm %s22172_s3, 512 }
  0x1b   :  { %p21201_p8 = scmp.ne.s32.totalorder %s22172_s3, %s21200_s29  ;;  %p21204_p9 = scmp.lt.u32.totalorder %s21200_s29, %s22172_s3 }
  0x1d   :  { %p21206_p10 = pnand %p21204_p9, %p21201_p8 }
  0x1f   :  { %21209 = shalt.err (!%p21206_p10)
}
  0x20   :  { %s21210_s1 = scalar_lea.vmem %s64_s23, 512  ;;  %p21215_p12 = scmp.lt.s32.totalorder %s64_s23, %s64_s23 }
  0x21   :  { %p21211_p11 = scmp.ne.s32.totalorder %s64_s23, %s21210_s1  ;;  %p21216_p13 = scmp.lt.s32.totalorder %s21210_s1, %s21210_s1 }
  0x23   :  { %p21217_p0 = por %p21216_p13, %p21215_p12 }
  0x25   :  { %p21218_p1 = pnand %p21217_p0, %p21211_p11 }
  0x27   :  { %21221 = shalt.err (!%p21218_p1)
}
  0x28   :  { %69 = dma.hbm_to_vmem [thread:$0]  %s22172_s3, 512, %s64_s23, [#allocation9], %s21503_s18, %s21503_s18, %s21504_s19  }
  0x29   :  { %s21222_s22 = scalar_lea.hbm %s22174_s5, 4096 }
  0x2a   :  { %p21223_p2 = scmp.ne.s32.totalorder %s22174_s5, %s21222_s22  ;;  %p21226_p3 = scmp.lt.u32.totalorder %s21222_s22, %s22174_s5 }
  0x2c   :  { %p21228_p4 = pnand %p21226_p3, %p21223_p2 }
  0x2e   :  { %21231 = shalt.err (!%p21228_p4)
}
  0x2f   :  { %s21232_s30 = scalar_lea.vmem %s86_s25, 4096  ;;  %p21237_p6 = scmp.lt.s32.totalorder %s86_s25, %s86_s25 }
  0x30   :  { %p21233_p5 = scmp.ne.s32.totalorder %s86_s25, %s21232_s30  ;;  %p21238_p7 = scmp.lt.s32.totalorder %s21232_s30, %s21232_s30 }
  0x32   :  { %p21239_p8 = por %p21238_p7, %p21237_p6 }
  0x34   :  { %p21240_p9 = pnand %p21239_p8, %p21233_p5 }
  0x36   :  { %21243 = shalt.err (!%p21240_p9)
}
  0x37   :  { %s21507_s3 = smov 256   ;;  %s21508_s19 = smov 16  }
  0x38   :  { %91 = dma.hbm_to_vmem [thread:$0]  %s22174_s5, 4096, %s86_s25, [#allocation12], %s21507_s3, %s21507_s3, %s21508_s19  }
  0x39   :  { %s21509_s15 = smov [#allocation14]   ;;  %s21244_s17 = scalar_lea.hbm %s22176_s7, 32768 }
  0x3a   :  { %s107_s16 = sshll.u32 %s21509_s15, 4  ;;  %p21245_p10 = scmp.ne.s32.totalorder %s22176_s7, %s21244_s17  ;;  %s108_s16 = int_to_ptr.vmem [resolvable:$true] %s107_s16 }
  0x3b   :  { %p21248_p11 = scmp.lt.u32.totalorder %s21244_s17, %s22176_s7 }
  0x3d   :  { %p21250_p12 = pnand %p21248_p11, %p21245_p10 }
  0x3f   :  { %21253 = shalt.err (!%p21250_p12)
}
  0x40   :  { %s21254_s27 = scalar_lea.vmem %s108_s16, 32768  ;;  %p21259_p0 = scmp.lt.s32.totalorder %s108_s16, %s108_s16 }
  0x41   :  { %p21255_p13 = scmp.ne.s32.totalorder %s108_s16, %s21254_s27  ;;  %p21260_p1 = scmp.lt.s32.totalorder %s21254_s27, %s21254_s27 }
  0x43   :  { %p21261_p2 = por %p21260_p1, %p21259_p0 }
  0x45   :  { %p21262_p3 = pnand %p21261_p2, %p21255_p13 }
  0x47   :  { %21265 = shalt.err (!%p21262_p3)
}
  0x48   :  { %s21510_s5 = smov 512   ;;  %s21511_s25 = smov 32  }
  0x49   :  { %113 = dma.hbm_to_vmem [thread:$0]  %s22176_s7, 32768, %s108_s16, [#allocation15], %s21510_s5, %s21510_s5, %s21511_s25  }
  0x4a   :  { %s21512_s30 = smov [#allocation17]   ;;  %s21513_s19 = smov [#allocation20]  }
  0x4b   :  { %s129_s3 = sshll.u32 %s21512_s30, 4  ;;  %s151_s23 = sshll.u32 %s21513_s19, 4  ;;  %s130_s3 = int_to_ptr.vmem [resolvable:$true] %s129_s3  ;;  %s152_s23 = int_to_ptr.vmem [resolvable:$true] %s151_s23 }
  0x4c   :  { %s21266_s1 = scalar_lea.hbm %s22178_s9, 131072 }
  0x4d   :  { %p21267_p4 = scmp.ne.s32.totalorder %s22178_s9, %s21266_s1  ;;  %p21270_p5 = scmp.lt.u32.totalorder %s21266_s1, %s22178_s9 }
  0x4f   :  { %p21272_p6 = pnand %p21270_p5, %p21267_p4 }
  0x51   :  { %21275 = shalt.err (!%p21272_p6)
}
  0x52   :  { %s21276_s7 = scalar_lea.vmem %s130_s3, 131072  ;;  %p21281_p8 = scmp.lt.s32.totalorder %s130_s3, %s130_s3 }
  0x53   :  { %p21277_p7 = scmp.ne.s32.totalorder %s130_s3, %s21276_s7  ;;  %p21282_p9 = scmp.lt.s32.totalorder %s21276_s7, %s21276_s7 }
  0x55   :  { %p21283_p10 = por %p21282_p9, %p21281_p8 }
  0x57   :  { %p21284_p11 = pnand %p21283_p10, %p21277_p7 }
  0x59   :  { %21287 = shalt.err (!%p21284_p11)
}
  0x5a   :  { %s21514_s16 = smov 1024   ;;  %s21288_s25 = scalar_lea.hbm %s22180_s11, 114688 }
  0x5b   :  { %135 = dma.hbm_to_vmem [thread:$0]  %s22178_s9, 131072, %s130_s3, [#allocation18], %s21514_s16, %s21514_s16, %s21503_s18  }
  0x5c   :  { %p21289_p12 = scmp.ne.s32.totalorder %s22180_s11, %s21288_s25  ;;  %p21292_p13 = scmp.lt.u32.totalorder %s21288_s25, %s22180_s11 }
  0x5e   :  { %p21294_p0 = pnand %p21292_p13, %p21289_p12 }
  0x60   :  { %21297 = shalt.err (!%p21294_p0)
}
  0x61   :  { %s21298_s14 = scalar_lea.vmem %s152_s23, 114688  ;;  %p21303_p2 = scmp.lt.s32.totalorder %s152_s23, %s152_s23 }
  0x62   :  { %p21299_p1 = scmp.ne.s32.totalorder %s152_s23, %s21298_s14  ;;  %p21304_p3 = scmp.lt.s32.totalorder %s21298_s14, %s21298_s14 }
  0x64   :  { %p21305_p4 = por %p21304_p3, %p21303_p2 }
  0x66   :  { %p21306_p5 = pnand %p21305_p4, %p21299_p1 }
  0x68   :  { %21309 = shalt.err (!%p21306_p5)
}
  0x69   :  { %s21515_s9 = smov 448   ;;  %s21516_s18 = smov 28  }
  0x6a   :  { %157 = dma.hbm_to_vmem [thread:$0]  %s22180_s11, 114688, %s152_s23, [#allocation21], %s21515_s9, %s21515_s9, %s21516_s18  }
  0x6b   :  { %s21517_s1 = smov [#allocation2]   ;;  %s21518_s17 = smov [#allocation7]  }
  0x6c   :  { %s32_s26 = sshll.u32 %s21517_s1, 4  ;;  %s54_s20 = sshll.u32 %s21518_s17, 4  ;;  %s33_s26 = int_to_ptr.vmem [resolvable:$true] %s32_s26  ;;  %s55_s20 = int_to_ptr.vmem [resolvable:$true] %s54_s20 }
  0x6d   :  { %s21310_s16 = scalar_lea.hbm %s22169_s0, 32 }
  0x6e   :  { %p21311_p6 = scmp.ne.s32.totalorder %s22169_s0, %s21310_s16  ;;  %p21314_p7 = scmp.lt.u32.totalorder %s21310_s16, %s22169_s0 }
  0x70   :  { %p21316_p8 = pnand %p21314_p7, %p21311_p6 }
  0x72   :  { %21319 = shalt.err (!%p21316_p8)
}
  0x73   :  { %s21320_s11 = scalar_lea.vmem %s33_s26, 32  ;;  %p21325_p10 = scmp.lt.s32.totalorder %s33_s26, %s33_s26 }
  0x74   :  { %p21321_p9 = scmp.ne.s32.totalorder %s33_s26, %s21320_s11  ;;  %p21326_p11 = scmp.lt.s32.totalorder %s21320_s11, %s21320_s11 }
  0x76   :  { %p21327_p12 = por %p21326_p11, %p21325_p10 }
  0x78   :  { %p21328_p13 = pnand %p21327_p12, %p21321_p9 }
  0x7a   :  { %21331 = shalt.err (!%p21328_p13)
}
  0x7b   :  { %35 = dma.hbm_to_vmem [thread:$0]  %s22169_s0, 32, %s33_s26, [#allocation3]  }
  0x7c   :  { %s21332_s30 = scalar_lea.hbm %s22171_s2, 16 }
  0x7d   :  { %p21333_p0 = scmp.ne.s32.totalorder %s22171_s2, %s21332_s30  ;;  %p21336_p1 = scmp.lt.u32.totalorder %s21332_s30, %s22171_s2 }
  0x7f   :  { %p21338_p2 = pnand %p21336_p1, %p21333_p0 }
  0x81   :  { %21341 = shalt.err (!%p21338_p2)
}
  0x82   :  { %s21342_s3 = scalar_lea.vmem %s55_s20, 16  ;;  %s21346_s15 = scalar_lea.vmem %s55_s20, 32 }
  0x83   :  { %p21343_p3 = scmp.ne.s32.totalorder %s55_s20, %s21342_s3  ;;  %p21347_p4 = scmp.lt.s32.totalorder %s55_s20, %s55_s20 }
  0x84   :  { %p21348_p5 = scmp.lt.s32.totalorder %s21346_s15, %s21342_s3 }
  0x86   :  { %p21349_p6 = por %p21348_p5, %p21347_p4 }
  0x88   :  { %p21350_p7 = pnand %p21349_p6, %p21343_p3 }
  0x8a   :  { %21353 = shalt.err (!%p21350_p7)
}
  0x8b   :  { %57 = dma.hbm_to_vmem [thread:$0]  %s22171_s2, 16, %s55_s20, [#allocation6]  }
  0x8c   :  { %s21519_s26 = smov [#allocation10]   ;;  %s21520_s21 = smov [#allocation13]  }
  0x8d   :  { %s76_s17 = sshll.u32 %s21519_s26, 4  ;;  %s98_s7 = sshll.u32 %s21520_s21, 4  ;;  %s77_s17 = int_to_ptr.vmem [resolvable:$true] %s76_s17  ;;  %s99_s7 = int_to_ptr.vmem [resolvable:$true] %s98_s7 }
  0x8e   :  { %s21354_s24 = scalar_lea.hbm %s22173_s4, 16 }
  0x8f   :  { %p21355_p8 = scmp.ne.s32.totalorder %s22173_s4, %s21354_s24  ;;  %p21358_p9 = scmp.lt.u32.totalorder %s21354_s24, %s22173_s4 }
  0x91   :  { %p21360_p10 = pnand %p21358_p9, %p21355_p8 }
  0x93   :  { %21363 = shalt.err (!%p21360_p10)
}
  0x94   :  { %s21364_s2 = scalar_lea.vmem %s77_s17, 16  ;;  %s21368_s20 = scalar_lea.vmem %s77_s17, 32 }
  0x95   :  { %p21365_p11 = scmp.ne.s32.totalorder %s77_s17, %s21364_s2  ;;  %p21369_p12 = scmp.lt.s32.totalorder %s77_s17, %s77_s17 }
  0x96   :  { %p21370_p13 = scmp.lt.s32.totalorder %s21368_s20, %s21364_s2 }
  0x98   :  { %p21371_p0 = por %p21370_p13, %p21369_p12 }
  0x9a   :  { %p21372_p1 = pnand %p21371_p0, %p21365_p11 }
  0x9c   :  { %21375 = shalt.err (!%p21372_p1)
}
  0x9d   :  { %79 = dma.hbm_to_vmem [thread:$0]  %s22173_s4, 16, %s77_s17, [#allocation9]  }
  0x9e   :  { %s21376_s19 = scalar_lea.hbm %s22175_s6, 64 }
  0x9f   :  { %p21377_p2 = scmp.ne.s32.totalorder %s22175_s6, %s21376_s19  ;;  %p21380_p3 = scmp.lt.u32.totalorder %s21376_s19, %s22175_s6 }
  0xa1   :  { %p21382_p4 = pnand %p21380_p3, %p21377_p2 }
  0xa3   :  { %21385 = shalt.err (!%p21382_p4)
}
  0xa4   :  { %s21386_s15 = scalar_lea.vmem %s99_s7, 64  ;;  %p21391_p6 = scmp.lt.s32.totalorder %s99_s7, %s99_s7 }
  0xa5   :  { %p21387_p5 = scmp.ne.s32.totalorder %s99_s7, %s21386_s15  ;;  %p21392_p7 = scmp.lt.s32.totalorder %s21386_s15, %s21386_s15 }
  0xa7   :  { %p21393_p8 = por %p21392_p7, %p21391_p6 }
  0xa9   :  { %p21394_p9 = pnand %p21393_p8, %p21387_p5 }
  0xab   :  { %21397 = shalt.err (!%p21394_p9)
}
  0xac   :  { %101 = dma.hbm_to_vmem [thread:$0]  %s22175_s6, 64, %s99_s7, [#allocation12]  }
  0xad   :  { %s21521_s1 = smov [#allocation16]   ;;  %s21522_s17 = smov [#allocation19]  }
  0xae   :  { %s120_s26 = sshll.u32 %s21521_s1, 4  ;;  %s142_s21 = sshll.u32 %s21522_s17, 4  ;;  %s121_s26 = int_to_ptr.vmem [resolvable:$true] %s120_s26  ;;  %s143_s21 = int_to_ptr.vmem [resolvable:$true] %s142_s21 }
  0xaf   :  { %s21398_s24 = scalar_lea.hbm %s22177_s8, 128 }
  0xb0   :  { %p21399_p10 = scmp.ne.s32.totalorder %s22177_s8, %s21398_s24  ;;  %p21402_p11 = scmp.lt.u32.totalorder %s21398_s24, %s22177_s8 }
  0xb2   :  { %p21404_p12 = pnand %p21402_p11, %p21399_p10 }
  0xb4   :  { %21407 = shalt.err (!%p21404_p12)
}
  0xb5   :  { %s21408_s6 = scalar_lea.vmem %s121_s26, 128  ;;  %p21413_p0 = scmp.lt.s32.totalorder %s121_s26, %s121_s26 }
  0xb6   :  { %p21409_p13 = scmp.ne.s32.totalorder %s121_s26, %s21408_s6  ;;  %p21414_p1 = scmp.lt.s32.totalorder %s21408_s6, %s21408_s6 }
  0xb8   :  { %p21415_p2 = por %p21414_p1, %p21413_p0 }
  0xba   :  { %p21416_p3 = pnand %p21415_p2, %p21409_p13 }
  0xbc   :  { %21419 = shalt.err (!%p21416_p3)
}
  0xbd   :  { %123 = dma.hbm_to_vmem [thread:$0]  %s22177_s8, 128, %s121_s26, [#allocation15]  }
  0xbe   :  { %s21420_s28 = scalar_lea.hbm %s22179_s10, 256 }
  0xbf   :  { %p21421_p4 = scmp.ne.s32.totalorder %s22179_s10, %s21420_s28  ;;  %p21424_p5 = scmp.lt.u32.totalorder %s21420_s28, %s22179_s10 }
  0xc1   :  { %p21426_p6 = pnand %p21424_p5, %p21421_p4 }
  0xc3   :  { %21429 = shalt.err (!%p21426_p6)
}
  0xc4   :  { %s21430_s9 = scalar_lea.vmem %s143_s21, 256  ;;  %p21435_p8 = scmp.lt.s32.totalorder %s143_s21, %s143_s21 }
  0xc5   :  { %p21431_p7 = scmp.ne.s32.totalorder %s143_s21, %s21430_s9  ;;  %p21436_p9 = scmp.lt.s32.totalorder %s21430_s9, %s21430_s9 }
  0xc7   :  { %p21437_p10 = por %p21436_p9, %p21435_p8 }
  0xc9   :  { %p21438_p11 = pnand %p21437_p10, %p21431_p7 }
  0xcb   :  { %21441 = shalt.err (!%p21438_p11)
}
  0xcc   :  { %145 = dma.hbm_to_vmem [thread:$0]  %s22179_s10, 256, %s143_s21, [#allocation18]  }
  0xcd   :  { %s21523_s3 = smov [#allocation22]   ;;  %s21442_s1 = scalar_lea.hbm %s22181_s12, 112 }
  0xce   :  { %s164_s15 = sshll.u32 %s21523_s3, 4  ;;  %p21443_p12 = scmp.ne.s32.totalorder %s22181_s12, %s21442_s1  ;;  %s165_s15 = int_to_ptr.vmem [resolvable:$true] %s164_s15 }
  0xcf   :  { %p21446_p13 = scmp.lt.u32.totalorder %s21442_s1, %s22181_s12 }
  0xd1   :  { %p21448_p0 = pnand %p21446_p13, %p21443_p12 }
  0xd3   :  { %21451 = shalt.err (!%p21448_p0)
}
  0xd4   :  { %s21452_s24 = scalar_lea.vmem %s165_s15, 112  ;;  %s21456_s10 = scalar_lea.vmem %s165_s15, 128 }
  0xd5   :  { %p21453_p1 = scmp.ne.s32.totalorder %s165_s15, %s21452_s24  ;;  %p21457_p2 = scmp.lt.s32.totalorder %s165_s15, %s165_s15 }
  0xd6   :  { %p21458_p3 = scmp.lt.s32.totalorder %s21456_s10, %s21452_s24 }
  0xd8   :  { %p21459_p4 = por %p21458_p3, %p21457_p2 }
  0xda   :  { %p21460_p5 = pnand %p21459_p4, %p21453_p1 }
  0xdc   :  { %21463 = shalt.err (!%p21460_p5)
}
  0xdd   :  { %167 = dma.hbm_to_vmem [thread:$0]  %s22181_s12, 112, %s165_s15, [#allocation21]  }
  0xde   :  { %21486 = dma.done.wait [#allocation3], 32  }
  0xdf   :  { %21487 = vsyncadd [#allocation3], 4294967264 }
  0xe0   :  { %21488 = dma.done.wait [#allocation6], 272  }
  0xe1   :  { %21489 = vsyncadd [#allocation6], 4294967024 }
  0xe2   :  { %21490 = dma.done.wait [#allocation9], 528  }
  0xe3   :  { %21491 = vsyncadd [#allocation9], 4294966768 }
  0xe4   :  { %21492 = dma.done.wait [#allocation12], 4160  }
  0xe5   :  { %21493 = vsyncadd [#allocation12], 4294963136 }
  0xe6   :  { %21494 = dma.done.wait [#allocation15], 32896  }
  0xe7   :  { %21495 = vsyncadd [#allocation15], 4294934400 }
  0xe8   :  { %21496 = dma.done.wait [#allocation18], 131328  }
  0xe9   :  { %21497 = vsyncadd [#allocation18], 4294835968 }
  0xea   :  { %21498 = dma.done.wait [#allocation21], 114800  }
  0xeb   :  { %21499 = vsyncadd [#allocation21], 4294852496  ;;  %v21524_v0 = vmov 0.0   ;;  %vm21525_vm0 = vmmov 0   ;;  %v19841_v1 = vld [vmem:[#allocation5] sm:$0xff]   ;;  %v19842_v2 = vld [vmem:[#allocation5 + $0x8] sm:$0xff]  }
  0xec   :  { %16922 = vmatprep.subr.bf16.mxu0 %v21524_v0  ;;  %16926 = vmatprep.mubr.msk.bf16.mxu0 %vm21525_vm0, %v21524_v0  ;;  %v208_v3 = vld [vmem:[#allocation2] sm:$0x3]  ;;  %v19843_v4 = vld [vmem:[#allocation8] sm:$0xff]   ;;  %vm233_vm1 = vcmask 261120   ;;  %v19845_v7 = vld [vmem:[#allocation8 + $0x10] sm:$0xff]   ;;  %vm318_vm2 = vcmask 523264  }
  0xed   :  { %16930 = vmatprep.subr.bf16.mxu1 %v21524_v0  ;;  %16938 = vmatprep.mubr.msk.bf16.mxu1 %vm21525_vm0, %v21524_v0  ;;  %v19844_v5 = vld [vmem:[#allocation8 + $0x8] sm:$0xff]   ;;  %v209_v6 = vpack.c.bf16 %v208_v3, %v208_v3  ;;  %v19846_v8 = vld [vmem:[#allocation8 + $0x18] sm:$0xff]   ;;  %v19847_v9 = vld [vmem:[#allocation11] ss:$16 sps:$4 sm:$0xff]   ;;  %v21526_v49 = vmov 0   ;;  %s21528_s12 = smov [#allocation23]  }
  0xee   :  { %16923 = vmatpush3.bf16.msra.mxu0 %v19841_v1  ;;  %16931 = vmatpush3.bf16.msra.mxu1 %v19843_v4  ;;  %v19849_v10 = vld [vmem:[#allocation11 + $0x4] ss:$16 sps:$4 sm:$0xff]   ;;  %v19852_v11 = vld [vmem:[#allocation11 + $0xc] ss:$16 sps:$4 sm:$0xff]   ;;  %v19853_v13 = vld [vmem:[#allocation11 + $0x20] ss:$16 sps:$4 sm:$0xff]  }
  0xef   :  { %16924 = vmatprep.subr.bf16.mxu0 %v21524_v0  ;;  %16932 = vmatprep.subr.bf16.mxu1 %v21524_v0  ;;  %v19855_v12 = vld [vmem:[#allocation11 + $0x24] ss:$16 sps:$4 sm:$0xff]   ;;  %v19859_v15 = vld [vmem:[#allocation11 + $0x40] ss:$16 sps:$4 sm:$0xff]   ;;  %v15312_v24 = vld [vmem:[#allocation7] ss:$0 sm:$0xff] }
  0xf0   :  { %v19861_v14 = vld [vmem:[#allocation11 + $0x44] ss:$16 sps:$4 sm:$0xff]   ;;  %v19865_v17 = vld [vmem:[#allocation11 + $0x60] ss:$16 sps:$4 sm:$0xff]   ;;  %v19850_v29 = vld [vmem:[#allocation11 + $0x8] ss:$16 sps:$4 sm:$0xff]  }
  0xf1   :  { %v19867_v16 = vld [vmem:[#allocation11 + $0x64] ss:$16 sps:$4 sm:$0xff]   ;;  %v19871_v19 = vld [vmem:[#allocation11 + $0x80] ss:$16 sps:$4 sm:$0xff]   ;;  %v19858_v32 = vld [vmem:[#allocation11 + $0x2c] ss:$16 sps:$4 sm:$0xff]  }
  0xf2   :  { %16925 = vmatpush3.bf16.msra.mxu0 %v19842_v2  ;;  %16933 = vmatpush3.bf16.msra.mxu1 %v19844_v5  ;;  %v19873_v18 = vld [vmem:[#allocation11 + $0x84] ss:$16 sps:$4 sm:$0xff]   ;;  %v19877_v21 = vld [vmem:[#allocation11 + $0xa0] ss:$16 sps:$4 sm:$0xff]   ;;  %v19856_v34 = vld [vmem:[#allocation11 + $0x28] ss:$16 sps:$4 sm:$0xff]  }
  0xf3   :  { %16934 = vmatprep.subr.bf16.mxu1 %v21524_v0  ;;  %578 = vmatprep.subr.bf16.mxu0 %v19849_v10  ;;  %v19879_v20 = vld [vmem:[#allocation11 + $0xa4] ss:$16 sps:$4 sm:$0xff]   ;;  %v19883_v23 = vld [vmem:[#allocation11 + $0xc0] ss:$16 sps:$4 sm:$0xff]   ;;  %v19864_v35 = vld [vmem:[#allocation11 + $0x4c] ss:$16 sps:$4 sm:$0xff]  }
  0xf4   :  { %v19885_v22 = vld [vmem:[#allocation11 + $0xc4] ss:$16 sps:$4 sm:$0xff]   ;;  %v19862_v36 = vld [vmem:[#allocation11 + $0x48] ss:$16 sps:$4 sm:$0xff]   ;;  %v19870_v37 = vld [vmem:[#allocation11 + $0x6c] ss:$16 sps:$4 sm:$0xff]  }
  0xf5   :  { %16927 = vmatmul.mubr.msk.bf16.vlgmr.msra.gmra.mrb[0].mxu0 %vm233_vm1, %v209_v6  ;;  %v19868_v38 = vld [vmem:[#allocation11 + $0x68] ss:$16 sps:$4 sm:$0xff]   ;;  %v19876_v39 = vld [vmem:[#allocation11 + $0x8c] ss:$16 sps:$4 sm:$0xff]   ;;  %v19891_v45 = vld [vmem:[#allocation11 + $0xe4] ss:$16 sps:$4 sm:$0xff]  }
  0xf6   :  { %16935 = vmatpush3.bf16.msra.mxu1 %v19845_v7  ;;  %579 = vmatpush1.bf16.msra.mxu0 %v19847_v9  ;;  %v19874_v40 = vld [vmem:[#allocation11 + $0x88] ss:$16 sps:$4 sm:$0xff]   ;;  %v19882_v41 = vld [vmem:[#allocation11 + $0xac] ss:$16 sps:$4 sm:$0xff]   ;;  %v19889_v47 = vld [vmem:[#allocation11 + $0xe0] ss:$16 sps:$4 sm:$0xff]  }
  0xf7   :  { %16936 = vmatprep.subr.bf16.mxu1 %v21524_v0  ;;  %580 = vmatprep.subr.bf16.mxu0 %v19855_v12  ;;  %v19880_v42 = vld [vmem:[#allocation11 + $0xa8] ss:$16 sps:$4 sm:$0xff]   ;;  %v19888_v43 = vld [vmem:[#allocation11 + $0xcc] ss:$16 sps:$4 sm:$0xff]   ;;  %s15297_s5 = sshll.u32 %s21528_s12, 4  ;;  %s15298_s5 = int_to_ptr.vmem [resolvable:$true] %s15297_s5 }
  0xf8   :  { %v19886_v44 = vld [vmem:[#allocation11 + $0xc8] ss:$16 sps:$4 sm:$0xff]   ;;  %v19894_v46 = vld [vmem:[#allocation11 + $0xec] ss:$16 sps:$4 sm:$0xff]   ;;  %610 = vmatprep.mubr.bf16.mxu0 %v21526_v49  ;;  %s21464_s11 = scalar_lea.vmem %s15298_s5, 224  ;;  %p21469_p7 = scmp.lt.s32.totalorder %s15298_s5, %s15298_s5 }
  0xf9   :  { %v19892_v48 = vld [vmem:[#allocation11 + $0xe8] ss:$16 sps:$4 sm:$0xff]   ;;  %v15316_v58 = vld [vmem:[#allocation10] ss:$0 sm:$0xff]  ;;  %p21465_p6 = scmp.ne.s32.totalorder %s15298_s5, %s21464_s11  ;;  %p21470_p8 = scmp.lt.s32.totalorder %s21464_s11, %s21464_s11 }
  0xfa   :  { %16937 = vmatpush3.bf16.msra.mxu1 %v19846_v8  ;;  %581 = vmatpush1.bf16.msra.mxu0 %v19853_v13  ;;  %v668_v50 = vld [vmem:[#allocation14] sm:$0xff]  ;;  %v670_v52 = vld [vmem:[#allocation14 + $0x10] sm:$0xff] }
  0xfb   :  { %619 = vmatprep.subr.bf16.mxu1 %v19852_v11  ;;  %582 = vmatprep.subr.bf16.mxu0 %v19861_v14  ;;  %v672_v51 = vld [vmem:[#allocation14 + $0x20] sm:$0xff]  ;;  %v674_v55 = vld [vmem:[#allocation14 + $0x30] sm:$0xff]  ;;  %p21471_p9 = por %p21470_p8, %p21469_p7 }
  0xfc   :  { %v15354_v53 = vcombine.low %v668_v50, %v672_v51  ;;  %v15355_v54 = vcombine.high %v668_v50, %v672_v51  ;;  %v15358_v56 = vcombine.low %v670_v52, %v674_v55  ;;  %v15359_v57 = vcombine.high %v670_v52, %v674_v55  ;;  %v676_v62 = vld [vmem:[#allocation14 + $0x40] sm:$0xff]  ;;  %v678_v1 = vld [vmem:[#allocation14 + $0x50] sm:$0xff] }
  0xfd   :  { %v680_v0 = vld [vmem:[#allocation14 + $0x60] sm:$0xff]  ;;  %v682_v2 = vld [vmem:[#allocation14 + $0x70] sm:$0xff]  ;;  %p21472_p10 = pnand %p21471_p9, %p21465_p6 }
  0xfe   :  { %583 = vmatpush1.bf16.msra.mxu0 %v19859_v15  ;;  %v15363_v6 = vcombine.high %v676_v62, %v680_v0  ;;  %v15367_v7 = vcombine.high %v678_v1, %v682_v2  ;;  %v684_v8 = vld [vmem:[#allocation14 + $0x80] sm:$0xff]  ;;  %v686_v10 = vld [vmem:[#allocation14 + $0x90] sm:$0xff]  ;;  %v15362_v12 = vcombine.low %v676_v62, %v680_v0  ;;  %v15366_v13 = vcombine.low %v678_v1, %v682_v2 }
  0xff   :  { %584 = vmatprep.subr.bf16.mxu0 %v19867_v16  ;;  %v688_v9 = vld [vmem:[#allocation14 + $0xa0] sm:$0xff]  ;;  %v690_v11 = vld [vmem:[#allocation14 + $0xb0] sm:$0xff] }
 0x100   :  { %v15371_v14 = vcombine.high %v684_v8, %v688_v9  ;;  %v15375_v15 = vcombine.high %v686_v10, %v690_v11  ;;  %v692_v16 = vld [vmem:[#allocation14 + $0xc0] sm:$0xff]  ;;  %v726_v50 = vld [vmem:[#allocation14 + $0x1d0] sm:$0xff] }
 0x101   :  { %v730_v51 = vld [vmem:[#allocation14 + $0x1f0] sm:$0xff]  ;;  %v740_v0 = vld [vmem:[#allocation14 + $0x240] sm:$0xff] }
 0x102   :  { %585 = vmatpush1.bf16.msra.mxu0 %v19865_v17  ;;  %v696_v17 = vld [vmem:[#allocation14 + $0xe0] sm:$0xff]  ;;  %v15415_v55 = vcombine.high %v726_v50, %v730_v51  ;;  %v742_v2 = vld [vmem:[#allocation14 + $0x250] sm:$0xff] }
 0x103   :  { %586 = vmatprep.subr.bf16.mxu0 %v19873_v18  ;;  %v694_v18 = vld [vmem:[#allocation14 + $0xd0] sm:$0xff]  ;;  %v744_v1 = vld [vmem:[#allocation14 + $0x260] sm:$0xff] }
 0x106   :  { %587 = vmatpush1.bf16.msra.mxu0 %v19871_v19  ;;  %v698_v19 = vld [vmem:[#allocation14 + $0xf0] sm:$0xff] }
 0x107   :  { %588 = vmatprep.subr.bf16.mxu0 %v19879_v20  ;;  %v15370_v20 = vcombine.low %v684_v8, %v688_v9  ;;  %v748_v8 = vld [vmem:[#allocation14 + $0x280] sm:$0xff] }
 0x108   :  { %v752_v9 = vld [vmem:[#allocation14 + $0x2a0] sm:$0xff] }
 0x10a   :  { %589 = vmatpush1.bf16.msra.mxu0 %v19877_v21  ;;  %v15374_v21 = vcombine.low %v686_v10, %v690_v11  ;;  %v750_v10 = vld [vmem:[#allocation14 + $0x290] sm:$0xff] }
 0x10b   :  { %590 = vmatprep.subr.bf16.mxu0 %v19885_v22  ;;  %v15379_v22 = vcombine.high %v692_v16, %v696_v17  ;;  %v754_v11 = vld [vmem:[#allocation14 + $0x2b0] sm:$0xff] }
 0x10e   :  { %591 = vmatpush1.bf16.msra.mxu0 %v19883_v23  ;;  %v15383_v23 = vcombine.high %v694_v18, %v698_v19 }
 0x10f   :  { %592 = vmatprep.subr.bf16.mxu0 %v19891_v45 }
 0x112   :  { %593 = vmatpush1.bf16.msra.mxu0 %v19889_v47 }
 0x113   :  { %2410 = vmatprep.subr.bf16.mxu0 %v15359_v57  ;;  %v736_v57 = vld [vmem:[#allocation14 + $0x220] sm:$0xff] }
 0x1c8   :  { %v271_v25 = vpop.f32.mrb[0].mxu0 }
 0x1c9   :  { %v272_v26 = vadd.f32 %v15312_v24, %v271_v25  ;;  %v16928_v27 = vpop.f32.mrb[1].mxu0  ;;  %v700_v24 = vld [vmem:[#allocation14 + $0x100] sm:$0xff] }
 0x1ca   :  { %v274_v28 = vpop.f32.mrb[2].mxu0  ;;  %v704_v25 = vld [vmem:[#allocation14 + $0x120] sm:$0xff]  ;;  %v706_v27 = vld [vmem:[#allocation14 + $0x130] sm:$0xff] }
 0x1cb   :  { %v277_v30 = vmax.f32 %v272_v26, 0.0  ;;  %v16929_v31 = vpop.f32.mrb[3].mxu0  ;;  %v702_v26 = vld [vmem:[#allocation14 + $0x110] sm:$0xff]  ;;  %v15378_v28 = vcombine.low %v692_v16, %v696_v17  ;;  %v756_v16 = vld [vmem:[#allocation14 + $0x2c0] sm:$0xff] }
 0x1cc   :  { %v15391_v31 = vcombine.high %v702_v26, %v706_v27  ;;  %v760_v17 = vld [vmem:[#allocation14 + $0x2e0] sm:$0xff] }
 0x1cd   :  { %v278_v33 = vpack.c.bf16 %v277_v30, %v277_v30  ;;  %v15387_v30 = vcombine.high %v700_v24, %v704_v25 }
 0x1cf   :  { %16939 = vmatmul.mubr.msk.bf16.vlgmr.msra.gmra.mrb[0].mxu1 %vm318_vm2, %v278_v33  ;;  %v712_v33 = vld [vmem:[#allocation14 + $0x160] sm:$0xff] }
 0x1d0   :  { %620 = vmatpush1.bf16.msra.mxu1 %v19850_v29  ;;  %651 = vmatprep.mubr.bf16.mxu1 %v21526_v49  ;;  %v15382_v29 = vcombine.low %v694_v18, %v698_v19  ;;  %v728_v49 = vld [vmem:[#allocation14 + $0x1e0] sm:$0xff]  ;;  %v758_v18 = vld [vmem:[#allocation14 + $0x2d0] sm:$0xff] }
 0x1d1   :  { %621 = vmatprep.subr.bf16.mxu1 %v19858_v32  ;;  %v708_v32 = vld [vmem:[#allocation14 + $0x140] sm:$0xff]  ;;  %v762_v19 = vld [vmem:[#allocation14 + $0x2f0] sm:$0xff] }
 0x1d4   :  { %622 = vmatpush1.bf16.msra.mxu1 %v19856_v34  ;;  %v710_v34 = vld [vmem:[#allocation14 + $0x150] sm:$0xff] }
 0x1d5   :  { %623 = vmatprep.subr.bf16.mxu1 %v19864_v35  ;;  %v714_v35 = vld [vmem:[#allocation14 + $0x170] sm:$0xff] }
 0x1d6   :  { %v15398_v45 = vcombine.low %v710_v34, %v714_v35 }
 0x1d8   :  { %624 = vmatpush1.bf16.msra.mxu1 %v19862_v36  ;;  %v15386_v36 = vcombine.low %v700_v24, %v704_v25  ;;  %v764_v24 = vld [vmem:[#allocation14 + $0x300] sm:$0xff] }
 0x1d9   :  { %625 = vmatprep.subr.bf16.mxu1 %v19870_v37  ;;  %v15390_v37 = vcombine.low %v702_v26, %v706_v27  ;;  %v768_v25 = vld [vmem:[#allocation14 + $0x320] sm:$0xff]  ;;  %v766_v26 = vld [vmem:[#allocation14 + $0x310] sm:$0xff] }
 0x1da   :  { %v770_v27 = vld [vmem:[#allocation14 + $0x330] sm:$0xff] }
 0x1dc   :  { %626 = vmatpush1.bf16.msra.mxu1 %v19868_v38  ;;  %v15395_v38 = vcombine.high %v708_v32, %v712_v33 }
 0x1dd   :  { %627 = vmatprep.subr.bf16.mxu1 %v19876_v39  ;;  %v15399_v39 = vcombine.high %v710_v34, %v714_v35  ;;  %v774_v34 = vld [vmem:[#allocation14 + $0x350] sm:$0xff] }
 0x1de   :  { %v778_v35 = vld [vmem:[#allocation14 + $0x370] sm:$0xff] }
 0x1e0   :  { %628 = vmatpush1.bf16.msra.mxu1 %v19874_v40  ;;  %v716_v40 = vld [vmem:[#allocation14 + $0x180] sm:$0xff] }
 0x1e1   :  { %629 = vmatprep.subr.bf16.mxu1 %v19882_v41  ;;  %v720_v41 = vld [vmem:[#allocation14 + $0x1a0] sm:$0xff] }
 0x1e2   :  { %v15402_v52 = vcombine.low %v716_v40, %v720_v41 }
 0x1e4   :  { %630 = vmatpush1.bf16.msra.mxu1 %v19880_v42  ;;  %v718_v42 = vld [vmem:[#allocation14 + $0x190] sm:$0xff] }
 0x1e5   :  { %631 = vmatprep.subr.bf16.mxu1 %v19888_v43  ;;  %v722_v43 = vld [vmem:[#allocation14 + $0x1b0] sm:$0xff] }
 0x1e6   :  { %v15407_v47 = vcombine.high %v718_v42, %v722_v43 }
 0x1e8   :  { %632 = vmatpush1.bf16.msra.mxu1 %v19886_v44  ;;  %v15394_v44 = vcombine.low %v708_v32, %v712_v33  ;;  %v772_v32 = vld [vmem:[#allocation14 + $0x340] sm:$0xff] }
 0x1e9   :  { %633 = vmatprep.subr.bf16.mxu1 %v19894_v46  ;;  %v15403_v46 = vcombine.high %v716_v40, %v720_v41  ;;  %v776_v33 = vld [vmem:[#allocation14 + $0x360] sm:$0xff]  ;;  %v15462_v41 = vcombine.low %v774_v34, %v778_v35 }
 0x1ea   :  { %v15458_v40 = vcombine.low %v772_v32, %v776_v33 }
 0x1ec   :  { %634 = vmatpush1.bf16.msra.mxu1 %v19892_v48  ;;  %v724_v48 = vld [vmem:[#allocation14 + $0x1c0] sm:$0xff] }
 0x1ed   :  { %2246 = vmatprep.subr.bf16.mxu1 %v15355_v54  ;;  %v15411_v54 = vcombine.high %v724_v48, %v728_v49 }
 0x2a2   :  { %v356_v59 = vpop.f32.mrb[0].mxu1 }
 0x2a3   :  { %v357_v60 = vadd.f32 %v15316_v58, %v356_v59  ;;  %v16940_v61 = vpop.f32.mrb[1].mxu1  ;;  %v734_v58 = vld [vmem:[#allocation14 + $0x210] sm:$0xff] }
 0x2a4   :  { %v359_v63 = vpop.f32.mrb[2].mxu1  ;;  %v738_v59 = vld [vmem:[#allocation14 + $0x230] sm:$0xff]  ;;  %v15414_v61 = vcombine.low %v726_v50, %v730_v51  ;;  %v788_v50 = vld [vmem:[#allocation14 + $0x3c0] sm:$0xff] }
 0x2a5   :  { %v362_v3 = vmax.f32 %v357_v60, 0.0  ;;  %v16941_v4 = vpop.f32.mrb[3].mxu1  ;;  %v15410_v60 = vcombine.low %v724_v48, %v728_v49  ;;  %v15423_v63 = vcombine.high %v734_v58, %v738_v59  ;;  %v792_v51 = vld [vmem:[#allocation14 + $0x3e0] sm:$0xff] }
 0x2a7   :  { %v363_v5 = vpack.c.bf16 %v362_v3, %v362_v3  ;;  %v746_v3 = vld [vmem:[#allocation14 + $0x270] sm:$0xff] }
 0x2a9   :  { %611 = vmatmul.mubr.bf16.vlgmr.msra.gmra.mrb[4].mxu0 %v363_v5  ;;  %652 = vmatmul.mubr.bf16.vlgmr.msra.gmra.mrb[4].mxu1 %v363_v5  ;;  %v15422_v5 = vcombine.low %v734_v58, %v738_v59  ;;  %v796_v58 = vld [vmem:[#allocation14 + $0x400] sm:$0xff] }
 0x2aa   :  { %2247 = vmatpush1.bf16.msra.mxu1 %v15354_v53  ;;  %2411 = vmatpush1.bf16.msra.mxu0 %v15358_v56  ;;  %v15406_v53 = vcombine.low %v718_v42, %v722_v43  ;;  %v732_v56 = vld [vmem:[#allocation14 + $0x200] sm:$0xff] }
 0x2ab   :  { %2248 = vmatprep.subr.bf16.mxu1 %v15363_v6  ;;  %2412 = vmatprep.subr.bf16.mxu0 %v15367_v7  ;;  %v15419_v62 = vcombine.high %v732_v56, %v736_v57  ;;  %v15418_v4 = vcombine.low %v732_v56, %v736_v57  ;;  %v15427_v6 = vcombine.high %v740_v0, %v744_v1  ;;  %v780_v42 = vld [vmem:[#allocation14 + $0x380] sm:$0xff] }
 0x2ac   :  { %v15431_v7 = vcombine.high %v742_v2, %v746_v3  ;;  %v784_v43 = vld [vmem:[#allocation14 + $0x3a0] sm:$0xff] }
 0x2ad   :  { %v800_v59 = vld [vmem:[#allocation14 + $0x420] sm:$0xff] }
 0x2ae   :  { %2249 = vmatpush1.bf16.msra.mxu1 %v15362_v12  ;;  %2413 = vmatpush1.bf16.msra.mxu0 %v15366_v13  ;;  %v15426_v12 = vcombine.low %v740_v0, %v744_v1  ;;  %v15430_v13 = vcombine.low %v742_v2, %v746_v3  ;;  %v398_v2 = vlaneseq }
 0x2af   :  { %2250 = vmatprep.subr.bf16.mxu1 %v15371_v14  ;;  %2414 = vmatprep.subr.bf16.mxu0 %v15375_v15  ;;  %v15435_v14 = vcombine.high %v748_v8, %v752_v9  ;;  %v15439_v15 = vcombine.high %v750_v10, %v754_v11 }
 0x2b0   :  { %v21760_v3 = vshrl.u32 %v398_v2, 7  ;;  %v844_v2 = vld [vmem:[#allocation14 + $0x580] sm:$0xff] }
 0x2b2   :  { %2251 = vmatpush1.bf16.msra.mxu1 %v15370_v20  ;;  %2415 = vmatpush1.bf16.msra.mxu0 %v15374_v21  ;;  %v15434_v20 = vcombine.low %v748_v8, %v752_v9  ;;  %v15438_v21 = vcombine.low %v750_v10, %v754_v11 }
 0x2b3   :  { %2252 = vmatprep.subr.bf16.mxu1 %v15379_v22  ;;  %2416 = vmatprep.subr.bf16.mxu0 %v15383_v23  ;;  %v15443_v22 = vcombine.high %v756_v16, %v760_v17  ;;  %v15447_v23 = vcombine.high %v758_v18, %v762_v19 }
 0x2b6   :  { %2253 = vmatpush1.bf16.msra.mxu1 %v15378_v28  ;;  %2417 = vmatpush1.bf16.msra.mxu0 %v15382_v29  ;;  %v15442_v28 = vcombine.low %v756_v16, %v760_v17  ;;  %v15446_v29 = vcombine.low %v758_v18, %v762_v19 }
 0x2b7   :  { %2254 = vmatprep.subr.bf16.mxu1 %v15387_v30  ;;  %2418 = vmatprep.subr.bf16.mxu0 %v15391_v31  ;;  %v15451_v30 = vcombine.high %v764_v24, %v768_v25  ;;  %v15455_v31 = vcombine.high %v766_v26, %v770_v27 }
 0x2ba   :  { %2255 = vmatpush1.bf16.msra.mxu1 %v15386_v36  ;;  %2419 = vmatpush1.bf16.msra.mxu0 %v15390_v37  ;;  %v15450_v36 = vcombine.low %v764_v24, %v768_v25  ;;  %v15454_v37 = vcombine.low %v766_v26, %v770_v27  ;;  %v804_v24 = vld [vmem:[#allocation14 + $0x440] sm:$0xff]  ;;  %v806_v27 = vld [vmem:[#allocation14 + $0x450] sm:$0xff] }
 0x2bb   :  { %2256 = vmatprep.subr.bf16.mxu1 %v15395_v38  ;;  %2420 = vmatprep.subr.bf16.mxu0 %v15399_v39  ;;  %v15459_v38 = vcombine.high %v772_v32, %v776_v33  ;;  %v15463_v39 = vcombine.high %v774_v34, %v778_v35  ;;  %v808_v26 = vld [vmem:[#allocation14 + $0x460] sm:$0xff]  ;;  %v814_v35 = vld [vmem:[#allocation14 + $0x490] sm:$0xff] }
 0x2bc   :  { %v15491_v32 = vcombine.high %v804_v24, %v808_v26  ;;  %v816_v34 = vld [vmem:[#allocation14 + $0x4a0] sm:$0xff] }
 0x2be   :  { %2257 = vmatpush1.bf16.msra.mxu1 %v15394_v44  ;;  %2421 = vmatpush1.bf16.msra.mxu0 %v15398_v45  ;;  %v782_v44 = vld [vmem:[#allocation14 + $0x390] sm:$0xff]  ;;  %v15467_v45 = vcombine.high %v780_v42, %v784_v43 }
 0x2bf   :  { %2258 = vmatprep.subr.bf16.mxu1 %v15403_v46  ;;  %2422 = vmatprep.subr.bf16.mxu0 %v15407_v47  ;;  %v786_v46 = vld [vmem:[#allocation14 + $0x3b0] sm:$0xff]  ;;  %v15466_v47 = vcombine.low %v780_v42, %v784_v43  ;;  %v820_v42 = vld [vmem:[#allocation14 + $0x4c0] sm:$0xff] }
 0x2c0   :  { %v15470_v48 = vcombine.low %v782_v44, %v786_v46  ;;  %v15471_v49 = vcombine.high %v782_v44, %v786_v46  ;;  %v824_v43 = vld [vmem:[#allocation14 + $0x4e0] sm:$0xff]  ;;  %v822_v44 = vld [vmem:[#allocation14 + $0x4d0] sm:$0xff] }
 0x2c2   :  { %2259 = vmatpush1.bf16.msra.mxu1 %v15402_v52  ;;  %2423 = vmatpush1.bf16.msra.mxu0 %v15406_v53  ;;  %v790_v52 = vld [vmem:[#allocation14 + $0x3d0] sm:$0xff]  ;;  %v15475_v53 = vcombine.high %v788_v50, %v792_v51 }
 0x2c3   :  { %2260 = vmatprep.subr.bf16.mxu1 %v15411_v54  ;;  %2424 = vmatprep.subr.bf16.mxu0 %v15415_v55  ;;  %v794_v54 = vld [vmem:[#allocation14 + $0x3f0] sm:$0xff]  ;;  %v15474_v55 = vcombine.low %v788_v50, %v792_v51  ;;  %v828_v50 = vld [vmem:[#allocation14 + $0x500] sm:$0xff] }
 0x2c4   :  { %v15478_v56 = vcombine.low %v790_v52, %v794_v54  ;;  %v15479_v57 = vcombine.high %v790_v52, %v794_v54  ;;  %v832_v51 = vld [vmem:[#allocation14 + $0x520] sm:$0xff]  ;;  %v830_v52 = vld [vmem:[#allocation14 + $0x510] sm:$0xff]  ;;  %v15506_v54 = vcombine.low %v820_v42, %v824_v43 }
 0x2c6   :  { %2261 = vmatpush1.bf16.msra.mxu1 %v15410_v60  ;;  %2425 = vmatpush1.bf16.msra.mxu0 %v15414_v61  ;;  %v798_v60 = vld [vmem:[#allocation14 + $0x410] sm:$0xff]  ;;  %v15483_v61 = vcombine.high %v796_v58, %v800_v59 }
 0x2c7   :  { %2262 = vmatprep.subr.bf16.mxu1 %v15419_v62  ;;  %2426 = vmatprep.subr.bf16.mxu0 %v15423_v63  ;;  %v802_v62 = vld [vmem:[#allocation14 + $0x430] sm:$0xff]  ;;  %v15482_v63 = vcombine.low %v796_v58, %v800_v59  ;;  %v836_v58 = vld [vmem:[#allocation14 + $0x540] sm:$0xff] }
 0x2c8   :  { %v15486_v0 = vcombine.low %v798_v60, %v802_v62  ;;  %v15487_v1 = vcombine.high %v798_v60, %v802_v62  ;;  %v840_v59 = vld [vmem:[#allocation14 + $0x560] sm:$0xff]  ;;  %v838_v60 = vld [vmem:[#allocation14 + $0x550] sm:$0xff]  ;;  %v15514_v62 = vcombine.low %v828_v50, %v832_v51 }
 0x2ca   :  { %2263 = vmatpush1.bf16.msra.mxu1 %v15418_v4  ;;  %2427 = vmatpush1.bf16.msra.mxu0 %v15422_v5  ;;  %v21763_v4 = vsub.s32 0, %v21760_v3  ;;  %v21765_v5 = vld [vmem:[#allocation13] sm:$0xf] }
 0x2cb   :  { %2264 = vmatprep.subr.bf16.mxu1 %v15427_v6  ;;  %2428 = vmatprep.subr.bf16.mxu0 %v15431_v7  ;;  %v21768_v6 = vsub.s32 1, %v21760_v3  ;;  %v21771_v7 = vsub.s32 3, %v21760_v3 }
 0x2cc   :  { %v401_v8 = vrot.slane %v21765_v5, %v21763_v4 }
 0x2cd   :  { %v405_v9 = vrot.slane %v21765_v5, %v21768_v6  ;;  %v413_v10 = vrot.slane %v21765_v5, %v21771_v7 }
 0x2ce   :  { %2265 = vmatpush1.bf16.msra.mxu1 %v15426_v12  ;;  %2429 = vmatpush1.bf16.msra.mxu0 %v15430_v13 }
 0x2cf   :  { %2266 = vmatprep.subr.bf16.mxu1 %v15435_v14  ;;  %2430 = vmatprep.subr.bf16.mxu0 %v15439_v15 }
 0x2d2   :  { %2267 = vmatpush1.bf16.msra.mxu1 %v15434_v20  ;;  %2431 = vmatpush1.bf16.msra.mxu0 %v15438_v21 }
 0x2d3   :  { %2268 = vmatprep.subr.bf16.mxu1 %v15443_v22  ;;  %2432 = vmatprep.subr.bf16.mxu0 %v15447_v23 }
 0x2d6   :  { %2269 = vmatpush1.bf16.msra.mxu1 %v15442_v28  ;;  %2433 = vmatpush1.bf16.msra.mxu0 %v15446_v29  ;;  %v810_v28 = vld [vmem:[#allocation14 + $0x470] sm:$0xff] }
 0x2d7   :  { %2270 = vmatprep.subr.bf16.mxu1 %v15451_v30  ;;  %2434 = vmatprep.subr.bf16.mxu0 %v15455_v31  ;;  %v812_v31 = vld [vmem:[#allocation14 + $0x480] sm:$0xff]  ;;  %v15495_v33 = vcombine.high %v806_v27, %v810_v28 }
 0x2d8   :  { %v15498_v46 = vcombine.low %v812_v31, %v816_v34 }
 0x2da   :  { %2271 = vmatpush1.bf16.msra.mxu1 %v15450_v36  ;;  %2435 = vmatpush1.bf16.msra.mxu0 %v15454_v37  ;;  %v818_v36 = vld [vmem:[#allocation14 + $0x4b0] sm:$0xff] }
 0x2db   :  { %2272 = vmatprep.subr.bf16.mxu1 %v15459_v38  ;;  %2436 = vmatprep.subr.bf16.mxu0 %v15463_v39  ;;  %v15490_v38 = vcombine.low %v804_v24, %v808_v26  ;;  %v15494_v39 = vcombine.low %v806_v27, %v810_v28  ;;  %v860_v24 = vld [vmem:[#allocation14 + $0x600] sm:$0xff]  ;;  %v862_v26 = vld [vmem:[#allocation14 + $0x610] sm:$0xff] }
 0x2dc   :  { %v866_v27 = vld [vmem:[#allocation14 + $0x630] sm:$0xff] }
 0x2de   :  { %2273 = vmatpush1.bf16.msra.mxu1 %v15458_v40  ;;  %2437 = vmatpush1.bf16.msra.mxu0 %v15462_v41  ;;  %v15499_v40 = vcombine.high %v812_v31, %v816_v34  ;;  %v15503_v41 = vcombine.high %v814_v35, %v818_v36  ;;  %v868_v34 = vld [vmem:[#allocation14 + $0x640] sm:$0xff] }
 0x2df   :  { %2274 = vmatprep.subr.bf16.mxu1 %v15467_v45  ;;  %2438 = vmatprep.subr.bf16.mxu0 %v15471_v49  ;;  %v826_v45 = vld [vmem:[#allocation14 + $0x4f0] sm:$0xff] }
 0x2e0   :  { %v15511_v49 = vcombine.high %v822_v44, %v826_v45 }
 0x2e2   :  { %2275 = vmatpush1.bf16.msra.mxu1 %v15466_v47  ;;  %2439 = vmatpush1.bf16.msra.mxu0 %v15470_v48  ;;  %v15502_v47 = vcombine.low %v814_v35, %v818_v36  ;;  %v15507_v48 = vcombine.high %v820_v42, %v824_v43  ;;  %v872_v35 = vld [vmem:[#allocation14 + $0x660] sm:$0xff]  ;;  %v870_v36 = vld [vmem:[#allocation14 + $0x650] sm:$0xff] }
 0x2e3   :  { %2276 = vmatprep.subr.bf16.mxu1 %v15475_v53  ;;  %2440 = vmatprep.subr.bf16.mxu0 %v15479_v57  ;;  %v834_v53 = vld [vmem:[#allocation14 + $0x530] sm:$0xff]  ;;  %v876_v43 = vld [vmem:[#allocation14 + $0x680] sm:$0xff] }
 0x2e4   :  { %v15519_v57 = vcombine.high %v830_v52, %v834_v53 }
 0x2e6   :  { %2277 = vmatpush1.bf16.msra.mxu1 %v15474_v55  ;;  %2441 = vmatpush1.bf16.msra.mxu0 %v15478_v56  ;;  %v15510_v55 = vcombine.low %v822_v44, %v826_v45  ;;  %v15515_v56 = vcombine.high %v828_v50, %v832_v51  ;;  %v880_v44 = vld [vmem:[#allocation14 + $0x6a0] sm:$0xff]  ;;  %v878_v45 = vld [vmem:[#allocation14 + $0x690] sm:$0xff] }
 0x2e7   :  { %2287 = vmatprep.subr.bf16.mxu1 %v15483_v61  ;;  %2451 = vmatprep.subr.bf16.mxu0 %v15487_v1  ;;  %v842_v61 = vld [vmem:[#allocation14 + $0x570] sm:$0xff]  ;;  %v884_v51 = vld [vmem:[#allocation14 + $0x6c0] sm:$0xff] }
 0x2e8   :  { %v15527_v1 = vcombine.high %v838_v60, %v842_v61 }
 0x37c   :  { %v612_v11 = vpop.f32.mrb[4].mxu0  ;;  %v21779_v12 = vpop.f32.mrb[4].mxu1 }
 0x37d   :  { %v613_v13 = vadd.f32 %v612_v11, %v401_v8  ;;  %v614_v14 = vpop.f32.mrb[5].mxu0  ;;  %v655_v15 = vpop.f32.mrb[5].mxu1  ;;  %v848_v8 = vld [vmem:[#allocation14 + $0x5a0] sm:$0xff]  ;;  %v15522_v11 = vcombine.low %v836_v58, %v840_v59 }
 0x37e   :  { %v615_v16 = vadd.f32 %v614_v14, %v405_v9  ;;  %v656_v17 = vadd.f32 %v655_v15, %v413_v10  ;;  %v616_v18 = vpop.f32.mrb[6].mxu0  ;;  %v657_v19 = vpop.f32.mrb[6].mxu1  ;;  %v846_v9 = vld [vmem:[#allocation14 + $0x590] sm:$0xff]  ;;  %v15531_v14 = vcombine.high %v844_v2, %v848_v8 }
 0x37f   :  { %v660_v20 = vmax.f32 %v613_v13, 0.0  ;;  %v617_v21 = vpop.f32.mrb[7].mxu0  ;;  %v658_v22 = vpop.f32.mrb[7].mxu1  ;;  %v850_v10 = vld [vmem:[#allocation14 + $0x5b0] sm:$0xff]  ;;  %v15526_v13 = vcombine.low %v838_v60, %v842_v61  ;;  %v896_v60 = vld [vmem:[#allocation14 + $0x720] sm:$0xff] }
 0x380   :  { %v661_v23 = vmax.f32 %v615_v16, 0.0  ;;  %v663_v25 = vmax.f32 %v656_v17, 0.0  ;;  %v15535_v15 = vcombine.high %v846_v9, %v850_v10  ;;  %v852_v16 = vld [vmem:[#allocation14 + $0x5c0] sm:$0xff]  ;;  %v854_v18 = vld [vmem:[#allocation14 + $0x5d0] sm:$0xff]  ;;  %v15534_v21 = vcombine.low %v846_v9, %v850_v10 }
 0x381   :  { %v21783_v30 = vpack.c.bf16 %v660_v20, %v660_v20  ;;  %v856_v17 = vld [vmem:[#allocation14 + $0x5e0] sm:$0xff]  ;;  %v858_v19 = vld [vmem:[#allocation14 + $0x5f0] sm:$0xff]  ;;  %v15530_v20 = vcombine.low %v844_v2, %v848_v8 }
 0x382   :  { %v21781_v29 = vpack.c.bf16 %v661_v23, %v661_v23  ;;  %v21787_v37 = vpack.c.bf16 %v663_v25, %v663_v25  ;;  %v15539_v22 = vcombine.high %v852_v16, %v856_v17  ;;  %v15543_v23 = vcombine.high %v854_v18, %v858_v19  ;;  %v864_v25 = vld [vmem:[#allocation14 + $0x620] sm:$0xff]  ;;  %v894_v61 = vld [vmem:[#allocation14 + $0x710] sm:$0xff] }
 0x383   :  { %v15538_v28 = vcombine.low %v852_v16, %v856_v17  ;;  %v15542_v31 = vcombine.low %v854_v18, %v858_v19  ;;  %v900_v8 = vld [vmem:[#allocation14 + $0x740] sm:$0xff]  ;;  %v902_v10 = vld [vmem:[#allocation14 + $0x750] sm:$0xff] }
 0x384   :  { %2278 = vmatprep.mubr.bf16.mxu1 %v21781_v29  ;;  %2442 = vmatprep.mubr.bf16.mxu0 %v21781_v29  ;;  %v904_v9 = vld [vmem:[#allocation14 + $0x760] sm:$0xff] }
 0x385   :  { %2279 = vmatmul.mubr.bf16.vlgmr.msra.gmra.mrb[8].mxu1 %v21783_v30  ;;  %2443 = vmatmul.mubr.bf16.vlgmr.msra.gmra.mrb[8].mxu0 %v21783_v30  ;;  %v15587_v16 = vcombine.high %v900_v8, %v904_v9  ;;  %v908_v18 = vld [vmem:[#allocation14 + $0x780] sm:$0xff] }
 0x386   :  { %2288 = vmatpush1.bf16.msra.mxu1 %v15482_v63  ;;  %2452 = vmatpush1.bf16.msra.mxu0 %v15486_v0  ;;  %v15518_v63 = vcombine.low %v830_v52, %v834_v53  ;;  %v15523_v0 = vcombine.high %v836_v58, %v840_v59  ;;  %v888_v52 = vld [vmem:[#allocation14 + $0x6e0] sm:$0xff]  ;;  %v886_v53 = vld [vmem:[#allocation14 + $0x6d0] sm:$0xff] }
 0x387   :  { %2319 = vmatprep.mubr.bf16.mxu1 %v21787_v37  ;;  %2483 = vmatprep.mubr.bf16.mxu0 %v21787_v37  ;;  %v892_v59 = vld [vmem:[#allocation14 + $0x700] sm:$0xff] }
 0x388   :  { %2289 = vmatprep.subr.bf16.mxu1 %v15491_v32  ;;  %2453 = vmatprep.subr.bf16.mxu0 %v15495_v33  ;;  %v15547_v32 = vcombine.high %v860_v24, %v864_v25  ;;  %v15551_v33 = vcombine.high %v862_v26, %v866_v27  ;;  %v912_v19 = vld [vmem:[#allocation14 + $0x7a0] sm:$0xff] }
 0x38a   :  { %2290 = vmatpush1.bf16.msra.mxu1 %v15490_v38  ;;  %2454 = vmatpush1.bf16.msra.mxu0 %v15494_v39  ;;  %v874_v38 = vld [vmem:[#allocation14 + $0x670] sm:$0xff]  ;;  %v15546_v39 = vcombine.low %v860_v24, %v864_v25  ;;  %v15595_v25 = vcombine.high %v908_v18, %v912_v19 }
 0x38b   :  { %2291 = vmatprep.subr.bf16.mxu1 %v15499_v40  ;;  %2455 = vmatprep.subr.bf16.mxu0 %v15503_v41  ;;  %v15550_v40 = vcombine.low %v862_v26, %v866_v27  ;;  %v15555_v41 = vcombine.high %v868_v34, %v872_v35  ;;  %v15559_v42 = vcombine.high %v870_v36, %v874_v38  ;;  %v916_v27 = vld [vmem:[#allocation14 + $0x7c0] sm:$0xff] }
 0x38e   :  { %2292 = vmatpush1.bf16.msra.mxu1 %v15498_v46  ;;  %2456 = vmatpush1.bf16.msra.mxu0 %v15502_v47  ;;  %v882_v46 = vld [vmem:[#allocation14 + $0x6b0] sm:$0xff]  ;;  %v15554_v47 = vcombine.low %v868_v34, %v872_v35 }
 0x38f   :  { %2293 = vmatprep.subr.bf16.mxu1 %v15507_v48  ;;  %2457 = vmatprep.subr.bf16.mxu0 %v15511_v49  ;;  %v15558_v48 = vcombine.low %v870_v36, %v874_v38  ;;  %v15563_v49 = vcombine.high %v876_v43, %v880_v44  ;;  %v15567_v50 = vcombine.high %v878_v45, %v882_v46 }
 0x392   :  { %2294 = vmatpush1.bf16.msra.mxu1 %v15506_v54  ;;  %2458 = vmatpush1.bf16.msra.mxu0 %v15510_v55  ;;  %v890_v54 = vld [vmem:[#allocation14 + $0x6f0] sm:$0xff]  ;;  %v15562_v55 = vcombine.low %v876_v43, %v880_v44  ;;  %v677_v44 = vld [vmem:[#allocation14 + $0x48] sm:$0xff] }
 0x393   :  { %2295 = vmatprep.subr.bf16.mxu1 %v15515_v56  ;;  %2459 = vmatprep.subr.bf16.mxu0 %v15519_v57  ;;  %v15566_v56 = vcombine.low %v878_v45, %v882_v46  ;;  %v15571_v57 = vcombine.high %v884_v51, %v888_v52  ;;  %v15575_v58 = vcombine.high %v886_v53, %v890_v54  ;;  %v681_v45 = vld [vmem:[#allocation14 + $0x68] sm:$0xff] }
 0x396   :  { %2296 = vmatpush1.bf16.msra.mxu1 %v15514_v62  ;;  %2460 = vmatpush1.bf16.msra.mxu0 %v15518_v63  ;;  %v898_v62 = vld [vmem:[#allocation14 + $0x730] sm:$0xff]  ;;  %v15570_v63 = vcombine.low %v884_v51, %v888_v52  ;;  %v693_v52 = vld [vmem:[#allocation14 + $0xc8] sm:$0xff] }
 0x397   :  { %2297 = vmatprep.subr.bf16.mxu1 %v15523_v0  ;;  %2461 = vmatprep.subr.bf16.mxu0 %v15527_v1  ;;  %v15574_v0 = vcombine.low %v886_v53, %v890_v54  ;;  %v15579_v1 = vcombine.high %v892_v59, %v896_v60  ;;  %v15583_v2 = vcombine.high %v894_v61, %v898_v62  ;;  %v697_v53 = vld [vmem:[#allocation14 + $0xe8] sm:$0xff] }
 0x39a   :  { %2298 = vmatpush1.bf16.msra.mxu1 %v15522_v11  ;;  %2462 = vmatpush1.bf16.msra.mxu0 %v15526_v13  ;;  %v906_v11 = vld [vmem:[#allocation14 + $0x770] sm:$0xff]  ;;  %v15578_v13 = vcombine.low %v892_v59, %v896_v60  ;;  %v709_v60 = vld [vmem:[#allocation14 + $0x148] sm:$0xff] }
 0x39b   :  { %2299 = vmatprep.subr.bf16.mxu1 %v15531_v14  ;;  %2463 = vmatprep.subr.bf16.mxu0 %v15535_v15  ;;  %v15582_v14 = vcombine.low %v894_v61, %v898_v62  ;;  %v21794_v15 = vsub.s32 2, %v21760_v3  ;;  %v15591_v17 = vcombine.high %v902_v10, %v906_v11  ;;  %v713_v61 = vld [vmem:[#allocation14 + $0x168] sm:$0xff] }
 0x39d   :  { %v409_v24 = vrot.slane %v21765_v5, %v21794_v15  ;;  %v673_v5 = vld [vmem:[#allocation14 + $0x28] sm:$0xff] }
 0x39e   :  { %2300 = vmatpush1.bf16.msra.mxu1 %v15530_v20  ;;  %2464 = vmatpush1.bf16.msra.mxu0 %v15534_v21  ;;  %v910_v20 = vld [vmem:[#allocation14 + $0x790] sm:$0xff] }
 0x39f   :  { %2301 = vmatprep.subr.bf16.mxu1 %v15539_v22  ;;  %2465 = vmatprep.subr.bf16.mxu0 %v15543_v23  ;;  %v914_v21 = vld [vmem:[#allocation14 + $0x7b0] sm:$0xff]  ;;  %v15586_v22 = vcombine.low %v900_v8, %v904_v9  ;;  %v15590_v23 = vcombine.low %v902_v10, %v906_v11  ;;  %v654_v35 = vadd.f32 %v21779_v12, %v409_v24  ;;  %v725_v9 = vld [vmem:[#allocation14 + $0x1c8] sm:$0xff] }
 0x3a0   :  { %v15599_v26 = vcombine.high %v910_v20, %v914_v21  ;;  %v15598_v34 = vcombine.low %v910_v20, %v914_v21  ;;  %v729_v10 = vld [vmem:[#allocation14 + $0x1e8] sm:$0xff] }
 0x3a1   :  { %v2598_v20 = vld [vmem:[#allocation17 + $0x40] sm:$0xff] }
 0x3a2   :  { %2302 = vmatpush1.bf16.msra.mxu1 %v15538_v28  ;;  %2466 = vmatpush1.bf16.msra.mxu0 %v15542_v31  ;;  %v920_v28 = vld [vmem:[#allocation14 + $0x7e0] sm:$0xff]  ;;  %v918_v31 = vld [vmem:[#allocation14 + $0x7d0] sm:$0xff]  ;;  %v741_v21 = vld [vmem:[#allocation14 + $0x248] sm:$0xff] }
 0x3a3   :  { %2303 = vmatprep.subr.bf16.mxu1 %v15547_v32  ;;  %2467 = vmatprep.subr.bf16.mxu0 %v15551_v33  ;;  %v922_v32 = vld [vmem:[#allocation14 + $0x7f0] sm:$0xff]  ;;  %v15594_v33 = vcombine.low %v908_v18, %v912_v19  ;;  %v15603_v36 = vcombine.high %v916_v27, %v920_v28  ;;  %v2590_v18 = vld [vmem:[#allocation17] sm:$0xff] }
 0x3a4   :  { %v15607_v38 = vcombine.high %v918_v31, %v922_v32  ;;  %v15611_v24 = vcombine.high %v2590_v18, %v2598_v20 }
 0x3a6   :  { %2304 = vmatpush1.bf16.msra.mxu1 %v15546_v39  ;;  %2468 = vmatpush1.bf16.msra.mxu0 %v15550_v40  ;;  %v669_v39 = vld [vmem:[#allocation14 + $0x8] sm:$0xff]  ;;  %v15602_v40 = vcombine.low %v916_v27, %v920_v28 }
 0x3a7   :  { %2305 = vmatprep.subr.bf16.mxu1 %v15555_v41  ;;  %2469 = vmatprep.subr.bf16.mxu0 %v15559_v42  ;;  %v15606_v41 = vcombine.low %v918_v31, %v922_v32  ;;  %v662_v42 = vmax.f32 %v654_v35, 0.0  ;;  %v15357_v43 = vcombine.high %v669_v39, %v673_v5  ;;  %v15356_v46 = vcombine.low %v669_v39, %v673_v5  ;;  %v2614_v28 = vld [vmem:[#allocation17 + $0xc0] sm:$0xff] }
 0x3a8   :  { %v749_v31 = vld [vmem:[#allocation14 + $0x288] sm:$0xff] }
 0x3a9   :  { %v21799_v12 = vpack.c.bf16 %v662_v42, %v662_v42  ;;  %v753_v32 = vld [vmem:[#allocation14 + $0x2a8] sm:$0xff] }
 0x3aa   :  { %2306 = vmatpush1.bf16.msra.mxu1 %v15554_v47  ;;  %2470 = vmatpush1.bf16.msra.mxu0 %v15558_v48  ;;  %v15365_v47 = vcombine.high %v677_v44, %v681_v45  ;;  %v685_v48 = vld [vmem:[#allocation14 + $0x88] sm:$0xff] }
 0x3ab   :  { %2307 = vmatprep.subr.bf16.mxu1 %v15563_v49  ;;  %2471 = vmatprep.subr.bf16.mxu0 %v15567_v50  ;;  %v689_v49 = vld [vmem:[#allocation14 + $0xa8] sm:$0xff]  ;;  %v15364_v50 = vcombine.low %v677_v44, %v681_v45 }
 0x3ac   :  { %v15373_v51 = vcombine.high %v685_v48, %v689_v49  ;;  %v15372_v54 = vcombine.low %v685_v48, %v689_v49  ;;  %v2630_v39 = vld [vmem:[#allocation17 + $0x140] sm:$0xff] }
 0x3ad   :  { %v757_v5 = vld [vmem:[#allocation14 + $0x2c8] sm:$0xff] }
 0x3ae   :  { %2308 = vmatpush1.bf16.msra.mxu1 %v15562_v55  ;;  %2472 = vmatpush1.bf16.msra.mxu0 %v15566_v56  ;;  %v15381_v55 = vcombine.high %v693_v52, %v697_v53  ;;  %v701_v56 = vld [vmem:[#allocation14 + $0x108] sm:$0xff] }
 0x3af   :  { %2309 = vmatprep.subr.bf16.mxu1 %v15571_v57  ;;  %2473 = vmatprep.subr.bf16.mxu0 %v15575_v58  ;;  %v705_v57 = vld [vmem:[#allocation14 + $0x128] sm:$0xff]  ;;  %v15380_v58 = vcombine.low %v693_v52, %v697_v53 }
 0x3b0   :  { %v15389_v59 = vcombine.high %v701_v56, %v705_v57  ;;  %v15388_v62 = vcombine.low %v701_v56, %v705_v57  ;;  %v2638_v44 = vld [vmem:[#allocation17 + $0x180] sm:$0xff] }
 0x3b1   :  { %v769_v48 = vld [vmem:[#allocation14 + $0x328] sm:$0xff] }
 0x3b2   :  { %2310 = vmatpush1.bf16.msra.mxu1 %v15570_v63  ;;  %2474 = vmatpush1.bf16.msra.mxu0 %v15574_v0  ;;  %v15397_v63 = vcombine.high %v709_v60, %v713_v61  ;;  %v717_v0 = vld [vmem:[#allocation14 + $0x188] sm:$0xff] }
 0x3b3   :  { %2311 = vmatprep.subr.bf16.mxu1 %v15579_v1  ;;  %2475 = vmatprep.subr.bf16.mxu0 %v15583_v2  ;;  %v721_v1 = vld [vmem:[#allocation14 + $0x1a8] sm:$0xff]  ;;  %v15396_v2 = vcombine.low %v709_v60, %v713_v61 }
 0x3b4   :  { %v15405_v8 = vcombine.high %v717_v0, %v721_v1  ;;  %v15404_v11 = vcombine.low %v717_v0, %v721_v1  ;;  %v2654_v52 = vld [vmem:[#allocation17 + $0x200] sm:$0xff] }
 0x3b5   :  { %v777_v56 = vld [vmem:[#allocation14 + $0x368] sm:$0xff] }
 0x3b6   :  { %2312 = vmatpush1.bf16.msra.mxu1 %v15578_v13  ;;  %2476 = vmatpush1.bf16.msra.mxu0 %v15582_v14  ;;  %v15413_v13 = vcombine.high %v725_v9, %v729_v10  ;;  %v733_v14 = vld [vmem:[#allocation14 + $0x208] sm:$0xff] }
 0x3b7   :  { %2313 = vmatprep.subr.bf16.mxu1 %v15587_v16  ;;  %2477 = vmatprep.subr.bf16.mxu0 %v15591_v17  ;;  %v737_v16 = vld [vmem:[#allocation14 + $0x228] sm:$0xff]  ;;  %v15412_v17 = vcombine.low %v725_v9, %v729_v10 }
 0x3b8   :  { %v15421_v19 = vcombine.high %v733_v14, %v737_v16  ;;  %v2670_v60 = vld [vmem:[#allocation17 + $0x280] sm:$0xff] }
 0x3b9   :  { %v785_v0 = vld [vmem:[#allocation14 + $0x3a8] sm:$0xff] }
 0x3ba   :  { %2314 = vmatpush1.bf16.msra.mxu1 %v15586_v22  ;;  %2478 = vmatpush1.bf16.msra.mxu0 %v15590_v23  ;;  %v745_v22 = vld [vmem:[#allocation14 + $0x268] sm:$0xff]  ;;  %v15610_v23 = vcombine.low %v2590_v18, %v2598_v20 }
 0x3bb   :  { %2315 = vmatprep.subr.bf16.mxu1 %v15595_v25  ;;  %2479 = vmatprep.subr.bf16.mxu0 %v15599_v26  ;;  %v15420_v25 = vcombine.low %v733_v14, %v737_v16  ;;  %v2606_v26 = vld [vmem:[#allocation17 + $0x80] sm:$0xff]  ;;  %v15429_v27 = vcombine.high %v741_v21, %v745_v22  ;;  %v15428_v35 = vcombine.low %v741_v21, %v745_v22 }
 0x3bc   :  { %v2686_v9 = vld [vmem:[#allocation17 + $0x300] sm:$0xff] }
 0x3bd   :  { %v793_v14 = vld [vmem:[#allocation14 + $0x3e8] sm:$0xff] }
 0x3be   :  { %2316 = vmatpush1.bf16.msra.mxu1 %v15594_v33  ;;  %2480 = vmatpush1.bf16.msra.mxu0 %v15598_v34  ;;  %v15626_v33 = vcombine.low %v2606_v26, %v2614_v28  ;;  %v15627_v34 = vcombine.high %v2606_v26, %v2614_v28  ;;  %v2710_v21 = vld [vmem:[#allocation17 + $0x3c0] sm:$0xff] }
 0x3bf   :  { %2317 = vmatprep.subr.bf16.mxu1 %v15603_v36  ;;  %2481 = vmatprep.subr.bf16.mxu0 %v15607_v38  ;;  %v2622_v36 = vld [vmem:[#allocation17 + $0x100] sm:$0xff]  ;;  %v15437_v38 = vcombine.high %v749_v31, %v753_v32 }
 0x3c0   :  { %v15643_v42 = vcombine.high %v2622_v36, %v2630_v39  ;;  %v797_v22 = vld [vmem:[#allocation14 + $0x408] sm:$0xff] }
 0x3c2   :  { %2318 = vmatpush1.bf16.msra.mxu1 %v15602_v40  ;;  %2482 = vmatpush1.bf16.msra.mxu0 %v15606_v41  ;;  %v761_v40 = vld [vmem:[#allocation14 + $0x2e8] sm:$0xff]  ;;  %v15642_v41 = vcombine.low %v2622_v36, %v2630_v39 }
 0x3c3   :  { %2328 = vmatprep.subr.bf16.mxu1 %v15357_v43  ;;  %8818 = vmatprep.subr.bf16.mxu0 %v15611_v24  ;;  %v15436_v43 = vcombine.low %v749_v31, %v753_v32  ;;  %v15445_v45 = vcombine.high %v757_v5, %v761_v40  ;;  %v2726_v31 = vld [vmem:[#allocation17 + $0x440] sm:$0xff] }
 0x3c4   :  { %v805_v32 = vld [vmem:[#allocation14 + $0x448] sm:$0xff] }
 0x3c5   :  { %2320 = vmatmul.mubr.bf16.vlgmr.msra.gmra.mrb[8].mxu1 %v21799_v12  ;;  %2484 = vmatmul.mubr.bf16.vlgmr.msra.gmra.mrb[8].mxu0 %v21799_v12 }
 0x3c6   :  { %2329 = vmatpush1.bf16.msra.mxu1 %v15356_v46  ;;  %2360 = vmatprep.mubr.bf16.mxu1 %v21781_v29  ;;  %v2646_v46 = vld [vmem:[#allocation17 + $0x1c0] sm:$0xff] }
 0x3c7   :  { %2330 = vmatprep.subr.bf16.mxu1 %v15365_v47  ;;  %8819 = vmatpush1.bf16.msra.mxu0 %v15610_v23  ;;  %v765_v47 = vld [vmem:[#allocation14 + $0x308] sm:$0xff]  ;;  %v15658_v49 = vcombine.low %v2638_v44, %v2646_v46 }
 0x3c8   :  { %8820 = vmatprep.subr.bf16.mxu0 %v15627_v34  ;;  %v15453_v53 = vcombine.high %v765_v47, %v769_v48  ;;  %v801_v23 = vld [vmem:[#allocation14 + $0x428] sm:$0xff] }
 0x3c9   :  { %v15485_v28 = vcombine.high %v797_v22, %v801_v23  ;;  %v15484_v36 = vcombine.low %v797_v22, %v801_v23  ;;  %v2822_v22 = vld [vmem:[#allocation17 + $0x740] sm:$0xff] }
 0x3ca   :  { %2331 = vmatpush1.bf16.msra.mxu1 %v15364_v50  ;;  %v15659_v50 = vcombine.high %v2638_v44, %v2646_v46  ;;  %v853_v23 = vld [vmem:[#allocation14 + $0x5c8] sm:$0xff] }
 0x3cb   :  { %2332 = vmatprep.subr.bf16.mxu1 %v15373_v51  ;;  %8821 = vmatpush1.bf16.msra.mxu0 %v15626_v33  ;;  %v15444_v51 = vcombine.low %v757_v5, %v761_v40  ;;  %v809_v33 = vld [vmem:[#allocation14 + $0x468] sm:$0xff] }
 0x3cc   :  { %8822 = vmatprep.subr.bf16.mxu0 %v15643_v42  ;;  %v15493_v39 = vcombine.high %v805_v32, %v809_v33  ;;  %v2742_v5 = vld [vmem:[#allocation17 + $0x4c0] sm:$0xff]  ;;  %v15492_v44 = vcombine.low %v805_v32, %v809_v33 }
 0x3cd   :  { %v813_v40 = vld [vmem:[#allocation14 + $0x488] sm:$0xff] }
 0x3ce   :  { %2333 = vmatpush1.bf16.msra.mxu1 %v15372_v54  ;;  %v2662_v54 = vld [vmem:[#allocation17 + $0x240] sm:$0xff] }
 0x3cf   :  { %2334 = vmatprep.subr.bf16.mxu1 %v15381_v55  ;;  %8823 = vmatpush1.bf16.msra.mxu0 %v15642_v41  ;;  %v773_v55 = vld [vmem:[#allocation14 + $0x348] sm:$0xff]  ;;  %v15674_v57 = vcombine.low %v2654_v52, %v2662_v54 }
 0x3d0   :  { %8824 = vmatprep.subr.bf16.mxu0 %v15659_v50  ;;  %v15461_v61 = vcombine.high %v773_v55, %v777_v56  ;;  %v817_v41 = vld [vmem:[#allocation14 + $0x4a8] sm:$0xff] }
 0x3d1   :  { %v15501_v46 = vcombine.high %v813_v40, %v817_v41  ;;  %v2838_v32 = vld [vmem:[#allocation17 + $0x7c0] sm:$0xff] }
 0x3d2   :  { %2335 = vmatpush1.bf16.msra.mxu1 %v15380_v58  ;;  %v15675_v58 = vcombine.high %v2654_v52, %v2662_v54  ;;  %v15500_v52 = vcombine.low %v813_v40, %v817_v41  ;;  %v861_v33 = vld [vmem:[#allocation14 + $0x608] sm:$0xff] }
 0x3d3   :  { %2336 = vmatprep.subr.bf16.mxu1 %v15389_v59  ;;  %8825 = vmatpush1.bf16.msra.mxu0 %v15658_v49  ;;  %v15452_v59 = vcombine.low %v765_v47, %v769_v48  ;;  %v2758_v47 = vld [vmem:[#allocation17 + $0x540] sm:$0xff] }
 0x3d4   :  { %8826 = vmatprep.subr.bf16.mxu0 %v15675_v58  ;;  %v821_v48 = vld [vmem:[#allocation14 + $0x4c8] sm:$0xff] }
 0x3d5   :  { %v825_v49 = vld [vmem:[#allocation14 + $0x4e8] sm:$0xff] }
 0x3d6   :  { %2337 = vmatpush1.bf16.msra.mxu1 %v15388_v62  ;;  %v2678_v62 = vld [vmem:[#allocation17 + $0x2c0] sm:$0xff]  ;;  %v15509_v54 = vcombine.high %v821_v48, %v825_v49 }
 0x3d7   :  { %2338 = vmatprep.subr.bf16.mxu1 %v15397_v63  ;;  %8827 = vmatpush1.bf16.msra.mxu0 %v15674_v57  ;;  %v781_v63 = vld [vmem:[#allocation14 + $0x388] sm:$0xff]  ;;  %v15690_v1 = vcombine.low %v2670_v60, %v2678_v62 }
 0x3d8   :  { %v15469_v10 = vcombine.high %v781_v63, %v785_v0  ;;  %v15468_v18 = vcombine.low %v781_v63, %v785_v0  ;;  %v833_v57 = vld [vmem:[#allocation14 + $0x528] sm:$0xff] }
 0x3d9   :  { %v2790_v63 = vld [vmem:[#allocation17 + $0x640] sm:$0xff] }
 0x3da   :  { %2339 = vmatpush1.bf16.msra.mxu1 %v15396_v2  ;;  %v15691_v2 = vcombine.high %v2670_v60, %v2678_v62  ;;  %v15508_v60 = vcombine.low %v821_v48, %v825_v49  ;;  %v837_v0 = vld [vmem:[#allocation14 + $0x548] sm:$0xff] }
 0x3db   :  { %2340 = vmatprep.subr.bf16.mxu1 %v15405_v8  ;;  %v15460_v8 = vcombine.low %v773_v55, %v777_v56  ;;  %v2774_v55 = vld [vmem:[#allocation17 + $0x5c0] sm:$0xff] }
 0x3dc   :  { %8828 = vmatprep.subr.bf16.mxu0 %v15691_v2  ;;  %v829_v56 = vld [vmem:[#allocation14 + $0x508] sm:$0xff] }
 0x3dd   :  { %8829 = vmatpush1.bf16.msra.mxu0 %v15690_v1  ;;  %v15517_v62 = vcombine.high %v829_v56, %v833_v57  ;;  %v841_v1 = vld [vmem:[#allocation14 + $0x568] sm:$0xff] }
 0x3de   :  { %2341 = vmatpush1.bf16.msra.mxu1 %v15404_v11  ;;  %v2694_v11 = vld [vmem:[#allocation17 + $0x340] sm:$0xff] }
 0x3df   :  { %2342 = vmatprep.subr.bf16.mxu1 %v15413_v13  ;;  %v789_v13 = vld [vmem:[#allocation14 + $0x3c8] sm:$0xff]  ;;  %v15706_v16 = vcombine.low %v2686_v9, %v2694_v11 }
 0x3e0   :  { %v15477_v20 = vcombine.high %v789_v13, %v793_v14  ;;  %v15476_v26 = vcombine.low %v789_v13, %v793_v14  ;;  %v2806_v13 = vld [vmem:[#allocation17 + $0x6c0] sm:$0xff] }
 0x3e1   :  { %v845_v14 = vld [vmem:[#allocation14 + $0x588] sm:$0xff] }
 0x3e2   :  { %2343 = vmatpush1.bf16.msra.mxu1 %v15412_v17  ;;  %v15707_v17 = vcombine.high %v2686_v9, %v2694_v11  ;;  %v15516_v9 = vcombine.low %v829_v56, %v833_v57  ;;  %v15525_v11 = vcombine.high %v837_v0, %v841_v1  ;;  %v873_v40 = vld [vmem:[#allocation14 + $0x668] sm:$0xff] }
 0x3e3   :  { %2344 = vmatprep.subr.bf16.mxu1 %v15421_v19  ;;  %v2702_v19 = vld [vmem:[#allocation17 + $0x380] sm:$0xff] }
 0x3e4   :  { %8830 = vmatprep.subr.bf16.mxu0 %v15707_v17  ;;  %v15722_v24 = vcombine.low %v2702_v19, %v2710_v21  ;;  %v889_v48 = vld [vmem:[#allocation14 + $0x6e8] sm:$0xff] }
 0x3e5   :  { %8831 = vmatpush1.bf16.msra.mxu0 %v15706_v16  ;;  %v849_v16 = vld [vmem:[#allocation14 + $0x5a8] sm:$0xff] }
 0x3e6   :  { %2345 = vmatpush1.bf16.msra.mxu1 %v15420_v25  ;;  %v15723_v25 = vcombine.high %v2702_v19, %v2710_v21  ;;  %v15524_v19 = vcombine.low %v837_v0, %v841_v1  ;;  %v2814_v21 = vld [vmem:[#allocation17 + $0x700] sm:$0xff] }
 0x3e7   :  { %2346 = vmatprep.subr.bf16.mxu1 %v15429_v27  ;;  %v2718_v27 = vld [vmem:[#allocation17 + $0x400] sm:$0xff] }
 0x3e8   :  { %8832 = vmatprep.subr.bf16.mxu0 %v15723_v25  ;;  %v15738_v34 = vcombine.low %v2718_v27, %v2726_v31  ;;  %v15834_v25 = vcombine.low %v2814_v21, %v2822_v22  ;;  %v905_v56 = vld [vmem:[#allocation14 + $0x768] sm:$0xff] }
 0x3e9   :  { %8833 = vmatpush1.bf16.msra.mxu0 %v15722_v24  ;;  %v857_v24 = vld [vmem:[#allocation14 + $0x5e8] sm:$0xff] }
 0x3ea   :  { %2347 = vmatpush1.bf16.msra.mxu1 %v15428_v35  ;;  %v15739_v35 = vcombine.high %v2718_v27, %v2726_v31  ;;  %v15532_v27 = vcombine.low %v845_v14, %v849_v16  ;;  %v15541_v31 = vcombine.high %v853_v23, %v857_v24  ;;  %v921_v0 = vld [vmem:[#allocation14 + $0x7e8] sm:$0xff] }
 0x3eb   :  { %2348 = vmatprep.subr.bf16.mxu1 %v15437_v38  ;;  %v2734_v38 = vld [vmem:[#allocation17 + $0x480] sm:$0xff] }
 0x3ec   :  { %8834 = vmatprep.subr.bf16.mxu0 %v15739_v35  ;;  %v15754_v42 = vcombine.low %v2734_v38, %v2742_v5 }
 0x3ed   :  { %8835 = vmatpush1.bf16.msra.mxu0 %v15738_v34  ;;  %v865_v34 = vld [vmem:[#allocation14 + $0x628] sm:$0xff] }
 0x3ee   :  { %2349 = vmatpush1.bf16.msra.mxu1 %v15436_v43  ;;  %v15755_v43 = vcombine.high %v2734_v38, %v2742_v5  ;;  %v15540_v38 = vcombine.low %v853_v23, %v857_v24  ;;  %v869_v5 = vld [vmem:[#allocation14 + $0x648] sm:$0xff]  ;;  %v15548_v41 = vcombine.low %v861_v33, %v865_v34  ;;  %v699_v23 = vld [vmem:[#allocation14 + $0xf8] sm:$0xff] }
 0x3ef   :  { %2350 = vmatprep.subr.bf16.mxu1 %v15445_v45  ;;  %v2750_v45 = vld [vmem:[#allocation17 + $0x500] sm:$0xff] }
 0x3f0   :  { %8836 = vmatprep.subr.bf16.mxu0 %v15755_v43  ;;  %v15770_v50 = vcombine.low %v2750_v45, %v2758_v47  ;;  %v877_v43 = vld [vmem:[#allocation14 + $0x688] sm:$0xff] }
 0x3f1   :  { %8837 = vmatpush1.bf16.msra.mxu0 %v15754_v42  ;;  %v15557_v42 = vcombine.high %v869_v5, %v873_v40 }
 0x3f2   :  { %2351 = vmatpush1.bf16.msra.mxu1 %v15444_v51  ;;  %v15771_v51 = vcombine.high %v2750_v45, %v2758_v47  ;;  %v15556_v45 = vcombine.low %v869_v5, %v873_v40  ;;  %v885_v47 = vld [vmem:[#allocation14 + $0x6c8] sm:$0xff]  ;;  %v727_v5 = vld [vmem:[#allocation14 + $0x1d8] sm:$0xff] }
 0x3f3   :  { %2352 = vmatprep.subr.bf16.mxu1 %v15453_v53  ;;  %v2766_v53 = vld [vmem:[#allocation17 + $0x580] sm:$0xff]  ;;  %v731_v40 = vld [vmem:[#allocation14 + $0x1f8] sm:$0xff] }
 0x3f4   :  { %8838 = vmatprep.subr.bf16.mxu0 %v15771_v51  ;;  %v15786_v58 = vcombine.low %v2766_v53, %v2774_v55  ;;  %v893_v51 = vld [vmem:[#allocation14 + $0x708] sm:$0xff] }
 0x3f5   :  { %8839 = vmatpush1.bf16.msra.mxu0 %v15770_v50  ;;  %v15573_v50 = vcombine.high %v885_v47, %v889_v48 }
 0x3f6   :  { %2353 = vmatpush1.bf16.msra.mxu1 %v15452_v59  ;;  %v15787_v59 = vcombine.high %v2766_v53, %v2774_v55  ;;  %v15572_v53 = vcombine.low %v885_v47, %v889_v48  ;;  %v901_v55 = vld [vmem:[#allocation14 + $0x748] sm:$0xff]  ;;  %v15416_v47 = vcombine.low %v727_v5, %v731_v40 }
 0x3f7   :  { %2354 = vmatprep.subr.bf16.mxu1 %v15461_v61  ;;  %v2782_v61 = vld [vmem:[#allocation17 + $0x600] sm:$0xff] }
 0x3f8   :  { %8840 = vmatprep.subr.bf16.mxu0 %v15787_v59  ;;  %v15802_v2 = vcombine.low %v2782_v61, %v2790_v63  ;;  %v909_v59 = vld [vmem:[#allocation14 + $0x788] sm:$0xff] }
 0x3f9   :  { %8841 = vmatpush1.bf16.msra.mxu0 %v15786_v58  ;;  %v15589_v58 = vcombine.high %v901_v55, %v905_v56 }
 0x3fa   :  { %2355 = vmatpush1.bf16.msra.mxu1 %v15460_v8  ;;  %v15803_v8 = vcombine.high %v2782_v61, %v2790_v63  ;;  %v15588_v61 = vcombine.low %v901_v55, %v905_v56  ;;  %v917_v63 = vld [vmem:[#allocation14 + $0x7c8] sm:$0xff]  ;;  %v751_v55 = vld [vmem:[#allocation14 + $0x298] sm:$0xff] }
 0x3fb   :  { %2356 = vmatprep.subr.bf16.mxu1 %v15469_v10  ;;  %v2798_v10 = vld [vmem:[#allocation17 + $0x680] sm:$0xff]  ;;  %v755_v56 = vld [vmem:[#allocation14 + $0x2b8] sm:$0xff] }
 0x3fc   :  { %8842 = vmatprep.subr.bf16.mxu0 %v15803_v8  ;;  %v15818_v17 = vcombine.low %v2798_v10, %v2806_v13  ;;  %v671_v8 = vld [vmem:[#allocation14 + $0x18] sm:$0xff] }
 0x3fd   :  { %8843 = vmatpush1.bf16.msra.mxu0 %v15802_v2  ;;  %v15605_v2 = vcombine.high %v917_v63, %v921_v0 }
 0x3fe   :  { %2357 = vmatpush1.bf16.msra.mxu1 %v15468_v18  ;;  %v15819_v18 = vcombine.high %v2798_v10, %v2806_v13  ;;  %v15604_v10 = vcombine.low %v917_v63, %v921_v0  ;;  %v679_v13 = vld [vmem:[#allocation14 + $0x58] sm:$0xff] }
 0x3ff   :  { %2358 = vmatprep.subr.bf16.mxu1 %v15477_v20  ;;  %v15533_v20 = vcombine.high %v845_v14, %v849_v16  ;;  %v683_v14 = vld [vmem:[#allocation14 + $0x78] sm:$0xff] }
 0x400   :  { %8844 = vmatprep.subr.bf16.mxu0 %v15819_v18  ;;  %v687_v18 = vld [vmem:[#allocation14 + $0x98] sm:$0xff] }
 0x401   :  { %8845 = vmatpush1.bf16.msra.mxu0 %v15818_v17  ;;  %v15369_v17 = vcombine.high %v679_v13, %v683_v14  ;;  %v767_v63 = vld [vmem:[#allocation14 + $0x318] sm:$0xff] }
 0x402   :  { %2359 = vmatpush1.bf16.msra.mxu1 %v15476_v26  ;;  %v15835_v26 = vcombine.high %v2814_v21, %v2822_v22  ;;  %v695_v22 = vld [vmem:[#allocation14 + $0xd8] sm:$0xff] }
 0x403   :  { %2369 = vmatprep.subr.bf16.mxu1 %v15485_v28  ;;  %v2830_v28 = vld [vmem:[#allocation17 + $0x780] sm:$0xff]  ;;  %v771_v0 = vld [vmem:[#allocation14 + $0x338] sm:$0xff] }
 0x404   :  { %8846 = vmatprep.subr.bf16.mxu0 %v15835_v26  ;;  %v15850_v35 = vcombine.low %v2830_v28, %v2838_v32  ;;  %v703_v26 = vld [vmem:[#allocation14 + $0x118] sm:$0xff] }
 0x405   :  { %2361 = vmatmul.mubr.bf16.vlgmr.msra.gmra.mrb[12].mxu1 %v21783_v30  ;;  %8847 = vmatpush1.bf16.msra.mxu0 %v15834_v25  ;;  %v15385_v25 = vcombine.high %v695_v22, %v699_v23 }
 0x406   :  { %2370 = vmatpush1.bf16.msra.mxu1 %v15484_v36  ;;  %2401 = vmatprep.mubr.bf16.mxu1 %v21787_v37  ;;  %v15851_v36 = vcombine.high %v2830_v28, %v2838_v32  ;;  %v15384_v28 = vcombine.low %v695_v22, %v699_v23  ;;  %v711_v32 = vld [vmem:[#allocation14 + $0x158] sm:$0xff] }
 0x407   :  { %2371 = vmatprep.subr.bf16.mxu1 %v15493_v39  ;;  %v15549_v39 = vcombine.high %v861_v33, %v865_v34  ;;  %v715_v33 = vld [vmem:[#allocation14 + $0x178] sm:$0xff] }
 0x408   :  { %8848 = vmatprep.subr.bf16.mxu0 %v15851_v36  ;;  %v723_v36 = vld [vmem:[#allocation14 + $0x1b8] sm:$0xff] }
 0x409   :  { %8849 = vmatpush1.bf16.msra.mxu0 %v15850_v35  ;;  %v719_v35 = vld [vmem:[#allocation14 + $0x198] sm:$0xff] }
 0x40a   :  { %2372 = vmatpush1.bf16.msra.mxu1 %v15492_v44  ;;  %v881_v44 = vld [vmem:[#allocation14 + $0x6a8] sm:$0xff]  ;;  %v799_v22 = vld [vmem:[#allocation14 + $0x418] sm:$0xff] }
 0x40b   :  { %2373 = vmatprep.subr.bf16.mxu1 %v15501_v46  ;;  %v15565_v46 = vcombine.high %v877_v43, %v881_v44  ;;  %v15564_v49 = vcombine.low %v877_v43, %v881_v44  ;;  %v735_v43 = vld [vmem:[#allocation14 + $0x218] sm:$0xff] }
 0x40c   :  { %v739_v44 = vld [vmem:[#allocation14 + $0x238] sm:$0xff] }
 0x40d   :  { %v803_v23 = vld [vmem:[#allocation14 + $0x438] sm:$0xff] }
 0x40e   :  { %2374 = vmatpush1.bf16.msra.mxu1 %v15500_v52  ;;  %v897_v52 = vld [vmem:[#allocation14 + $0x728] sm:$0xff] }
 0x40f   :  { %2375 = vmatprep.subr.bf16.mxu1 %v15509_v54  ;;  %v15581_v54 = vcombine.high %v893_v51, %v897_v52  ;;  %v15580_v57 = vcombine.low %v893_v51, %v897_v52  ;;  %v743_v51 = vld [vmem:[#allocation14 + $0x258] sm:$0xff] }
 0x410   :  { %v747_v52 = vld [vmem:[#allocation14 + $0x278] sm:$0xff] }
 0x412   :  { %2376 = vmatpush1.bf16.msra.mxu1 %v15508_v60  ;;  %v913_v60 = vld [vmem:[#allocation14 + $0x7a8] sm:$0xff] }
 0x413   :  { %2377 = vmatprep.subr.bf16.mxu1 %v15517_v62  ;;  %v15597_v62 = vcombine.high %v909_v59, %v913_v60  ;;  %v15596_v1 = vcombine.low %v909_v59, %v913_v60  ;;  %v759_v59 = vld [vmem:[#allocation14 + $0x2d8] sm:$0xff] }
 0x414   :  { %v763_v60 = vld [vmem:[#allocation14 + $0x2f8] sm:$0xff] }
 0x416   :  { %2378 = vmatpush1.bf16.msra.mxu1 %v15516_v9  ;;  %v675_v9 = vld [vmem:[#allocation14 + $0x38] sm:$0xff] }
 0x417   :  { %2379 = vmatprep.subr.bf16.mxu1 %v15525_v11  ;;  %v15361_v11 = vcombine.high %v671_v8, %v675_v9  ;;  %v15360_v16 = vcombine.low %v671_v8, %v675_v9  ;;  %v775_v8 = vld [vmem:[#allocation14 + $0x358] sm:$0xff] }
 0x418   :  { %v779_v9 = vld [vmem:[#allocation14 + $0x378] sm:$0xff] }
 0x41a   :  { %2380 = vmatpush1.bf16.msra.mxu1 %v15524_v19  ;;  %v691_v19 = vld [vmem:[#allocation14 + $0xb8] sm:$0xff] }
 0x41b   :  { %2381 = vmatprep.subr.bf16.mxu1 %v15533_v20  ;;  %v15368_v20 = vcombine.low %v679_v13, %v683_v14  ;;  %v15377_v21 = vcombine.high %v687_v18, %v691_v19  ;;  %v15376_v24 = vcombine.low %v687_v18, %v691_v19  ;;  %v783_v13 = vld [vmem:[#allocation14 + $0x398] sm:$0xff] }
 0x41c   :  { %v787_v14 = vld [vmem:[#allocation14 + $0x3b8] sm:$0xff] }
 0x41d   :  { %v791_v18 = vld [vmem:[#allocation14 + $0x3d8] sm:$0xff] }
 0x41e   :  { %2382 = vmatpush1.bf16.msra.mxu1 %v15532_v27  ;;  %v707_v27 = vld [vmem:[#allocation14 + $0x138] sm:$0xff] }
 0x41f   :  { %2383 = vmatprep.subr.bf16.mxu1 %v15541_v31  ;;  %v15393_v31 = vcombine.high %v703_v26, %v707_v27  ;;  %v15392_v34 = vcombine.low %v703_v26, %v707_v27  ;;  %v795_v19 = vld [vmem:[#allocation14 + $0x3f8] sm:$0xff] }
 0x420   :  { %v807_v26 = vld [vmem:[#allocation14 + $0x458] sm:$0xff] }
 0x421   :  { %v811_v27 = vld [vmem:[#allocation14 + $0x478] sm:$0xff] }
 0x422   :  { %2384 = vmatpush1.bf16.msra.mxu1 %v15540_v38  ;;  %v15400_v38 = vcombine.low %v711_v32, %v715_v33 }
 0x423   :  { %2385 = vmatprep.subr.bf16.mxu1 %v15549_v39  ;;  %v15409_v39 = vcombine.high %v719_v35, %v723_v36 }
 0x426   :  { %2386 = vmatpush1.bf16.msra.mxu1 %v15548_v41  ;;  %v15408_v41 = vcombine.low %v719_v35, %v723_v36  ;;  %v823_v35 = vld [vmem:[#allocation14 + $0x4d8] sm:$0xff] }
 0x427   :  { %2387 = vmatprep.subr.bf16.mxu1 %v15557_v42  ;;  %v15417_v42 = vcombine.high %v727_v5, %v731_v40  ;;  %v827_v36 = vld [vmem:[#allocation14 + $0x4f8] sm:$0xff] }
 0x428   :  { %v831_v5 = vld [vmem:[#allocation14 + $0x518] sm:$0xff] }
 0x429   :  { %v835_v40 = vld [vmem:[#allocation14 + $0x538] sm:$0xff] }
 0x42a   :  { %2388 = vmatpush1.bf16.msra.mxu1 %v15556_v45  ;;  %v21808_v45 = vld [vmem:[#allocation17 + $0x800] sm:$0xff] }
 0x42b   :  { %2389 = vmatprep.subr.bf16.mxu1 %v15565_v46  ;;  %v21810_v46 = vld [vmem:[#allocation17 + $0x840] sm:$0xff] }
 0x42c   :  { %v15866_v48 = vcombine.low %v21808_v45, %v21810_v46 }
 0x42e   :  { %2390 = vmatpush1.bf16.msra.mxu1 %v15564_v49  ;;  %v15867_v49 = vcombine.high %v21808_v45, %v21810_v46  ;;  %v891_v45 = vld [vmem:[#allocation14 + $0x6f8] sm:$0xff]  ;;  %v2910_v46 = vld [vmem:[#allocation17 + $0xa00] sm:$0xff] }
 0x42f   :  { %2391 = vmatprep.subr.bf16.mxu1 %v15573_v50  ;;  %v15425_v50 = vcombine.high %v735_v43, %v739_v44 }
 0x430   :  { %8859 = vmatprep.subr.bf16.mxu0 %v15867_v49  ;;  %v847_v49 = vld [vmem:[#allocation14 + $0x598] sm:$0xff] }
 0x432   :  { %2392 = vmatpush1.bf16.msra.mxu1 %v15572_v53  ;;  %v15424_v53 = vcombine.low %v735_v43, %v739_v44  ;;  %v839_v43 = vld [vmem:[#allocation14 + $0x558] sm:$0xff]  ;;  %v15520_v44 = vcombine.low %v831_v5, %v835_v40 }
 0x433   :  { %2393 = vmatprep.subr.bf16.mxu1 %v15581_v54  ;;  %v15433_v54 = vcombine.high %v743_v51, %v747_v52 }
 0x436   :  { %2394 = vmatpush1.bf16.msra.mxu1 %v15580_v57  ;;  %v15432_v57 = vcombine.low %v743_v51, %v747_v52 }
 0x437   :  { %2395 = vmatprep.subr.bf16.mxu1 %v15589_v58  ;;  %v15441_v58 = vcombine.high %v751_v55, %v755_v56 }
 0x43a   :  { %2396 = vmatpush1.bf16.msra.mxu1 %v15588_v61  ;;  %v15440_v61 = vcombine.low %v751_v55, %v755_v56 }
 0x43b   :  { %2397 = vmatprep.subr.bf16.mxu1 %v15597_v62  ;;  %v15449_v62 = vcombine.high %v759_v59, %v763_v60 }
 0x43e   :  { %2398 = vmatpush1.bf16.msra.mxu1 %v15596_v1  ;;  %v15448_v1 = vcombine.low %v759_v59, %v763_v60 }
 0x43f   :  { %2399 = vmatprep.subr.bf16.mxu1 %v15605_v2  ;;  %v15457_v2 = vcombine.high %v767_v63, %v771_v0 }
 0x442   :  { %2400 = vmatpush1.bf16.msra.mxu1 %v15604_v10  ;;  %v15456_v10 = vcombine.low %v767_v63, %v771_v0 }
 0x443   :  { %2492 = vmatprep.subr.bf16.mxu1 %v15361_v11  ;;  %v15465_v11 = vcombine.high %v775_v8, %v779_v9 }
 0x445   :  { %2402 = vmatmul.mubr.bf16.vlgmr.msra.gmra.mrb[12].mxu1 %v21799_v12 }
 0x446   :  { %2493 = vmatpush1.bf16.msra.mxu1 %v15360_v16  ;;  %2524 = vmatprep.mubr.bf16.mxu1 %v21781_v29  ;;  %v15401_v29 = vcombine.high %v711_v32, %v715_v33  ;;  %v15464_v16 = vcombine.low %v775_v8, %v779_v9  ;;  %v815_v32 = vld [vmem:[#allocation14 + $0x498] sm:$0xff] }
 0x447   :  { %2494 = vmatprep.subr.bf16.mxu1 %v15369_v17  ;;  %v15473_v17 = vcombine.high %v783_v13, %v787_v14  ;;  %v819_v33 = vld [vmem:[#allocation14 + $0x4b8] sm:$0xff] }
 0x44a   :  { %2495 = vmatpush1.bf16.msra.mxu1 %v15368_v20  ;;  %v15472_v20 = vcombine.low %v783_v13, %v787_v14  ;;  %v867_v14 = vld [vmem:[#allocation14 + $0x638] sm:$0xff] }
 0x44b   :  { %2496 = vmatprep.subr.bf16.mxu1 %v15377_v21  ;;  %v15481_v21 = vcombine.high %v791_v18, %v795_v19 }
 0x44e   :  { %2497 = vmatpush1.bf16.msra.mxu1 %v15376_v24  ;;  %v15480_v24 = vcombine.low %v791_v18, %v795_v19  ;;  %v21828_v18 = vld [vmem:[#allocation17 + $0x1000] sm:$0xff] }
 0x44f   :  { %2498 = vmatprep.subr.bf16.mxu1 %v15385_v25  ;;  %v15489_v25 = vcombine.high %v799_v22, %v803_v23  ;;  %v21830_v19 = vld [vmem:[#allocation17 + $0x1040] sm:$0xff] }
 0x452   :  { %2499 = vmatpush1.bf16.msra.mxu1 %v15384_v28  ;;  %v15488_v28 = vcombine.low %v799_v22, %v803_v23 }
 0x453   :  { %2500 = vmatprep.subr.bf16.mxu1 %v15393_v31  ;;  %v15497_v31 = vcombine.high %v807_v26, %v811_v27 }
 0x456   :  { %2501 = vmatpush1.bf16.msra.mxu1 %v15392_v34  ;;  %v15496_v34 = vcombine.low %v807_v26, %v811_v27  ;;  %v16122_v26 = vcombine.low %v21828_v18, %v21830_v19  ;;  %v875_v27 = vld [vmem:[#allocation14 + $0x678] sm:$0xff] }
 0x457   :  { %2502 = vmatprep.subr.bf16.mxu1 %v15401_v29  ;;  %v15505_v29 = vcombine.high %v815_v32, %v819_v33 }
 0x45a   :  { %2503 = vmatpush1.bf16.msra.mxu1 %v15400_v38  ;;  %v15504_v38 = vcombine.low %v815_v32, %v819_v33 }
 0x45b   :  { %2504 = vmatprep.subr.bf16.mxu1 %v15409_v39  ;;  %v15513_v39 = vcombine.high %v823_v35, %v827_v36 }
 0x45e   :  { %2505 = vmatpush1.bf16.msra.mxu1 %v15408_v41  ;;  %v15512_v41 = vcombine.low %v823_v35, %v827_v36  ;;  %v883_v36 = vld [vmem:[#allocation14 + $0x6b8] sm:$0xff] }
 0x45f   :  { %2506 = vmatprep.subr.bf16.mxu1 %v15417_v42  ;;  %v15521_v42 = vcombine.high %v831_v5, %v835_v40 }
 0x462   :  { %2507 = vmatpush1.bf16.msra.mxu1 %v15416_v47 }
 0x463   :  { %2508 = vmatprep.subr.bf16.mxu1 %v15425_v50  ;;  %v851_v50 = vld [vmem:[#allocation14 + $0x5b8] sm:$0xff] }
 0x466   :  { %2509 = vmatpush1.bf16.msra.mxu1 %v15424_v53 }
 0x467   :  { %2510 = vmatprep.subr.bf16.mxu1 %v15433_v54  ;;  %v15537_v54 = vcombine.high %v847_v49, %v851_v50 }
 0x46a   :  { %2511 = vmatpush1.bf16.msra.mxu1 %v15432_v57  ;;  %v855_v57 = vld [vmem:[#allocation14 + $0x5d8] sm:$0xff] }
 0x46b   :  { %2512 = vmatprep.subr.bf16.mxu1 %v15441_v58  ;;  %v859_v58 = vld [vmem:[#allocation14 + $0x5f8] sm:$0xff] }
 0x46e   :  { %2513 = vmatpush1.bf16.msra.mxu1 %v15440_v61 }
 0x46f   :  { %2514 = vmatprep.subr.bf16.mxu1 %v15449_v62 }
 0x472   :  { %2515 = vmatpush1.bf16.msra.mxu1 %v15448_v1  ;;  %v15536_v1 = vcombine.low %v847_v49, %v851_v50  ;;  %v895_v49 = vld [vmem:[#allocation14 + $0x718] sm:$0xff] }
 0x473   :  { %2516 = vmatprep.subr.bf16.mxu1 %v15457_v2 }
 0x476   :  { %2517 = vmatpush1.bf16.msra.mxu1 %v15456_v10  ;;  %v15545_v10 = vcombine.high %v855_v57, %v859_v58 }
 0x477   :  { %2518 = vmatprep.subr.bf16.mxu1 %v15465_v11  ;;  %v863_v11 = vld [vmem:[#allocation14 + $0x618] sm:$0xff] }
 0x478   :  { %v15553_v23 = vcombine.high %v863_v11, %v867_v14  ;;  %v15552_v32 = vcombine.low %v863_v11, %v867_v14  ;;  %v2958_v11 = vld [vmem:[#allocation17 + $0xb80] sm:$0xff] }
 0x47a   :  { %2519 = vmatpush1.bf16.msra.mxu1 %v15464_v16  ;;  %v2862_v16 = vld [vmem:[#allocation17 + $0x880] sm:$0xff] }
 0x47b   :  { %2520 = vmatprep.subr.bf16.mxu1 %v15473_v17  ;;  %v2870_v17 = vld [vmem:[#allocation17 + $0x8c0] sm:$0xff] }
 0x47c   :  { %v15882_v33 = vcombine.low %v2862_v16, %v2870_v17 }
 0x47e   :  { %2521 = vmatpush1.bf16.msra.mxu1 %v15472_v20 }
 0x47f   :  { %2522 = vmatprep.subr.bf16.mxu1 %v15481_v21  ;;  %v15544_v21 = vcombine.low %v855_v57, %v859_v58  ;;  %v903_v58 = vld [vmem:[#allocation14 + $0x758] sm:$0xff] }
 0x482   :  { %2523 = vmatpush1.bf16.msra.mxu1 %v15480_v24  ;;  %v871_v24 = vld [vmem:[#allocation14 + $0x658] sm:$0xff] }
 0x483   :  { %2533 = vmatprep.subr.bf16.mxu1 %v15489_v25  ;;  %v15883_v25 = vcombine.high %v2862_v16, %v2870_v17  ;;  %v15560_v5 = vcombine.low %v871_v24, %v875_v27 }
 0x485   :  { %2525 = vmatmul.mubr.bf16.vlgmr.msra.gmra.mrb[16].mxu1 %v21783_v30  ;;  %v843_v30 = vld [vmem:[#allocation14 + $0x578] sm:$0xff] }
 0x486   :  { %2534 = vmatpush1.bf16.msra.mxu1 %v15488_v28  ;;  %2565 = vmatprep.mubr.bf16.mxu1 %v21787_v37  ;;  %v21818_v37 = vld [vmem:[#allocation16] sm:$0xff]  ;;  %v15529_v47 = vcombine.high %v839_v43, %v843_v30  ;;  %v15528_v53 = vcombine.low %v839_v43, %v843_v30  ;;  %v2878_v28 = vld [vmem:[#allocation17 + $0x900] sm:$0xff] }
 0x487   :  { %2535 = vmatprep.subr.bf16.mxu1 %v15497_v31  ;;  %v929_v51 = vrot.slane %v21818_v37, %v21763_v4  ;;  %v933_v52 = vrot.slane %v21818_v37, %v21768_v6  ;;  %v2886_v31 = vld [vmem:[#allocation17 + $0x940] sm:$0xff] }
 0x488   :  { %v15899_v35 = vcombine.high %v2878_v28, %v2886_v31  ;;  %v15898_v40 = vcombine.low %v2878_v28, %v2886_v31 }
 0x48a   :  { %2536 = vmatpush1.bf16.msra.mxu1 %v15496_v34  ;;  %v15561_v34 = vcombine.high %v871_v24, %v875_v27  ;;  %v923_v24 = vld [vmem:[#allocation14 + $0x7f8] sm:$0xff]  ;;  %v2982_v27 = vld [vmem:[#allocation17 + $0xc40] sm:$0xff] }
 0x48b   :  { %2537 = vmatprep.subr.bf16.mxu1 %v15505_v29  ;;  %v879_v29 = vld [vmem:[#allocation14 + $0x698] sm:$0xff] }
 0x48c   :  { %v15568_v30 = vcombine.low %v879_v29, %v883_v36 }
 0x48e   :  { %2538 = vmatpush1.bf16.msra.mxu1 %v15504_v38  ;;  %v2894_v38 = vld [vmem:[#allocation17 + $0x980] sm:$0xff] }
 0x48f   :  { %2539 = vmatprep.subr.bf16.mxu1 %v15513_v39  ;;  %v2902_v39 = vld [vmem:[#allocation17 + $0x9c0] sm:$0xff] }
 0x490   :  { %v15915_v43 = vcombine.high %v2894_v38, %v2902_v39 }
 0x492   :  { %2540 = vmatpush1.bf16.msra.mxu1 %v15512_v41  ;;  %v15569_v41 = vcombine.high %v879_v29, %v883_v36  ;;  %v2599_v29 = vld [vmem:[#allocation17 + $0x48] sm:$0xff]  ;;  %v2998_v36 = vld [vmem:[#allocation17 + $0xcc0] sm:$0xff] }
 0x493   :  { %2541 = vmatprep.subr.bf16.mxu1 %v15521_v42  ;;  %v887_v42 = vld [vmem:[#allocation14 + $0x6d8] sm:$0xff] }
 0x496   :  { %2542 = vmatpush1.bf16.msra.mxu1 %v15520_v44  ;;  %v15914_v44 = vcombine.low %v2894_v38, %v2902_v39 }
 0x497   :  { %2543 = vmatprep.subr.bf16.mxu1 %v15529_v47  ;;  %v15577_v47 = vcombine.high %v887_v42, %v891_v45 }
 0x498   :  { %v2321_v55 = vpop.f32.mrb[8].mxu1  ;;  %v21824_v56 = vpop.f32.mrb[8].mxu0 }
 0x499   :  { %v18734_v59 = vadd.f32 %v2321_v55, %v929_v51  ;;  %v2323_v60 = vpop.f32.mrb[9].mxu1  ;;  %v21826_v61 = vpop.f32.mrb[9].mxu0  ;;  %v899_v51 = vld [vmem:[#allocation14 + $0x738] sm:$0xff] }
 0x49a   :  { %v18735_v62 = vadd.f32 %v2323_v60, %v933_v52  ;;  %v2325_v63 = vpop.f32.mrb[10].mxu1  ;;  %v2489_v0 = vpop.f32.mrb[10].mxu0  ;;  %2544 = vmatpush1.bf16.msra.mxu1 %v15528_v53  ;;  %v2926_v52 = vld [vmem:[#allocation17 + $0xa80] sm:$0xff]  ;;  %v15585_v57 = vcombine.high %v895_v49, %v899_v51  ;;  %v907_v60 = vld [vmem:[#allocation14 + $0x778] sm:$0xff] }
 0x49b   :  { %v2574_v2 = vmax.f32 %v18734_v59, 0.0  ;;  %v2326_v8 = vpop.f32.mrb[11].mxu1  ;;  %v2490_v9 = vpop.f32.mrb[11].mxu0  ;;  %2545 = vmatprep.subr.bf16.mxu1 %v15537_v54  ;;  %v2934_v53 = vld [vmem:[#allocation17 + $0xac0] sm:$0xff]  ;;  %v15576_v54 = vcombine.low %v887_v42, %v891_v45  ;;  %v15584_v0 = vcombine.low %v895_v49, %v899_v51  ;;  %v15592_v14 = vcombine.low %v903_v58, %v907_v60  ;;  %v2615_v42 = vld [vmem:[#allocation17 + $0xc8] sm:$0xff] }
 0x49c   :  { %v2575_v13 = vmax.f32 %v18735_v62, 0.0  ;;  %v15947_v59 = vcombine.high %v2926_v52, %v2934_v53  ;;  %v2942_v62 = vld [vmem:[#allocation17 + $0xb00] sm:$0xff]  ;;  %v911_v8 = vld [vmem:[#allocation14 + $0x798] sm:$0xff] }
 0x49d   :  { %v21834_v22 = vpack.c.bf16 %v2574_v2, %v2574_v2  ;;  %v2950_v63 = vld [vmem:[#allocation17 + $0xb40] sm:$0xff]  ;;  %v15593_v2 = vcombine.high %v903_v58, %v907_v60 }
 0x49e   :  { %v21832_v20 = vpack.c.bf16 %v2575_v13, %v2575_v13  ;;  %2546 = vmatpush1.bf16.msra.mxu1 %v15536_v1  ;;  %v15946_v1 = vcombine.low %v2926_v52, %v2934_v53  ;;  %v15963_v9 = vcombine.high %v2942_v62, %v2950_v63  ;;  %v2966_v13 = vld [vmem:[#allocation17 + $0xbc0] sm:$0xff]  ;;  %v15962_v16 = vcombine.low %v2942_v62, %v2950_v63 }
 0x49f   :  { %2547 = vmatprep.subr.bf16.mxu1 %v15545_v10  ;;  %v915_v10 = vld [vmem:[#allocation14 + $0x7b8] sm:$0xff]  ;;  %v15978_v31 = vcombine.low %v2958_v11, %v2966_v13  ;;  %v3014_v45 = vld [vmem:[#allocation17 + $0xd40] sm:$0xff] }
 0x4a0   :  { %8850 = vmatprep.mubr.bf16.mxu0 %v21832_v20  ;;  %v15601_v17 = vcombine.high %v911_v8, %v915_v10  ;;  %v15600_v28 = vcombine.low %v911_v8, %v915_v10  ;;  %v3030_v51 = vld [vmem:[#allocation17 + $0xdc0] sm:$0xff] }
 0x4a1   :  { %8851 = vmatmul.mubr.bf16.vlgmr.msra.gmra.mrb[12].mxu0 %v21834_v22  ;;  %v3046_v60 = vld [vmem:[#allocation17 + $0xe40] sm:$0xff] }
 0x4a2   :  { %2548 = vmatpush1.bf16.msra.mxu1 %v15544_v21  ;;  %8860 = vmatpush1.bf16.msra.mxu0 %v15866_v48  ;;  %v2918_v48 = vld [vmem:[#allocation17 + $0xa40] sm:$0xff]  ;;  %v919_v21 = vld [vmem:[#allocation14 + $0x7d8] sm:$0xff] }
 0x4a3   :  { %2549 = vmatprep.subr.bf16.mxu1 %v15553_v23  ;;  %8861 = vmatprep.subr.bf16.mxu0 %v15883_v25  ;;  %v15931_v50 = vcombine.high %v2910_v46, %v2918_v48  ;;  %v15930_v55 = vcombine.low %v2910_v46, %v2918_v48  ;;  %v15979_v23 = vcombine.high %v2958_v11, %v2966_v13  ;;  %v2974_v25 = vld [vmem:[#allocation17 + $0xc00] sm:$0xff] }
 0x4a4   :  { %v15608_v38 = vcombine.low %v919_v21, %v923_v24  ;;  %v15994_v39 = vcombine.low %v2974_v25, %v2982_v27  ;;  %v3054_v8 = vld [vmem:[#allocation17 + $0xe80] sm:$0xff] }
 0x4a6   :  { %2550 = vmatpush1.bf16.msra.mxu1 %v15552_v32  ;;  %8862 = vmatpush1.bf16.msra.mxu0 %v15882_v33  ;;  %v15609_v32 = vcombine.high %v919_v21, %v923_v24  ;;  %v2591_v33 = vld [vmem:[#allocation17 + $0x8] sm:$0xff]  ;;  %v3070_v21 = vld [vmem:[#allocation17 + $0xf00] sm:$0xff] }
 0x4a7   :  { %2551 = vmatprep.subr.bf16.mxu1 %v15561_v34  ;;  %8863 = vmatprep.subr.bf16.mxu0 %v15899_v35  ;;  %v15995_v34 = vcombine.high %v2974_v25, %v2982_v27  ;;  %v2990_v35 = vld [vmem:[#allocation17 + $0xc80] sm:$0xff]  ;;  %v15612_v46 = vcombine.low %v2591_v33, %v2599_v29 }
 0x4aa   :  { %2552 = vmatpush1.bf16.msra.mxu1 %v15560_v5  ;;  %8864 = vmatpush1.bf16.msra.mxu0 %v15898_v40  ;;  %v15613_v5 = vcombine.high %v2591_v33, %v2599_v29  ;;  %v16011_v40 = vcombine.high %v2990_v35, %v2998_v36  ;;  %v3086_v33 = vld [vmem:[#allocation17 + $0xf80] sm:$0xff] }
 0x4ab   :  { %2553 = vmatprep.subr.bf16.mxu1 %v15569_v41  ;;  %8865 = vmatprep.subr.bf16.mxu0 %v15915_v43  ;;  %v2607_v41 = vld [vmem:[#allocation17 + $0x88] sm:$0xff]  ;;  %v3006_v43 = vld [vmem:[#allocation17 + $0xd00] sm:$0xff] }
 0x4ac   :  { %v15629_v48 = vcombine.high %v2607_v41, %v2615_v42  ;;  %v16027_v49 = vcombine.high %v3006_v43, %v3014_v45  ;;  %v15628_v52 = vcombine.low %v2607_v41, %v2615_v42 }
 0x4ae   :  { %2554 = vmatpush1.bf16.msra.mxu1 %v15568_v30  ;;  %8866 = vmatpush1.bf16.msra.mxu0 %v15914_v44  ;;  %v16010_v30 = vcombine.low %v2990_v35, %v2998_v36  ;;  %v2623_v44 = vld [vmem:[#allocation17 + $0x108] sm:$0xff] }
 0x4af   :  { %2555 = vmatprep.subr.bf16.mxu1 %v15577_v47  ;;  %8867 = vmatprep.subr.bf16.mxu0 %v15931_v50  ;;  %v2631_v47 = vld [vmem:[#allocation17 + $0x148] sm:$0xff]  ;;  %v3022_v50 = vld [vmem:[#allocation17 + $0xd80] sm:$0xff] }
 0x4b0   :  { %v15645_v53 = vcombine.high %v2623_v44, %v2631_v47  ;;  %v16043_v58 = vcombine.high %v3022_v50, %v3030_v51  ;;  %v15644_v62 = vcombine.low %v2623_v44, %v2631_v47  ;;  %v16042_v63 = vcombine.low %v3022_v50, %v3030_v51  ;;  %v2735_v44 = vld [vmem:[#allocation17 + $0x488] sm:$0xff] }
 0x4b1   :  { %v2743_v47 = vld [vmem:[#allocation17 + $0x4c8] sm:$0xff] }
 0x4b2   :  { %2556 = vmatpush1.bf16.msra.mxu1 %v15576_v54  ;;  %8868 = vmatpush1.bf16.msra.mxu0 %v15930_v55  ;;  %v16026_v54 = vcombine.low %v3006_v43, %v3014_v45  ;;  %v2639_v55 = vld [vmem:[#allocation17 + $0x188] sm:$0xff]  ;;  %v15757_v50 = vcombine.high %v2735_v44, %v2743_v47 }
 0x4b3   :  { %2557 = vmatprep.subr.bf16.mxu1 %v15585_v57  ;;  %8869 = vmatprep.subr.bf16.mxu0 %v15947_v59  ;;  %v2647_v57 = vld [vmem:[#allocation17 + $0x1c8] sm:$0xff]  ;;  %v3038_v59 = vld [vmem:[#allocation17 + $0xe00] sm:$0xff] }
 0x4b4   :  { %v15660_v10 = vcombine.low %v2639_v55, %v2647_v57  ;;  %v16058_v13 = vcombine.low %v3038_v59, %v3046_v60  ;;  %v2719_v43 = vld [vmem:[#allocation17 + $0x408] sm:$0xff] }
 0x4b5   :  { %v2727_v45 = vld [vmem:[#allocation17 + $0x448] sm:$0xff] }
 0x4b6   :  { %2558 = vmatpush1.bf16.msra.mxu1 %v15584_v0  ;;  %8870 = vmatpush1.bf16.msra.mxu0 %v15946_v1  ;;  %v2655_v0 = vld [vmem:[#allocation17 + $0x208] sm:$0xff] }
 0x4b7   :  { %2559 = vmatprep.subr.bf16.mxu1 %v15593_v2  ;;  %8871 = vmatprep.subr.bf16.mxu0 %v15963_v9  ;;  %v2663_v1 = vld [vmem:[#allocation17 + $0x248] sm:$0xff]  ;;  %v16059_v2 = vcombine.high %v3038_v59, %v3046_v60  ;;  %v3062_v9 = vld [vmem:[#allocation17 + $0xec0] sm:$0xff] }
 0x4b8   :  { %v15677_v11 = vcombine.high %v2655_v0, %v2663_v1  ;;  %v15676_v24 = vcombine.low %v2655_v0, %v2663_v1  ;;  %v16074_v27 = vcombine.low %v3054_v8, %v3062_v9  ;;  %v2751_v51 = vld [vmem:[#allocation17 + $0x508] sm:$0xff] }
 0x4b9   :  { %v2783_v60 = vld [vmem:[#allocation17 + $0x608] sm:$0xff] }
 0x4ba   :  { %2560 = vmatpush1.bf16.msra.mxu1 %v15592_v14  ;;  %8872 = vmatpush1.bf16.msra.mxu0 %v15962_v16  ;;  %v2671_v14 = vld [vmem:[#allocation17 + $0x288] sm:$0xff] }
 0x4bb   :  { %2561 = vmatprep.subr.bf16.mxu1 %v15601_v17  ;;  %8873 = vmatprep.subr.bf16.mxu0 %v15979_v23  ;;  %v2679_v16 = vld [vmem:[#allocation17 + $0x2c8] sm:$0xff]  ;;  %v16075_v17 = vcombine.high %v3054_v8, %v3062_v9  ;;  %v3078_v23 = vld [vmem:[#allocation17 + $0xf40] sm:$0xff] }
 0x4bc   :  { %v15693_v25 = vcombine.high %v2671_v14, %v2679_v16  ;;  %v15692_v29 = vcombine.low %v2671_v14, %v2679_v16  ;;  %v16090_v36 = vcombine.low %v3070_v21, %v3078_v23  ;;  %v2799_v0 = vld [vmem:[#allocation17 + $0x688] sm:$0xff] }
 0x4bd   :  { %v2807_v1 = vld [vmem:[#allocation17 + $0x6c8] sm:$0xff] }
 0x4be   :  { %2562 = vmatpush1.bf16.msra.mxu1 %v15600_v28  ;;  %8874 = vmatpush1.bf16.msra.mxu0 %v15978_v31  ;;  %v2687_v28 = vld [vmem:[#allocation17 + $0x308] sm:$0xff]  ;;  %v15821_v8 = vcombine.high %v2799_v0, %v2807_v1 }
 0x4bf   :  { %2563 = vmatprep.subr.bf16.mxu1 %v15609_v32  ;;  %8875 = vmatprep.subr.bf16.mxu0 %v15995_v34  ;;  %v2695_v31 = vld [vmem:[#allocation17 + $0x348] sm:$0xff]  ;;  %v16091_v32 = vcombine.high %v3070_v21, %v3078_v23  ;;  %v3094_v34 = vld [vmem:[#allocation17 + $0xfc0] sm:$0xff] }
 0x4c0   :  { %v15709_v35 = vcombine.high %v2687_v28, %v2695_v31  ;;  %v16106_v42 = vcombine.low %v3086_v33, %v3094_v34  ;;  %v2815_v9 = vld [vmem:[#allocation17 + $0x708] sm:$0xff] }
 0x4c1   :  { %v2831_v14 = vld [vmem:[#allocation17 + $0x788] sm:$0xff] }
 0x4c2   :  { %2564 = vmatpush1.bf16.msra.mxu1 %v15608_v38  ;;  %8876 = vmatpush1.bf16.msra.mxu0 %v15994_v39  ;;  %v2703_v38 = vld [vmem:[#allocation17 + $0x388] sm:$0xff] }
 0x4c3   :  { %8982 = vmatprep.subr.bf16.mxu1 %v15613_v5  ;;  %8877 = vmatprep.subr.bf16.mxu0 %v16011_v40  ;;  %v2711_v39 = vld [vmem:[#allocation17 + $0x3c8] sm:$0xff]  ;;  %v16107_v5 = vcombine.high %v3086_v33, %v3094_v34  ;;  %v15708_v40 = vcombine.low %v2687_v28, %v2695_v31 }
 0x4c4   :  { %v15725_v41 = vcombine.high %v2703_v38, %v2711_v39  ;;  %v2839_v16 = vld [vmem:[#allocation17 + $0x7c8] sm:$0xff] }
 0x4c5   :  { %2566 = vmatmul.mubr.bf16.vlgmr.msra.gmra.mrb[16].mxu1 %v21799_v12  ;;  %v15661_v12 = vcombine.high %v2639_v55, %v2647_v57  ;;  %v2767_v55 = vld [vmem:[#allocation17 + $0x588] sm:$0xff]  ;;  %v15853_v21 = vcombine.high %v2831_v14, %v2839_v16 }
 0x4c6   :  { %8983 = vmatpush1.bf16.msra.mxu1 %v15612_v46  ;;  %9014 = vmatprep.mubr.bf16.mxu1 %v21832_v20  ;;  %v16123_v46 = vcombine.high %v21828_v18, %v21830_v19  ;;  %v2775_v57 = vld [vmem:[#allocation17 + $0x5c8] sm:$0xff] }
 0x4c7   :  { %8984 = vmatprep.subr.bf16.mxu1 %v15629_v48  ;;  %8878 = vmatpush1.bf16.msra.mxu0 %v16010_v30  ;;  %v15724_v48 = vcombine.low %v2703_v38, %v2711_v39  ;;  %v15741_v30 = vcombine.high %v2719_v43, %v2727_v45  ;;  %v15789_v59 = vcombine.high %v2767_v55, %v2775_v57  ;;  %v2847_v23 = vld [vmem:[#allocation17 + $0x808] sm:$0xff] }
 0x4c8   :  { %8879 = vmatprep.subr.bf16.mxu0 %v16027_v49  ;;  %v15740_v49 = vcombine.low %v2719_v43, %v2727_v45  ;;  %v2863_v28 = vld [vmem:[#allocation17 + $0x888] sm:$0xff] }
 0x4c9   :  { %v2871_v31 = vld [vmem:[#allocation17 + $0x8c8] sm:$0xff] }
 0x4ca   :  { %8985 = vmatpush1.bf16.msra.mxu1 %v15628_v52  ;;  %v2759_v52 = vld [vmem:[#allocation17 + $0x548] sm:$0xff]  ;;  %v15885_v33 = vcombine.high %v2863_v28, %v2871_v31 }
 0x4cb   :  { %8986 = vmatprep.subr.bf16.mxu1 %v15645_v53  ;;  %8880 = vmatpush1.bf16.msra.mxu0 %v16026_v54  ;;  %v15756_v53 = vcombine.low %v2735_v44, %v2743_v47  ;;  %v15773_v54 = vcombine.high %v2751_v51, %v2759_v52  ;;  %v2879_v34 = vld [vmem:[#allocation17 + $0x908] sm:$0xff] }
 0x4cc   :  { %8881 = vmatprep.subr.bf16.mxu0 %v16043_v58  ;;  %v15772_v58 = vcombine.low %v2751_v51, %v2759_v52  ;;  %v2895_v38 = vld [vmem:[#allocation17 + $0x988] sm:$0xff]  ;;  %v937_v52 = vrot.slane %v21818_v37, %v21794_v15 }
 0x4cd   :  { %v2903_v39 = vld [vmem:[#allocation17 + $0x9c8] sm:$0xff] }
 0x4ce   :  { %8987 = vmatpush1.bf16.msra.mxu1 %v15644_v62  ;;  %v2791_v62 = vld [vmem:[#allocation17 + $0x648] sm:$0xff]  ;;  %v15916_v43 = vcombine.low %v2895_v38, %v2903_v39 }
 0x4cf   :  { %8988 = vmatprep.subr.bf16.mxu1 %v15661_v12  ;;  %8882 = vmatpush1.bf16.msra.mxu0 %v16042_v63  ;;  %v15788_v12 = vcombine.low %v2767_v55, %v2775_v57  ;;  %v15805_v63 = vcombine.high %v2783_v60, %v2791_v62  ;;  %v2951_v51 = vld [vmem:[#allocation17 + $0xb48] sm:$0xff] }
 0x4d0   :  { %8883 = vmatprep.subr.bf16.mxu0 %v16059_v2  ;;  %v15804_v2 = vcombine.low %v2783_v60, %v2791_v62  ;;  %v2967_v60 = vld [vmem:[#allocation17 + $0xbc8] sm:$0xff] }
 0x4d2   :  { %8989 = vmatpush1.bf16.msra.mxu1 %v15660_v10  ;;  %v2823_v10 = vld [vmem:[#allocation17 + $0x748] sm:$0xff] }
 0x4d3   :  { %8990 = vmatprep.subr.bf16.mxu1 %v15677_v11  ;;  %8884 = vmatpush1.bf16.msra.mxu0 %v16058_v13  ;;  %v15820_v11 = vcombine.low %v2799_v0, %v2807_v1  ;;  %v15837_v13 = vcombine.high %v2815_v9, %v2823_v10 }
 0x4d4   :  { %8885 = vmatprep.subr.bf16.mxu0 %v16075_v17  ;;  %v15836_v17 = vcombine.low %v2815_v9, %v2823_v10 }
 0x4d6   :  { %8991 = vmatpush1.bf16.msra.mxu1 %v15676_v24  ;;  %v2855_v24 = vld [vmem:[#allocation17 + $0x848] sm:$0xff] }
 0x4d7   :  { %8992 = vmatprep.subr.bf16.mxu1 %v15693_v25  ;;  %8886 = vmatpush1.bf16.msra.mxu0 %v16074_v27  ;;  %v15852_v25 = vcombine.low %v2831_v14, %v2839_v16  ;;  %v15869_v27 = vcombine.high %v2847_v23, %v2855_v24  ;;  %v3126_v14 = vld [vmem:[#allocation17 + $0x10c0] sm:$0xff]  ;;  %v2975_v16 = vld [vmem:[#allocation17 + $0xc08] sm:$0xff] }
 0x4d8   :  { %8887 = vmatprep.subr.bf16.mxu0 %v16091_v32  ;;  %v15868_v32 = vcombine.low %v2847_v23, %v2855_v24 }
 0x4da   :  { %8993 = vmatpush1.bf16.msra.mxu1 %v15692_v29  ;;  %v2887_v29 = vld [vmem:[#allocation17 + $0x948] sm:$0xff] }
 0x4db   :  { %8994 = vmatprep.subr.bf16.mxu1 %v15709_v35  ;;  %8888 = vmatpush1.bf16.msra.mxu0 %v16090_v36  ;;  %v15884_v35 = vcombine.low %v2863_v28, %v2871_v31  ;;  %v15901_v36 = vcombine.high %v2879_v34, %v2887_v29  ;;  %v3134_v28 = vld [vmem:[#allocation17 + $0x1100] sm:$0xff] }
 0x4dc   :  { %8889 = vmatprep.subr.bf16.mxu0 %v16107_v5  ;;  %v15900_v5 = vcombine.low %v2879_v34, %v2887_v29  ;;  %v3142_v31 = vld [vmem:[#allocation17 + $0x1140] sm:$0xff] }
 0x4de   :  { %8995 = vmatpush1.bf16.msra.mxu1 %v15708_v40  ;;  %v15917_v40 = vcombine.high %v2895_v38, %v2903_v39  ;;  %v3150_v38 = vld [vmem:[#allocation17 + $0x1180] sm:$0xff] }
 0x4df   :  { %8996 = vmatprep.subr.bf16.mxu1 %v15725_v41  ;;  %8890 = vmatpush1.bf16.msra.mxu0 %v16106_v42  ;;  %v2911_v41 = vld [vmem:[#allocation17 + $0xa08] sm:$0xff]  ;;  %v3158_v39 = vld [vmem:[#allocation17 + $0x11c0] sm:$0xff] }
 0x4e0   :  { %8900 = vmatprep.subr.bf16.mxu0 %v16123_v46  ;;  %v2919_v42 = vld [vmem:[#allocation17 + $0xa48] sm:$0xff]  ;;  %v21849_v46 = vsub.s32 5, %v21760_v3  ;;  %v16171_v18 = vcombine.high %v3150_v38, %v3158_v39 }
 0x4e1   :  { %v15933_v45 = vcombine.high %v2911_v41, %v2919_v42  ;;  %v15932_v44 = vcombine.low %v2911_v41, %v2919_v42  ;;  %v16154_v41 = vcombine.low %v3134_v28, %v3142_v31 }
 0x4e2   :  { %8997 = vmatpush1.bf16.msra.mxu1 %v15724_v48  ;;  %v2927_v48 = vld [vmem:[#allocation17 + $0xa88] sm:$0xff] }
 0x4e3   :  { %8998 = vmatprep.subr.bf16.mxu1 %v15741_v30  ;;  %v2935_v30 = vld [vmem:[#allocation17 + $0xac8] sm:$0xff] }
 0x4e4   :  { %v15949_v47 = vcombine.high %v2927_v48, %v2935_v30 }
 0x4e6   :  { %8999 = vmatpush1.bf16.msra.mxu1 %v15740_v49  ;;  %v949_v49 = vrot.slane %v21818_v37, %v21849_v46 }
 0x4e7   :  { %9000 = vmatprep.subr.bf16.mxu1 %v15757_v50  ;;  %v2943_v50 = vld [vmem:[#allocation17 + $0xb08] sm:$0xff] }
 0x4e8   :  { %v15965_v55 = vcombine.high %v2943_v50, %v2951_v51  ;;  %v18739_v57 = vadd.f32 %v21826_v61, %v949_v49  ;;  %v15964_v1 = vcombine.low %v2943_v50, %v2951_v51  ;;  %v3182_v50 = vld [vmem:[#allocation17 + $0x1280] sm:$0xff] }
 0x4e9   :  { %v3190_v51 = vld [vmem:[#allocation17 + $0x12c0] sm:$0xff] }
 0x4ea   :  { %9001 = vmatpush1.bf16.msra.mxu1 %v15756_v53  ;;  %v941_v53 = vrot.slane %v21818_v37, %v21771_v7  ;;  %v2579_v10 = vmax.f32 %v18739_v57, 0.0  ;;  %v16203_v57 = vcombine.high %v3182_v50, %v3190_v51 }
 0x4eb   :  { %9002 = vmatprep.subr.bf16.mxu1 %v15773_v54  ;;  %v15948_v54 = vcombine.low %v2927_v48, %v2935_v30  ;;  %v3031_v48 = vld [vmem:[#allocation17 + $0xdc8] sm:$0xff]  ;;  %v16170_v30 = vcombine.low %v3150_v38, %v3158_v39 }
 0x4ec   :  { %v3111_v38 = vld [vmem:[#allocation17 + $0x1048] sm:$0xff] }
 0x4ee   :  { %9003 = vmatpush1.bf16.msra.mxu1 %v15772_v58 }
 0x4ef   :  { %9004 = vmatprep.subr.bf16.mxu1 %v15789_v59  ;;  %v2959_v59 = vld [vmem:[#allocation17 + $0xb88] sm:$0xff] }
 0x4f0   :  { %v15981_v9 = vcombine.high %v2959_v59, %v2967_v60  ;;  %v15980_v23 = vcombine.low %v2959_v59, %v2967_v60  ;;  %v3198_v59 = vld [vmem:[#allocation17 + $0x1300] sm:$0xff] }
 0x4f1   :  { %v3206_v60 = vld [vmem:[#allocation17 + $0x1340] sm:$0xff] }
 0x4f2   :  { %9005 = vmatpush1.bf16.msra.mxu1 %v15788_v12 }
 0x4f3   :  { %9006 = vmatprep.subr.bf16.mxu1 %v15805_v63 }
 0x4f6   :  { %9007 = vmatpush1.bf16.msra.mxu1 %v15804_v2 }
 0x4f7   :  { %9008 = vmatprep.subr.bf16.mxu1 %v15821_v8 }
 0x4fa   :  { %9009 = vmatpush1.bf16.msra.mxu1 %v15820_v11 }
 0x4fb   :  { %9010 = vmatprep.subr.bf16.mxu1 %v15837_v13  ;;  %v3118_v13 = vld [vmem:[#allocation17 + $0x1080] sm:$0xff] }
 0x4fc   :  { %v16139_v24 = vcombine.high %v3118_v13, %v3126_v14  ;;  %v16138_v34 = vcombine.low %v3118_v13, %v3126_v14  ;;  %v16218_v13 = vcombine.low %v3198_v59, %v3206_v60 }
 0x4fe   :  { %9011 = vmatpush1.bf16.msra.mxu1 %v15836_v17  ;;  %v2983_v17 = vld [vmem:[#allocation17 + $0xc48] sm:$0xff] }
 0x4ff   :  { %9012 = vmatprep.subr.bf16.mxu1 %v15853_v21  ;;  %v15996_v29 = vcombine.low %v2975_v16, %v2983_v17 }
 0x502   :  { %9013 = vmatpush1.bf16.msra.mxu1 %v15852_v25  ;;  %v21862_v25 = vpack.c.bf16 %v2579_v10, %v2579_v10  ;;  %v3071_v10 = vld [vmem:[#allocation17 + $0xf08] sm:$0xff] }
 0x503   :  { %9023 = vmatprep.subr.bf16.mxu1 %v15869_v27  ;;  %v15997_v27 = vcombine.high %v2975_v16, %v2983_v17 }
 0x505   :  { %9015 = vmatmul.mubr.bf16.vlgmr.msra.gmra.mrb[20].mxu1 %v21834_v22 }
 0x506   :  { %9024 = vmatpush1.bf16.msra.mxu1 %v15868_v32  ;;  %v2991_v32 = vld [vmem:[#allocation17 + $0xc88] sm:$0xff] }
 0x507   :  { %9025 = vmatprep.subr.bf16.mxu1 %v15885_v33  ;;  %v2999_v33 = vld [vmem:[#allocation17 + $0xcc8] sm:$0xff] }
 0x508   :  { %v16012_v42 = vcombine.low %v2991_v32, %v2999_v33 }
 0x50a   :  { %9026 = vmatpush1.bf16.msra.mxu1 %v15884_v35  ;;  %v16155_v35 = vcombine.high %v3134_v28, %v3142_v31  ;;  %v3095_v28 = vld [vmem:[#allocation17 + $0xfc8] sm:$0xff] }
 0x50b   :  { %9027 = vmatprep.subr.bf16.mxu1 %v15901_v36  ;;  %v16013_v36 = vcombine.high %v2991_v32, %v2999_v33 }
 0x50e   :  { %9028 = vmatpush1.bf16.msra.mxu1 %v15900_v5  ;;  %v3007_v5 = vld [vmem:[#allocation17 + $0xd08] sm:$0xff] }
 0x50f   :  { %9029 = vmatprep.subr.bf16.mxu1 %v15917_v40  ;;  %v3015_v40 = vld [vmem:[#allocation17 + $0xd48] sm:$0xff] }
 0x510   :  { %v16029_v19 = vcombine.high %v3007_v5, %v3015_v40 }
 0x512   :  { %9030 = vmatpush1.bf16.msra.mxu1 %v15916_v43  ;;  %v3174_v43 = vld [vmem:[#allocation17 + $0x1240] sm:$0xff] }
 0x513   :  { %9031 = vmatprep.subr.bf16.mxu1 %v15933_v45  ;;  %v3023_v45 = vld [vmem:[#allocation17 + $0xd88] sm:$0xff] }
 0x514   :  { %v16045_v49 = vcombine.high %v3023_v45, %v3031_v48 }
 0x516   :  { %9032 = vmatpush1.bf16.msra.mxu1 %v15932_v44  ;;  %v16028_v44 = vcombine.low %v3007_v5, %v3015_v40 }
 0x517   :  { %9033 = vmatprep.subr.bf16.mxu1 %v15949_v47 }
 0x518   :  { %v2403_v58 = vpop.f32.mrb[12].mxu1 }
 0x519   :  { %v18736_v62 = vadd.f32 %v2403_v58, %v937_v52  ;;  %v2405_v12 = vpop.f32.mrb[13].mxu1  ;;  %v3039_v52 = vld [vmem:[#allocation17 + $0xe08] sm:$0xff] }
 0x51a   :  { %v18737_v63 = vadd.f32 %v2405_v12, %v941_v53  ;;  %v2407_v0 = vpop.f32.mrb[14].mxu1  ;;  %9034 = vmatpush1.bf16.msra.mxu1 %v15948_v54  ;;  %v3047_v53 = vld [vmem:[#allocation17 + $0xe48] sm:$0xff] }
 0x51b   :  { %v2576_v2 = vmax.f32 %v18736_v62, 0.0  ;;  %v2408_v8 = vpop.f32.mrb[15].mxu1  ;;  %9035 = vmatprep.subr.bf16.mxu1 %v15965_v55  ;;  %v16044_v55 = vcombine.low %v3023_v45, %v3031_v48  ;;  %v16061_v58 = vcombine.high %v3039_v52, %v3047_v53  ;;  %v3055_v62 = vld [vmem:[#allocation17 + $0xe88] sm:$0xff]  ;;  %v16060_v0 = vcombine.low %v3039_v52, %v3047_v53 }
 0x51c   :  { %v2577_v11 = vmax.f32 %v18737_v63, 0.0  ;;  %v3063_v12 = vld [vmem:[#allocation17 + $0xec8] sm:$0xff]  ;;  %v16202_v63 = vcombine.low %v3182_v50, %v3190_v51  ;;  %v3214_v8 = vld [vmem:[#allocation17 + $0x1380] sm:$0xff] }
 0x51d   :  { %v21860_v21 = vpack.c.bf16 %v2576_v2, %v2576_v2  ;;  %v16077_v2 = vcombine.high %v3055_v62, %v3063_v12  ;;  %v16076_v14 = vcombine.low %v3055_v62, %v3063_v12  ;;  %v3143_v50 = vld [vmem:[#allocation17 + $0x1148] sm:$0xff] }
 0x51e   :  { %v21858_v61 = vpack.c.bf16 %v2577_v11, %v2577_v11  ;;  %9036 = vmatpush1.bf16.msra.mxu1 %v15964_v1  ;;  %v16219_v1 = vcombine.high %v3198_v59, %v3206_v60  ;;  %v3079_v11 = vld [vmem:[#allocation17 + $0xf48] sm:$0xff] }
 0x51f   :  { %9037 = vmatprep.subr.bf16.mxu1 %v15981_v9  ;;  %v3222_v9 = vld [vmem:[#allocation17 + $0x13c0] sm:$0xff]  ;;  %v16093_v17 = vcombine.high %v3071_v10, %v3079_v11  ;;  %v16092_v32 = vcombine.low %v3071_v10, %v3079_v11  ;;  %v3159_v59 = vld [vmem:[#allocation17 + $0x11c8] sm:$0xff]  ;;  %v21874_v10 = vsub.s32 4, %v21760_v3 }
 0x520   :  { %8891 = vmatprep.mubr.bf16.mxu0 %v21858_v61  ;;  %9055 = vmatprep.mubr.bf16.mxu1 %v21858_v61  ;;  %v16235_v16 = vcombine.high %v3214_v8, %v3222_v9  ;;  %v16234_v31 = vcombine.low %v3214_v8, %v3222_v9  ;;  %v3175_v8 = vld [vmem:[#allocation17 + $0x1248] sm:$0xff] }
 0x521   :  { %8892 = vmatmul.mubr.bf16.vlgmr.msra.gmra.mrb[12].mxu0 %v21860_v21 }
 0x522   :  { %8901 = vmatpush1.bf16.msra.mxu0 %v16122_v26  ;;  %8932 = vmatprep.mubr.bf16.mxu0 %v21862_v25  ;;  %v3166_v26 = vld [vmem:[#allocation17 + $0x1200] sm:$0xff] }
 0x523   :  { %9038 = vmatpush1.bf16.msra.mxu1 %v15980_v23  ;;  %8902 = vmatprep.subr.bf16.mxu0 %v16139_v24  ;;  %v16187_v47 = vcombine.high %v3166_v26, %v3174_v43  ;;  %v16186_v54 = vcombine.low %v3166_v26, %v3174_v43  ;;  %v3230_v23 = vld [vmem:[#allocation17 + $0x1400] sm:$0xff]  ;;  %v3127_v26 = vld [vmem:[#allocation17 + $0x10c8] sm:$0xff] }
 0x524   :  { %9039 = vmatprep.subr.bf16.mxu1 %v15997_v27  ;;  %v3238_v24 = vld [vmem:[#allocation17 + $0x1440] sm:$0xff]  ;;  %v3087_v27 = vld [vmem:[#allocation17 + $0xf88] sm:$0xff] }
 0x525   :  { %v16251_v33 = vcombine.high %v3230_v23, %v3238_v24  ;;  %v16250_v39 = vcombine.low %v3230_v23, %v3238_v24  ;;  %v16108_v5 = vcombine.low %v3087_v27, %v3095_v28  ;;  %v3183_v23 = vld [vmem:[#allocation17 + $0x1288] sm:$0xff] }
 0x526   :  { %8903 = vmatpush1.bf16.msra.mxu0 %v16138_v34  ;;  %v16109_v34 = vcombine.high %v3087_v27, %v3095_v28  ;;  %v3191_v24 = vld [vmem:[#allocation17 + $0x12c8] sm:$0xff]  ;;  %v945_v28 = vrot.slane %v21818_v37, %v21874_v10 }
 0x527   :  { %9040 = vmatpush1.bf16.msra.mxu1 %v15996_v29  ;;  %8904 = vmatprep.subr.bf16.mxu0 %v16155_v35  ;;  %v3246_v29 = vld [vmem:[#allocation17 + $0x1480] sm:$0xff] }
 0x528   :  { %9041 = vmatprep.subr.bf16.mxu1 %v16013_v36  ;;  %v3254_v35 = vld [vmem:[#allocation17 + $0x14c0] sm:$0xff]  ;;  %v3103_v36 = vld [vmem:[#allocation17 + $0x1008] sm:$0xff] }
 0x529   :  { %v16267_v40 = vcombine.high %v3246_v29, %v3254_v35  ;;  %v16266_v43 = vcombine.low %v3246_v29, %v3254_v35  ;;  %v16124_v45 = vcombine.low %v3103_v36, %v3111_v38  ;;  %v3350_v29 = vld [vmem:[#allocation17 + $0x17c0] sm:$0xff]  ;;  %v3199_v35 = vld [vmem:[#allocation17 + $0x1308] sm:$0xff] }
 0x52a   :  { %8905 = vmatpush1.bf16.msra.mxu0 %v16154_v41  ;;  %v16125_v41 = vcombine.high %v3103_v36, %v3111_v38  ;;  %v3207_v36 = vld [vmem:[#allocation17 + $0x1348] sm:$0xff] }
 0x52b   :  { %9042 = vmatpush1.bf16.msra.mxu1 %v16012_v42  ;;  %8906 = vmatprep.subr.bf16.mxu0 %v16171_v18  ;;  %v3262_v42 = vld [vmem:[#allocation17 + $0x1500] sm:$0xff]  ;;  %v16221_v37 = vcombine.high %v3199_v35, %v3207_v36 }
 0x52c   :  { %9043 = vmatprep.subr.bf16.mxu1 %v16029_v19  ;;  %v3270_v18 = vld [vmem:[#allocation17 + $0x1540] sm:$0xff]  ;;  %v3119_v19 = vld [vmem:[#allocation17 + $0x1088] sm:$0xff] }
 0x52d   :  { %v16283_v48 = vcombine.high %v3262_v42, %v3270_v18  ;;  %v16282_v51 = vcombine.low %v3262_v42, %v3270_v18  ;;  %v16140_v52 = vcombine.low %v3119_v19, %v3127_v26  ;;  %v3366_v42 = vld [vmem:[#allocation17 + $0x1840] sm:$0xff]  ;;  %v3215_v18 = vld [vmem:[#allocation17 + $0x1388] sm:$0xff] }
 0x52e   :  { %8907 = vmatpush1.bf16.msra.mxu0 %v16170_v30  ;;  %v16141_v30 = vcombine.high %v3119_v19, %v3127_v26  ;;  %v3223_v19 = vld [vmem:[#allocation17 + $0x13c8] sm:$0xff] }
 0x52f   :  { %9044 = vmatpush1.bf16.msra.mxu1 %v16028_v44  ;;  %8908 = vmatprep.subr.bf16.mxu0 %v16187_v47  ;;  %v3278_v44 = vld [vmem:[#allocation17 + $0x1580] sm:$0xff] }
 0x530   :  { %9045 = vmatprep.subr.bf16.mxu1 %v16045_v49  ;;  %v3286_v47 = vld [vmem:[#allocation17 + $0x15c0] sm:$0xff]  ;;  %v3135_v49 = vld [vmem:[#allocation17 + $0x1108] sm:$0xff] }
 0x531   :  { %v16299_v53 = vcombine.high %v3278_v44, %v3286_v47  ;;  %v16298_v60 = vcombine.low %v3278_v44, %v3286_v47  ;;  %v16156_v62 = vcombine.low %v3135_v49, %v3143_v50  ;;  %v3382_v44 = vld [vmem:[#allocation17 + $0x18c0] sm:$0xff]  ;;  %v3231_v47 = vld [vmem:[#allocation17 + $0x1408] sm:$0xff] }
 0x532   :  { %8909 = vmatpush1.bf16.msra.mxu0 %v16186_v54  ;;  %v16157_v54 = vcombine.high %v3135_v49, %v3143_v50  ;;  %v3239_v49 = vld [vmem:[#allocation17 + $0x1448] sm:$0xff] }
 0x533   :  { %9046 = vmatpush1.bf16.msra.mxu1 %v16044_v55  ;;  %8910 = vmatprep.subr.bf16.mxu0 %v16203_v57  ;;  %v3294_v55 = vld [vmem:[#allocation17 + $0x1600] sm:$0xff] }
 0x534   :  { %9047 = vmatprep.subr.bf16.mxu1 %v16061_v58  ;;  %v3302_v57 = vld [vmem:[#allocation17 + $0x1640] sm:$0xff]  ;;  %v3151_v58 = vld [vmem:[#allocation17 + $0x1188] sm:$0xff] }
 0x535   :  { %v16315_v12 = vcombine.high %v3294_v55, %v3302_v57  ;;  %v16314_v9 = vcombine.low %v3294_v55, %v3302_v57  ;;  %v16172_v11 = vcombine.low %v3151_v58, %v3159_v59  ;;  %v3390_v55 = vld [vmem:[#allocation17 + $0x1900] sm:$0xff] }
 0x536   :  { %8911 = vmatpush1.bf16.msra.mxu0 %v16202_v63  ;;  %v16173_v63 = vcombine.high %v3151_v58, %v3159_v59  ;;  %v3398_v57 = vld [vmem:[#allocation17 + $0x1940] sm:$0xff]  ;;  %v3247_v58 = vld [vmem:[#allocation17 + $0x1488] sm:$0xff] }
 0x537   :  { %9048 = vmatpush1.bf16.msra.mxu1 %v16060_v0  ;;  %8912 = vmatprep.subr.bf16.mxu0 %v16219_v1  ;;  %v3310_v0 = vld [vmem:[#allocation17 + $0x1680] sm:$0xff]  ;;  %v3255_v59 = vld [vmem:[#allocation17 + $0x14c8] sm:$0xff] }
 0x538   :  { %9049 = vmatprep.subr.bf16.mxu1 %v16077_v2  ;;  %v3318_v1 = vld [vmem:[#allocation17 + $0x16c0] sm:$0xff]  ;;  %v3167_v2 = vld [vmem:[#allocation17 + $0x1208] sm:$0xff] }
 0x539   :  { %v16330_v27 = vcombine.low %v3310_v0, %v3318_v1 }
 0x53a   :  { %8913 = vmatpush1.bf16.msra.mxu0 %v16218_v13  ;;  %v16331_v13 = vcombine.high %v3310_v0, %v3318_v1  ;;  %v3406_v0 = vld [vmem:[#allocation17 + $0x1980] sm:$0xff] }
 0x53b   :  { %9050 = vmatpush1.bf16.msra.mxu1 %v16076_v14  ;;  %8914 = vmatprep.subr.bf16.mxu0 %v16235_v16  ;;  %v16189_v14 = vcombine.high %v3167_v2, %v3175_v8  ;;  %v3326_v16 = vld [vmem:[#allocation17 + $0x1700] sm:$0xff] }
 0x53c   :  { %9051 = vmatprep.subr.bf16.mxu1 %v16093_v17  ;;  %v3334_v17 = vld [vmem:[#allocation17 + $0x1740] sm:$0xff] }
 0x53d   :  { %v16346_v38 = vcombine.low %v3326_v16, %v3334_v17  ;;  %v3414_v1 = vld [vmem:[#allocation17 + $0x19c0] sm:$0xff] }
 0x53e   :  { %8915 = vmatpush1.bf16.msra.mxu0 %v16234_v31  ;;  %v16188_v31 = vcombine.low %v3167_v2, %v3175_v8  ;;  %v3263_v2 = vld [vmem:[#allocation17 + $0x1508] sm:$0xff] }
 0x53f   :  { %9052 = vmatpush1.bf16.msra.mxu1 %v16092_v32  ;;  %8916 = vmatprep.subr.bf16.mxu0 %v16251_v33  ;;  %v16347_v32 = vcombine.high %v3326_v16, %v3334_v17  ;;  %v16205_v33 = vcombine.high %v3183_v23, %v3191_v24  ;;  %v3271_v8 = vld [vmem:[#allocation17 + $0x1548] sm:$0xff]  ;;  %v3422_v16 = vld [vmem:[#allocation17 + $0x1a00] sm:$0xff] }
 0x540   :  { %9053 = vmatprep.subr.bf16.mxu1 %v16109_v34  ;;  %v3342_v34 = vld [vmem:[#allocation17 + $0x1780] sm:$0xff] }
 0x541   :  { %v16362_v26 = vcombine.low %v3342_v34, %v3350_v29  ;;  %v3430_v17 = vld [vmem:[#allocation17 + $0x1a40] sm:$0xff] }
 0x542   :  { %8917 = vmatpush1.bf16.msra.mxu0 %v16250_v39  ;;  %v18738_v39 = vadd.f32 %v21824_v56, %v945_v28  ;;  %v3374_v56 = vld [vmem:[#allocation17 + $0x1880] sm:$0xff]  ;;  %v16284_v28 = vcombine.low %v3263_v2, %v3271_v8 }
 0x543   :  { %9054 = vmatpush1.bf16.msra.mxu1 %v16108_v5  ;;  %8918 = vmatprep.subr.bf16.mxu0 %v16267_v40  ;;  %v16204_v5 = vcombine.low %v3183_v23, %v3191_v24  ;;  %v16363_v40 = vcombine.high %v3342_v34, %v3350_v29  ;;  %v3279_v23 = vld [vmem:[#allocation17 + $0x1588] sm:$0xff]  ;;  %v3446_v34 = vld [vmem:[#allocation17 + $0x1ac0] sm:$0xff] }
 0x544   :  { %9064 = vmatprep.subr.bf16.mxu1 %v16125_v41  ;;  %v3358_v41 = vld [vmem:[#allocation17 + $0x1800] sm:$0xff]  ;;  %v3287_v24 = vld [vmem:[#allocation17 + $0x15c8] sm:$0xff] }
 0x545   :  { %v16378_v50 = vcombine.low %v3358_v41, %v3366_v42  ;;  %v3295_v29 = vld [vmem:[#allocation17 + $0x1608] sm:$0xff] }
 0x546   :  { %8919 = vmatpush1.bf16.msra.mxu0 %v16266_v43  ;;  %9056 = vmatmul.mubr.bf16.vlgmr.msra.gmra.mrb[20].mxu1 %v21860_v21  ;;  %v2578_v43 = vmax.f32 %v18738_v39, 0.0 }
 0x547   :  { %9065 = vmatpush1.bf16.msra.mxu1 %v16124_v45  ;;  %9096 = vmatprep.mubr.bf16.mxu1 %v21862_v25  ;;  %v16220_v45 = vcombine.low %v3199_v35, %v3207_v36  ;;  %v3303_v35 = vld [vmem:[#allocation17 + $0x1648] sm:$0xff]  ;;  %v16442_v36 = vcombine.low %v3422_v16, %v3430_v17 }
 0x548   :  { %8920 = vmatprep.subr.bf16.mxu0 %v16283_v48  ;;  %9066 = vmatprep.subr.bf16.mxu1 %v16141_v30  ;;  %v16379_v48 = vcombine.high %v3358_v41, %v3366_v42  ;;  %v16237_v30 = vcombine.high %v3215_v18, %v3223_v19  ;;  %v3311_v41 = vld [vmem:[#allocation17 + $0x1688] sm:$0xff] }
 0x549   :  { %v3319_v42 = vld [vmem:[#allocation17 + $0x16c8] sm:$0xff] }
 0x54a   :  { %8921 = vmatpush1.bf16.msra.mxu0 %v16282_v51  ;;  %v21879_v51 = vpack.c.bf16 %v2578_v43, %v2578_v43  ;;  %v16333_v43 = vcombine.high %v3311_v41, %v3319_v42 }
 0x54b   :  { %9067 = vmatpush1.bf16.msra.mxu1 %v16140_v52  ;;  %8922 = vmatprep.subr.bf16.mxu0 %v16299_v53  ;;  %v16236_v52 = vcombine.low %v3215_v18, %v3223_v19  ;;  %v16395_v53 = vcombine.high %v3374_v56, %v3382_v44  ;;  %v16316_v19 = vcombine.low %v3295_v29, %v3303_v35 }
 0x54c   :  { %9068 = vmatprep.subr.bf16.mxu1 %v16157_v54  ;;  %v16253_v54 = vcombine.high %v3231_v47, %v3239_v49 }
 0x54e   :  { %8923 = vmatpush1.bf16.msra.mxu0 %v16298_v60  ;;  %v16394_v60 = vcombine.low %v3374_v56, %v3382_v44  ;;  %v3335_v56 = vld [vmem:[#allocation17 + $0x1748] sm:$0xff] }
 0x54f   :  { %9069 = vmatpush1.bf16.msra.mxu1 %v16156_v62  ;;  %8924 = vmatprep.subr.bf16.mxu0 %v16315_v12  ;;  %v16252_v62 = vcombine.low %v3231_v47, %v3239_v49  ;;  %v16411_v12 = vcombine.high %v3390_v55, %v3398_v57  ;;  %v16332_v47 = vcombine.low %v3311_v41, %v3319_v42 }
 0x550   :  { %9070 = vmatprep.subr.bf16.mxu1 %v16173_v63  ;;  %v16269_v63 = vcombine.high %v3247_v58, %v3255_v59 }
 0x552   :  { %8925 = vmatpush1.bf16.msra.mxu0 %v16314_v9  ;;  %v16410_v9 = vcombine.low %v3390_v55, %v3398_v57  ;;  %v3351_v55 = vld [vmem:[#allocation17 + $0x17c8] sm:$0xff] }
 0x553   :  { %9071 = vmatpush1.bf16.msra.mxu1 %v16172_v11  ;;  %8926 = vmatprep.subr.bf16.mxu0 %v16331_v13  ;;  %v16268_v11 = vcombine.low %v3247_v58, %v3255_v59  ;;  %v16427_v13 = vcombine.high %v3406_v0, %v3414_v1 }
 0x554   :  { %9072 = vmatprep.subr.bf16.mxu1 %v16189_v14  ;;  %v16285_v14 = vcombine.high %v3263_v2, %v3271_v8 }
 0x556   :  { %8927 = vmatpush1.bf16.msra.mxu0 %v16330_v27  ;;  %v16426_v27 = vcombine.low %v3406_v0, %v3414_v1  ;;  %v3367_v0 = vld [vmem:[#allocation17 + $0x1848] sm:$0xff] }
 0x557   :  { %9073 = vmatpush1.bf16.msra.mxu1 %v16188_v31  ;;  %8928 = vmatprep.subr.bf16.mxu0 %v16347_v32  ;;  %v16443_v31 = vcombine.high %v3422_v16, %v3430_v17  ;;  %v16301_v32 = vcombine.high %v3279_v23, %v3287_v24  ;;  %v3383_v16 = vld [vmem:[#allocation17 + $0x18c8] sm:$0xff] }
 0x558   :  { %9074 = vmatprep.subr.bf16.mxu1 %v16205_v33  ;;  %v3438_v33 = vld [vmem:[#allocation17 + $0x1a80] sm:$0xff] }
 0x559   :  { %v16459_v39 = vcombine.high %v3438_v33, %v3446_v34  ;;  %v16458_v18 = vcombine.low %v3438_v33, %v3446_v34  ;;  %v3399_v33 = vld [vmem:[#allocation17 + $0x1948] sm:$0xff] }
 0x55a   :  { %8929 = vmatpush1.bf16.msra.mxu0 %v16346_v38  ;;  %v16300_v38 = vcombine.low %v3279_v23, %v3287_v24 }
 0x55b   :  { %9075 = vmatpush1.bf16.msra.mxu1 %v16204_v5  ;;  %8930 = vmatprep.subr.bf16.mxu0 %v16363_v40  ;;  %v16317_v5 = vcombine.high %v3295_v29, %v3303_v35  ;;  %v3454_v40 = vld [vmem:[#allocation17 + $0x1b00] sm:$0xff] }
 0x55c   :  { %9076 = vmatprep.subr.bf16.mxu1 %v16221_v37  ;;  %v3462_v37 = vld [vmem:[#allocation17 + $0x1b40] sm:$0xff] }
 0x55d   :  { %v16474_v44 = vcombine.low %v3454_v40, %v3462_v37 }
 0x55e   :  { %8931 = vmatpush1.bf16.msra.mxu0 %v16362_v26  ;;  %v16475_v26 = vcombine.high %v3454_v40, %v3462_v37  ;;  %v3415_v40 = vld [vmem:[#allocation17 + $0x19c8] sm:$0xff] }
 0x55f   :  { %9077 = vmatpush1.bf16.msra.mxu1 %v16220_v45  ;;  %8941 = vmatprep.subr.bf16.mxu0 %v16379_v48  ;;  %v3470_v45 = vld [vmem:[#allocation17 + $0x1b80] sm:$0xff] }
 0x560   :  { %9078 = vmatprep.subr.bf16.mxu1 %v16237_v30  ;;  %v3478_v48 = vld [vmem:[#allocation17 + $0x1bc0] sm:$0xff]  ;;  %v3327_v30 = vld [vmem:[#allocation17 + $0x1708] sm:$0xff] }
 0x561   :  { %8933 = vmatmul.mubr.bf16.vlgmr.msra.gmra.mrb[12].mxu0 %v21879_v51  ;;  %v16491_v49 = vcombine.high %v3470_v45, %v3478_v48  ;;  %v16490_v57 = vcombine.low %v3470_v45, %v3478_v48  ;;  %v16348_v58 = vcombine.low %v3327_v30, %v3335_v56  ;;  %v3431_v45 = vld [vmem:[#allocation17 + $0x1a48] sm:$0xff] }
 0x562   :  { %8942 = vmatpush1.bf16.msra.mxu0 %v16378_v50  ;;  %v16349_v50 = vcombine.high %v3327_v30, %v3335_v56 }
 0x563   :  { %9079 = vmatpush1.bf16.msra.mxu1 %v16236_v52  ;;  %8943 = vmatprep.subr.bf16.mxu0 %v16395_v53  ;;  %v3486_v52 = vld [vmem:[#allocation17 + $0x1c00] sm:$0xff] }
 0x564   :  { %9080 = vmatprep.subr.bf16.mxu1 %v16253_v54  ;;  %v3494_v53 = vld [vmem:[#allocation17 + $0x1c40] sm:$0xff]  ;;  %v3343_v54 = vld [vmem:[#allocation17 + $0x1788] sm:$0xff] }
 0x565   :  { %v16507_v59 = vcombine.high %v3486_v52, %v3494_v53  ;;  %v16506_v1 = vcombine.low %v3486_v52, %v3494_v53  ;;  %v16364_v2 = vcombine.low %v3343_v54, %v3351_v55  ;;  %v3439_v52 = vld [vmem:[#allocation17 + $0x1a88] sm:$0xff] }
 0x566   :  { %8944 = vmatpush1.bf16.msra.mxu0 %v16394_v60  ;;  %v16365_v60 = vcombine.high %v3343_v54, %v3351_v55  ;;  %v3447_v53 = vld [vmem:[#allocation17 + $0x1ac8] sm:$0xff]  ;;  %v21887_v55 = vsub.s32 7, %v21760_v3 }
 0x567   :  { %9081 = vmatpush1.bf16.msra.mxu1 %v16252_v62  ;;  %8945 = vmatprep.subr.bf16.mxu0 %v16411_v12  ;;  %v3502_v62 = vld [vmem:[#allocation17 + $0x1c80] sm:$0xff] }
 0x568   :  { %9082 = vmatprep.subr.bf16.mxu1 %v16269_v63  ;;  %v3510_v12 = vld [vmem:[#allocation17 + $0x1cc0] sm:$0xff]  ;;  %v3359_v63 = vld [vmem:[#allocation17 + $0x1808] sm:$0xff] }
 0x569   :  { %v16523_v8 = vcombine.high %v3502_v62, %v3510_v12  ;;  %v16522_v17 = vcombine.low %v3502_v62, %v3510_v12  ;;  %v16380_v23 = vcombine.low %v3359_v63, %v3367_v0  ;;  %v3606_v62 = vld [vmem:[#allocation17 + $0x1fc0] sm:$0xff]  ;;  %v21175_v12 = vld [vmem:[#allocation16] sm:$0xff] }
 0x56a   :  { %8946 = vmatpush1.bf16.msra.mxu0 %v16410_v9  ;;  %v16381_v9 = vcombine.high %v3359_v63, %v3367_v0  ;;  %v3455_v0 = vld [vmem:[#allocation17 + $0x1b08] sm:$0xff] }
 0x56b   :  { %9083 = vmatpush1.bf16.msra.mxu1 %v16268_v11  ;;  %8947 = vmatprep.subr.bf16.mxu0 %v16427_v13  ;;  %v3518_v11 = vld [vmem:[#allocation17 + $0x1d00] sm:$0xff] }
 0x56c   :  { %9084 = vmatprep.subr.bf16.mxu1 %v16285_v14  ;;  %v3526_v13 = vld [vmem:[#allocation17 + $0x1d40] sm:$0xff]  ;;  %v3375_v14 = vld [vmem:[#allocation17 + $0x1888] sm:$0xff] }
 0x56d   :  { %v16539_v24 = vcombine.high %v3518_v11, %v3526_v13  ;;  %v16538_v34 = vcombine.low %v3518_v11, %v3526_v13  ;;  %v16396_v29 = vcombine.low %v3375_v14, %v3383_v16 }
 0x56e   :  { %8948 = vmatpush1.bf16.msra.mxu0 %v16426_v27  ;;  %v16397_v27 = vcombine.high %v3375_v14, %v3383_v16  ;;  %v2592_v16 = vld [vmem:[#allocation17 + $0x10] sm:$0xff] }
 0x56f   :  { %9085 = vmatpush1.bf16.msra.mxu1 %v16284_v28  ;;  %8949 = vmatprep.subr.bf16.mxu0 %v16443_v31  ;;  %v3534_v28 = vld [vmem:[#allocation17 + $0x1d80] sm:$0xff] }
 0x570   :  { %9086 = vmatprep.subr.bf16.mxu1 %v16301_v32  ;;  %v3542_v31 = vld [vmem:[#allocation17 + $0x1dc0] sm:$0xff]  ;;  %v3391_v32 = vld [vmem:[#allocation17 + $0x1908] sm:$0xff] }
 0x571   :  { %v16555_v35 = vcombine.high %v3534_v28, %v3542_v31  ;;  %v16554_v37 = vcombine.low %v3534_v28, %v3542_v31  ;;  %v16412_v41 = vcombine.low %v3391_v32, %v3399_v33 }
 0x572   :  { %8950 = vmatpush1.bf16.msra.mxu0 %v16442_v36  ;;  %v16413_v36 = vcombine.high %v3391_v32, %v3399_v33  ;;  %v3471_v32 = vld [vmem:[#allocation17 + $0x1b88] sm:$0xff] }
 0x573   :  { %9087 = vmatpush1.bf16.msra.mxu1 %v16300_v38  ;;  %8951 = vmatprep.subr.bf16.mxu0 %v16459_v39  ;;  %v3550_v38 = vld [vmem:[#allocation17 + $0x1e00] sm:$0xff]  ;;  %v3479_v33 = vld [vmem:[#allocation17 + $0x1bc8] sm:$0xff] }
 0x574   :  { %9088 = vmatprep.subr.bf16.mxu1 %v16317_v5  ;;  %v3558_v39 = vld [vmem:[#allocation17 + $0x1e40] sm:$0xff]  ;;  %v3407_v5 = vld [vmem:[#allocation17 + $0x1988] sm:$0xff] }
 0x575   :  { %v16571_v42 = vcombine.high %v3550_v38, %v3558_v39  ;;  %v16570_v48 = vcombine.low %v3550_v38, %v3558_v39  ;;  %v16428_v30 = vcombine.low %v3407_v5, %v3415_v40  ;;  %v2608_v39 = vld [vmem:[#allocation17 + $0x90] sm:$0xff] }
 0x576   :  { %8952 = vmatpush1.bf16.msra.mxu0 %v16458_v18  ;;  %v16429_v18 = vcombine.high %v3407_v5, %v3415_v40  ;;  %v2616_v5 = vld [vmem:[#allocation17 + $0xd0] sm:$0xff]  ;;  %v16493_v40 = vcombine.high %v3471_v32, %v3479_v33 }
 0x577   :  { %9089 = vmatpush1.bf16.msra.mxu1 %v16316_v19  ;;  %8953 = vmatprep.subr.bf16.mxu0 %v16475_v26  ;;  %v3566_v19 = vld [vmem:[#allocation17 + $0x1e80] sm:$0xff] }
 0x578   :  { %9090 = vmatprep.subr.bf16.mxu1 %v16333_v43  ;;  %v3574_v26 = vld [vmem:[#allocation17 + $0x1ec0] sm:$0xff]  ;;  %v3423_v43 = vld [vmem:[#allocation17 + $0x1a08] sm:$0xff] }
 0x579   :  { %v16587_v56 = vcombine.high %v3566_v19, %v3574_v26  ;;  %v16586_v54 = vcombine.low %v3566_v19, %v3574_v26  ;;  %v16492_v26 = vcombine.low %v3471_v32, %v3479_v33  ;;  %v2688_v33 = vld [vmem:[#allocation17 + $0x310] sm:$0xff] }
 0x57a   :  { %8954 = vmatpush1.bf16.msra.mxu0 %v16474_v44  ;;  %v16445_v44 = vcombine.high %v3423_v43, %v3431_v45 }
 0x57b   :  { %9091 = vmatpush1.bf16.msra.mxu1 %v16332_v47  ;;  %8955 = vmatprep.subr.bf16.mxu0 %v16491_v49  ;;  %v3582_v47 = vld [vmem:[#allocation17 + $0x1f00] sm:$0xff] }
 0x57c   :  { %9092 = vmatprep.subr.bf16.mxu1 %v16349_v50  ;;  %v3590_v49 = vld [vmem:[#allocation17 + $0x1f40] sm:$0xff]  ;;  %v21884_v50 = vsub.s32 6, %v21760_v3 }
 0x57e   :  { %8956 = vmatpush1.bf16.msra.mxu0 %v16490_v57  ;;  %v16444_v57 = vcombine.low %v3423_v43, %v3431_v45  ;;  %v953_v63 = vrot.slane %v21175_v12, %v21884_v50  ;;  %v15631_v43 = vcombine.high %v2608_v39, %v2616_v5 }
 0x57f   :  { %9093 = vmatpush1.bf16.msra.mxu1 %v16348_v58  ;;  %8957 = vmatprep.subr.bf16.mxu0 %v16507_v59  ;;  %v16603_v58 = vcombine.high %v3582_v47, %v3590_v49  ;;  %v16461_v59 = vcombine.high %v3439_v52, %v3447_v53 }
 0x580   :  { %9094 = vmatprep.subr.bf16.mxu1 %v16365_v60  ;;  %v3598_v60 = vld [vmem:[#allocation17 + $0x1f80] sm:$0xff] }
 0x581   :  { %v16619_v11 = vcombine.high %v3598_v60, %v3606_v62  ;;  %v16618_v31 = vcombine.low %v3598_v60, %v3606_v62 }
 0x582   :  { %8958 = vmatpush1.bf16.msra.mxu0 %v16506_v1  ;;  %v3463_v1 = vld [vmem:[#allocation17 + $0x1b48] sm:$0xff] }
 0x583   :  { %9095 = vmatpush1.bf16.msra.mxu1 %v16364_v2  ;;  %8959 = vmatprep.subr.bf16.mxu0 %v16523_v8  ;;  %v16602_v2 = vcombine.low %v3582_v47, %v3590_v49  ;;  %v957_v8 = vrot.slane %v21175_v12, %v21887_v55  ;;  %v16477_v14 = vcombine.high %v3455_v0, %v3463_v1 }
 0x584   :  { %9105 = vmatprep.subr.bf16.mxu1 %v16381_v9  ;;  %v16460_v9 = vcombine.low %v3439_v52, %v3447_v53  ;;  %v15630_v47 = vcombine.low %v2608_v39, %v2616_v5 }
 0x586   :  { %8960 = vmatpush1.bf16.msra.mxu0 %v16522_v17  ;;  %9097 = vmatmul.mubr.bf16.vlgmr.msra.gmra.mrb[20].mxu1 %v21879_v51  ;;  %v2600_v17 = vld [vmem:[#allocation17 + $0x50] sm:$0xff] }
 0x587   :  { %9106 = vmatpush1.bf16.msra.mxu1 %v16380_v23  ;;  %8961 = vmatprep.subr.bf16.mxu0 %v16539_v24 }
 0x588   :  { %9107 = vmatprep.subr.bf16.mxu1 %v16397_v27 }
 0x58a   :  { %8962 = vmatpush1.bf16.msra.mxu0 %v16538_v34 }
 0x58b   :  { %9108 = vmatpush1.bf16.msra.mxu1 %v16396_v29  ;;  %8963 = vmatprep.subr.bf16.mxu0 %v16555_v35  ;;  %v16476_v35 = vcombine.low %v3455_v0, %v3463_v1  ;;  %v2656_v0 = vld [vmem:[#allocation17 + $0x210] sm:$0xff] }
 0x58c   :  { %9109 = vmatprep.subr.bf16.mxu1 %v16413_v36  ;;  %v15615_v36 = vcombine.high %v2592_v16, %v2600_v17  ;;  %v2664_v1 = vld [vmem:[#allocation17 + $0x250] sm:$0xff] }
 0x58e   :  { %8964 = vmatpush1.bf16.msra.mxu0 %v16554_v37  ;;  %v3487_v37 = vld [vmem:[#allocation17 + $0x1c08] sm:$0xff] }
 0x58f   :  { %9110 = vmatpush1.bf16.msra.mxu1 %v16412_v41  ;;  %8965 = vmatprep.subr.bf16.mxu0 %v16571_v42  ;;  %v3495_v41 = vld [vmem:[#allocation17 + $0x1c48] sm:$0xff] }
 0x590   :  { %9111 = vmatprep.subr.bf16.mxu1 %v16429_v18  ;;  %v15614_v18 = vcombine.low %v2592_v16, %v2600_v17  ;;  %v16509_v45 = vcombine.high %v3487_v37, %v3495_v41  ;;  %v16508_v49 = vcombine.low %v3487_v37, %v3495_v41  ;;  %v2672_v16 = vld [vmem:[#allocation17 + $0x290] sm:$0xff]  ;;  %v3583_v41 = vld [vmem:[#allocation17 + $0x1f08] sm:$0xff] }
 0x591   :  { %v2680_v17 = vld [vmem:[#allocation17 + $0x2d0] sm:$0xff] }
 0x592   :  { %8966 = vmatpush1.bf16.msra.mxu0 %v16570_v48  ;;  %v2624_v48 = vld [vmem:[#allocation17 + $0x110] sm:$0xff] }
 0x593   :  { %9112 = vmatpush1.bf16.msra.mxu1 %v16428_v30  ;;  %8967 = vmatprep.subr.bf16.mxu0 %v16587_v56  ;;  %v2632_v30 = vld [vmem:[#allocation17 + $0x150] sm:$0xff]  ;;  %v3503_v56 = vld [vmem:[#allocation17 + $0x1c88] sm:$0xff] }
 0x594   :  { %9113 = vmatprep.subr.bf16.mxu1 %v16445_v44  ;;  %v3511_v44 = vld [vmem:[#allocation17 + $0x1cc8] sm:$0xff]  ;;  %v15647_v52 = vcombine.high %v2624_v48, %v2632_v30  ;;  %v15646_v60 = vcombine.low %v2624_v48, %v2632_v30  ;;  %v2712_v37 = vld [vmem:[#allocation17 + $0x3d0] sm:$0xff] }
 0x595   :  { %v16525_v53 = vcombine.high %v3503_v56, %v3511_v44  ;;  %v16524_v62 = vcombine.low %v3503_v56, %v3511_v44  ;;  %v2720_v30 = vld [vmem:[#allocation17 + $0x410] sm:$0xff]  ;;  %v3599_v44 = vld [vmem:[#allocation17 + $0x1f88] sm:$0xff] }
 0x596   :  { %8968 = vmatpush1.bf16.msra.mxu0 %v16586_v54  ;;  %v2640_v54 = vld [vmem:[#allocation17 + $0x190] sm:$0xff] }
 0x597   :  { %9114 = vmatpush1.bf16.msra.mxu1 %v16444_v57  ;;  %8969 = vmatprep.subr.bf16.mxu0 %v16603_v58  ;;  %v2648_v57 = vld [vmem:[#allocation17 + $0x1d0] sm:$0xff]  ;;  %v3519_v58 = vld [vmem:[#allocation17 + $0x1d08] sm:$0xff] }
 0x598   :  { %v2567_v13 = vpop.f32.mrb[16].mxu1  ;;  %9115 = vmatprep.subr.bf16.mxu1 %v16461_v59  ;;  %v3527_v59 = vld [vmem:[#allocation17 + $0x1d48] sm:$0xff]  ;;  %v15663_v12 = vcombine.high %v2640_v54, %v2648_v57  ;;  %v2728_v56 = vld [vmem:[#allocation17 + $0x450] sm:$0xff] }
 0x599   :  { %v18740_v23 = vadd.f32 %v2567_v13, %v953_v63  ;;  %v2569_v24 = vpop.f32.mrb[17].mxu1  ;;  %v16541_v63 = vcombine.high %v3519_v58, %v3527_v59  ;;  %v15679_v13 = vcombine.high %v2656_v0, %v2664_v1 }
 0x59a   :  { %v18741_v27 = vadd.f32 %v2569_v24, %v957_v8  ;;  %8970 = vmatpush1.bf16.msra.mxu0 %v16602_v2  ;;  %v2571_v28 = vpop.f32.mrb[18].mxu1  ;;  %v3535_v2 = vld [vmem:[#allocation17 + $0x1d88] sm:$0xff] }
 0x59b   :  { %v2580_v34 = vmax.f32 %v18740_v23, 0.0  ;;  %9116 = vmatpush1.bf16.msra.mxu1 %v16460_v9  ;;  %v2572_v29 = vpop.f32.mrb[19].mxu1  ;;  %8971 = vmatprep.subr.bf16.mxu0 %v16619_v11  ;;  %v3543_v8 = vld [vmem:[#allocation17 + $0x1dc8] sm:$0xff]  ;;  %v15662_v9 = vcombine.low %v2640_v54, %v2648_v57  ;;  %v16540_v11 = vcombine.low %v3519_v58, %v3527_v59  ;;  %v2736_v57 = vld [vmem:[#allocation17 + $0x490] sm:$0xff]  ;;  %v2593_v59 = vld [vmem:[#allocation17 + $0x18] sm:$0xff] }
 0x59c   :  { %v2581_v38 = vmax.f32 %v18741_v27, 0.0  ;;  %9117 = vmatprep.subr.bf16.mxu1 %v16477_v14  ;;  %v16557_v14 = vcombine.high %v3535_v2, %v3543_v8  ;;  %v3551_v23 = vld [vmem:[#allocation17 + $0x1e08] sm:$0xff]  ;;  %v15678_v27 = vcombine.low %v2656_v0, %v2664_v1  ;;  %v16556_v28 = vcombine.low %v3535_v2, %v3543_v8  ;;  %v2744_v58 = vld [vmem:[#allocation17 + $0x4d0] sm:$0xff]  ;;  %v2609_v8 = vld [vmem:[#allocation17 + $0x98] sm:$0xff] }
 0x59d   :  { %v21893_v19 = vpack.c.bf16 %v2580_v34, %v2580_v34  ;;  %v3559_v24 = vld [vmem:[#allocation17 + $0x1e48] sm:$0xff]  ;;  %v2696_v34 = vld [vmem:[#allocation17 + $0x350] sm:$0xff] }
 0x59e   :  { %v21891_v42 = vpack.c.bf16 %v2581_v38, %v2581_v38  ;;  %8972 = vmatpush1.bf16.msra.mxu0 %v16618_v31  ;;  %v15695_v31 = vcombine.high %v2672_v16, %v2680_v17  ;;  %v16573_v32 = vcombine.high %v3551_v23, %v3559_v24  ;;  %v3567_v29 = vld [vmem:[#allocation17 + $0x1e88] sm:$0xff]  ;;  %v16572_v38 = vcombine.low %v3551_v23, %v3559_v24  ;;  %v2752_v1 = vld [vmem:[#allocation17 + $0x510] sm:$0xff]  ;;  %v2625_v24 = vld [vmem:[#allocation17 + $0x118] sm:$0xff] }
 0x59f   :  { %9118 = vmatpush1.bf16.msra.mxu1 %v16476_v35  ;;  %9146 = vmatprep.subr.bf16.mxu0 %v15615_v36  ;;  %v3575_v35 = vld [vmem:[#allocation17 + $0x1ec8] sm:$0xff]  ;;  %v15694_v36 = vcombine.low %v2672_v16, %v2680_v17  ;;  %v15711_v39 = vcombine.high %v2688_v33, %v2696_v34  ;;  %v2760_v2 = vld [vmem:[#allocation17 + $0x550] sm:$0xff] }
 0x5a0   :  { %8973 = vmatprep.mubr.bf16.mxu0 %v21891_v42  ;;  %9137 = vmatprep.mubr.bf16.mxu1 %v21891_v42  ;;  %v16589_v5 = vcombine.high %v3567_v29, %v3575_v35  ;;  %v2768_v17 = vld [vmem:[#allocation17 + $0x590] sm:$0xff] }
 0x5a1   :  { %8974 = vmatmul.mubr.bf16.vlgmr.msra.gmra.mrb[12].mxu0 %v21893_v19  ;;  %9119 = vmatprep.subr.bf16.mxu1 %v16493_v40  ;;  %v2704_v40 = vld [vmem:[#allocation17 + $0x390] sm:$0xff] }
 0x5a2   :  { %9147 = vmatpush1.bf16.msra.mxu0 %v15614_v18  ;;  %9178 = vmatprep.mubr.bf16.mxu0 %v21832_v20  ;;  %v3591_v18 = vld [vmem:[#allocation17 + $0x1f48] sm:$0xff]  ;;  %v2776_v23 = vld [vmem:[#allocation17 + $0x5d0] sm:$0xff] }
 0x5a3   :  { %9120 = vmatpush1.bf16.msra.mxu1 %v16492_v26  ;;  %9148 = vmatprep.subr.bf16.mxu0 %v15631_v43  ;;  %v15710_v26 = vcombine.low %v2688_v33, %v2696_v34  ;;  %v16588_v43 = vcombine.low %v3567_v29, %v3575_v35  ;;  %v16605_v48 = vcombine.high %v3583_v41, %v3591_v18  ;;  %v2784_v34 = vld [vmem:[#allocation17 + $0x610] sm:$0xff]  ;;  %v2641_v35 = vld [vmem:[#allocation17 + $0x198] sm:$0xff] }
 0x5a4   :  { %9121 = vmatprep.subr.bf16.mxu1 %v16509_v45  ;;  %v15727_v45 = vcombine.high %v2704_v40, %v2712_v37  ;;  %v2792_v29 = vld [vmem:[#allocation17 + $0x650] sm:$0xff] }
 0x5a6   :  { %9149 = vmatpush1.bf16.msra.mxu0 %v15630_v47  ;;  %v3607_v47 = vld [vmem:[#allocation17 + $0x1fc8] sm:$0xff] }
 0x5a7   :  { %9122 = vmatpush1.bf16.msra.mxu1 %v16508_v49  ;;  %9150 = vmatprep.subr.bf16.mxu0 %v15647_v52  ;;  %v15726_v49 = vcombine.low %v2704_v40, %v2712_v37  ;;  %v16604_v52 = vcombine.low %v3583_v41, %v3591_v18  ;;  %v16621_v54 = vcombine.high %v3599_v44, %v3607_v47  ;;  %v2800_v37 = vld [vmem:[#allocation17 + $0x690] sm:$0xff]  ;;  %v2657_v18 = vld [vmem:[#allocation17 + $0x218] sm:$0xff] }
 0x5a8   :  { %9123 = vmatprep.subr.bf16.mxu1 %v16525_v53  ;;  %v15743_v53 = vcombine.high %v2720_v30, %v2728_v56  ;;  %v2808_v41 = vld [vmem:[#allocation17 + $0x6d0] sm:$0xff] }
 0x5aa   :  { %9151 = vmatpush1.bf16.msra.mxu0 %v15646_v60  ;;  %v2601_v60 = vld [vmem:[#allocation17 + $0x58] sm:$0xff] }
 0x5ab   :  { %9124 = vmatpush1.bf16.msra.mxu1 %v16524_v62  ;;  %9152 = vmatprep.subr.bf16.mxu0 %v15663_v12  ;;  %v15742_v62 = vcombine.low %v2720_v30, %v2728_v56  ;;  %v16620_v12 = vcombine.low %v3599_v44, %v3607_v47  ;;  %v15617_v0 = vcombine.high %v2593_v59, %v2601_v60  ;;  %v2816_v56 = vld [vmem:[#allocation17 + $0x710] sm:$0xff]  ;;  %v2673_v47 = vld [vmem:[#allocation17 + $0x298] sm:$0xff] }
 0x5ac   :  { %9125 = vmatprep.subr.bf16.mxu1 %v16541_v63  ;;  %v15759_v63 = vcombine.high %v2736_v57, %v2744_v58  ;;  %v2824_v44 = vld [vmem:[#allocation17 + $0x750] sm:$0xff] }
 0x5ae   :  { %9153 = vmatpush1.bf16.msra.mxu0 %v15662_v9  ;;  %v2617_v9 = vld [vmem:[#allocation17 + $0xd8] sm:$0xff] }
 0x5af   :  { %9126 = vmatpush1.bf16.msra.mxu1 %v16540_v11  ;;  %9154 = vmatprep.subr.bf16.mxu0 %v15679_v13  ;;  %v15758_v11 = vcombine.low %v2736_v57, %v2744_v58  ;;  %v15616_v13 = vcombine.low %v2593_v59, %v2601_v60  ;;  %v15633_v16 = vcombine.high %v2609_v8, %v2617_v9  ;;  %v2832_v58 = vld [vmem:[#allocation17 + $0x790] sm:$0xff]  ;;  %v2689_v60 = vld [vmem:[#allocation17 + $0x318] sm:$0xff] }
 0x5b0   :  { %9127 = vmatprep.subr.bf16.mxu1 %v16557_v14  ;;  %v15775_v14 = vcombine.high %v2752_v1, %v2760_v2  ;;  %v2840_v59 = vld [vmem:[#allocation17 + $0x7d0] sm:$0xff] }
 0x5b2   :  { %9155 = vmatpush1.bf16.msra.mxu0 %v15678_v27  ;;  %v2633_v27 = vld [vmem:[#allocation17 + $0x158] sm:$0xff] }
 0x5b3   :  { %9128 = vmatpush1.bf16.msra.mxu1 %v16556_v28  ;;  %9156 = vmatprep.subr.bf16.mxu0 %v15695_v31  ;;  %v15774_v28 = vcombine.low %v2752_v1, %v2760_v2  ;;  %v15632_v31 = vcombine.low %v2609_v8, %v2617_v9  ;;  %v15649_v33 = vcombine.high %v2625_v24, %v2633_v27  ;;  %v2848_v2 = vld [vmem:[#allocation17 + $0x810] sm:$0xff]  ;;  %v2705_v9 = vld [vmem:[#allocation17 + $0x398] sm:$0xff] }
 0x5b4   :  { %9129 = vmatprep.subr.bf16.mxu1 %v16573_v32  ;;  %v15791_v32 = vcombine.high %v2768_v17, %v2776_v23  ;;  %v2856_v8 = vld [vmem:[#allocation17 + $0x850] sm:$0xff] }
 0x5b6   :  { %9157 = vmatpush1.bf16.msra.mxu0 %v15694_v36  ;;  %v2649_v36 = vld [vmem:[#allocation17 + $0x1d8] sm:$0xff] }
 0x5b7   :  { %9130 = vmatpush1.bf16.msra.mxu1 %v16572_v38  ;;  %9158 = vmatprep.subr.bf16.mxu0 %v15711_v39  ;;  %v15790_v38 = vcombine.low %v2768_v17, %v2776_v23  ;;  %v15648_v39 = vcombine.low %v2625_v24, %v2633_v27  ;;  %v15665_v40 = vcombine.high %v2641_v35, %v2649_v36  ;;  %v2864_v23 = vld [vmem:[#allocation17 + $0x890] sm:$0xff]  ;;  %v2721_v27 = vld [vmem:[#allocation17 + $0x418] sm:$0xff] }
 0x5b8   :  { %9131 = vmatprep.subr.bf16.mxu1 %v16589_v5  ;;  %v15807_v5 = vcombine.high %v2784_v34, %v2792_v29  ;;  %v2872_v24 = vld [vmem:[#allocation17 + $0x8d0] sm:$0xff] }
 0x5ba   :  { %9159 = vmatpush1.bf16.msra.mxu0 %v15710_v26  ;;  %v2665_v26 = vld [vmem:[#allocation17 + $0x258] sm:$0xff] }
 0x5bb   :  { %9132 = vmatpush1.bf16.msra.mxu1 %v16588_v43  ;;  %9160 = vmatprep.subr.bf16.mxu0 %v15727_v45  ;;  %v15806_v43 = vcombine.low %v2784_v34, %v2792_v29  ;;  %v15664_v45 = vcombine.low %v2641_v35, %v2649_v36  ;;  %v15681_v30 = vcombine.high %v2657_v18, %v2665_v26  ;;  %v2880_v29 = vld [vmem:[#allocation17 + $0x910] sm:$0xff]  ;;  %v2737_v36 = vld [vmem:[#allocation17 + $0x498] sm:$0xff] }
 0x5bc   :  { %9133 = vmatprep.subr.bf16.mxu1 %v16605_v48  ;;  %v15823_v48 = vcombine.high %v2800_v37, %v2808_v41  ;;  %v2888_v35 = vld [vmem:[#allocation17 + $0x950] sm:$0xff] }
 0x5be   :  { %9161 = vmatpush1.bf16.msra.mxu0 %v15726_v49  ;;  %v2681_v49 = vld [vmem:[#allocation17 + $0x2d8] sm:$0xff] }
 0x5bf   :  { %9134 = vmatpush1.bf16.msra.mxu1 %v16604_v52  ;;  %9162 = vmatprep.subr.bf16.mxu0 %v15743_v53  ;;  %v15822_v52 = vcombine.low %v2800_v37, %v2808_v41  ;;  %v15680_v53 = vcombine.low %v2657_v18, %v2665_v26  ;;  %v15697_v57 = vcombine.high %v2673_v47, %v2681_v49  ;;  %v2896_v41 = vld [vmem:[#allocation17 + $0x990] sm:$0xff]  ;;  %v2753_v26 = vld [vmem:[#allocation17 + $0x518] sm:$0xff] }
 0x5c0   :  { %9135 = vmatprep.subr.bf16.mxu1 %v16621_v54  ;;  %v15839_v54 = vcombine.high %v2816_v56, %v2824_v44  ;;  %v2904_v18 = vld [vmem:[#allocation17 + $0x9d0] sm:$0xff] }
 0x5c2   :  { %9163 = vmatpush1.bf16.msra.mxu0 %v15742_v62  ;;  %v2697_v62 = vld [vmem:[#allocation17 + $0x358] sm:$0xff] }
 0x5c3   :  { %9136 = vmatpush1.bf16.msra.mxu1 %v16620_v12  ;;  %9164 = vmatprep.subr.bf16.mxu0 %v15759_v63  ;;  %v15838_v12 = vcombine.low %v2816_v56, %v2824_v44  ;;  %v15696_v63 = vcombine.low %v2673_v47, %v2681_v49  ;;  %v15713_v1 = vcombine.high %v2689_v60, %v2697_v62  ;;  %v2912_v44 = vld [vmem:[#allocation17 + $0xa10] sm:$0xff]  ;;  %v2769_v49 = vld [vmem:[#allocation17 + $0x598] sm:$0xff] }
 0x5c4   :  { %9310 = vmatprep.subr.bf16.mxu1 %v15617_v0  ;;  %v15855_v0 = vcombine.high %v2832_v58, %v2840_v59  ;;  %v2920_v47 = vld [vmem:[#allocation17 + $0xa50] sm:$0xff] }
 0x5c6   :  { %9138 = vmatmul.mubr.bf16.vlgmr.msra.gmra.mrb[20].mxu1 %v21893_v19  ;;  %9165 = vmatpush1.bf16.msra.mxu0 %v15758_v11  ;;  %v2713_v11 = vld [vmem:[#allocation17 + $0x3d8] sm:$0xff] }
 0x5c7   :  { %9311 = vmatpush1.bf16.msra.mxu1 %v15616_v13  ;;  %9342 = vmatprep.mubr.bf16.mxu1 %v21832_v20  ;;  %v15854_v13 = vcombine.low %v2832_v58, %v2840_v59  ;;  %v15729_v17 = vcombine.high %v2705_v9, %v2713_v11  ;;  %v2928_v59 = vld [vmem:[#allocation17 + $0xa90] sm:$0xff] }
 0x5c8   :  { %9166 = vmatprep.subr.bf16.mxu0 %v15775_v14  ;;  %9312 = vmatprep.subr.bf16.mxu1 %v15633_v16  ;;  %v15712_v14 = vcombine.low %v2689_v60, %v2697_v62  ;;  %v15871_v16 = vcombine.high %v2848_v2, %v2856_v8  ;;  %v2936_v60 = vld [vmem:[#allocation17 + $0xad0] sm:$0xff]  ;;  %v2785_v62 = vld [vmem:[#allocation17 + $0x618] sm:$0xff] }
 0x5ca   :  { %9167 = vmatpush1.bf16.msra.mxu0 %v15774_v28  ;;  %v2729_v28 = vld [vmem:[#allocation17 + $0x458] sm:$0xff] }
 0x5cb   :  { %9313 = vmatpush1.bf16.msra.mxu1 %v15632_v31  ;;  %9168 = vmatprep.subr.bf16.mxu0 %v15791_v32  ;;  %v15870_v31 = vcombine.low %v2848_v2, %v2856_v8  ;;  %v15728_v32 = vcombine.low %v2705_v9, %v2713_v11  ;;  %v15745_v34 = vcombine.high %v2721_v27, %v2729_v28  ;;  %v2944_v8 = vld [vmem:[#allocation17 + $0xb10] sm:$0xff]  ;;  %v2801_v11 = vld [vmem:[#allocation17 + $0x698] sm:$0xff] }
 0x5cc   :  { %9314 = vmatprep.subr.bf16.mxu1 %v15649_v33  ;;  %v15887_v33 = vcombine.high %v2864_v23, %v2872_v24  ;;  %v2952_v9 = vld [vmem:[#allocation17 + $0xb50] sm:$0xff] }
 0x5ce   :  { %9169 = vmatpush1.bf16.msra.mxu0 %v15790_v38  ;;  %v2745_v38 = vld [vmem:[#allocation17 + $0x4d8] sm:$0xff] }
 0x5cf   :  { %9315 = vmatpush1.bf16.msra.mxu1 %v15648_v39  ;;  %9170 = vmatprep.subr.bf16.mxu0 %v15807_v5  ;;  %v15886_v39 = vcombine.low %v2864_v23, %v2872_v24  ;;  %v15744_v5 = vcombine.low %v2721_v27, %v2729_v28  ;;  %v15761_v37 = vcombine.high %v2737_v36, %v2745_v38  ;;  %v2960_v24 = vld [vmem:[#allocation17 + $0xb90] sm:$0xff]  ;;  %v2817_v28 = vld [vmem:[#allocation17 + $0x718] sm:$0xff] }
 0x5d0   :  { %9316 = vmatprep.subr.bf16.mxu1 %v15665_v40  ;;  %v15903_v40 = vcombine.high %v2880_v29, %v2888_v35  ;;  %v2968_v27 = vld [vmem:[#allocation17 + $0xbd0] sm:$0xff] }
 0x5d2   :  { %9171 = vmatpush1.bf16.msra.mxu0 %v15806_v43  ;;  %v2761_v43 = vld [vmem:[#allocation17 + $0x558] sm:$0xff] }
 0x5d3   :  { %9317 = vmatpush1.bf16.msra.mxu1 %v15664_v45  ;;  %9172 = vmatprep.subr.bf16.mxu0 %v15823_v48  ;;  %v15902_v45 = vcombine.low %v2880_v29, %v2888_v35  ;;  %v15760_v48 = vcombine.low %v2737_v36, %v2745_v38  ;;  %v15777_v56 = vcombine.high %v2753_v26, %v2761_v43  ;;  %v2976_v35 = vld [vmem:[#allocation17 + $0xc10] sm:$0xff]  ;;  %v2833_v38 = vld [vmem:[#allocation17 + $0x798] sm:$0xff] }
 0x5d4   :  { %9318 = vmatprep.subr.bf16.mxu1 %v15681_v30  ;;  %v15919_v30 = vcombine.high %v2896_v41, %v2904_v18  ;;  %v2984_v36 = vld [vmem:[#allocation17 + $0xc50] sm:$0xff] }
 0x5d6   :  { %9173 = vmatpush1.bf16.msra.mxu0 %v15822_v52  ;;  %v2777_v52 = vld [vmem:[#allocation17 + $0x5d8] sm:$0xff] }
 0x5d7   :  { %9319 = vmatpush1.bf16.msra.mxu1 %v15680_v53  ;;  %9174 = vmatprep.subr.bf16.mxu0 %v15839_v54  ;;  %v15918_v53 = vcombine.low %v2896_v41, %v2904_v18  ;;  %v15776_v54 = vcombine.low %v2753_v26, %v2761_v43  ;;  %v15793_v58 = vcombine.high %v2769_v49, %v2777_v52  ;;  %v2992_v18 = vld [vmem:[#allocation17 + $0xc90] sm:$0xff]  ;;  %v2849_v43 = vld [vmem:[#allocation17 + $0x818] sm:$0xff] }
 0x5d8   :  { %9320 = vmatprep.subr.bf16.mxu1 %v15697_v57  ;;  %v15935_v57 = vcombine.high %v2912_v44, %v2920_v47  ;;  %v3000_v26 = vld [vmem:[#allocation17 + $0xcd0] sm:$0xff] }
 0x5da   :  { %9175 = vmatpush1.bf16.msra.mxu0 %v15838_v12  ;;  %v2793_v12 = vld [vmem:[#allocation17 + $0x658] sm:$0xff] }
 0x5db   :  { %9321 = vmatpush1.bf16.msra.mxu1 %v15696_v63  ;;  %9176 = vmatprep.subr.bf16.mxu0 %v15855_v0  ;;  %v15934_v63 = vcombine.low %v2912_v44, %v2920_v47  ;;  %v15792_v0 = vcombine.low %v2769_v49, %v2777_v52  ;;  %v15809_v2 = vcombine.high %v2785_v62, %v2793_v12  ;;  %v3008_v47 = vld [vmem:[#allocation17 + $0xd10] sm:$0xff]  ;;  %v2865_v52 = vld [vmem:[#allocation17 + $0x898] sm:$0xff] }
 0x5dc   :  { %9322 = vmatprep.subr.bf16.mxu1 %v15713_v1  ;;  %v15951_v1 = vcombine.high %v2928_v59, %v2936_v60  ;;  %v3016_v49 = vld [vmem:[#allocation17 + $0xd50] sm:$0xff] }
 0x5de   :  { %9177 = vmatpush1.bf16.msra.mxu0 %v15854_v13  ;;  %v2809_v13 = vld [vmem:[#allocation17 + $0x6d8] sm:$0xff] }
 0x5df   :  { %9323 = vmatpush1.bf16.msra.mxu1 %v15712_v14  ;;  %9187 = vmatprep.subr.bf16.mxu0 %v15871_v16  ;;  %v15950_v14 = vcombine.low %v2928_v59, %v2936_v60  ;;  %v15808_v16 = vcombine.low %v2785_v62, %v2793_v12  ;;  %v15825_v23 = vcombine.high %v2801_v11, %v2809_v13  ;;  %v3024_v60 = vld [vmem:[#allocation17 + $0xd90] sm:$0xff]  ;;  %v2881_v12 = vld [vmem:[#allocation17 + $0x918] sm:$0xff] }
 0x5e0   :  { %9324 = vmatprep.subr.bf16.mxu1 %v15729_v17  ;;  %v15967_v17 = vcombine.high %v2944_v8, %v2952_v9  ;;  %v3032_v62 = vld [vmem:[#allocation17 + $0xdd0] sm:$0xff] }
 0x5e1   :  { %9179 = vmatmul.mubr.bf16.vlgmr.msra.gmra.mrb[16].mxu0 %v21834_v22 }
 0x5e2   :  { %9188 = vmatpush1.bf16.msra.mxu0 %v15870_v31  ;;  %9219 = vmatprep.mubr.bf16.mxu0 %v21858_v61  ;;  %v2825_v31 = vld [vmem:[#allocation17 + $0x758] sm:$0xff] }
 0x5e3   :  { %9325 = vmatpush1.bf16.msra.mxu1 %v15728_v32  ;;  %9189 = vmatprep.subr.bf16.mxu0 %v15887_v33  ;;  %v15966_v32 = vcombine.low %v2944_v8, %v2952_v9  ;;  %v15824_v33 = vcombine.low %v2801_v11, %v2809_v13  ;;  %v15841_v29 = vcombine.high %v2817_v28, %v2825_v31  ;;  %v3040_v9 = vld [vmem:[#allocation17 + $0xe10] sm:$0xff]  ;;  %v2897_v13 = vld [vmem:[#allocation17 + $0x998] sm:$0xff] }
 0x5e4   :  { %9326 = vmatprep.subr.bf16.mxu1 %v15745_v34  ;;  %v15983_v34 = vcombine.high %v2960_v24, %v2968_v27  ;;  %v3048_v11 = vld [vmem:[#allocation17 + $0xe50] sm:$0xff] }
 0x5e6   :  { %9190 = vmatpush1.bf16.msra.mxu0 %v15886_v39  ;;  %v2841_v39 = vld [vmem:[#allocation17 + $0x7d8] sm:$0xff] }
 0x5e7   :  { %9327 = vmatpush1.bf16.msra.mxu1 %v15744_v5  ;;  %9191 = vmatprep.subr.bf16.mxu0 %v15903_v40  ;;  %v15982_v5 = vcombine.low %v2960_v24, %v2968_v27  ;;  %v15840_v40 = vcombine.low %v2817_v28, %v2825_v31  ;;  %v15857_v41 = vcombine.high %v2833_v38, %v2841_v39  ;;  %v3056_v27 = vld [vmem:[#allocation17 + $0xe90] sm:$0xff]  ;;  %v2913_v31 = vld [vmem:[#allocation17 + $0xa18] sm:$0xff] }
 0x5e8   :  { %9328 = vmatprep.subr.bf16.mxu1 %v15761_v37  ;;  %v15999_v37 = vcombine.high %v2976_v35, %v2984_v36  ;;  %v3064_v28 = vld [vmem:[#allocation17 + $0xed0] sm:$0xff] }
 0x5ea   :  { %9192 = vmatpush1.bf16.msra.mxu0 %v15902_v45  ;;  %v2857_v45 = vld [vmem:[#allocation17 + $0x858] sm:$0xff] }
 0x5eb   :  { %9329 = vmatpush1.bf16.msra.mxu1 %v15760_v48  ;;  %9193 = vmatprep.subr.bf16.mxu0 %v15919_v30  ;;  %v15998_v48 = vcombine.low %v2976_v35, %v2984_v36  ;;  %v15856_v30 = vcombine.low %v2833_v38, %v2841_v39  ;;  %v15873_v44 = vcombine.high %v2849_v43, %v2857_v45  ;;  %v3072_v36 = vld [vmem:[#allocation17 + $0xf10] sm:$0xff]  ;;  %v2929_v39 = vld [vmem:[#allocation17 + $0xa98] sm:$0xff] }
 0x5ec   :  { %9330 = vmatprep.subr.bf16.mxu1 %v15777_v56  ;;  %v16015_v56 = vcombine.high %v2992_v18, %v3000_v26  ;;  %v3080_v38 = vld [vmem:[#allocation17 + $0xf50] sm:$0xff] }
 0x5ee   :  { %9194 = vmatpush1.bf16.msra.mxu0 %v15918_v53  ;;  %v2873_v53 = vld [vmem:[#allocation17 + $0x8d8] sm:$0xff] }
 0x5ef   :  { %9331 = vmatpush1.bf16.msra.mxu1 %v15776_v54  ;;  %9195 = vmatprep.subr.bf16.mxu0 %v15935_v57  ;;  %v16014_v54 = vcombine.low %v2992_v18, %v3000_v26  ;;  %v15872_v57 = vcombine.low %v2849_v43, %v2857_v45  ;;  %v15889_v59 = vcombine.high %v2865_v52, %v2873_v53  ;;  %v3088_v26 = vld [vmem:[#allocation17 + $0xf90] sm:$0xff]  ;;  %v2945_v45 = vld [vmem:[#allocation17 + $0xb18] sm:$0xff] }
 0x5f0   :  { %9332 = vmatprep.subr.bf16.mxu1 %v15793_v58  ;;  %v16031_v58 = vcombine.high %v3008_v47, %v3016_v49  ;;  %v3096_v43 = vld [vmem:[#allocation17 + $0xfd0] sm:$0xff] }
 0x5f2   :  { %9196 = vmatpush1.bf16.msra.mxu0 %v15934_v63  ;;  %v2889_v63 = vld [vmem:[#allocation17 + $0x958] sm:$0xff] }
 0x5f3   :  { %9333 = vmatpush1.bf16.msra.mxu1 %v15792_v0  ;;  %9197 = vmatprep.subr.bf16.mxu0 %v15951_v1  ;;  %v16030_v0 = vcombine.low %v3008_v47, %v3016_v49  ;;  %v15888_v1 = vcombine.low %v2865_v52, %v2873_v53  ;;  %v15905_v8 = vcombine.high %v2881_v12, %v2889_v63  ;;  %v3104_v49 = vld [vmem:[#allocation17 + $0x1010] sm:$0xff]  ;;  %v2961_v53 = vld [vmem:[#allocation17 + $0xb98] sm:$0xff] }
 0x5f4   :  { %9334 = vmatprep.subr.bf16.mxu1 %v15809_v2  ;;  %v16047_v2 = vcombine.high %v3024_v60, %v3032_v62  ;;  %v3112_v52 = vld [vmem:[#allocation17 + $0x1050] sm:$0xff] }
 0x5f6   :  { %9198 = vmatpush1.bf16.msra.mxu0 %v15950_v14  ;;  %v2905_v14 = vld [vmem:[#allocation17 + $0x9d8] sm:$0xff] }
 0x5f7   :  { %9335 = vmatpush1.bf16.msra.mxu1 %v15808_v16  ;;  %9199 = vmatprep.subr.bf16.mxu0 %v15967_v17  ;;  %v16046_v16 = vcombine.low %v3024_v60, %v3032_v62  ;;  %v15904_v17 = vcombine.low %v2881_v12, %v2889_v63  ;;  %v15921_v24 = vcombine.high %v2897_v13, %v2905_v14  ;;  %v3120_v62 = vld [vmem:[#allocation17 + $0x1090] sm:$0xff]  ;;  %v2977_v63 = vld [vmem:[#allocation17 + $0xc18] sm:$0xff] }
 0x5f8   :  { %9336 = vmatprep.subr.bf16.mxu1 %v15825_v23  ;;  %v16063_v23 = vcombine.high %v3040_v9, %v3048_v11  ;;  %v3128_v12 = vld [vmem:[#allocation17 + $0x10d0] sm:$0xff] }
 0x5fa   :  { %9200 = vmatpush1.bf16.msra.mxu0 %v15966_v32  ;;  %v2921_v32 = vld [vmem:[#allocation17 + $0xa58] sm:$0xff] }
 0x5fb   :  { %9337 = vmatpush1.bf16.msra.mxu1 %v15824_v33  ;;  %9201 = vmatprep.subr.bf16.mxu0 %v15983_v34  ;;  %v16062_v33 = vcombine.low %v3040_v9, %v3048_v11  ;;  %v15920_v34 = vcombine.low %v2897_v13, %v2905_v14  ;;  %v15937_v35 = vcombine.high %v2913_v31, %v2921_v32  ;;  %v3136_v11 = vld [vmem:[#allocation17 + $0x1110] sm:$0xff]  ;;  %v2993_v14 = vld [vmem:[#allocation17 + $0xc98] sm:$0xff] }
 0x5fc   :  { %9338 = vmatprep.subr.bf16.mxu1 %v15841_v29  ;;  %v16079_v29 = vcombine.high %v3056_v27, %v3064_v28  ;;  %v3144_v13 = vld [vmem:[#allocation17 + $0x1150] sm:$0xff] }
 0x5fe   :  { %9202 = vmatpush1.bf16.msra.mxu0 %v15982_v5  ;;  %v2937_v5 = vld [vmem:[#allocation17 + $0xad8] sm:$0xff] }
 0x5ff   :  { %9339 = vmatpush1.bf16.msra.mxu1 %v15840_v40  ;;  %9203 = vmatprep.subr.bf16.mxu0 %v15999_v37  ;;  %v16078_v40 = vcombine.low %v3056_v27, %v3064_v28  ;;  %v15936_v37 = vcombine.low %v2913_v31, %v2921_v32  ;;  %v15953_v18 = vcombine.high %v2929_v39, %v2937_v5  ;;  %v3152_v28 = vld [vmem:[#allocation17 + $0x1190] sm:$0xff]  ;;  %v3009_v32 = vld [vmem:[#allocation17 + $0xd18] sm:$0xff] }
 0x600   :  { %9340 = vmatprep.subr.bf16.mxu1 %v15857_v41  ;;  %v16095_v41 = vcombine.high %v3072_v36, %v3080_v38  ;;  %v3160_v31 = vld [vmem:[#allocation17 + $0x11d0] sm:$0xff] }
 0x602   :  { %9204 = vmatpush1.bf16.msra.mxu0 %v15998_v48  ;;  %v2953_v48 = vld [vmem:[#allocation17 + $0xb58] sm:$0xff] }
 0x603   :  { %9341 = vmatpush1.bf16.msra.mxu1 %v15856_v30  ;;  %9205 = vmatprep.subr.bf16.mxu0 %v16015_v56  ;;  %v16094_v30 = vcombine.low %v3072_v36, %v3080_v38  ;;  %v15952_v56 = vcombine.low %v2929_v39, %v2937_v5  ;;  %v15969_v47 = vcombine.high %v2945_v45, %v2953_v48  ;;  %v3168_v38 = vld [vmem:[#allocation17 + $0x1210] sm:$0xff]  ;;  %v3025_v5 = vld [vmem:[#allocation17 + $0xd98] sm:$0xff] }
 0x604   :  { %9351 = vmatprep.subr.bf16.mxu1 %v15873_v44  ;;  %v16111_v44 = vcombine.high %v3088_v26, %v3096_v43  ;;  %v3176_v39 = vld [vmem:[#allocation17 + $0x1250] sm:$0xff] }
 0x606   :  { %9206 = vmatpush1.bf16.msra.mxu0 %v16014_v54  ;;  %9343 = vmatmul.mubr.bf16.vlgmr.msra.gmra.mrb[24].mxu1 %v21834_v22  ;;  %v2969_v54 = vld [vmem:[#allocation17 + $0xbd8] sm:$0xff] }
 0x607   :  { %9352 = vmatpush1.bf16.msra.mxu1 %v15872_v57  ;;  %9383 = vmatprep.mubr.bf16.mxu1 %v21858_v61  ;;  %v16110_v57 = vcombine.low %v3088_v26, %v3096_v43  ;;  %v15985_v60 = vcombine.high %v2961_v53, %v2969_v54  ;;  %v3184_v43 = vld [vmem:[#allocation17 + $0x1290] sm:$0xff] }
 0x608   :  { %9207 = vmatprep.subr.bf16.mxu0 %v16031_v58  ;;  %9353 = vmatprep.subr.bf16.mxu1 %v15889_v59  ;;  %v15968_v58 = vcombine.low %v2945_v45, %v2953_v48  ;;  %v16127_v59 = vcombine.high %v3104_v49, %v3112_v52  ;;  %v3192_v45 = vld [vmem:[#allocation17 + $0x12d0] sm:$0xff]  ;;  %v3041_v48 = vld [vmem:[#allocation17 + $0xe18] sm:$0xff] }
 0x60a   :  { %9208 = vmatpush1.bf16.msra.mxu0 %v16030_v0  ;;  %v2985_v0 = vld [vmem:[#allocation17 + $0xc58] sm:$0xff] }
 0x60b   :  { %9354 = vmatpush1.bf16.msra.mxu1 %v15888_v1  ;;  %9209 = vmatprep.subr.bf16.mxu0 %v16047_v2  ;;  %v16126_v1 = vcombine.low %v3104_v49, %v3112_v52  ;;  %v15984_v2 = vcombine.low %v2961_v53, %v2969_v54  ;;  %v16001_v9 = vcombine.high %v2977_v63, %v2985_v0  ;;  %v3200_v52 = vld [vmem:[#allocation17 + $0x1310] sm:$0xff]  ;;  %v3057_v54 = vld [vmem:[#allocation17 + $0xe98] sm:$0xff] }
 0x60c   :  { %9355 = vmatprep.subr.bf16.mxu1 %v15905_v8  ;;  %v16143_v8 = vcombine.high %v3120_v62, %v3128_v12  ;;  %v3208_v53 = vld [vmem:[#allocation17 + $0x1350] sm:$0xff] }
 0x60e   :  { %9210 = vmatpush1.bf16.msra.mxu0 %v16046_v16  ;;  %v3001_v16 = vld [vmem:[#allocation17 + $0xcd8] sm:$0xff] }
 0x60f   :  { %9356 = vmatpush1.bf16.msra.mxu1 %v15904_v17  ;;  %9211 = vmatprep.subr.bf16.mxu0 %v16063_v23  ;;  %v16142_v17 = vcombine.low %v3120_v62, %v3128_v12  ;;  %v16000_v23 = vcombine.low %v2977_v63, %v2985_v0  ;;  %v16017_v27 = vcombine.high %v2993_v14, %v3001_v16  ;;  %v3216_v12 = vld [vmem:[#allocation17 + $0x1390] sm:$0xff]  ;;  %v3073_v0 = vld [vmem:[#allocation17 + $0xf18] sm:$0xff] }
 0x610   :  { %9357 = vmatprep.subr.bf16.mxu1 %v15921_v24  ;;  %v16159_v24 = vcombine.high %v3136_v11, %v3144_v13  ;;  %v3224_v63 = vld [vmem:[#allocation17 + $0x13d0] sm:$0xff] }
 0x612   :  { %9212 = vmatpush1.bf16.msra.mxu0 %v16062_v33  ;;  %v3017_v33 = vld [vmem:[#allocation17 + $0xd58] sm:$0xff] }
 0x613   :  { %9358 = vmatpush1.bf16.msra.mxu1 %v15920_v34  ;;  %9213 = vmatprep.subr.bf16.mxu0 %v16079_v29  ;;  %v16158_v34 = vcombine.low %v3136_v11, %v3144_v13  ;;  %v16016_v29 = vcombine.low %v2993_v14, %v3001_v16  ;;  %v16033_v36 = vcombine.high %v3009_v32, %v3017_v33  ;;  %v3232_v13 = vld [vmem:[#allocation17 + $0x1410] sm:$0xff]  ;;  %v3089_v16 = vld [vmem:[#allocation17 + $0xf98] sm:$0xff] }
 0x614   :  { %9359 = vmatprep.subr.bf16.mxu1 %v15937_v35  ;;  %v16175_v35 = vcombine.high %v3152_v28, %v3160_v31  ;;  %v3240_v14 = vld [vmem:[#allocation17 + $0x1450] sm:$0xff] }
 0x616   :  { %9214 = vmatpush1.bf16.msra.mxu0 %v16078_v40  ;;  %v3033_v40 = vld [vmem:[#allocation17 + $0xdd8] sm:$0xff] }
 0x617   :  { %9360 = vmatpush1.bf16.msra.mxu1 %v15936_v37  ;;  %9215 = vmatprep.subr.bf16.mxu0 %v16095_v41  ;;  %v16174_v37 = vcombine.low %v3152_v28, %v3160_v31  ;;  %v16032_v41 = vcombine.low %v3009_v32, %v3017_v33  ;;  %v16049_v26 = vcombine.high %v3025_v5, %v3033_v40  ;;  %v3248_v31 = vld [vmem:[#allocation17 + $0x1490] sm:$0xff]  ;;  %v3105_v33 = vld [vmem:[#allocation17 + $0x1018] sm:$0xff] }
 0x618   :  { %9361 = vmatprep.subr.bf16.mxu1 %v15953_v18  ;;  %v16191_v18 = vcombine.high %v3168_v38, %v3176_v39  ;;  %v3256_v32 = vld [vmem:[#allocation17 + $0x14d0] sm:$0xff] }
 0x61a   :  { %9216 = vmatpush1.bf16.msra.mxu0 %v16094_v30  ;;  %v3049_v30 = vld [vmem:[#allocation17 + $0xe58] sm:$0xff] }
 0x61b   :  { %9362 = vmatpush1.bf16.msra.mxu1 %v15952_v56  ;;  %9217 = vmatprep.subr.bf16.mxu0 %v16111_v44  ;;  %v16190_v56 = vcombine.low %v3168_v38, %v3176_v39  ;;  %v16048_v44 = vcombine.low %v3025_v5, %v3033_v40  ;;  %v16065_v49 = vcombine.high %v3041_v48, %v3049_v30  ;;  %v3264_v39 = vld [vmem:[#allocation17 + $0x1510] sm:$0xff]  ;;  %v3121_v40 = vld [vmem:[#allocation17 + $0x1098] sm:$0xff] }
 0x61c   :  { %9363 = vmatprep.subr.bf16.mxu1 %v15969_v47  ;;  %v16207_v47 = vcombine.high %v3184_v43, %v3192_v45  ;;  %v3272_v5 = vld [vmem:[#allocation17 + $0x1550] sm:$0xff] }
 0x61e   :  { %9218 = vmatpush1.bf16.msra.mxu0 %v16110_v57  ;;  %v3065_v57 = vld [vmem:[#allocation17 + $0xed8] sm:$0xff] }
 0x61f   :  { %9364 = vmatpush1.bf16.msra.mxu1 %v15968_v58  ;;  %9228 = vmatprep.subr.bf16.mxu0 %v16127_v59  ;;  %v16206_v58 = vcombine.low %v3184_v43, %v3192_v45  ;;  %v16064_v59 = vcombine.low %v3041_v48, %v3049_v30  ;;  %v16081_v62 = vcombine.high %v3057_v54, %v3065_v57  ;;  %v3280_v45 = vld [vmem:[#allocation17 + $0x1590] sm:$0xff]  ;;  %v3137_v30 = vld [vmem:[#allocation17 + $0x1118] sm:$0xff] }
 0x620   :  { %9365 = vmatprep.subr.bf16.mxu1 %v15985_v60  ;;  %v16223_v60 = vcombine.high %v3200_v52, %v3208_v53  ;;  %v3288_v48 = vld [vmem:[#allocation17 + $0x15d0] sm:$0xff] }
 0x621   :  { %9220 = vmatmul.mubr.bf16.vlgmr.msra.gmra.mrb[16].mxu0 %v21860_v21 }
 0x622   :  { %9229 = vmatpush1.bf16.msra.mxu0 %v16126_v1  ;;  %9260 = vmatprep.mubr.bf16.mxu0 %v21862_v25  ;;  %v3081_v1 = vld [vmem:[#allocation17 + $0xf58] sm:$0xff] }
 0x623   :  { %9366 = vmatpush1.bf16.msra.mxu1 %v15984_v2  ;;  %9230 = vmatprep.subr.bf16.mxu0 %v16143_v8  ;;  %v16222_v2 = vcombine.low %v3200_v52, %v3208_v53  ;;  %v16080_v8 = vcombine.low %v3057_v54, %v3065_v57  ;;  %v16097_v11 = vcombine.high %v3073_v0, %v3081_v1  ;;  %v3296_v53 = vld [vmem:[#allocation17 + $0x1610] sm:$0xff]  ;;  %v3153_v57 = vld [vmem:[#allocation17 + $0x1198] sm:$0xff] }
 0x624   :  { %9367 = vmatprep.subr.bf16.mxu1 %v16001_v9  ;;  %v16239_v9 = vcombine.high %v3216_v12, %v3224_v63  ;;  %v3304_v54 = vld [vmem:[#allocation17 + $0x1650] sm:$0xff] }
 0x626   :  { %9231 = vmatpush1.bf16.msra.mxu0 %v16142_v17  ;;  %v3097_v17 = vld [vmem:[#allocation17 + $0xfd8] sm:$0xff] }
 0x627   :  { %9368 = vmatpush1.bf16.msra.mxu1 %v16000_v23  ;;  %9232 = vmatprep.subr.bf16.mxu0 %v16159_v24  ;;  %v16238_v23 = vcombine.low %v3216_v12, %v3224_v63  ;;  %v16096_v24 = vcombine.low %v3073_v0, %v3081_v1  ;;  %v16113_v28 = vcombine.high %v3089_v16, %v3097_v17  ;;  %v3312_v63 = vld [vmem:[#allocation17 + $0x1690] sm:$0xff]  ;;  %v3169_v1 = vld [vmem:[#allocation17 + $0x1218] sm:$0xff] }
 0x628   :  { %9369 = vmatprep.subr.bf16.mxu1 %v16017_v27  ;;  %v16255_v27 = vcombine.high %v3232_v13, %v3240_v14  ;;  %v3320_v0 = vld [vmem:[#allocation17 + $0x16d0] sm:$0xff] }
 0x62a   :  { %9233 = vmatpush1.bf16.msra.mxu0 %v16158_v34  ;;  %v3113_v34 = vld [vmem:[#allocation17 + $0x1058] sm:$0xff] }
 0x62b   :  { %9370 = vmatpush1.bf16.msra.mxu1 %v16016_v29  ;;  %9234 = vmatprep.subr.bf16.mxu0 %v16175_v35  ;;  %v16254_v29 = vcombine.low %v3232_v13, %v3240_v14  ;;  %v16112_v35 = vcombine.low %v3089_v16, %v3097_v17  ;;  %v16129_v38 = vcombine.high %v3105_v33, %v3113_v34  ;;  %v3328_v14 = vld [vmem:[#allocation17 + $0x1710] sm:$0xff]  ;;  %v3185_v17 = vld [vmem:[#allocation17 + $0x1298] sm:$0xff] }
 0x62c   :  { %9371 = vmatprep.subr.bf16.mxu1 %v16033_v36  ;;  %v16271_v36 = vcombine.high %v3248_v31, %v3256_v32  ;;  %v3336_v16 = vld [vmem:[#allocation17 + $0x1750] sm:$0xff] }
 0x62e   :  { %9235 = vmatpush1.bf16.msra.mxu0 %v16174_v37  ;;  %v3129_v37 = vld [vmem:[#allocation17 + $0x10d8] sm:$0xff] }
 0x62f   :  { %9372 = vmatpush1.bf16.msra.mxu1 %v16032_v41  ;;  %9236 = vmatprep.subr.bf16.mxu0 %v16191_v18  ;;  %v16270_v41 = vcombine.low %v3248_v31, %v3256_v32  ;;  %v16128_v18 = vcombine.low %v3105_v33, %v3113_v34  ;;  %v16145_v43 = vcombine.high %v3121_v40, %v3129_v37  ;;  %v3344_v32 = vld [vmem:[#allocation17 + $0x1790] sm:$0xff]  ;;  %v3201_v34 = vld [vmem:[#allocation17 + $0x1318] sm:$0xff] }
 0x630   :  { %9373 = vmatprep.subr.bf16.mxu1 %v16049_v26  ;;  %v16287_v26 = vcombine.high %v3264_v39, %v3272_v5  ;;  %v3352_v33 = vld [vmem:[#allocation17 + $0x17d0] sm:$0xff] }
 0x632   :  { %9237 = vmatpush1.bf16.msra.mxu0 %v16190_v56  ;;  %v3145_v56 = vld [vmem:[#allocation17 + $0x1158] sm:$0xff] }
 0x633   :  { %9374 = vmatpush1.bf16.msra.mxu1 %v16048_v44  ;;  %9238 = vmatprep.subr.bf16.mxu0 %v16207_v47  ;;  %v16286_v44 = vcombine.low %v3264_v39, %v3272_v5  ;;  %v16144_v47 = vcombine.low %v3121_v40, %v3129_v37  ;;  %v16161_v52 = vcombine.high %v3137_v30, %v3145_v56  ;;  %v3360_v5 = vld [vmem:[#allocation17 + $0x1810] sm:$0xff]  ;;  %v3217_v37 = vld [vmem:[#allocation17 + $0x1398] sm:$0xff] }
 0x634   :  { %9375 = vmatprep.subr.bf16.mxu1 %v16065_v49  ;;  %v16303_v49 = vcombine.high %v3280_v45, %v3288_v48  ;;  %v3368_v40 = vld [vmem:[#allocation17 + $0x1850] sm:$0xff] }
 0x636   :  { %9239 = vmatpush1.bf16.msra.mxu0 %v16206_v58  ;;  %v3161_v58 = vld [vmem:[#allocation17 + $0x11d8] sm:$0xff] }
 0x637   :  { %9376 = vmatpush1.bf16.msra.mxu1 %v16064_v59  ;;  %9240 = vmatprep.subr.bf16.mxu0 %v16223_v60  ;;  %v16302_v59 = vcombine.low %v3280_v45, %v3288_v48  ;;  %v16160_v60 = vcombine.low %v3137_v30, %v3145_v56  ;;  %v16177_v12 = vcombine.high %v3153_v57, %v3161_v58  ;;  %v3376_v48 = vld [vmem:[#allocation17 + $0x1890] sm:$0xff]  ;;  %v3233_v56 = vld [vmem:[#allocation17 + $0x1418] sm:$0xff] }
 0x638   :  { %9377 = vmatprep.subr.bf16.mxu1 %v16081_v62  ;;  %v16319_v62 = vcombine.high %v3296_v53, %v3304_v54  ;;  %v3384_v30 = vld [vmem:[#allocation17 + $0x18d0] sm:$0xff] }
 0x63a   :  { %9241 = vmatpush1.bf16.msra.mxu0 %v16222_v2  ;;  %v3177_v2 = vld [vmem:[#allocation17 + $0x1258] sm:$0xff] }
 0x63b   :  { %9378 = vmatpush1.bf16.msra.mxu1 %v16080_v8  ;;  %9242 = vmatprep.subr.bf16.mxu0 %v16239_v9  ;;  %v16318_v8 = vcombine.low %v3296_v53, %v3304_v54  ;;  %v16176_v9 = vcombine.low %v3153_v57, %v3161_v58  ;;  %v16193_v13 = vcombine.high %v3169_v1, %v3177_v2  ;;  %v3392_v54 = vld [vmem:[#allocation17 + $0x1910] sm:$0xff]  ;;  %v3249_v58 = vld [vmem:[#allocation17 + $0x1498] sm:$0xff] }
 0x63c   :  { %9379 = vmatprep.subr.bf16.mxu1 %v16097_v11  ;;  %v16335_v11 = vcombine.high %v3312_v63, %v3320_v0  ;;  %v3400_v57 = vld [vmem:[#allocation17 + $0x1950] sm:$0xff] }
 0x63e   :  { %9243 = vmatpush1.bf16.msra.mxu0 %v16238_v23  ;;  %v3193_v23 = vld [vmem:[#allocation17 + $0x12d8] sm:$0xff] }
 0x63f   :  { %9380 = vmatpush1.bf16.msra.mxu1 %v16096_v24  ;;  %9244 = vmatprep.subr.bf16.mxu0 %v16255_v27  ;;  %v16334_v24 = vcombine.low %v3312_v63, %v3320_v0  ;;  %v16192_v27 = vcombine.low %v3169_v1, %v3177_v2  ;;  %v16209_v31 = vcombine.high %v3185_v17, %v3193_v23  ;;  %v3408_v0 = vld [vmem:[#allocation17 + $0x1990] sm:$0xff]  ;;  %v3265_v2 = vld [vmem:[#allocation17 + $0x1518] sm:$0xff] }
 0x640   :  { %9381 = vmatprep.subr.bf16.mxu1 %v16113_v28  ;;  %v16351_v28 = vcombine.high %v3328_v14, %v3336_v16  ;;  %v3416_v1 = vld [vmem:[#allocation17 + $0x19d0] sm:$0xff] }
 0x642   :  { %9245 = vmatpush1.bf16.msra.mxu0 %v16254_v29  ;;  %v3209_v29 = vld [vmem:[#allocation17 + $0x1358] sm:$0xff] }
 0x643   :  { %9382 = vmatpush1.bf16.msra.mxu1 %v16112_v35  ;;  %9246 = vmatprep.subr.bf16.mxu0 %v16271_v36  ;;  %v16350_v35 = vcombine.low %v3328_v14, %v3336_v16  ;;  %v16208_v36 = vcombine.low %v3185_v17, %v3193_v23  ;;  %v16225_v39 = vcombine.high %v3201_v34, %v3209_v29  ;;  %v3424_v16 = vld [vmem:[#allocation17 + $0x1a10] sm:$0xff]  ;;  %v3281_v23 = vld [vmem:[#allocation17 + $0x1598] sm:$0xff] }
 0x644   :  { %9392 = vmatprep.subr.bf16.mxu1 %v16129_v38  ;;  %v16367_v38 = vcombine.high %v3344_v32, %v3352_v33  ;;  %v3432_v17 = vld [vmem:[#allocation17 + $0x1a50] sm:$0xff] }
 0x646   :  { %9247 = vmatpush1.bf16.msra.mxu0 %v16270_v41  ;;  %9384 = vmatmul.mubr.bf16.vlgmr.msra.gmra.mrb[24].mxu1 %v21860_v21  ;;  %v3225_v41 = vld [vmem:[#allocation17 + $0x13d8] sm:$0xff] }
 0x647   :  { %9393 = vmatpush1.bf16.msra.mxu1 %v16128_v18  ;;  %9424 = vmatprep.mubr.bf16.mxu1 %v21862_v25  ;;  %v16366_v18 = vcombine.low %v3344_v32, %v3352_v33  ;;  %v16241_v45 = vcombine.high %v3217_v37, %v3225_v41  ;;  %v3440_v33 = vld [vmem:[#allocation17 + $0x1a90] sm:$0xff] }
 0x648   :  { %9248 = vmatprep.subr.bf16.mxu0 %v16287_v26  ;;  %9394 = vmatprep.subr.bf16.mxu1 %v16145_v43  ;;  %v16224_v26 = vcombine.low %v3201_v34, %v3209_v29  ;;  %v16383_v43 = vcombine.high %v3360_v5, %v3368_v40  ;;  %v3448_v34 = vld [vmem:[#allocation17 + $0x1ad0] sm:$0xff]  ;;  %v3297_v29 = vld [vmem:[#allocation17 + $0x1618] sm:$0xff] }
 0x64a   :  { %9249 = vmatpush1.bf16.msra.mxu0 %v16286_v44  ;;  %v3241_v44 = vld [vmem:[#allocation17 + $0x1458] sm:$0xff] }
 0x64b   :  { %9395 = vmatpush1.bf16.msra.mxu1 %v16144_v47  ;;  %9250 = vmatprep.subr.bf16.mxu0 %v16303_v49  ;;  %v16382_v47 = vcombine.low %v3360_v5, %v3368_v40  ;;  %v16240_v49 = vcombine.low %v3217_v37, %v3225_v41  ;;  %v16257_v53 = vcombine.high %v3233_v56, %v3241_v44  ;;  %v3456_v40 = vld [vmem:[#allocation17 + $0x1b10] sm:$0xff]  ;;  %v3313_v41 = vld [vmem:[#allocation17 + $0x1698] sm:$0xff] }
 0x64c   :  { %9396 = vmatprep.subr.bf16.mxu1 %v16161_v52  ;;  %v16399_v52 = vcombine.high %v3376_v48, %v3384_v30  ;;  %v3464_v37 = vld [vmem:[#allocation17 + $0x1b50] sm:$0xff] }
 0x64e   :  { %9251 = vmatpush1.bf16.msra.mxu0 %v16302_v59  ;;  %v3257_v59 = vld [vmem:[#allocation17 + $0x14d8] sm:$0xff] }
 0x64f   :  { %9397 = vmatpush1.bf16.msra.mxu1 %v16160_v60  ;;  %9252 = vmatprep.subr.bf16.mxu0 %v16319_v62  ;;  %v16398_v60 = vcombine.low %v3376_v48, %v3384_v30  ;;  %v16256_v62 = vcombine.low %v3233_v56, %v3241_v44  ;;  %v16273_v63 = vcombine.high %v3249_v58, %v3257_v59  ;;  %v3472_v56 = vld [vmem:[#allocation17 + $0x1b90] sm:$0xff] }
 0x650   :  { %9398 = vmatprep.subr.bf16.mxu1 %v16177_v12  ;;  %v16415_v12 = vcombine.high %v3392_v54, %v3400_v57  ;;  %v3480_v44 = vld [vmem:[#allocation17 + $0x1bd0] sm:$0xff] }
 0x652   :  { %9253 = vmatpush1.bf16.msra.mxu0 %v16318_v8  ;;  %v3273_v8 = vld [vmem:[#allocation17 + $0x1558] sm:$0xff] }
 0x653   :  { %9399 = vmatpush1.bf16.msra.mxu1 %v16176_v9  ;;  %9254 = vmatprep.subr.bf16.mxu0 %v16335_v11  ;;  %v16414_v9 = vcombine.low %v3392_v54, %v3400_v57  ;;  %v16272_v11 = vcombine.low %v3249_v58, %v3257_v59  ;;  %v16289_v14 = vcombine.high %v3265_v2, %v3273_v8 }
 0x654   :  { %9400 = vmatprep.subr.bf16.mxu1 %v16193_v13  ;;  %v16431_v13 = vcombine.high %v3408_v0, %v3416_v1  ;;  %v16478_v54 = vcombine.low %v3456_v40, %v3464_v37  ;;  %v16495_v59 = vcombine.high %v3472_v56, %v3480_v44 }
 0x656   :  { %9255 = vmatpush1.bf16.msra.mxu0 %v16334_v24  ;;  %v3289_v24 = vld [vmem:[#allocation17 + $0x15d8] sm:$0xff] }
 0x657   :  { %9401 = vmatpush1.bf16.msra.mxu1 %v16192_v27  ;;  %9256 = vmatprep.subr.bf16.mxu0 %v16351_v28  ;;  %v16430_v27 = vcombine.low %v3408_v0, %v3416_v1  ;;  %v16288_v28 = vcombine.low %v3265_v2, %v3273_v8  ;;  %v16305_v32 = vcombine.high %v3281_v23, %v3289_v24  ;;  %v3353_v0 = vld [vmem:[#allocation17 + $0x17d8] sm:$0xff] }
 0x658   :  { %9402 = vmatprep.subr.bf16.mxu1 %v16209_v31  ;;  %v16447_v31 = vcombine.high %v3424_v16, %v3432_v17  ;;  %v16494_v1 = vcombine.low %v3472_v56, %v3480_v44  ;;  %v3417_v56 = vld [vmem:[#allocation17 + $0x19d8] sm:$0xff] }
 0x65a   :  { %9257 = vmatpush1.bf16.msra.mxu0 %v16350_v35  ;;  %v3305_v35 = vld [vmem:[#allocation17 + $0x1658] sm:$0xff] }
 0x65b   :  { %9403 = vmatpush1.bf16.msra.mxu1 %v16208_v36  ;;  %9258 = vmatprep.subr.bf16.mxu0 %v16367_v38  ;;  %v16446_v36 = vcombine.low %v3424_v16, %v3432_v17  ;;  %v16304_v38 = vcombine.low %v3281_v23, %v3289_v24  ;;  %v16321_v5 = vcombine.high %v3297_v29, %v3305_v35  ;;  %v3369_v16 = vld [vmem:[#allocation17 + $0x1858] sm:$0xff] }
 0x65c   :  { %9404 = vmatprep.subr.bf16.mxu1 %v16225_v39  ;;  %v16463_v39 = vcombine.high %v3440_v33, %v3448_v34 }
 0x65e   :  { %9259 = vmatpush1.bf16.msra.mxu0 %v16366_v18  ;;  %v3321_v18 = vld [vmem:[#allocation17 + $0x16d8] sm:$0xff] }
 0x65f   :  { %9405 = vmatpush1.bf16.msra.mxu1 %v16224_v26  ;;  %9269 = vmatprep.subr.bf16.mxu0 %v16383_v43  ;;  %v16462_v26 = vcombine.low %v3440_v33, %v3448_v34  ;;  %v16320_v43 = vcombine.low %v3297_v29, %v3305_v35  ;;  %v16337_v30 = vcombine.high %v3313_v41, %v3321_v18  ;;  %v3385_v33 = vld [vmem:[#allocation17 + $0x18d8] sm:$0xff] }
 0x660   :  { %9406 = vmatprep.subr.bf16.mxu1 %v16241_v45  ;;  %v16479_v45 = vcombine.high %v3456_v40, %v3464_v37  ;;  %v16336_v58 = vcombine.low %v3313_v41, %v3321_v18  ;;  %v3401_v40 = vld [vmem:[#allocation17 + $0x1958] sm:$0xff] }
 0x661   :  { %9261 = vmatmul.mubr.bf16.vlgmr.msra.gmra.mrb[16].mxu0 %v21879_v51 }
 0x662   :  { %9270 = vmatpush1.bf16.msra.mxu0 %v16382_v47  ;;  %9301 = vmatprep.mubr.bf16.mxu0 %v21891_v42 }
 0x663   :  { %9407 = vmatpush1.bf16.msra.mxu1 %v16240_v49  ;;  %9271 = vmatprep.subr.bf16.mxu0 %v16399_v52  ;;  %v3329_v49 = vld [vmem:[#allocation17 + $0x1718] sm:$0xff] }
 0x664   :  { %9408 = vmatprep.subr.bf16.mxu1 %v16257_v53  ;;  %v3337_v52 = vld [vmem:[#allocation17 + $0x1758] sm:$0xff] }
 0x665   :  { %v16352_v2 = vcombine.low %v3329_v49, %v3337_v52 }
 0x666   :  { %9272 = vmatpush1.bf16.msra.mxu0 %v16398_v60  ;;  %v16353_v60 = vcombine.high %v3329_v49, %v3337_v52 }
 0x667   :  { %9409 = vmatpush1.bf16.msra.mxu1 %v16256_v62  ;;  %9273 = vmatprep.subr.bf16.mxu0 %v16415_v12  ;;  %v3488_v62 = vld [vmem:[#allocation17 + $0x1c10] sm:$0xff] }
 0x668   :  { %9410 = vmatprep.subr.bf16.mxu1 %v16273_v63  ;;  %v3496_v12 = vld [vmem:[#allocation17 + $0x1c50] sm:$0xff]  ;;  %v3345_v63 = vld [vmem:[#allocation17 + $0x1798] sm:$0xff] }
 0x669   :  { %v16511_v8 = vcombine.high %v3488_v62, %v3496_v12  ;;  %v16510_v17 = vcombine.low %v3488_v62, %v3496_v12  ;;  %v16368_v23 = vcombine.low %v3345_v63, %v3353_v0 }
 0x66a   :  { %9274 = vmatpush1.bf16.msra.mxu0 %v16414_v9  ;;  %v16369_v9 = vcombine.high %v3345_v63, %v3353_v0  ;;  %v3584_v0 = vld [vmem:[#allocation17 + $0x1f10] sm:$0xff] }
 0x66b   :  { %9411 = vmatpush1.bf16.msra.mxu1 %v16272_v11  ;;  %9275 = vmatprep.subr.bf16.mxu0 %v16431_v13  ;;  %v3504_v11 = vld [vmem:[#allocation17 + $0x1c90] sm:$0xff] }
 0x66c   :  { %9412 = vmatprep.subr.bf16.mxu1 %v16289_v14  ;;  %v3512_v13 = vld [vmem:[#allocation17 + $0x1cd0] sm:$0xff]  ;;  %v3361_v14 = vld [vmem:[#allocation17 + $0x1818] sm:$0xff] }
 0x66d   :  { %v16527_v24 = vcombine.high %v3504_v11, %v3512_v13  ;;  %v16526_v34 = vcombine.low %v3504_v11, %v3512_v13  ;;  %v16384_v29 = vcombine.low %v3361_v14, %v3369_v16 }
 0x66e   :  { %9276 = vmatpush1.bf16.msra.mxu0 %v16430_v27  ;;  %v16385_v27 = vcombine.high %v3361_v14, %v3369_v16  ;;  %v3600_v16 = vld [vmem:[#allocation17 + $0x1f90] sm:$0xff] }
 0x66f   :  { %9413 = vmatpush1.bf16.msra.mxu1 %v16288_v28  ;;  %9277 = vmatprep.subr.bf16.mxu0 %v16447_v31  ;;  %v3520_v28 = vld [vmem:[#allocation17 + $0x1d10] sm:$0xff] }
 0x670   :  { %9414 = vmatprep.subr.bf16.mxu1 %v16305_v32  ;;  %v3528_v31 = vld [vmem:[#allocation17 + $0x1d50] sm:$0xff]  ;;  %v3377_v32 = vld [vmem:[#allocation17 + $0x1898] sm:$0xff] }
 0x671   :  { %v16543_v35 = vcombine.high %v3520_v28, %v3528_v31  ;;  %v16542_v37 = vcombine.low %v3520_v28, %v3528_v31  ;;  %v16400_v41 = vcombine.low %v3377_v32, %v3385_v33 }
 0x672   :  { %9278 = vmatpush1.bf16.msra.mxu0 %v16446_v36  ;;  %v16401_v36 = vcombine.high %v3377_v32, %v3385_v33  ;;  %v2594_v33 = vld [vmem:[#allocation17 + $0x20] sm:$0xff] }
 0x673   :  { %9415 = vmatpush1.bf16.msra.mxu1 %v16304_v38  ;;  %9279 = vmatprep.subr.bf16.mxu0 %v16463_v39  ;;  %v3536_v38 = vld [vmem:[#allocation17 + $0x1d90] sm:$0xff] }
 0x674   :  { %v21911_v48 = vpop.f32.mrb[12].mxu0  ;;  %9416 = vmatprep.subr.bf16.mxu1 %v16321_v5  ;;  %v3544_v39 = vld [vmem:[#allocation17 + $0x1dd0] sm:$0xff]  ;;  %v3393_v5 = vld [vmem:[#allocation17 + $0x1918] sm:$0xff] }
 0x675   :  { %v21913_v47 = vpop.f32.mrb[13].mxu0  ;;  %v16559_v18 = vcombine.high %v3536_v38, %v3544_v39  ;;  %v16558_v44 = vcombine.low %v3536_v38, %v3544_v39  ;;  %v16416_v49 = vcombine.low %v3393_v5, %v3401_v40 }
 0x676   :  { %9280 = vmatpush1.bf16.msra.mxu0 %v16462_v26  ;;  %v8979_v53 = vpop.f32.mrb[14].mxu0  ;;  %v16417_v26 = vcombine.high %v3393_v5, %v3401_v40 }
 0x677   :  { %9417 = vmatpush1.bf16.msra.mxu1 %v16320_v43  ;;  %v8980_v57 = vpop.f32.mrb[15].mxu0  ;;  %9281 = vmatprep.subr.bf16.mxu0 %v16479_v45  ;;  %v3552_v43 = vld [vmem:[#allocation17 + $0x1e10] sm:$0xff] }
 0x678   :  { %9418 = vmatprep.subr.bf16.mxu1 %v16337_v30  ;;  %v3560_v45 = vld [vmem:[#allocation17 + $0x1e50] sm:$0xff]  ;;  %v3409_v30 = vld [vmem:[#allocation17 + $0x1998] sm:$0xff] }
 0x679   :  { %v16575_v52 = vcombine.high %v3552_v43, %v3560_v45  ;;  %v16433_v53 = vcombine.high %v3409_v30, %v3417_v56  ;;  %v3576_v57 = vld [vmem:[#allocation17 + $0x1ed0] sm:$0xff]  ;;  %v16432_v62 = vcombine.low %v3409_v30, %v3417_v56  ;;  %v3497_v30 = vld [vmem:[#allocation17 + $0x1c58] sm:$0xff] }
 0x67a   :  { %9282 = vmatpush1.bf16.msra.mxu0 %v16478_v54  ;;  %v3568_v54 = vld [vmem:[#allocation17 + $0x1e90] sm:$0xff] }
 0x67b   :  { %9419 = vmatpush1.bf16.msra.mxu1 %v16336_v58  ;;  %9283 = vmatprep.subr.bf16.mxu0 %v16495_v59  ;;  %v3425_v58 = vld [vmem:[#allocation17 + $0x1a18] sm:$0xff]  ;;  %v16591_v12 = vcombine.high %v3568_v54, %v3576_v57 }
 0x67c   :  { %9420 = vmatprep.subr.bf16.mxu1 %v16353_v60  ;;  %v3433_v59 = vld [vmem:[#allocation17 + $0x1a58] sm:$0xff]  ;;  %v16574_v60 = vcombine.low %v3552_v43, %v3560_v45  ;;  %v2618_v43 = vld [vmem:[#allocation17 + $0xe0] sm:$0xff] }
 0x67d   :  { %v16449_v63 = vcombine.high %v3425_v58, %v3433_v59  ;;  %v16448_v11 = vcombine.low %v3425_v58, %v3433_v59  ;;  %v3489_v45 = vld [vmem:[#allocation17 + $0x1c18] sm:$0xff] }
 0x67e   :  { %9284 = vmatpush1.bf16.msra.mxu0 %v16494_v1  ;;  %v3592_v1 = vld [vmem:[#allocation17 + $0x1f50] sm:$0xff]  ;;  %v3513_v58 = vld [vmem:[#allocation17 + $0x1cd8] sm:$0xff] }
 0x67f   :  { %9421 = vmatpush1.bf16.msra.mxu1 %v16352_v2  ;;  %9285 = vmatprep.subr.bf16.mxu0 %v16511_v8  ;;  %v3441_v2 = vld [vmem:[#allocation17 + $0x1a98] sm:$0xff]  ;;  %v16607_v13 = vcombine.high %v3584_v0, %v3592_v1 }
 0x680   :  { %9422 = vmatprep.subr.bf16.mxu1 %v16369_v9  ;;  %v3449_v8 = vld [vmem:[#allocation17 + $0x1ad8] sm:$0xff]  ;;  %v16590_v9 = vcombine.low %v3568_v54, %v3576_v57  ;;  %v2634_v54 = vld [vmem:[#allocation17 + $0x160] sm:$0xff] }
 0x681   :  { %v16465_v14 = vcombine.high %v3441_v2, %v3449_v8  ;;  %v16464_v28 = vcombine.low %v3441_v2, %v3449_v8  ;;  %v3505_v57 = vld [vmem:[#allocation17 + $0x1c98] sm:$0xff] }
 0x682   :  { %9286 = vmatpush1.bf16.msra.mxu0 %v16510_v17  ;;  %v3608_v17 = vld [vmem:[#allocation17 + $0x1fd0] sm:$0xff]  ;;  %v3529_v2 = vld [vmem:[#allocation17 + $0x1d58] sm:$0xff] }
 0x683   :  { %9423 = vmatpush1.bf16.msra.mxu1 %v16368_v23  ;;  %9287 = vmatprep.subr.bf16.mxu0 %v16527_v24  ;;  %v3457_v23 = vld [vmem:[#allocation17 + $0x1b18] sm:$0xff]  ;;  %v16623_v31 = vcombine.high %v3600_v16, %v3608_v17  ;;  %v16622_v39 = vcombine.low %v3600_v16, %v3608_v17  ;;  %v2666_v16 = vld [vmem:[#allocation17 + $0x260] sm:$0xff] }
 0x684   :  { %9433 = vmatprep.subr.bf16.mxu1 %v16385_v27  ;;  %v3465_v24 = vld [vmem:[#allocation17 + $0x1b58] sm:$0xff]  ;;  %v16606_v27 = vcombine.low %v3584_v0, %v3592_v1  ;;  %v2650_v0 = vld [vmem:[#allocation17 + $0x1e0] sm:$0xff] }
 0x685   :  { %v16481_v32 = vcombine.high %v3457_v23, %v3465_v24  ;;  %v16480_v40 = vcombine.low %v3457_v23, %v3465_v24  ;;  %v3521_v1 = vld [vmem:[#allocation17 + $0x1d18] sm:$0xff] }
 0x686   :  { %9288 = vmatpush1.bf16.msra.mxu0 %v16526_v34  ;;  %9425 = vmatmul.mubr.bf16.vlgmr.msra.gmra.mrb[24].mxu1 %v21879_v51  ;;  %v2602_v34 = vld [vmem:[#allocation17 + $0x60] sm:$0xff]  ;;  %v3537_v17 = vld [vmem:[#allocation17 + $0x1d98] sm:$0xff] }
 0x687   :  { %9434 = vmatpush1.bf16.msra.mxu1 %v16384_v29  ;;  %9465 = vmatprep.mubr.bf16.mxu1 %v21891_v42  ;;  %v15618_v56 = vcombine.low %v2594_v33, %v2602_v34  ;;  %v3545_v23 = vld [vmem:[#allocation17 + $0x1dd8] sm:$0xff] }
 0x688   :  { %9289 = vmatprep.subr.bf16.mxu0 %v16543_v35  ;;  %9435 = vmatprep.subr.bf16.mxu1 %v16401_v36  ;;  %v3473_v35 = vld [vmem:[#allocation17 + $0x1b98] sm:$0xff] }
 0x689   :  { %v3481_v36 = vld [vmem:[#allocation17 + $0x1bd8] sm:$0xff] }
 0x68a   :  { %9290 = vmatpush1.bf16.msra.mxu0 %v16542_v37  ;;  %v15619_v37 = vcombine.high %v2594_v33, %v2602_v34  ;;  %v2682_v33 = vld [vmem:[#allocation17 + $0x2e0] sm:$0xff]  ;;  %v3553_v34 = vld [vmem:[#allocation17 + $0x1e18] sm:$0xff] }
 0x68b   :  { %9436 = vmatpush1.bf16.msra.mxu1 %v16400_v41  ;;  %9291 = vmatprep.subr.bf16.mxu0 %v16559_v18  ;;  %v16497_v18 = vcombine.high %v3473_v35, %v3481_v36 }
 0x68c   :  { %9437 = vmatprep.subr.bf16.mxu1 %v16417_v26  ;;  %v2610_v26 = vld [vmem:[#allocation17 + $0xa0] sm:$0xff] }
 0x68d   :  { %v15634_v59 = vcombine.low %v2610_v26, %v2618_v43 }
 0x68e   :  { %9292 = vmatpush1.bf16.msra.mxu0 %v16558_v44  ;;  %v16496_v44 = vcombine.low %v3473_v35, %v3481_v36  ;;  %v3561_v35 = vld [vmem:[#allocation17 + $0x1e58] sm:$0xff] }
 0x68f   :  { %9438 = vmatpush1.bf16.msra.mxu1 %v16416_v49  ;;  %9293 = vmatprep.subr.bf16.mxu0 %v16575_v52  ;;  %v15635_v49 = vcombine.high %v2610_v26, %v2618_v43  ;;  %v16513_v52 = vcombine.high %v3489_v45, %v3497_v30  ;;  %v3577_v26 = vld [vmem:[#allocation17 + $0x1ed8] sm:$0xff] }
 0x690   :  { %9439 = vmatprep.subr.bf16.mxu1 %v16433_v53  ;;  %v2626_v53 = vld [vmem:[#allocation17 + $0x120] sm:$0xff] }
 0x691   :  { %v15650_v8 = vcombine.low %v2626_v53, %v2634_v54 }
 0x692   :  { %9294 = vmatpush1.bf16.msra.mxu0 %v16574_v60  ;;  %v16512_v60 = vcombine.low %v3489_v45, %v3497_v30  ;;  %v16576_v45 = vcombine.low %v3553_v34, %v3561_v35 }
 0x693   :  { %9440 = vmatpush1.bf16.msra.mxu1 %v16432_v62  ;;  %9295 = vmatprep.subr.bf16.mxu0 %v16591_v12  ;;  %v15651_v62 = vcombine.high %v2626_v53, %v2634_v54  ;;  %v16529_v12 = vcombine.high %v3505_v57, %v3513_v58  ;;  %v3593_v53 = vld [vmem:[#allocation17 + $0x1f58] sm:$0xff] }
 0x694   :  { %9441 = vmatprep.subr.bf16.mxu1 %v16449_v63  ;;  %v2642_v63 = vld [vmem:[#allocation17 + $0x1a0] sm:$0xff] }
 0x695   :  { %v15666_v24 = vcombine.low %v2642_v63, %v2650_v0 }
 0x696   :  { %9296 = vmatpush1.bf16.msra.mxu0 %v16590_v9  ;;  %v16528_v9 = vcombine.low %v3505_v57, %v3513_v58 }
 0x697   :  { %9442 = vmatpush1.bf16.msra.mxu1 %v16448_v11  ;;  %9297 = vmatprep.subr.bf16.mxu0 %v16607_v13  ;;  %v15667_v11 = vcombine.high %v2642_v63, %v2650_v0  ;;  %v16545_v13 = vcombine.high %v3521_v1, %v3529_v2  ;;  %v3609_v63 = vld [vmem:[#allocation17 + $0x1fd8] sm:$0xff] }
 0x698   :  { %9443 = vmatprep.subr.bf16.mxu1 %v16465_v14  ;;  %v2658_v14 = vld [vmem:[#allocation17 + $0x220] sm:$0xff] }
 0x699   :  { %v21917_v29 = vpop.f32.mrb[20].mxu1  ;;  %v15682_v36 = vcombine.low %v2658_v14, %v2666_v16 }
 0x69a   :  { %v21919_v38 = vpop.f32.mrb[21].mxu1  ;;  %9298 = vmatpush1.bf16.msra.mxu0 %v16606_v27  ;;  %v16544_v27 = vcombine.low %v3521_v1, %v3529_v2 }
 0x69b   :  { %v9143_v5 = vpop.f32.mrb[22].mxu1  ;;  %9444 = vmatpush1.bf16.msra.mxu1 %v16464_v28  ;;  %9299 = vmatprep.subr.bf16.mxu0 %v16623_v31  ;;  %v15683_v28 = vcombine.high %v2658_v14, %v2666_v16  ;;  %v16561_v31 = vcombine.high %v3537_v17, %v3545_v23  ;;  %v2603_v14 = vld [vmem:[#allocation17 + $0x68] sm:$0xff] }
 0x69c   :  { %v9144_v41 = vpop.f32.mrb[23].mxu1  ;;  %9445 = vmatprep.subr.bf16.mxu1 %v16481_v32  ;;  %v2674_v32 = vld [vmem:[#allocation17 + $0x2a0] sm:$0xff] }
 0x69d   :  { %v15699_v5 = vcombine.high %v2674_v32, %v2682_v33  ;;  %v2698_v41 = vld [vmem:[#allocation17 + $0x360] sm:$0xff]  ;;  %v15698_v43 = vcombine.low %v2674_v32, %v2682_v33  ;;  %v2619_v32 = vld [vmem:[#allocation17 + $0xe8] sm:$0xff] }
 0x69e   :  { %9300 = vmatpush1.bf16.msra.mxu0 %v16622_v39  ;;  %v16560_v39 = vcombine.low %v3537_v17, %v3545_v23 }
 0x69f   :  { %9446 = vmatpush1.bf16.msra.mxu1 %v16480_v40  ;;  %9474 = vmatprep.subr.bf16.mxu0 %v15619_v37  ;;  %v16577_v40 = vcombine.high %v3553_v34, %v3561_v35  ;;  %v2690_v37 = vld [vmem:[#allocation17 + $0x320] sm:$0xff] }
 0x6a0   :  { %9447 = vmatprep.subr.bf16.mxu1 %v16497_v18  ;;  %v3569_v18 = vld [vmem:[#allocation17 + $0x1e98] sm:$0xff]  ;;  %v15715_v30 = vcombine.high %v2690_v37, %v2698_v41  ;;  %v15714_v54 = vcombine.low %v2690_v37, %v2698_v41  ;;  %v2635_v37 = vld [vmem:[#allocation17 + $0x168] sm:$0xff] }
 0x6a1   :  { %9302 = vmatmul.mubr.bf16.vlgmr.msra.gmra.mrb[16].mxu0 %v21893_v19  ;;  %v16592_v57 = vcombine.low %v3569_v18, %v3577_v26 }
 0x6a2   :  { %9475 = vmatpush1.bf16.msra.mxu0 %v15618_v56  ;;  %9506 = vmatprep.mubr.bf16.mxu0 %v21832_v20  ;;  %v16593_v56 = vcombine.high %v3569_v18, %v3577_v26 }
 0x6a3   :  { %9448 = vmatpush1.bf16.msra.mxu1 %v16496_v44  ;;  %9476 = vmatprep.subr.bf16.mxu0 %v15635_v49  ;;  %v2706_v44 = vld [vmem:[#allocation17 + $0x3a0] sm:$0xff] }
 0x6a4   :  { %9449 = vmatprep.subr.bf16.mxu1 %v16513_v52  ;;  %v2714_v49 = vld [vmem:[#allocation17 + $0x3e0] sm:$0xff]  ;;  %v3585_v52 = vld [vmem:[#allocation17 + $0x1f18] sm:$0xff] }
 0x6a5   :  { %v15731_v58 = vcombine.high %v2706_v44, %v2714_v49  ;;  %v15730_v0 = vcombine.low %v2706_v44, %v2714_v49  ;;  %v16608_v1 = vcombine.low %v3585_v52, %v3593_v53  ;;  %v2651_v44 = vld [vmem:[#allocation17 + $0x1e8] sm:$0xff] }
 0x6a6   :  { %9477 = vmatpush1.bf16.msra.mxu0 %v15634_v59  ;;  %v16609_v59 = vcombine.high %v3585_v52, %v3593_v53 }
 0x6a7   :  { %9450 = vmatpush1.bf16.msra.mxu1 %v16512_v60  ;;  %9478 = vmatprep.subr.bf16.mxu0 %v15651_v62  ;;  %v2722_v60 = vld [vmem:[#allocation17 + $0x420] sm:$0xff] }
 0x6a8   :  { %9451 = vmatprep.subr.bf16.mxu1 %v16529_v12  ;;  %v2730_v62 = vld [vmem:[#allocation17 + $0x460] sm:$0xff]  ;;  %v3601_v12 = vld [vmem:[#allocation17 + $0x1f98] sm:$0xff] }
 0x6a9   :  { %v15747_v2 = vcombine.high %v2722_v60, %v2730_v62  ;;  %v15746_v16 = vcombine.low %v2722_v60, %v2730_v62  ;;  %v16624_v17 = vcombine.low %v3601_v12, %v3609_v63  ;;  %v2667_v60 = vld [vmem:[#allocation17 + $0x268] sm:$0xff] }
 0x6aa   :  { %9479 = vmatpush1.bf16.msra.mxu0 %v15650_v8  ;;  %v16625_v8 = vcombine.high %v3601_v12, %v3609_v63 }
 0x6ab   :  { %9452 = vmatpush1.bf16.msra.mxu1 %v16528_v9  ;;  %9480 = vmatprep.subr.bf16.mxu0 %v15667_v11  ;;  %v2738_v9 = vld [vmem:[#allocation17 + $0x4a0] sm:$0xff] }
 0x6ac   :  { %9453 = vmatprep.subr.bf16.mxu1 %v16545_v13  ;;  %v2746_v11 = vld [vmem:[#allocation17 + $0x4e0] sm:$0xff]  ;;  %v2595_v13 = vld [vmem:[#allocation17 + $0x28] sm:$0xff] }
 0x6ad   :  { %v15763_v23 = vcombine.high %v2738_v9, %v2746_v11  ;;  %v15762_v33 = vcombine.low %v2738_v9, %v2746_v11  ;;  %v15620_v34 = vcombine.low %v2595_v13, %v2603_v14  ;;  %v2683_v9 = vld [vmem:[#allocation17 + $0x2e8] sm:$0xff] }
 0x6ae   :  { %9481 = vmatpush1.bf16.msra.mxu0 %v15666_v24  ;;  %v15621_v24 = vcombine.high %v2595_v13, %v2603_v14 }
 0x6af   :  { %9454 = vmatpush1.bf16.msra.mxu1 %v16544_v27  ;;  %9482 = vmatprep.subr.bf16.mxu0 %v15683_v28  ;;  %v2754_v27 = vld [vmem:[#allocation17 + $0x520] sm:$0xff] }
 0x6b0   :  { %9455 = vmatprep.subr.bf16.mxu1 %v16561_v31  ;;  %v2762_v28 = vld [vmem:[#allocation17 + $0x560] sm:$0xff]  ;;  %v2611_v31 = vld [vmem:[#allocation17 + $0xa8] sm:$0xff] }
 0x6b1   :  { %v15779_v35 = vcombine.high %v2754_v27, %v2762_v28  ;;  %v15778_v41 = vcombine.low %v2754_v27, %v2762_v28  ;;  %v15636_v18 = vcombine.low %v2611_v31, %v2619_v32  ;;  %v2699_v27 = vld [vmem:[#allocation17 + $0x368] sm:$0xff] }
 0x6b2   :  { %9483 = vmatpush1.bf16.msra.mxu0 %v15682_v36  ;;  %v15637_v36 = vcombine.high %v2611_v31, %v2619_v32 }
 0x6b3   :  { %9456 = vmatpush1.bf16.msra.mxu1 %v16560_v39  ;;  %9484 = vmatprep.subr.bf16.mxu0 %v15699_v5  ;;  %v2770_v39 = vld [vmem:[#allocation17 + $0x5a0] sm:$0xff] }
 0x6b4   :  { %9457 = vmatprep.subr.bf16.mxu1 %v16577_v40  ;;  %v2778_v5 = vld [vmem:[#allocation17 + $0x5e0] sm:$0xff]  ;;  %v2627_v40 = vld [vmem:[#allocation17 + $0x128] sm:$0xff] }
 0x6b5   :  { %v15795_v26 = vcombine.high %v2770_v39, %v2778_v5  ;;  %v15794_v49 = vcombine.low %v2770_v39, %v2778_v5  ;;  %v15652_v52 = vcombine.low %v2627_v40, %v2635_v37  ;;  %v2715_v39 = vld [vmem:[#allocation17 + $0x3e8] sm:$0xff] }
 0x6b6   :  { %9485 = vmatpush1.bf16.msra.mxu0 %v15698_v43  ;;  %v15653_v43 = vcombine.high %v2627_v40, %v2635_v37 }
 0x6b7   :  { %9458 = vmatpush1.bf16.msra.mxu1 %v16576_v45  ;;  %9486 = vmatprep.subr.bf16.mxu0 %v15715_v30  ;;  %v2786_v45 = vld [vmem:[#allocation17 + $0x620] sm:$0xff] }
 0x6b8   :  { %9459 = vmatprep.subr.bf16.mxu1 %v16593_v56  ;;  %v2794_v30 = vld [vmem:[#allocation17 + $0x660] sm:$0xff]  ;;  %v2643_v56 = vld [vmem:[#allocation17 + $0x1a8] sm:$0xff] }
 0x6b9   :  { %v15811_v53 = vcombine.high %v2786_v45, %v2794_v30  ;;  %v15810_v62 = vcombine.low %v2786_v45, %v2794_v30  ;;  %v15668_v12 = vcombine.low %v2643_v56, %v2651_v44  ;;  %v2731_v45 = vld [vmem:[#allocation17 + $0x468] sm:$0xff] }
 0x6ba   :  { %9487 = vmatpush1.bf16.msra.mxu0 %v15714_v54  ;;  %v15669_v54 = vcombine.high %v2643_v56, %v2651_v44 }
 0x6bb   :  { %9460 = vmatpush1.bf16.msra.mxu1 %v16592_v57  ;;  %9488 = vmatprep.subr.bf16.mxu0 %v15731_v58  ;;  %v2802_v57 = vld [vmem:[#allocation17 + $0x6a0] sm:$0xff] }
 0x6bc   :  { %9461 = vmatprep.subr.bf16.mxu1 %v16609_v59  ;;  %v2810_v58 = vld [vmem:[#allocation17 + $0x6e0] sm:$0xff]  ;;  %v2659_v59 = vld [vmem:[#allocation17 + $0x228] sm:$0xff] }
 0x6bd   :  { %v15827_v63 = vcombine.high %v2802_v57, %v2810_v58  ;;  %v15826_v11 = vcombine.low %v2802_v57, %v2810_v58  ;;  %v15684_v13 = vcombine.low %v2659_v59, %v2667_v60  ;;  %v2747_v57 = vld [vmem:[#allocation17 + $0x4e8] sm:$0xff] }
 0x6be   :  { %9489 = vmatpush1.bf16.msra.mxu0 %v15730_v0  ;;  %v15685_v0 = vcombine.high %v2659_v59, %v2667_v60 }
 0x6bf   :  { %9462 = vmatpush1.bf16.msra.mxu1 %v16608_v1  ;;  %9490 = vmatprep.subr.bf16.mxu0 %v15747_v2  ;;  %v2818_v1 = vld [vmem:[#allocation17 + $0x720] sm:$0xff] }
 0x6c0   :  { %9463 = vmatprep.subr.bf16.mxu1 %v16625_v8  ;;  %v2826_v2 = vld [vmem:[#allocation17 + $0x760] sm:$0xff]  ;;  %v2675_v8 = vld [vmem:[#allocation17 + $0x2a8] sm:$0xff] }
 0x6c1   :  { %v15843_v14 = vcombine.high %v2818_v1, %v2826_v2  ;;  %v15842_v28 = vcombine.low %v2818_v1, %v2826_v2  ;;  %v15700_v31 = vcombine.low %v2675_v8, %v2683_v9  ;;  %v2763_v1 = vld [vmem:[#allocation17 + $0x568] sm:$0xff] }
 0x6c2   :  { %9491 = vmatpush1.bf16.msra.mxu0 %v15746_v16  ;;  %v15701_v16 = vcombine.high %v2675_v8, %v2683_v9 }
 0x6c3   :  { %9464 = vmatpush1.bf16.msra.mxu1 %v16624_v17  ;;  %9492 = vmatprep.subr.bf16.mxu0 %v15763_v23  ;;  %v2834_v17 = vld [vmem:[#allocation17 + $0x7a0] sm:$0xff] }
 0x6c4   :  { %9638 = vmatprep.subr.bf16.mxu1 %v15621_v24  ;;  %v2842_v23 = vld [vmem:[#allocation17 + $0x7e0] sm:$0xff]  ;;  %v2691_v24 = vld [vmem:[#allocation17 + $0x328] sm:$0xff] }
 0x6c5   :  { %v15859_v32 = vcombine.high %v2834_v17, %v2842_v23  ;;  %v15858_v5 = vcombine.low %v2834_v17, %v2842_v23  ;;  %v15716_v40 = vcombine.low %v2691_v24, %v2699_v27  ;;  %v2779_v17 = vld [vmem:[#allocation17 + $0x5e8] sm:$0xff] }
 0x6c6   :  { %9466 = vmatmul.mubr.bf16.vlgmr.msra.gmra.mrb[24].mxu1 %v21893_v19  ;;  %9493 = vmatpush1.bf16.msra.mxu0 %v15762_v33  ;;  %v15717_v33 = vcombine.high %v2691_v24, %v2699_v27 }
 0x6c7   :  { %9639 = vmatpush1.bf16.msra.mxu1 %v15620_v34  ;;  %9670 = vmatprep.mubr.bf16.mxu1 %v21832_v20  ;;  %v2850_v34 = vld [vmem:[#allocation17 + $0x820] sm:$0xff] }
 0x6c8   :  { %9494 = vmatprep.subr.bf16.mxu0 %v15779_v35  ;;  %9640 = vmatprep.subr.bf16.mxu1 %v15637_v36  ;;  %v2858_v35 = vld [vmem:[#allocation17 + $0x860] sm:$0xff]  ;;  %v2707_v36 = vld [vmem:[#allocation17 + $0x3a8] sm:$0xff] }
 0x6c9   :  { %v15875_v37 = vcombine.high %v2850_v34, %v2858_v35  ;;  %v15874_v30 = vcombine.low %v2850_v34, %v2858_v35  ;;  %v15732_v56 = vcombine.low %v2707_v36, %v2715_v39  ;;  %v2795_v34 = vld [vmem:[#allocation17 + $0x668] sm:$0xff] }
 0x6ca   :  { %9495 = vmatpush1.bf16.msra.mxu0 %v15778_v41  ;;  %v15733_v41 = vcombine.high %v2707_v36, %v2715_v39 }
 0x6cb   :  { %9641 = vmatpush1.bf16.msra.mxu1 %v15636_v18  ;;  %9496 = vmatprep.subr.bf16.mxu0 %v15795_v26  ;;  %v2866_v18 = vld [vmem:[#allocation17 + $0x8a0] sm:$0xff] }
 0x6cc   :  { %9642 = vmatprep.subr.bf16.mxu1 %v15653_v43  ;;  %v2874_v26 = vld [vmem:[#allocation17 + $0x8e0] sm:$0xff]  ;;  %v2723_v43 = vld [vmem:[#allocation17 + $0x428] sm:$0xff] }
 0x6cd   :  { %v15891_v44 = vcombine.high %v2866_v18, %v2874_v26  ;;  %v15890_v58 = vcombine.low %v2866_v18, %v2874_v26  ;;  %v15748_v59 = vcombine.low %v2723_v43, %v2731_v45  ;;  %v2811_v18 = vld [vmem:[#allocation17 + $0x6e8] sm:$0xff] }
 0x6ce   :  { %9497 = vmatpush1.bf16.msra.mxu0 %v15794_v49  ;;  %v15749_v49 = vcombine.high %v2723_v43, %v2731_v45 }
 0x6cf   :  { %9643 = vmatpush1.bf16.msra.mxu1 %v15652_v52  ;;  %9498 = vmatprep.subr.bf16.mxu0 %v15811_v53  ;;  %v2882_v52 = vld [vmem:[#allocation17 + $0x920] sm:$0xff] }
 0x6d0   :  { %9644 = vmatprep.subr.bf16.mxu1 %v15669_v54  ;;  %v2890_v53 = vld [vmem:[#allocation17 + $0x960] sm:$0xff]  ;;  %v2739_v54 = vld [vmem:[#allocation17 + $0x4a8] sm:$0xff] }
 0x6d1   :  { %v15907_v60 = vcombine.high %v2882_v52, %v2890_v53  ;;  %v15906_v2 = vcombine.low %v2882_v52, %v2890_v53  ;;  %v15764_v8 = vcombine.low %v2739_v54, %v2747_v57  ;;  %v2827_v52 = vld [vmem:[#allocation17 + $0x768] sm:$0xff] }
 0x6d2   :  { %9499 = vmatpush1.bf16.msra.mxu0 %v15810_v62  ;;  %v15765_v62 = vcombine.high %v2739_v54, %v2747_v57 }
 0x6d3   :  { %9645 = vmatpush1.bf16.msra.mxu1 %v15668_v12  ;;  %9500 = vmatprep.subr.bf16.mxu0 %v15827_v63  ;;  %v2898_v12 = vld [vmem:[#allocation17 + $0x9a0] sm:$0xff] }
 0x6d4   :  { %9646 = vmatprep.subr.bf16.mxu1 %v15685_v0  ;;  %v2906_v63 = vld [vmem:[#allocation17 + $0x9e0] sm:$0xff]  ;;  %v2755_v0 = vld [vmem:[#allocation17 + $0x528] sm:$0xff] }
 0x6d5   :  { %v15923_v9 = vcombine.high %v2898_v12, %v2906_v63  ;;  %v15922_v23 = vcombine.low %v2898_v12, %v2906_v63  ;;  %v15780_v24 = vcombine.low %v2755_v0, %v2763_v1  ;;  %v2843_v12 = vld [vmem:[#allocation17 + $0x7e8] sm:$0xff] }
 0x6d6   :  { %9501 = vmatpush1.bf16.msra.mxu0 %v15826_v11  ;;  %v15781_v11 = vcombine.high %v2755_v0, %v2763_v1 }
 0x6d7   :  { %9647 = vmatpush1.bf16.msra.mxu1 %v15684_v13  ;;  %9502 = vmatprep.subr.bf16.mxu0 %v15843_v14  ;;  %v2914_v13 = vld [vmem:[#allocation17 + $0xa20] sm:$0xff] }
 0x6d8   :  { %9648 = vmatprep.subr.bf16.mxu1 %v15701_v16  ;;  %v2922_v14 = vld [vmem:[#allocation17 + $0xa60] sm:$0xff]  ;;  %v2771_v16 = vld [vmem:[#allocation17 + $0x5a8] sm:$0xff] }
 0x6d9   :  { %v15939_v27 = vcombine.high %v2914_v13, %v2922_v14  ;;  %v15938_v35 = vcombine.low %v2914_v13, %v2922_v14  ;;  %v15796_v36 = vcombine.low %v2771_v16, %v2779_v17  ;;  %v2859_v13 = vld [vmem:[#allocation17 + $0x868] sm:$0xff] }
 0x6da   :  { %9503 = vmatpush1.bf16.msra.mxu0 %v15842_v28  ;;  %v15797_v28 = vcombine.high %v2771_v16, %v2779_v17 }
 0x6db   :  { %9649 = vmatpush1.bf16.msra.mxu1 %v15700_v31  ;;  %9504 = vmatprep.subr.bf16.mxu0 %v15859_v32  ;;  %v2930_v31 = vld [vmem:[#allocation17 + $0xaa0] sm:$0xff] }
 0x6dc   :  { %9650 = vmatprep.subr.bf16.mxu1 %v15717_v33  ;;  %v2938_v32 = vld [vmem:[#allocation17 + $0xae0] sm:$0xff]  ;;  %v2787_v33 = vld [vmem:[#allocation17 + $0x628] sm:$0xff] }
 0x6dd   :  { %v15955_v39 = vcombine.high %v2930_v31, %v2938_v32  ;;  %v15954_v26 = vcombine.low %v2930_v31, %v2938_v32  ;;  %v15812_v43 = vcombine.low %v2787_v33, %v2795_v34  ;;  %v2875_v31 = vld [vmem:[#allocation17 + $0x8e8] sm:$0xff] }
 0x6de   :  { %9505 = vmatpush1.bf16.msra.mxu0 %v15858_v5  ;;  %v15813_v5 = vcombine.high %v2787_v33, %v2795_v34 }
 0x6df   :  { %9651 = vmatpush1.bf16.msra.mxu1 %v15716_v40  ;;  %9515 = vmatprep.subr.bf16.mxu0 %v15875_v37  ;;  %v2946_v40 = vld [vmem:[#allocation17 + $0xb20] sm:$0xff] }
 0x6e0   :  { %9652 = vmatprep.subr.bf16.mxu1 %v15733_v41  ;;  %v2954_v37 = vld [vmem:[#allocation17 + $0xb60] sm:$0xff]  ;;  %v2803_v41 = vld [vmem:[#allocation17 + $0x6a8] sm:$0xff] }
 0x6e1   :  { %9507 = vmatmul.mubr.bf16.vlgmr.msra.gmra.mrb[20].mxu0 %v21834_v22  ;;  %v15971_v45 = vcombine.high %v2946_v40, %v2954_v37  ;;  %v15970_v53 = vcombine.low %v2946_v40, %v2954_v37  ;;  %v15828_v54 = vcombine.low %v2803_v41, %v2811_v18  ;;  %v2891_v40 = vld [vmem:[#allocation17 + $0x968] sm:$0xff] }
 0x6e2   :  { %9516 = vmatpush1.bf16.msra.mxu0 %v15874_v30  ;;  %9547 = vmatprep.mubr.bf16.mxu0 %v21858_v61  ;;  %v15829_v30 = vcombine.high %v2803_v41, %v2811_v18 }
 0x6e3   :  { %9653 = vmatpush1.bf16.msra.mxu1 %v15732_v56  ;;  %9517 = vmatprep.subr.bf16.mxu0 %v15891_v44  ;;  %v2962_v56 = vld [vmem:[#allocation17 + $0xba0] sm:$0xff] }
 0x6e4   :  { %9654 = vmatprep.subr.bf16.mxu1 %v15749_v49  ;;  %v2970_v44 = vld [vmem:[#allocation17 + $0xbe0] sm:$0xff]  ;;  %v2819_v49 = vld [vmem:[#allocation17 + $0x728] sm:$0xff] }
 0x6e5   :  { %v15987_v57 = vcombine.high %v2962_v56, %v2970_v44  ;;  %v15986_v63 = vcombine.low %v2962_v56, %v2970_v44  ;;  %v15844_v0 = vcombine.low %v2819_v49, %v2827_v52  ;;  %v2907_v56 = vld [vmem:[#allocation17 + $0x9e8] sm:$0xff] }
 0x6e6   :  { %9518 = vmatpush1.bf16.msra.mxu0 %v15890_v58  ;;  %v15845_v58 = vcombine.high %v2819_v49, %v2827_v52 }
 0x6e7   :  { %9655 = vmatpush1.bf16.msra.mxu1 %v15748_v59  ;;  %9519 = vmatprep.subr.bf16.mxu0 %v15907_v60  ;;  %v2978_v59 = vld [vmem:[#allocation17 + $0xc20] sm:$0xff] }
 0x6e8   :  { %9656 = vmatprep.subr.bf16.mxu1 %v15765_v62  ;;  %v2986_v60 = vld [vmem:[#allocation17 + $0xc60] sm:$0xff]  ;;  %v2835_v62 = vld [vmem:[#allocation17 + $0x7a8] sm:$0xff] }
 0x6e9   :  { %v16003_v1 = vcombine.high %v2978_v59, %v2986_v60  ;;  %v16002_v14 = vcombine.low %v2978_v59, %v2986_v60  ;;  %v15860_v16 = vcombine.low %v2835_v62, %v2843_v12  ;;  %v2923_v59 = vld [vmem:[#allocation17 + $0xa68] sm:$0xff] }
 0x6ea   :  { %9520 = vmatpush1.bf16.msra.mxu0 %v15906_v2  ;;  %v15861_v2 = vcombine.high %v2835_v62, %v2843_v12 }
 0x6eb   :  { %9657 = vmatpush1.bf16.msra.mxu1 %v15764_v8  ;;  %9521 = vmatprep.subr.bf16.mxu0 %v15923_v9  ;;  %v2994_v8 = vld [vmem:[#allocation17 + $0xca0] sm:$0xff] }
 0x6ec   :  { %9658 = vmatprep.subr.bf16.mxu1 %v15781_v11  ;;  %v3002_v9 = vld [vmem:[#allocation17 + $0xce0] sm:$0xff]  ;;  %v2851_v11 = vld [vmem:[#allocation17 + $0x828] sm:$0xff] }
 0x6ed   :  { %v16019_v17 = vcombine.high %v2994_v8, %v3002_v9  ;;  %v16018_v32 = vcombine.low %v2994_v8, %v3002_v9  ;;  %v15876_v33 = vcombine.low %v2851_v11, %v2859_v13  ;;  %v2939_v8 = vld [vmem:[#allocation17 + $0xae8] sm:$0xff] }
 0x6ee   :  { %9522 = vmatpush1.bf16.msra.mxu0 %v15922_v23  ;;  %v15877_v23 = vcombine.high %v2851_v11, %v2859_v13 }
 0x6ef   :  { %9659 = vmatpush1.bf16.msra.mxu1 %v15780_v24  ;;  %9523 = vmatprep.subr.bf16.mxu0 %v15939_v27  ;;  %v3010_v24 = vld [vmem:[#allocation17 + $0xd20] sm:$0xff] }
 0x6f0   :  { %9660 = vmatprep.subr.bf16.mxu1 %v15797_v28  ;;  %v3018_v27 = vld [vmem:[#allocation17 + $0xd60] sm:$0xff]  ;;  %v2867_v28 = vld [vmem:[#allocation17 + $0x8a8] sm:$0xff] }
 0x6f1   :  { %v16035_v34 = vcombine.high %v3010_v24, %v3018_v27  ;;  %v16034_v37 = vcombine.low %v3010_v24, %v3018_v27  ;;  %v15892_v41 = vcombine.low %v2867_v28, %v2875_v31  ;;  %v2955_v24 = vld [vmem:[#allocation17 + $0xb68] sm:$0xff] }
 0x6f2   :  { %9524 = vmatpush1.bf16.msra.mxu0 %v15938_v35  ;;  %v15893_v35 = vcombine.high %v2867_v28, %v2875_v31 }
 0x6f3   :  { %9661 = vmatpush1.bf16.msra.mxu1 %v15796_v36  ;;  %9525 = vmatprep.subr.bf16.mxu0 %v15955_v39  ;;  %v3026_v36 = vld [vmem:[#allocation17 + $0xda0] sm:$0xff] }
 0x6f4   :  { %9662 = vmatprep.subr.bf16.mxu1 %v15813_v5  ;;  %v3034_v39 = vld [vmem:[#allocation17 + $0xde0] sm:$0xff]  ;;  %v2883_v5 = vld [vmem:[#allocation17 + $0x928] sm:$0xff] }
 0x6f5   :  { %v16051_v18 = vcombine.high %v3026_v36, %v3034_v39  ;;  %v16050_v44 = vcombine.low %v3026_v36, %v3034_v39  ;;  %v15908_v49 = vcombine.low %v2883_v5, %v2891_v40  ;;  %v2971_v36 = vld [vmem:[#allocation17 + $0xbe8] sm:$0xff] }
 0x6f6   :  { %9526 = vmatpush1.bf16.msra.mxu0 %v15954_v26  ;;  %v15909_v26 = vcombine.high %v2883_v5, %v2891_v40 }
 0x6f7   :  { %9663 = vmatpush1.bf16.msra.mxu1 %v15812_v43  ;;  %9527 = vmatprep.subr.bf16.mxu0 %v15971_v45  ;;  %v3042_v43 = vld [vmem:[#allocation17 + $0xe20] sm:$0xff] }
 0x6f8   :  { %9664 = vmatprep.subr.bf16.mxu1 %v15829_v30  ;;  %v3050_v45 = vld [vmem:[#allocation17 + $0xe60] sm:$0xff]  ;;  %v2899_v30 = vld [vmem:[#allocation17 + $0x9a8] sm:$0xff] }
 0x6f9   :  { %v16067_v52 = vcombine.high %v3042_v43, %v3050_v45  ;;  %v16066_v60 = vcombine.low %v3042_v43, %v3050_v45  ;;  %v15924_v62 = vcombine.low %v2899_v30, %v2907_v56  ;;  %v2987_v43 = vld [vmem:[#allocation17 + $0xc68] sm:$0xff] }
 0x6fa   :  { %9528 = vmatpush1.bf16.msra.mxu0 %v15970_v53  ;;  %v15925_v53 = vcombine.high %v2899_v30, %v2907_v56 }
 0x6fb   :  { %9665 = vmatpush1.bf16.msra.mxu1 %v15828_v54  ;;  %9529 = vmatprep.subr.bf16.mxu0 %v15987_v57  ;;  %v3058_v54 = vld [vmem:[#allocation17 + $0xea0] sm:$0xff] }
 0x6fc   :  { %9666 = vmatprep.subr.bf16.mxu1 %v15845_v58  ;;  %v3066_v57 = vld [vmem:[#allocation17 + $0xee0] sm:$0xff]  ;;  %v2915_v58 = vld [vmem:[#allocation17 + $0xa28] sm:$0xff] }
 0x6fd   :  { %v16083_v12 = vcombine.high %v3058_v54, %v3066_v57  ;;  %v16082_v9 = vcombine.low %v3058_v54, %v3066_v57  ;;  %v15940_v11 = vcombine.low %v2915_v58, %v2923_v59  ;;  %v3003_v54 = vld [vmem:[#allocation17 + $0xce8] sm:$0xff] }
 0x6fe   :  { %9530 = vmatpush1.bf16.msra.mxu0 %v15986_v63  ;;  %v15941_v63 = vcombine.high %v2915_v58, %v2923_v59 }
 0x6ff   :  { %9667 = vmatpush1.bf16.msra.mxu1 %v15844_v0  ;;  %9531 = vmatprep.subr.bf16.mxu0 %v16003_v1  ;;  %v3074_v0 = vld [vmem:[#allocation17 + $0xf20] sm:$0xff] }
 0x700   :  { %9668 = vmatprep.subr.bf16.mxu1 %v15861_v2  ;;  %v3082_v1 = vld [vmem:[#allocation17 + $0xf60] sm:$0xff]  ;;  %v2931_v2 = vld [vmem:[#allocation17 + $0xaa8] sm:$0xff] }
 0x701   :  { %v16099_v13 = vcombine.high %v3074_v0, %v3082_v1  ;;  %v16098_v27 = vcombine.low %v3074_v0, %v3082_v1  ;;  %v15956_v28 = vcombine.low %v2931_v2, %v2939_v8  ;;  %v3019_v0 = vld [vmem:[#allocation17 + $0xd68] sm:$0xff] }
 0x702   :  { %9532 = vmatpush1.bf16.msra.mxu0 %v16002_v14  ;;  %v15957_v14 = vcombine.high %v2931_v2, %v2939_v8 }
 0x703   :  { %9669 = vmatpush1.bf16.msra.mxu1 %v15860_v16  ;;  %9533 = vmatprep.subr.bf16.mxu0 %v16019_v17  ;;  %v3090_v16 = vld [vmem:[#allocation17 + $0xfa0] sm:$0xff] }
 0x704   :  { %9679 = vmatprep.subr.bf16.mxu1 %v15877_v23  ;;  %v3098_v17 = vld [vmem:[#allocation17 + $0xfe0] sm:$0xff]  ;;  %v2947_v23 = vld [vmem:[#allocation17 + $0xb28] sm:$0xff] }
 0x705   :  { %v16115_v31 = vcombine.high %v3090_v16, %v3098_v17  ;;  %v16114_v39 = vcombine.low %v3090_v16, %v3098_v17  ;;  %v15972_v5 = vcombine.low %v2947_v23, %v2955_v24  ;;  %v3035_v16 = vld [vmem:[#allocation17 + $0xde8] sm:$0xff] }
 0x706   :  { %9534 = vmatpush1.bf16.msra.mxu0 %v16018_v32  ;;  %9671 = vmatmul.mubr.bf16.vlgmr.msra.gmra.mrb[28].mxu1 %v21834_v22  ;;  %v15973_v32 = vcombine.high %v2947_v23, %v2955_v24 }
 0x707   :  { %9680 = vmatpush1.bf16.msra.mxu1 %v15876_v33  ;;  %9711 = vmatprep.mubr.bf16.mxu1 %v21858_v61  ;;  %v3106_v33 = vld [vmem:[#allocation17 + $0x1020] sm:$0xff] }
 0x708   :  { %9535 = vmatprep.subr.bf16.mxu0 %v16035_v34  ;;  %9681 = vmatprep.subr.bf16.mxu1 %v15893_v35  ;;  %v3114_v34 = vld [vmem:[#allocation17 + $0x1060] sm:$0xff]  ;;  %v2963_v35 = vld [vmem:[#allocation17 + $0xba8] sm:$0xff] }
 0x709   :  { %v16131_v40 = vcombine.high %v3106_v33, %v3114_v34  ;;  %v16130_v45 = vcombine.low %v3106_v33, %v3114_v34  ;;  %v15988_v30 = vcombine.low %v2963_v35, %v2971_v36  ;;  %v3051_v33 = vld [vmem:[#allocation17 + $0xe68] sm:$0xff] }
 0x70a   :  { %9536 = vmatpush1.bf16.msra.mxu0 %v16034_v37  ;;  %v15989_v37 = vcombine.high %v2963_v35, %v2971_v36 }
 0x70b   :  { %9682 = vmatpush1.bf16.msra.mxu1 %v15892_v41  ;;  %9537 = vmatprep.subr.bf16.mxu0 %v16051_v18  ;;  %v3122_v41 = vld [vmem:[#allocation17 + $0x10a0] sm:$0xff] }
 0x70c   :  { %9683 = vmatprep.subr.bf16.mxu1 %v15909_v26  ;;  %v3130_v18 = vld [vmem:[#allocation17 + $0x10e0] sm:$0xff]  ;;  %v2979_v26 = vld [vmem:[#allocation17 + $0xc28] sm:$0xff] }
 0x70d   :  { %v16147_v56 = vcombine.high %v3122_v41, %v3130_v18  ;;  %v16146_v57 = vcombine.low %v3122_v41, %v3130_v18  ;;  %v16004_v58 = vcombine.low %v2979_v26, %v2987_v43  ;;  %v3067_v41 = vld [vmem:[#allocation17 + $0xee8] sm:$0xff] }
 0x70e   :  { %9538 = vmatpush1.bf16.msra.mxu0 %v16050_v44  ;;  %v16005_v44 = vcombine.high %v2979_v26, %v2987_v43 }
 0x70f   :  { %9684 = vmatpush1.bf16.msra.mxu1 %v15908_v49  ;;  %9539 = vmatprep.subr.bf16.mxu0 %v16067_v52  ;;  %v3138_v49 = vld [vmem:[#allocation17 + $0x1120] sm:$0xff] }
 0x710   :  { %9685 = vmatprep.subr.bf16.mxu1 %v15925_v53  ;;  %v3146_v52 = vld [vmem:[#allocation17 + $0x1160] sm:$0xff]  ;;  %v2995_v53 = vld [vmem:[#allocation17 + $0xca8] sm:$0xff] }
 0x711   :  { %v16163_v59 = vcombine.high %v3138_v49, %v3146_v52  ;;  %v16162_v1 = vcombine.low %v3138_v49, %v3146_v52  ;;  %v16020_v2 = vcombine.low %v2995_v53, %v3003_v54  ;;  %v3083_v49 = vld [vmem:[#allocation17 + $0xf68] sm:$0xff] }
 0x712   :  { %9540 = vmatpush1.bf16.msra.mxu0 %v16066_v60  ;;  %v16021_v60 = vcombine.high %v2995_v53, %v3003_v54 }
 0x713   :  { %9686 = vmatpush1.bf16.msra.mxu1 %v15924_v62  ;;  %9541 = vmatprep.subr.bf16.mxu0 %v16083_v12  ;;  %v3154_v62 = vld [vmem:[#allocation17 + $0x11a0] sm:$0xff] }
 0x714   :  { %9687 = vmatprep.subr.bf16.mxu1 %v15941_v63  ;;  %v3162_v12 = vld [vmem:[#allocation17 + $0x11e0] sm:$0xff]  ;;  %v3011_v63 = vld [vmem:[#allocation17 + $0xd28] sm:$0xff] }
 0x715   :  { %v16179_v8 = vcombine.high %v3154_v62, %v3162_v12  ;;  %v16178_v17 = vcombine.low %v3154_v62, %v3162_v12  ;;  %v16036_v23 = vcombine.low %v3011_v63, %v3019_v0  ;;  %v3099_v62 = vld [vmem:[#allocation17 + $0xfe8] sm:$0xff] }
 0x716   :  { %9542 = vmatpush1.bf16.msra.mxu0 %v16082_v9  ;;  %v16037_v9 = vcombine.high %v3011_v63, %v3019_v0 }
 0x717   :  { %9688 = vmatpush1.bf16.msra.mxu1 %v15940_v11  ;;  %9543 = vmatprep.subr.bf16.mxu0 %v16099_v13  ;;  %v3170_v11 = vld [vmem:[#allocation17 + $0x1220] sm:$0xff] }
 0x718   :  { %9689 = vmatprep.subr.bf16.mxu1 %v15957_v14  ;;  %v3178_v13 = vld [vmem:[#allocation17 + $0x1260] sm:$0xff]  ;;  %v3027_v14 = vld [vmem:[#allocation17 + $0xda8] sm:$0xff] }
 0x719   :  { %v16195_v24 = vcombine.high %v3170_v11, %v3178_v13  ;;  %v16194_v34 = vcombine.low %v3170_v11, %v3178_v13  ;;  %v16052_v35 = vcombine.low %v3027_v14, %v3035_v16  ;;  %v3115_v11 = vld [vmem:[#allocation17 + $0x1068] sm:$0xff] }
 0x71a   :  { %9544 = vmatpush1.bf16.msra.mxu0 %v16098_v27  ;;  %v16053_v27 = vcombine.high %v3027_v14, %v3035_v16 }
 0x71b   :  { %9690 = vmatpush1.bf16.msra.mxu1 %v15956_v28  ;;  %9545 = vmatprep.subr.bf16.mxu0 %v16115_v31  ;;  %v3186_v28 = vld [vmem:[#allocation17 + $0x12a0] sm:$0xff] }
 0x71c   :  { %9691 = vmatprep.subr.bf16.mxu1 %v15973_v32  ;;  %v3194_v31 = vld [vmem:[#allocation17 + $0x12e0] sm:$0xff]  ;;  %v3043_v32 = vld [vmem:[#allocation17 + $0xe28] sm:$0xff] }
 0x71d   :  { %v16211_v36 = vcombine.high %v3186_v28, %v3194_v31  ;;  %v16210_v18 = vcombine.low %v3186_v28, %v3194_v31  ;;  %v16068_v26 = vcombine.low %v3043_v32, %v3051_v33  ;;  %v3131_v28 = vld [vmem:[#allocation17 + $0x10e8] sm:$0xff] }
 0x71e   :  { %9546 = vmatpush1.bf16.msra.mxu0 %v16114_v39  ;;  %v16069_v39 = vcombine.high %v3043_v32, %v3051_v33 }
 0x71f   :  { %9692 = vmatpush1.bf16.msra.mxu1 %v15972_v5  ;;  %9556 = vmatprep.subr.bf16.mxu0 %v16131_v40  ;;  %v3202_v5 = vld [vmem:[#allocation17 + $0x1320] sm:$0xff] }
 0x720   :  { %9693 = vmatprep.subr.bf16.mxu1 %v15989_v37  ;;  %v3210_v40 = vld [vmem:[#allocation17 + $0x1360] sm:$0xff]  ;;  %v3059_v37 = vld [vmem:[#allocation17 + $0xea8] sm:$0xff] }
 0x721   :  { %9548 = vmatmul.mubr.bf16.vlgmr.msra.gmra.mrb[20].mxu0 %v21860_v21  ;;  %v16227_v43 = vcombine.high %v3202_v5, %v3210_v40  ;;  %v16226_v52 = vcombine.low %v3202_v5, %v3210_v40  ;;  %v16084_v53 = vcombine.low %v3059_v37, %v3067_v41  ;;  %v3147_v5 = vld [vmem:[#allocation17 + $0x1168] sm:$0xff] }
 0x722   :  { %9557 = vmatpush1.bf16.msra.mxu0 %v16130_v45  ;;  %9588 = vmatprep.mubr.bf16.mxu0 %v21862_v25  ;;  %v16085_v45 = vcombine.high %v3059_v37, %v3067_v41 }
 0x723   :  { %9694 = vmatpush1.bf16.msra.mxu1 %v15988_v30  ;;  %9558 = vmatprep.subr.bf16.mxu0 %v16147_v56  ;;  %v3218_v30 = vld [vmem:[#allocation17 + $0x13a0] sm:$0xff] }
 0x724   :  { %9695 = vmatprep.subr.bf16.mxu1 %v16005_v44  ;;  %v3226_v56 = vld [vmem:[#allocation17 + $0x13e0] sm:$0xff]  ;;  %v3075_v44 = vld [vmem:[#allocation17 + $0xf28] sm:$0xff] }
 0x725   :  { %v16243_v54 = vcombine.high %v3218_v30, %v3226_v56  ;;  %v16242_v12 = vcombine.low %v3218_v30, %v3226_v56  ;;  %v16100_v63 = vcombine.low %v3075_v44, %v3083_v49  ;;  %v3163_v30 = vld [vmem:[#allocation17 + $0x11e8] sm:$0xff] }
 0x726   :  { %9559 = vmatpush1.bf16.msra.mxu0 %v16146_v57  ;;  %v16101_v57 = vcombine.high %v3075_v44, %v3083_v49 }
 0x727   :  { %9696 = vmatpush1.bf16.msra.mxu1 %v16004_v58  ;;  %9560 = vmatprep.subr.bf16.mxu0 %v16163_v59  ;;  %v3234_v58 = vld [vmem:[#allocation17 + $0x1420] sm:$0xff] }
 0x728   :  { %9697 = vmatprep.subr.bf16.mxu1 %v16021_v60  ;;  %v3242_v59 = vld [vmem:[#allocation17 + $0x1460] sm:$0xff]  ;;  %v3091_v60 = vld [vmem:[#allocation17 + $0xfa8] sm:$0xff] }
 0x729   :  { %v16259_v0 = vcombine.high %v3234_v58, %v3242_v59  ;;  %v16258_v13 = vcombine.low %v3234_v58, %v3242_v59  ;;  %v16116_v14 = vcombine.low %v3091_v60, %v3099_v62  ;;  %v3179_v58 = vld [vmem:[#allocation17 + $0x1268] sm:$0xff] }
 0x72a   :  { %9561 = vmatpush1.bf16.msra.mxu0 %v16162_v1  ;;  %v16117_v1 = vcombine.high %v3091_v60, %v3099_v62 }
 0x72b   :  { %9698 = vmatpush1.bf16.msra.mxu1 %v16020_v2  ;;  %9562 = vmatprep.subr.bf16.mxu0 %v16179_v8  ;;  %v3250_v2 = vld [vmem:[#allocation17 + $0x14a0] sm:$0xff] }
 0x72c   :  { %9699 = vmatprep.subr.bf16.mxu1 %v16037_v9  ;;  %v3258_v8 = vld [vmem:[#allocation17 + $0x14e0] sm:$0xff]  ;;  %v3107_v9 = vld [vmem:[#allocation17 + $0x1028] sm:$0xff] }
 0x72d   :  { %v16275_v16 = vcombine.high %v3250_v2, %v3258_v8  ;;  %v16274_v31 = vcombine.low %v3250_v2, %v3258_v8  ;;  %v16132_v32 = vcombine.low %v3107_v9, %v3115_v11  ;;  %v3195_v2 = vld [vmem:[#allocation17 + $0x12e8] sm:$0xff] }
 0x72e   :  { %9563 = vmatpush1.bf16.msra.mxu0 %v16178_v17  ;;  %v16133_v17 = vcombine.high %v3107_v9, %v3115_v11 }
 0x72f   :  { %9700 = vmatpush1.bf16.msra.mxu1 %v16036_v23  ;;  %9564 = vmatprep.subr.bf16.mxu0 %v16195_v24  ;;  %v3266_v23 = vld [vmem:[#allocation17 + $0x1520] sm:$0xff] }
 0x730   :  { %9701 = vmatprep.subr.bf16.mxu1 %v16053_v27  ;;  %v3274_v24 = vld [vmem:[#allocation17 + $0x1560] sm:$0xff]  ;;  %v3123_v27 = vld [vmem:[#allocation17 + $0x10a8] sm:$0xff] }
 0x731   :  { %v16291_v33 = vcombine.high %v3266_v23, %v3274_v24  ;;  %v16290_v40 = vcombine.low %v3266_v23, %v3274_v24  ;;  %v16148_v37 = vcombine.low %v3123_v27, %v3131_v28  ;;  %v3211_v23 = vld [vmem:[#allocation17 + $0x1368] sm:$0xff] }
 0x732   :  { %9565 = vmatpush1.bf16.msra.mxu0 %v16194_v34  ;;  %v16149_v34 = vcombine.high %v3123_v27, %v3131_v28 }
 0x733   :  { %9702 = vmatpush1.bf16.msra.mxu1 %v16052_v35  ;;  %9566 = vmatprep.subr.bf16.mxu0 %v16211_v36  ;;  %v3282_v35 = vld [vmem:[#allocation17 + $0x15a0] sm:$0xff] }
 0x734   :  { %9703 = vmatprep.subr.bf16.mxu1 %v16069_v39  ;;  %v3290_v36 = vld [vmem:[#allocation17 + $0x15e0] sm:$0xff]  ;;  %v3139_v39 = vld [vmem:[#allocation17 + $0x1128] sm:$0xff] }
 0x735   :  { %v16307_v41 = vcombine.high %v3282_v35, %v3290_v36  ;;  %v16306_v56 = vcombine.low %v3282_v35, %v3290_v36  ;;  %v16164_v44 = vcombine.low %v3139_v39, %v3147_v5  ;;  %v3227_v35 = vld [vmem:[#allocation17 + $0x13e8] sm:$0xff] }
 0x736   :  { %9567 = vmatpush1.bf16.msra.mxu0 %v16210_v18  ;;  %v16165_v18 = vcombine.high %v3139_v39, %v3147_v5 }
 0x737   :  { %9704 = vmatpush1.bf16.msra.mxu1 %v16068_v26  ;;  %9568 = vmatprep.subr.bf16.mxu0 %v16227_v43  ;;  %v3298_v26 = vld [vmem:[#allocation17 + $0x1620] sm:$0xff] }
 0x738   :  { %9705 = vmatprep.subr.bf16.mxu1 %v16085_v45  ;;  %v3306_v43 = vld [vmem:[#allocation17 + $0x1660] sm:$0xff]  ;;  %v3155_v45 = vld [vmem:[#allocation17 + $0x11a8] sm:$0xff] }
 0x739   :  { %v16323_v49 = vcombine.high %v3298_v26, %v3306_v43  ;;  %v16322_v59 = vcombine.low %v3298_v26, %v3306_v43  ;;  %v16180_v60 = vcombine.low %v3155_v45, %v3163_v30  ;;  %v3243_v26 = vld [vmem:[#allocation17 + $0x1468] sm:$0xff] }
 0x73a   :  { %9569 = vmatpush1.bf16.msra.mxu0 %v16226_v52  ;;  %v16181_v52 = vcombine.high %v3155_v45, %v3163_v30 }
 0x73b   :  { %9706 = vmatpush1.bf16.msra.mxu1 %v16084_v53  ;;  %9570 = vmatprep.subr.bf16.mxu0 %v16243_v54  ;;  %v3314_v53 = vld [vmem:[#allocation17 + $0x16a0] sm:$0xff] }
 0x73c   :  { %9707 = vmatprep.subr.bf16.mxu1 %v16101_v57  ;;  %v3322_v54 = vld [vmem:[#allocation17 + $0x16e0] sm:$0xff]  ;;  %v3171_v57 = vld [vmem:[#allocation17 + $0x1228] sm:$0xff] }
 0x73d   :  { %v16339_v62 = vcombine.high %v3314_v53, %v3322_v54  ;;  %v16338_v8 = vcombine.low %v3314_v53, %v3322_v54  ;;  %v16196_v9 = vcombine.low %v3171_v57, %v3179_v58  ;;  %v3259_v53 = vld [vmem:[#allocation17 + $0x14e8] sm:$0xff] }
 0x73e   :  { %9571 = vmatpush1.bf16.msra.mxu0 %v16242_v12  ;;  %v16197_v12 = vcombine.high %v3171_v57, %v3179_v58 }
 0x73f   :  { %9708 = vmatpush1.bf16.msra.mxu1 %v16100_v63  ;;  %9572 = vmatprep.subr.bf16.mxu0 %v16259_v0  ;;  %v3330_v63 = vld [vmem:[#allocation17 + $0x1720] sm:$0xff] }
 0x740   :  { %9709 = vmatprep.subr.bf16.mxu1 %v16117_v1  ;;  %v3338_v0 = vld [vmem:[#allocation17 + $0x1760] sm:$0xff]  ;;  %v3187_v1 = vld [vmem:[#allocation17 + $0x12a8] sm:$0xff] }
 0x741   :  { %v16355_v11 = vcombine.high %v3330_v63, %v3338_v0  ;;  %v16354_v24 = vcombine.low %v3330_v63, %v3338_v0  ;;  %v16212_v27 = vcombine.low %v3187_v1, %v3195_v2  ;;  %v3275_v63 = vld [vmem:[#allocation17 + $0x1568] sm:$0xff] }
 0x742   :  { %9573 = vmatpush1.bf16.msra.mxu0 %v16258_v13  ;;  %v16213_v13 = vcombine.high %v3187_v1, %v3195_v2 }
 0x743   :  { %9710 = vmatpush1.bf16.msra.mxu1 %v16116_v14  ;;  %9574 = vmatprep.subr.bf16.mxu0 %v16275_v16  ;;  %v3346_v14 = vld [vmem:[#allocation17 + $0x17a0] sm:$0xff] }
 0x744   :  { %9720 = vmatprep.subr.bf16.mxu1 %v16133_v17  ;;  %v3354_v16 = vld [vmem:[#allocation17 + $0x17e0] sm:$0xff]  ;;  %v3203_v17 = vld [vmem:[#allocation17 + $0x1328] sm:$0xff] }
 0x745   :  { %v16371_v28 = vcombine.high %v3346_v14, %v3354_v16  ;;  %v16370_v36 = vcombine.low %v3346_v14, %v3354_v16  ;;  %v16228_v39 = vcombine.low %v3203_v17, %v3211_v23  ;;  %v3291_v14 = vld [vmem:[#allocation17 + $0x15e8] sm:$0xff] }
 0x746   :  { %9575 = vmatpush1.bf16.msra.mxu0 %v16274_v31  ;;  %9712 = vmatmul.mubr.bf16.vlgmr.msra.gmra.mrb[28].mxu1 %v21860_v21  ;;  %v16229_v31 = vcombine.high %v3203_v17, %v3211_v23 }
 0x747   :  { %9721 = vmatpush1.bf16.msra.mxu1 %v16132_v32  ;;  %9752 = vmatprep.mubr.bf16.mxu1 %v21862_v25  ;;  %v3362_v32 = vld [vmem:[#allocation17 + $0x1820] sm:$0xff] }
 0x748   :  { %9576 = vmatprep.subr.bf16.mxu0 %v16291_v33  ;;  %9722 = vmatprep.subr.bf16.mxu1 %v16149_v34  ;;  %v3370_v33 = vld [vmem:[#allocation17 + $0x1860] sm:$0xff]  ;;  %v3219_v34 = vld [vmem:[#allocation17 + $0x13a8] sm:$0xff] }
 0x749   :  { %v16387_v5 = vcombine.high %v3362_v32, %v3370_v33  ;;  %v16386_v43 = vcombine.low %v3362_v32, %v3370_v33  ;;  %v16244_v45 = vcombine.low %v3219_v34, %v3227_v35  ;;  %v3307_v32 = vld [vmem:[#allocation17 + $0x1668] sm:$0xff] }
 0x74a   :  { %9577 = vmatpush1.bf16.msra.mxu0 %v16290_v40  ;;  %v16245_v40 = vcombine.high %v3219_v34, %v3227_v35 }
 0x74b   :  { %9723 = vmatpush1.bf16.msra.mxu1 %v16148_v37  ;;  %9578 = vmatprep.subr.bf16.mxu0 %v16307_v41  ;;  %v3378_v37 = vld [vmem:[#allocation17 + $0x18a0] sm:$0xff] }
 0x74c   :  { %9724 = vmatprep.subr.bf16.mxu1 %v16165_v18  ;;  %v3386_v41 = vld [vmem:[#allocation17 + $0x18e0] sm:$0xff]  ;;  %v3235_v18 = vld [vmem:[#allocation17 + $0x1428] sm:$0xff] }
 0x74d   :  { %v16403_v30 = vcombine.high %v3378_v37, %v3386_v41  ;;  %v16402_v54 = vcombine.low %v3378_v37, %v3386_v41  ;;  %v16260_v57 = vcombine.low %v3235_v18, %v3243_v26  ;;  %v3323_v37 = vld [vmem:[#allocation17 + $0x16e8] sm:$0xff] }
 0x74e   :  { %9579 = vmatpush1.bf16.msra.mxu0 %v16306_v56  ;;  %v16261_v56 = vcombine.high %v3235_v18, %v3243_v26 }
 0x74f   :  { %9725 = vmatpush1.bf16.msra.mxu1 %v16164_v44  ;;  %9580 = vmatprep.subr.bf16.mxu0 %v16323_v49  ;;  %v3394_v44 = vld [vmem:[#allocation17 + $0x1920] sm:$0xff] }
 0x750   :  { %9726 = vmatprep.subr.bf16.mxu1 %v16181_v52  ;;  %v3402_v49 = vld [vmem:[#allocation17 + $0x1960] sm:$0xff]  ;;  %v3251_v52 = vld [vmem:[#allocation17 + $0x14a8] sm:$0xff] }
 0x751   :  { %v16419_v58 = vcombine.high %v3394_v44, %v3402_v49  ;;  %v16418_v0 = vcombine.low %v3394_v44, %v3402_v49  ;;  %v16276_v1 = vcombine.low %v3251_v52, %v3259_v53  ;;  %v3331_v49 = vld [vmem:[#allocation17 + $0x1728] sm:$0xff] }
 0x752   :  { %9581 = vmatpush1.bf16.msra.mxu0 %v16322_v59  ;;  %v16277_v59 = vcombine.high %v3251_v52, %v3259_v53  ;;  %v3339_v52 = vld [vmem:[#allocation17 + $0x1768] sm:$0xff] }
 0x753   :  { %9727 = vmatpush1.bf16.msra.mxu1 %v16180_v60  ;;  %9582 = vmatprep.subr.bf16.mxu0 %v16339_v62  ;;  %v3410_v60 = vld [vmem:[#allocation17 + $0x19a0] sm:$0xff] }
 0x754   :  { %9728 = vmatprep.subr.bf16.mxu1 %v16197_v12  ;;  %v3418_v62 = vld [vmem:[#allocation17 + $0x19e0] sm:$0xff]  ;;  %v3267_v12 = vld [vmem:[#allocation17 + $0x1528] sm:$0xff] }
 0x755   :  { %v16435_v2 = vcombine.high %v3410_v60, %v3418_v62  ;;  %v16434_v16 = vcombine.low %v3410_v60, %v3418_v62  ;;  %v16292_v17 = vcombine.low %v3267_v12, %v3275_v63  ;;  %v16357_v60 = vcombine.high %v3331_v49, %v3339_v52  ;;  %v3490_v62 = vld [vmem:[#allocation17 + $0x1c20] sm:$0xff] }
 0x756   :  { %9583 = vmatpush1.bf16.msra.mxu0 %v16338_v8  ;;  %v16293_v8 = vcombine.high %v3267_v12, %v3275_v63  ;;  %v3498_v12 = vld [vmem:[#allocation17 + $0x1c60] sm:$0xff]  ;;  %v3347_v63 = vld [vmem:[#allocation17 + $0x17a8] sm:$0xff] }
 0x757   :  { %9729 = vmatpush1.bf16.msra.mxu1 %v16196_v9  ;;  %9584 = vmatprep.subr.bf16.mxu0 %v16355_v11  ;;  %v3426_v9 = vld [vmem:[#allocation17 + $0x1a20] sm:$0xff] }
 0x758   :  { %9730 = vmatprep.subr.bf16.mxu1 %v16213_v13  ;;  %v3434_v11 = vld [vmem:[#allocation17 + $0x1a60] sm:$0xff]  ;;  %v3283_v13 = vld [vmem:[#allocation17 + $0x15a8] sm:$0xff] }
 0x759   :  { %v16451_v23 = vcombine.high %v3426_v9, %v3434_v11  ;;  %v16450_v33 = vcombine.low %v3426_v9, %v3434_v11  ;;  %v16308_v34 = vcombine.low %v3283_v13, %v3291_v14  ;;  %v3506_v11 = vld [vmem:[#allocation17 + $0x1ca0] sm:$0xff] }
 0x75a   :  { %9585 = vmatpush1.bf16.msra.mxu0 %v16354_v24  ;;  %v16309_v24 = vcombine.high %v3283_v13, %v3291_v14  ;;  %v3514_v13 = vld [vmem:[#allocation17 + $0x1ce0] sm:$0xff]  ;;  %v3363_v14 = vld [vmem:[#allocation17 + $0x1828] sm:$0xff] }
 0x75b   :  { %9731 = vmatpush1.bf16.msra.mxu1 %v16212_v27  ;;  %9586 = vmatprep.subr.bf16.mxu0 %v16371_v28  ;;  %v3442_v27 = vld [vmem:[#allocation17 + $0x1aa0] sm:$0xff] }
 0x75c   :  { %9732 = vmatprep.subr.bf16.mxu1 %v16229_v31  ;;  %v3450_v28 = vld [vmem:[#allocation17 + $0x1ae0] sm:$0xff]  ;;  %v3299_v31 = vld [vmem:[#allocation17 + $0x1628] sm:$0xff] }
 0x75d   :  { %v16467_v35 = vcombine.high %v3442_v27, %v3450_v28  ;;  %v16466_v41 = vcombine.low %v3442_v27, %v3450_v28  ;;  %v16324_v18 = vcombine.low %v3299_v31, %v3307_v32  ;;  %v3522_v28 = vld [vmem:[#allocation17 + $0x1d20] sm:$0xff] }
 0x75e   :  { %9587 = vmatpush1.bf16.msra.mxu0 %v16370_v36  ;;  %v16325_v36 = vcombine.high %v3299_v31, %v3307_v32  ;;  %v3530_v31 = vld [vmem:[#allocation17 + $0x1d60] sm:$0xff]  ;;  %v3379_v32 = vld [vmem:[#allocation17 + $0x18a8] sm:$0xff] }
 0x75f   :  { %9733 = vmatpush1.bf16.msra.mxu1 %v16228_v39  ;;  %9597 = vmatprep.subr.bf16.mxu0 %v16387_v5  ;;  %v3458_v39 = vld [vmem:[#allocation17 + $0x1b20] sm:$0xff] }
 0x760   :  { %9734 = vmatprep.subr.bf16.mxu1 %v16245_v40  ;;  %v3466_v5 = vld [vmem:[#allocation17 + $0x1b60] sm:$0xff]  ;;  %v3315_v40 = vld [vmem:[#allocation17 + $0x16a8] sm:$0xff] }
 0x761   :  { %9589 = vmatmul.mubr.bf16.vlgmr.msra.gmra.mrb[20].mxu0 %v21879_v51  ;;  %v16483_v26 = vcombine.high %v3458_v39, %v3466_v5 }
 0x762   :  { %9598 = vmatpush1.bf16.msra.mxu0 %v16386_v43  ;;  %9629 = vmatprep.mubr.bf16.mxu0 %v21891_v42 }
 0x763   :  { %9735 = vmatpush1.bf16.msra.mxu1 %v16244_v45  ;;  %9599 = vmatprep.subr.bf16.mxu0 %v16403_v30  ;;  %v16341_v45 = vcombine.high %v3315_v40, %v3323_v37  ;;  %v3474_v30 = vld [vmem:[#allocation17 + $0x1ba0] sm:$0xff] }
 0x764   :  { %9736 = vmatprep.subr.bf16.mxu1 %v16261_v56  ;;  %v3482_v56 = vld [vmem:[#allocation17 + $0x1be0] sm:$0xff] }
 0x766   :  { %9600 = vmatpush1.bf16.msra.mxu0 %v16402_v54  ;;  %v16482_v54 = vcombine.low %v3458_v39, %v3466_v5  ;;  %v3538_v5 = vld [vmem:[#allocation17 + $0x1da0] sm:$0xff] }
 0x767   :  { %9737 = vmatpush1.bf16.msra.mxu1 %v16260_v57  ;;  %9601 = vmatprep.subr.bf16.mxu0 %v16419_v58  ;;  %v16340_v58 = vcombine.low %v3315_v40, %v3323_v37  ;;  %v3546_v40 = vld [vmem:[#allocation17 + $0x1de0] sm:$0xff]  ;;  %v3395_v37 = vld [vmem:[#allocation17 + $0x1928] sm:$0xff] }
 0x768   :  { %9738 = vmatprep.subr.bf16.mxu1 %v16277_v59  ;;  %v16499_v59 = vcombine.high %v3474_v30, %v3482_v56 }
 0x76a   :  { %9602 = vmatpush1.bf16.msra.mxu0 %v16418_v0  ;;  %v3355_v0 = vld [vmem:[#allocation17 + $0x17e8] sm:$0xff] }
 0x76b   :  { %9739 = vmatpush1.bf16.msra.mxu1 %v16276_v1  ;;  %9603 = vmatprep.subr.bf16.mxu0 %v16435_v2  ;;  %v16498_v1 = vcombine.low %v3474_v30, %v3482_v56  ;;  %v16356_v2 = vcombine.low %v3331_v49, %v3339_v52  ;;  %v16373_v9 = vcombine.high %v3347_v63, %v3355_v0  ;;  %v3554_v56 = vld [vmem:[#allocation17 + $0x1e20] sm:$0xff]  ;;  %v3411_v52 = vld [vmem:[#allocation17 + $0x19a8] sm:$0xff] }
 0x76c   :  { %9740 = vmatprep.subr.bf16.mxu1 %v16293_v8  ;;  %v16515_v8 = vcombine.high %v3490_v62, %v3498_v12  ;;  %v3562_v49 = vld [vmem:[#allocation17 + $0x1e60] sm:$0xff] }
 0x76e   :  { %9604 = vmatpush1.bf16.msra.mxu0 %v16434_v16  ;;  %v3371_v16 = vld [vmem:[#allocation17 + $0x1868] sm:$0xff] }
 0x76f   :  { %9741 = vmatpush1.bf16.msra.mxu1 %v16292_v17  ;;  %9605 = vmatprep.subr.bf16.mxu0 %v16451_v23  ;;  %v16514_v17 = vcombine.low %v3490_v62, %v3498_v12  ;;  %v16372_v23 = vcombine.low %v3347_v63, %v3355_v0  ;;  %v16389_v27 = vcombine.high %v3363_v14, %v3371_v16  ;;  %v3578_v62 = vld [vmem:[#allocation17 + $0x1ee0] sm:$0xff]  ;;  %v3427_v12 = vld [vmem:[#allocation17 + $0x1a28] sm:$0xff] }
 0x770   :  { %9742 = vmatprep.subr.bf16.mxu1 %v16309_v24  ;;  %v16531_v24 = vcombine.high %v3506_v11, %v3514_v13  ;;  %v3435_v63 = vld [vmem:[#allocation17 + $0x1a68] sm:$0xff]  ;;  %v16578_v0 = vcombine.low %v3554_v56, %v3562_v49 }
 0x772   :  { %9606 = vmatpush1.bf16.msra.mxu0 %v16450_v33  ;;  %v3387_v33 = vld [vmem:[#allocation17 + $0x18e8] sm:$0xff] }
 0x773   :  { %9743 = vmatpush1.bf16.msra.mxu1 %v16308_v34  ;;  %9607 = vmatprep.subr.bf16.mxu0 %v16467_v35  ;;  %v16530_v34 = vcombine.low %v3506_v11, %v3514_v13  ;;  %v16388_v35 = vcombine.low %v3363_v14, %v3371_v16  ;;  %v16405_v39 = vcombine.high %v3379_v32, %v3387_v33  ;;  %v3594_v11 = vld [vmem:[#allocation17 + $0x1f60] sm:$0xff]  ;;  %v3443_v13 = vld [vmem:[#allocation17 + $0x1aa8] sm:$0xff] }
 0x774   :  { %v21935_v43 = vpop.f32.mrb[16].mxu0  ;;  %9744 = vmatprep.subr.bf16.mxu1 %v16325_v36  ;;  %v16547_v36 = vcombine.high %v3522_v28, %v3530_v31  ;;  %v3451_v14 = vld [vmem:[#allocation17 + $0x1ae8] sm:$0xff] }
 0x775   :  { %v21937_v44 = vpop.f32.mrb[17].mxu0 }
 0x776   :  { %v9307_v53 = vpop.f32.mrb[18].mxu0  ;;  %9608 = vmatpush1.bf16.msra.mxu0 %v16466_v41  ;;  %v3403_v41 = vld [vmem:[#allocation17 + $0x1968] sm:$0xff] }
 0x777   :  { %v9308_v57 = vpop.f32.mrb[19].mxu0  ;;  %9745 = vmatpush1.bf16.msra.mxu1 %v16324_v18  ;;  %9609 = vmatprep.subr.bf16.mxu0 %v16483_v26  ;;  %v16546_v18 = vcombine.low %v3522_v28, %v3530_v31  ;;  %v16404_v26 = vcombine.low %v3379_v32, %v3387_v33  ;;  %v16421_v30 = vcombine.high %v3395_v37, %v3403_v41  ;;  %v3419_v53 = vld [vmem:[#allocation17 + $0x19e8] sm:$0xff]  ;;  %v3610_v28 = vld [vmem:[#allocation17 + $0x1fe0] sm:$0xff] }
 0x778   :  { %9746 = vmatprep.subr.bf16.mxu1 %v16341_v45  ;;  %v16563_v45 = vcombine.high %v3538_v5, %v3546_v40  ;;  %v16420_v57 = vcombine.low %v3395_v37, %v3403_v41  ;;  %v3459_v31 = vld [vmem:[#allocation17 + $0x1b28] sm:$0xff] }
 0x779   :  { %v3467_v32 = vld [vmem:[#allocation17 + $0x1b68] sm:$0xff] }
 0x77a   :  { %9610 = vmatpush1.bf16.msra.mxu0 %v16482_v54  ;;  %v16562_v54 = vcombine.low %v3538_v5, %v3546_v40  ;;  %v2604_v5 = vld [vmem:[#allocation17 + $0x70] sm:$0xff]  ;;  %v3475_v37 = vld [vmem:[#allocation17 + $0x1ba8] sm:$0xff] }
 0x77b   :  { %9747 = vmatpush1.bf16.msra.mxu1 %v16340_v58  ;;  %9611 = vmatprep.subr.bf16.mxu0 %v16499_v59  ;;  %v16579_v58 = vcombine.high %v3554_v56, %v3562_v49  ;;  %v16437_v59 = vcombine.high %v3411_v52, %v3419_v53  ;;  %v3483_v41 = vld [vmem:[#allocation17 + $0x1be8] sm:$0xff] }
 0x77c   :  { %9748 = vmatprep.subr.bf16.mxu1 %v16357_v60  ;;  %v3570_v60 = vld [vmem:[#allocation17 + $0x1ea0] sm:$0xff] }
 0x77d   :  { %v16594_v16 = vcombine.low %v3570_v60, %v3578_v62 }
 0x77e   :  { %9612 = vmatpush1.bf16.msra.mxu0 %v16498_v1  ;;  %v16436_v1 = vcombine.low %v3411_v52, %v3419_v53  ;;  %v16501_v52 = vcombine.high %v3475_v37, %v3483_v41  ;;  %v2612_v53 = vld [vmem:[#allocation17 + $0xb0] sm:$0xff] }
 0x77f   :  { %9749 = vmatpush1.bf16.msra.mxu1 %v16356_v2  ;;  %9613 = vmatprep.subr.bf16.mxu0 %v16515_v8  ;;  %v16595_v2 = vcombine.high %v3570_v60, %v3578_v62  ;;  %v16453_v8 = vcombine.high %v3427_v12, %v3435_v63  ;;  %v16500_v60 = vcombine.low %v3475_v37, %v3483_v41  ;;  %v2676_v41 = vld [vmem:[#allocation17 + $0x2b0] sm:$0xff] }
 0x780   :  { %9750 = vmatprep.subr.bf16.mxu1 %v16373_v9  ;;  %v3586_v9 = vld [vmem:[#allocation17 + $0x1f20] sm:$0xff] }
 0x781   :  { %v16610_v33 = vcombine.low %v3586_v9, %v3594_v11 }
 0x782   :  { %9614 = vmatpush1.bf16.msra.mxu0 %v16514_v17  ;;  %v16452_v17 = vcombine.low %v3427_v12, %v3435_v63  ;;  %v2628_v63 = vld [vmem:[#allocation17 + $0x130] sm:$0xff] }
 0x783   :  { %9751 = vmatpush1.bf16.msra.mxu1 %v16372_v23  ;;  %9615 = vmatprep.subr.bf16.mxu0 %v16531_v24  ;;  %v16611_v23 = vcombine.high %v3586_v9, %v3594_v11  ;;  %v16469_v24 = vcombine.high %v3443_v13, %v3451_v14 }
 0x784   :  { %9761 = vmatprep.subr.bf16.mxu1 %v16389_v27  ;;  %v3602_v27 = vld [vmem:[#allocation17 + $0x1fa0] sm:$0xff] }
 0x786   :  { %9616 = vmatpush1.bf16.msra.mxu0 %v16530_v34  ;;  %9753 = vmatmul.mubr.bf16.vlgmr.msra.gmra.mrb[28].mxu1 %v21879_v51  ;;  %v16468_v34 = vcombine.low %v3443_v13, %v3451_v14  ;;  %v2644_v14 = vld [vmem:[#allocation17 + $0x1b0] sm:$0xff] }
 0x787   :  { %9762 = vmatpush1.bf16.msra.mxu1 %v16388_v35  ;;  %9793 = vmatprep.mubr.bf16.mxu1 %v21891_v42  ;;  %v16627_v35 = vcombine.high %v3602_v27, %v3610_v28 }
 0x788   :  { %9617 = vmatprep.subr.bf16.mxu0 %v16547_v36  ;;  %9763 = vmatprep.subr.bf16.mxu1 %v16405_v39  ;;  %v16485_v36 = vcombine.high %v3459_v31, %v3467_v32  ;;  %v2596_v39 = vld [vmem:[#allocation17 + $0x30] sm:$0xff] }
 0x789   :  { %v15623_v56 = vcombine.high %v2596_v39, %v2604_v5 }
 0x78a   :  { %9618 = vmatpush1.bf16.msra.mxu0 %v16546_v18 }
 0x78b   :  { %9764 = vmatpush1.bf16.msra.mxu1 %v16404_v26  ;;  %9619 = vmatprep.subr.bf16.mxu0 %v16563_v45  ;;  %v16626_v26 = vcombine.low %v3602_v27, %v3610_v28 }
 0x78c   :  { %9765 = vmatprep.subr.bf16.mxu1 %v16421_v30  ;;  %v16484_v30 = vcombine.low %v3459_v31, %v3467_v32  ;;  %v2660_v32 = vld [vmem:[#allocation17 + $0x230] sm:$0xff] }
 0x78e   :  { %9620 = vmatpush1.bf16.msra.mxu0 %v16562_v54  ;;  %v2620_v54 = vld [vmem:[#allocation17 + $0xf0] sm:$0xff] }
 0x78f   :  { %9766 = vmatpush1.bf16.msra.mxu1 %v16420_v57  ;;  %9621 = vmatprep.subr.bf16.mxu0 %v16579_v58  ;;  %v3491_v57 = vld [vmem:[#allocation17 + $0x1c28] sm:$0xff]  ;;  %v15639_v62 = vcombine.high %v2612_v53, %v2620_v54 }
 0x790   :  { %9767 = vmatprep.subr.bf16.mxu1 %v16437_v59  ;;  %v3499_v58 = vld [vmem:[#allocation17 + $0x1c68] sm:$0xff]  ;;  %v15622_v59 = vcombine.low %v2596_v39, %v2604_v5 }
 0x791   :  { %v16517_v12 = vcombine.high %v3491_v57, %v3499_v58  ;;  %v16516_v9 = vcombine.low %v3491_v57, %v3499_v58  ;;  %v2700_v57 = vld [vmem:[#allocation17 + $0x370] sm:$0xff]  ;;  %v3571_v58 = vld [vmem:[#allocation17 + $0x1ea8] sm:$0xff] }
 0x792   :  { %9622 = vmatpush1.bf16.msra.mxu0 %v16578_v0  ;;  %v2636_v0 = vld [vmem:[#allocation17 + $0x170] sm:$0xff] }
 0x793   :  { %9768 = vmatpush1.bf16.msra.mxu1 %v16436_v1  ;;  %9623 = vmatprep.subr.bf16.mxu0 %v16595_v2  ;;  %v3507_v1 = vld [vmem:[#allocation17 + $0x1ca8] sm:$0xff]  ;;  %v15655_v11 = vcombine.high %v2628_v63, %v2636_v0 }
 0x794   :  { %9769 = vmatprep.subr.bf16.mxu1 %v16453_v8  ;;  %v3515_v2 = vld [vmem:[#allocation17 + $0x1ce8] sm:$0xff]  ;;  %v15638_v8 = vcombine.low %v2612_v53, %v2620_v54  ;;  %v2692_v54 = vld [vmem:[#allocation17 + $0x330] sm:$0xff] }
 0x795   :  { %v16533_v13 = vcombine.high %v3507_v1, %v3515_v2  ;;  %v16532_v27 = vcombine.low %v3507_v1, %v3515_v2  ;;  %v2716_v1 = vld [vmem:[#allocation17 + $0x3f0] sm:$0xff]  ;;  %v3587_v2 = vld [vmem:[#allocation17 + $0x1f28] sm:$0xff] }
 0x796   :  { %9624 = vmatpush1.bf16.msra.mxu0 %v16594_v16  ;;  %v2652_v16 = vld [vmem:[#allocation17 + $0x1f0] sm:$0xff] }
 0x797   :  { %9770 = vmatpush1.bf16.msra.mxu1 %v16452_v17  ;;  %9625 = vmatprep.subr.bf16.mxu0 %v16611_v23  ;;  %v3523_v17 = vld [vmem:[#allocation17 + $0x1d28] sm:$0xff]  ;;  %v15671_v28 = vcombine.high %v2644_v14, %v2652_v16 }
 0x798   :  { %9771 = vmatprep.subr.bf16.mxu1 %v16469_v24  ;;  %v3531_v23 = vld [vmem:[#allocation17 + $0x1d68] sm:$0xff]  ;;  %v15654_v24 = vcombine.low %v2628_v63, %v2636_v0  ;;  %v2708_v0 = vld [vmem:[#allocation17 + $0x3b0] sm:$0xff] }
 0x799   :  { %v21941_v40 = vpop.f32.mrb[24].mxu1  ;;  %v16549_v31 = vcombine.high %v3523_v17, %v3531_v23  ;;  %v16548_v39 = vcombine.low %v3523_v17, %v3531_v23  ;;  %v2732_v17 = vld [vmem:[#allocation17 + $0x470] sm:$0xff]  ;;  %v3603_v23 = vld [vmem:[#allocation17 + $0x1fa8] sm:$0xff] }
 0x79a   :  { %v21943_v18 = vpop.f32.mrb[25].mxu1  ;;  %9626 = vmatpush1.bf16.msra.mxu0 %v16610_v33  ;;  %v2668_v33 = vld [vmem:[#allocation17 + $0x270] sm:$0xff] }
 0x79b   :  { %v9471_v45 = vpop.f32.mrb[26].mxu1  ;;  %9772 = vmatpush1.bf16.msra.mxu1 %v16468_v34  ;;  %9627 = vmatprep.subr.bf16.mxu0 %v16627_v35  ;;  %v3539_v34 = vld [vmem:[#allocation17 + $0x1da8] sm:$0xff]  ;;  %v15687_v5 = vcombine.high %v2660_v32, %v2668_v33 }
 0x79c   :  { %v9472_v49 = vpop.f32.mrb[27].mxu1  ;;  %9773 = vmatprep.subr.bf16.mxu1 %v16485_v36  ;;  %v3547_v35 = vld [vmem:[#allocation17 + $0x1de8] sm:$0xff]  ;;  %v15670_v36 = vcombine.low %v2644_v14, %v2652_v16  ;;  %v2724_v16 = vld [vmem:[#allocation17 + $0x430] sm:$0xff] }
 0x79d   :  { %v16565_v37 = vcombine.high %v3539_v34, %v3547_v35  ;;  %v3555_v45 = vld [vmem:[#allocation17 + $0x1e28] sm:$0xff]  ;;  %v16564_v49 = vcombine.low %v3539_v34, %v3547_v35  ;;  %v2748_v34 = vld [vmem:[#allocation17 + $0x4f0] sm:$0xff]  ;;  %v2597_v35 = vld [vmem:[#allocation17 + $0x38] sm:$0xff] }
 0x79e   :  { %9628 = vmatpush1.bf16.msra.mxu0 %v16626_v26  ;;  %v2684_v26 = vld [vmem:[#allocation17 + $0x2f0] sm:$0xff] }
 0x79f   :  { %9774 = vmatpush1.bf16.msra.mxu1 %v16484_v30  ;;  %9802 = vmatprep.subr.bf16.mxu0 %v15623_v56  ;;  %v3563_v30 = vld [vmem:[#allocation17 + $0x1e68] sm:$0xff]  ;;  %v15686_v56 = vcombine.low %v2660_v32, %v2668_v33  ;;  %v2740_v33 = vld [vmem:[#allocation17 + $0x4b0] sm:$0xff] }
 0x7a0   :  { %9775 = vmatprep.subr.bf16.mxu1 %v16501_v52  ;;  %v15703_v52 = vcombine.high %v2676_v41, %v2684_v26  ;;  %v16581_v53 = vcombine.high %v3555_v45, %v3563_v30 }
 0x7a1   :  { %9630 = vmatmul.mubr.bf16.vlgmr.msra.gmra.mrb[20].mxu0 %v21893_v19 }
 0x7a2   :  { %9803 = vmatpush1.bf16.msra.mxu0 %v15622_v59  ;;  %9834 = vmatprep.mubr.bf16.mxu0 %v21832_v20  ;;  %v3579_v59 = vld [vmem:[#allocation17 + $0x1ee8] sm:$0xff] }
 0x7a3   :  { %9776 = vmatpush1.bf16.msra.mxu1 %v16500_v60  ;;  %9804 = vmatprep.subr.bf16.mxu0 %v15639_v62  ;;  %v15702_v60 = vcombine.low %v2676_v41, %v2684_v26  ;;  %v16580_v62 = vcombine.low %v3555_v45, %v3563_v30  ;;  %v16597_v63 = vcombine.high %v3571_v58, %v3579_v59  ;;  %v2756_v26 = vld [vmem:[#allocation17 + $0x530] sm:$0xff]  ;;  %v2613_v30 = vld [vmem:[#allocation17 + $0xb8] sm:$0xff] }
 0x7a4   :  { %9777 = vmatprep.subr.bf16.mxu1 %v16517_v12  ;;  %v15719_v12 = vcombine.high %v2692_v54, %v2700_v57  ;;  %v2764_v45 = vld [vmem:[#allocation17 + $0x570] sm:$0xff] }
 0x7a6   :  { %9805 = vmatpush1.bf16.msra.mxu0 %v15638_v8  ;;  %v3595_v8 = vld [vmem:[#allocation17 + $0x1f68] sm:$0xff] }
 0x7a7   :  { %9778 = vmatpush1.bf16.msra.mxu1 %v16516_v9  ;;  %9806 = vmatprep.subr.bf16.mxu0 %v15655_v11  ;;  %v15718_v9 = vcombine.low %v2692_v54, %v2700_v57  ;;  %v16596_v11 = vcombine.low %v3571_v58, %v3579_v59  ;;  %v16613_v14 = vcombine.high %v3587_v2, %v3595_v8  ;;  %v2772_v57 = vld [vmem:[#allocation17 + $0x5b0] sm:$0xff]  ;;  %v2629_v59 = vld [vmem:[#allocation17 + $0x138] sm:$0xff] }
 0x7a8   :  { %9779 = vmatprep.subr.bf16.mxu1 %v16533_v13  ;;  %v15735_v13 = vcombine.high %v2708_v0, %v2716_v1  ;;  %v2780_v58 = vld [vmem:[#allocation17 + $0x5f0] sm:$0xff] }
 0x7aa   :  { %9807 = vmatpush1.bf16.msra.mxu0 %v15654_v24  ;;  %v3611_v24 = vld [vmem:[#allocation17 + $0x1fe8] sm:$0xff] }
 0x7ab   :  { %9780 = vmatpush1.bf16.msra.mxu1 %v16532_v27  ;;  %9808 = vmatprep.subr.bf16.mxu0 %v15671_v28  ;;  %v15734_v27 = vcombine.low %v2708_v0, %v2716_v1  ;;  %v16612_v28 = vcombine.low %v3587_v2, %v3595_v8  ;;  %v16629_v32 = vcombine.high %v3603_v23, %v3611_v24  ;;  %v2788_v1 = vld [vmem:[#allocation17 + $0x630] sm:$0xff]  ;;  %v2645_v8 = vld [vmem:[#allocation17 + $0x1b8] sm:$0xff] }
 0x7ac   :  { %9781 = vmatprep.subr.bf16.mxu1 %v16549_v31  ;;  %v15751_v31 = vcombine.high %v2724_v16, %v2732_v17  ;;  %v2796_v2 = vld [vmem:[#allocation17 + $0x670] sm:$0xff] }
 0x7ae   :  { %9809 = vmatpush1.bf16.msra.mxu0 %v15670_v36  ;;  %v2605_v36 = vld [vmem:[#allocation17 + $0x78] sm:$0xff] }
 0x7af   :  { %9782 = vmatpush1.bf16.msra.mxu1 %v16548_v39  ;;  %9810 = vmatprep.subr.bf16.mxu0 %v15687_v5  ;;  %v15750_v39 = vcombine.low %v2724_v16, %v2732_v17  ;;  %v16628_v5 = vcombine.low %v3603_v23, %v3611_v24  ;;  %v15625_v41 = vcombine.high %v2597_v35, %v2605_v36  ;;  %v2804_v17 = vld [vmem:[#allocation17 + $0x6b0] sm:$0xff]  ;;  %v2669_v24 = vld [vmem:[#allocation17 + $0x278] sm:$0xff] }
 0x7b0   :  { %9783 = vmatprep.subr.bf16.mxu1 %v16565_v37  ;;  %v15767_v37 = vcombine.high %v2740_v33, %v2748_v34  ;;  %v2812_v23 = vld [vmem:[#allocation17 + $0x6f0] sm:$0xff] }
 0x7b2   :  { %9811 = vmatpush1.bf16.msra.mxu0 %v15686_v56  ;;  %v2621_v56 = vld [vmem:[#allocation17 + $0xf8] sm:$0xff] }
 0x7b3   :  { %9784 = vmatpush1.bf16.msra.mxu1 %v16564_v49  ;;  %9812 = vmatprep.subr.bf16.mxu0 %v15703_v52  ;;  %v15766_v49 = vcombine.low %v2740_v33, %v2748_v34  ;;  %v15624_v52 = vcombine.low %v2597_v35, %v2605_v36  ;;  %v15641_v54 = vcombine.high %v2613_v30, %v2621_v56  ;;  %v2820_v33 = vld [vmem:[#allocation17 + $0x730] sm:$0xff]  ;;  %v2677_v35 = vld [vmem:[#allocation17 + $0x2b8] sm:$0xff] }
 0x7b4   :  { %9785 = vmatprep.subr.bf16.mxu1 %v16581_v53  ;;  %v15783_v53 = vcombine.high %v2756_v26, %v2764_v45  ;;  %v2828_v34 = vld [vmem:[#allocation17 + $0x770] sm:$0xff]  ;;  %v2685_v36 = vld [vmem:[#allocation17 + $0x2f8] sm:$0xff] }
 0x7b6   :  { %9813 = vmatpush1.bf16.msra.mxu0 %v15702_v60  ;;  %v2637_v60 = vld [vmem:[#allocation17 + $0x178] sm:$0xff] }
 0x7b7   :  { %9786 = vmatpush1.bf16.msra.mxu1 %v16580_v62  ;;  %9814 = vmatprep.subr.bf16.mxu0 %v15719_v12  ;;  %v15782_v62 = vcombine.low %v2756_v26, %v2764_v45  ;;  %v15640_v12 = vcombine.low %v2613_v30, %v2621_v56  ;;  %v15657_v0 = vcombine.high %v2629_v59, %v2637_v60  ;;  %v2836_v26 = vld [vmem:[#allocation17 + $0x7b0] sm:$0xff]  ;;  %v2693_v30 = vld [vmem:[#allocation17 + $0x338] sm:$0xff] }
 0x7b8   :  { %9787 = vmatprep.subr.bf16.mxu1 %v16597_v63  ;;  %v15799_v63 = vcombine.high %v2772_v57, %v2780_v58  ;;  %v2844_v45 = vld [vmem:[#allocation17 + $0x7f0] sm:$0xff]  ;;  %v2701_v56 = vld [vmem:[#allocation17 + $0x378] sm:$0xff] }
 0x7ba   :  { %9815 = vmatpush1.bf16.msra.mxu0 %v15718_v9  ;;  %v2653_v9 = vld [vmem:[#allocation17 + $0x1f8] sm:$0xff] }
 0x7bb   :  { %9788 = vmatpush1.bf16.msra.mxu1 %v16596_v11  ;;  %9816 = vmatprep.subr.bf16.mxu0 %v15735_v13  ;;  %v15798_v11 = vcombine.low %v2772_v57, %v2780_v58  ;;  %v15656_v13 = vcombine.low %v2629_v59, %v2637_v60  ;;  %v15673_v16 = vcombine.high %v2645_v8, %v2653_v9  ;;  %v2852_v57 = vld [vmem:[#allocation17 + $0x830] sm:$0xff]  ;;  %v2709_v59 = vld [vmem:[#allocation17 + $0x3b8] sm:$0xff] }
 0x7bc   :  { %9789 = vmatprep.subr.bf16.mxu1 %v16613_v14  ;;  %v15815_v14 = vcombine.high %v2788_v1, %v2796_v2  ;;  %v2860_v58 = vld [vmem:[#allocation17 + $0x870] sm:$0xff]  ;;  %v2717_v60 = vld [vmem:[#allocation17 + $0x3f8] sm:$0xff] }
 0x7be   :  { %9817 = vmatpush1.bf16.msra.mxu0 %v15734_v27  ;;  %v15814_v27 = vcombine.low %v2788_v1, %v2796_v2  ;;  %v2868_v1 = vld [vmem:[#allocation17 + $0x8b0] sm:$0xff] }
 0x7bf   :  { %9790 = vmatpush1.bf16.msra.mxu1 %v16612_v28  ;;  %9818 = vmatprep.subr.bf16.mxu0 %v15751_v31  ;;  %v15672_v28 = vcombine.low %v2645_v8, %v2653_v9  ;;  %v15831_v31 = vcombine.high %v2804_v17, %v2812_v23  ;;  %v2876_v2 = vld [vmem:[#allocation17 + $0x8f0] sm:$0xff]  ;;  %v2725_v8 = vld [vmem:[#allocation17 + $0x438] sm:$0xff] }
 0x7c0   :  { %9791 = vmatprep.subr.bf16.mxu1 %v16629_v32  ;;  %v2733_v9 = vld [vmem:[#allocation17 + $0x478] sm:$0xff] }
 0x7c2   :  { %9819 = vmatpush1.bf16.msra.mxu0 %v15750_v39  ;;  %v15830_v39 = vcombine.low %v2804_v17, %v2812_v23  ;;  %v2884_v17 = vld [vmem:[#allocation17 + $0x930] sm:$0xff] }
 0x7c3   :  { %9792 = vmatpush1.bf16.msra.mxu1 %v16628_v5  ;;  %9820 = vmatprep.subr.bf16.mxu0 %v15767_v37  ;;  %v15847_v37 = vcombine.high %v2820_v33, %v2828_v34  ;;  %v2892_v23 = vld [vmem:[#allocation17 + $0x970] sm:$0xff] }
 0x7c4   :  { %9966 = vmatprep.subr.bf16.mxu1 %v15625_v41  ;;  %v15705_v41 = vcombine.high %v2677_v35, %v2685_v36 }
 0x7c6   :  { %9794 = vmatmul.mubr.bf16.vlgmr.msra.gmra.mrb[28].mxu1 %v21893_v19  ;;  %9821 = vmatpush1.bf16.msra.mxu0 %v15766_v49  ;;  %v15846_v49 = vcombine.low %v2820_v33, %v2828_v34  ;;  %v2900_v33 = vld [vmem:[#allocation17 + $0x9b0] sm:$0xff] }
 0x7c7   :  { %9967 = vmatpush1.bf16.msra.mxu1 %v15624_v52  ;;  %9998 = vmatprep.mubr.bf16.mxu1 %v21832_v20  ;;  %v2661_v20 = vld [vmem:[#allocation17 + $0x238] sm:$0xff]  ;;  %v15704_v52 = vcombine.low %v2677_v35, %v2685_v36  ;;  %v2908_v34 = vld [vmem:[#allocation17 + $0x9f0] sm:$0xff] }
 0x7c8   :  { %9822 = vmatprep.subr.bf16.mxu0 %v15783_v53  ;;  %9968 = vmatprep.subr.bf16.mxu1 %v15641_v54  ;;  %v15689_v32 = vcombine.high %v2661_v20, %v2669_v24  ;;  %v15688_v5 = vcombine.low %v2661_v20, %v2669_v24  ;;  %v15863_v53 = vcombine.high %v2836_v26, %v2844_v45  ;;  %v2741_v20 = vld [vmem:[#allocation17 + $0x4b8] sm:$0xff] }
 0x7c9   :  { %v15721_v54 = vcombine.high %v2693_v30, %v2701_v56  ;;  %v2749_v24 = vld [vmem:[#allocation17 + $0x4f8] sm:$0xff] }
 0x7ca   :  { %9823 = vmatpush1.bf16.msra.mxu0 %v15782_v62  ;;  %v15862_v62 = vcombine.low %v2836_v26, %v2844_v45  ;;  %v2757_v35 = vld [vmem:[#allocation17 + $0x538] sm:$0xff]  ;;  %v2916_v26 = vld [vmem:[#allocation17 + $0xa30] sm:$0xff] }
 0x7cb   :  { %9969 = vmatpush1.bf16.msra.mxu1 %v15640_v12  ;;  %9824 = vmatprep.subr.bf16.mxu0 %v15799_v63  ;;  %v15720_v12 = vcombine.low %v2693_v30, %v2701_v56  ;;  %v15879_v63 = vcombine.high %v2852_v57, %v2860_v58  ;;  %v2765_v36 = vld [vmem:[#allocation17 + $0x578] sm:$0xff]  ;;  %v2924_v45 = vld [vmem:[#allocation17 + $0xa70] sm:$0xff] }
 0x7cc   :  { %9970 = vmatprep.subr.bf16.mxu1 %v15657_v0  ;;  %v15737_v0 = vcombine.high %v2709_v59, %v2717_v60  ;;  %v2773_v30 = vld [vmem:[#allocation17 + $0x5b8] sm:$0xff] }
 0x7cd   :  { %v2781_v56 = vld [vmem:[#allocation17 + $0x5f8] sm:$0xff] }
 0x7ce   :  { %9825 = vmatpush1.bf16.msra.mxu0 %v15798_v11  ;;  %v15878_v11 = vcombine.low %v2852_v57, %v2860_v58  ;;  %v2932_v57 = vld [vmem:[#allocation17 + $0xab0] sm:$0xff] }
 0x7cf   :  { %9971 = vmatpush1.bf16.msra.mxu1 %v15656_v13  ;;  %9826 = vmatprep.subr.bf16.mxu0 %v15815_v14  ;;  %v15736_v13 = vcombine.low %v2709_v59, %v2717_v60  ;;  %v15895_v14 = vcombine.high %v2868_v1, %v2876_v2  ;;  %v2940_v58 = vld [vmem:[#allocation17 + $0xaf0] sm:$0xff]  ;;  %v2789_v59 = vld [vmem:[#allocation17 + $0x638] sm:$0xff] }
 0x7d0   :  { %9972 = vmatprep.subr.bf16.mxu1 %v15673_v16  ;;  %v15753_v16 = vcombine.high %v2725_v8, %v2733_v9  ;;  %v2797_v60 = vld [vmem:[#allocation17 + $0x678] sm:$0xff] }
 0x7d2   :  { %9827 = vmatpush1.bf16.msra.mxu0 %v15814_v27  ;;  %v15894_v27 = vcombine.low %v2868_v1, %v2876_v2  ;;  %v2948_v1 = vld [vmem:[#allocation17 + $0xb30] sm:$0xff] }
 0x7d3   :  { %9973 = vmatpush1.bf16.msra.mxu1 %v15672_v28  ;;  %9828 = vmatprep.subr.bf16.mxu0 %v15831_v31  ;;  %v15752_v28 = vcombine.low %v2725_v8, %v2733_v9  ;;  %v15911_v31 = vcombine.high %v2884_v17, %v2892_v23  ;;  %v2956_v2 = vld [vmem:[#allocation17 + $0xb70] sm:$0xff]  ;;  %v2805_v8 = vld [vmem:[#allocation17 + $0x6b8] sm:$0xff] }
 0x7d4   :  { %9974 = vmatprep.subr.bf16.mxu1 %v15689_v32  ;;  %v15769_v32 = vcombine.high %v2741_v20, %v2749_v24  ;;  %v2813_v9 = vld [vmem:[#allocation17 + $0x6f8] sm:$0xff] }
 0x7d6   :  { %9829 = vmatpush1.bf16.msra.mxu0 %v15830_v39  ;;  %v15910_v39 = vcombine.low %v2884_v17, %v2892_v23  ;;  %v2964_v17 = vld [vmem:[#allocation17 + $0xbb0] sm:$0xff] }
 0x7d7   :  { %9975 = vmatpush1.bf16.msra.mxu1 %v15688_v5  ;;  %9830 = vmatprep.subr.bf16.mxu0 %v15847_v37  ;;  %v15768_v5 = vcombine.low %v2741_v20, %v2749_v24  ;;  %v15927_v37 = vcombine.high %v2900_v33, %v2908_v34  ;;  %v2972_v23 = vld [vmem:[#allocation17 + $0xbf0] sm:$0xff]  ;;  %v2821_v20 = vld [vmem:[#allocation17 + $0x738] sm:$0xff] }
 0x7d8   :  { %9976 = vmatprep.subr.bf16.mxu1 %v15705_v41  ;;  %v15785_v41 = vcombine.high %v2757_v35, %v2765_v36  ;;  %v2829_v24 = vld [vmem:[#allocation17 + $0x778] sm:$0xff] }
 0x7da   :  { %9831 = vmatpush1.bf16.msra.mxu0 %v15846_v49  ;;  %v15926_v49 = vcombine.low %v2900_v33, %v2908_v34  ;;  %v2980_v33 = vld [vmem:[#allocation17 + $0xc30] sm:$0xff] }
 0x7db   :  { %9977 = vmatpush1.bf16.msra.mxu1 %v15704_v52  ;;  %9832 = vmatprep.subr.bf16.mxu0 %v15863_v53  ;;  %v15784_v52 = vcombine.low %v2757_v35, %v2765_v36  ;;  %v15943_v53 = vcombine.high %v2916_v26, %v2924_v45  ;;  %v2988_v34 = vld [vmem:[#allocation17 + $0xc70] sm:$0xff]  ;;  %v2837_v35 = vld [vmem:[#allocation17 + $0x7b8] sm:$0xff] }
 0x7dc   :  { %9978 = vmatprep.subr.bf16.mxu1 %v15721_v54  ;;  %v15801_v54 = vcombine.high %v2773_v30, %v2781_v56  ;;  %v2845_v36 = vld [vmem:[#allocation17 + $0x7f8] sm:$0xff] }
 0x7de   :  { %9833 = vmatpush1.bf16.msra.mxu0 %v15862_v62  ;;  %v15942_v62 = vcombine.low %v2916_v26, %v2924_v45  ;;  %v2996_v26 = vld [vmem:[#allocation17 + $0xcb0] sm:$0xff] }
 0x7df   :  { %9979 = vmatpush1.bf16.msra.mxu1 %v15720_v12  ;;  %9843 = vmatprep.subr.bf16.mxu0 %v15879_v63  ;;  %v15800_v12 = vcombine.low %v2773_v30, %v2781_v56  ;;  %v15959_v63 = vcombine.high %v2932_v57, %v2940_v58  ;;  %v3004_v45 = vld [vmem:[#allocation17 + $0xcf0] sm:$0xff]  ;;  %v2853_v30 = vld [vmem:[#allocation17 + $0x838] sm:$0xff] }
 0x7e0   :  { %9980 = vmatprep.subr.bf16.mxu1 %v15737_v0  ;;  %v15817_v0 = vcombine.high %v2789_v59, %v2797_v60  ;;  %v2861_v56 = vld [vmem:[#allocation17 + $0x878] sm:$0xff] }
 0x7e1   :  { %9835 = vmatmul.mubr.bf16.vlgmr.msra.gmra.mrb[24].mxu0 %v21834_v22 }
 0x7e2   :  { %9844 = vmatpush1.bf16.msra.mxu0 %v15878_v11  ;;  %9875 = vmatprep.mubr.bf16.mxu0 %v21858_v61  ;;  %v15958_v11 = vcombine.low %v2932_v57, %v2940_v58  ;;  %v3012_v57 = vld [vmem:[#allocation17 + $0xd30] sm:$0xff] }
 0x7e3   :  { %9981 = vmatpush1.bf16.msra.mxu1 %v15736_v13  ;;  %9845 = vmatprep.subr.bf16.mxu0 %v15895_v14  ;;  %v15816_v13 = vcombine.low %v2789_v59, %v2797_v60  ;;  %v15975_v14 = vcombine.high %v2948_v1, %v2956_v2  ;;  %v3020_v58 = vld [vmem:[#allocation17 + $0xd70] sm:$0xff]  ;;  %v2869_v59 = vld [vmem:[#allocation17 + $0x8b8] sm:$0xff] }
 0x7e4   :  { %9982 = vmatprep.subr.bf16.mxu1 %v15753_v16  ;;  %v15833_v16 = vcombine.high %v2805_v8, %v2813_v9  ;;  %v2877_v60 = vld [vmem:[#allocation17 + $0x8f8] sm:$0xff] }
 0x7e6   :  { %9846 = vmatpush1.bf16.msra.mxu0 %v15894_v27  ;;  %v15974_v27 = vcombine.low %v2948_v1, %v2956_v2  ;;  %v3028_v1 = vld [vmem:[#allocation17 + $0xdb0] sm:$0xff] }
 0x7e7   :  { %9983 = vmatpush1.bf16.msra.mxu1 %v15752_v28  ;;  %9847 = vmatprep.subr.bf16.mxu0 %v15911_v31  ;;  %v15832_v28 = vcombine.low %v2805_v8, %v2813_v9  ;;  %v15991_v31 = vcombine.high %v2964_v17, %v2972_v23  ;;  %v3036_v2 = vld [vmem:[#allocation17 + $0xdf0] sm:$0xff]  ;;  %v2885_v8 = vld [vmem:[#allocation17 + $0x938] sm:$0xff] }
 0x7e8   :  { %9984 = vmatprep.subr.bf16.mxu1 %v15769_v32  ;;  %v15849_v32 = vcombine.high %v2821_v20, %v2829_v24  ;;  %v2893_v9 = vld [vmem:[#allocation17 + $0x978] sm:$0xff] }
 0x7ea   :  { %9848 = vmatpush1.bf16.msra.mxu0 %v15910_v39  ;;  %v15990_v39 = vcombine.low %v2964_v17, %v2972_v23  ;;  %v3044_v17 = vld [vmem:[#allocation17 + $0xe30] sm:$0xff] }
 0x7eb   :  { %9985 = vmatpush1.bf16.msra.mxu1 %v15768_v5  ;;  %9849 = vmatprep.subr.bf16.mxu0 %v15927_v37  ;;  %v15848_v5 = vcombine.low %v2821_v20, %v2829_v24  ;;  %v16007_v37 = vcombine.high %v2980_v33, %v2988_v34  ;;  %v3052_v23 = vld [vmem:[#allocation17 + $0xe70] sm:$0xff]  ;;  %v2901_v20 = vld [vmem:[#allocation17 + $0x9b8] sm:$0xff] }
 0x7ec   :  { %9986 = vmatprep.subr.bf16.mxu1 %v15785_v41  ;;  %v15865_v41 = vcombine.high %v2837_v35, %v2845_v36  ;;  %v2909_v24 = vld [vmem:[#allocation17 + $0x9f8] sm:$0xff] }
 0x7ee   :  { %9850 = vmatpush1.bf16.msra.mxu0 %v15926_v49  ;;  %v16006_v49 = vcombine.low %v2980_v33, %v2988_v34  ;;  %v3068_v33 = vld [vmem:[#allocation17 + $0xef0] sm:$0xff]  ;;  %v2925_v34 = vld [vmem:[#allocation17 + $0xa78] sm:$0xff] }
 0x7ef   :  { %9987 = vmatpush1.bf16.msra.mxu1 %v15784_v52  ;;  %9851 = vmatprep.subr.bf16.mxu0 %v15943_v53  ;;  %v15864_v52 = vcombine.low %v2837_v35, %v2845_v36  ;;  %v16023_v53 = vcombine.high %v2996_v26, %v3004_v45  ;;  %v16070_v35 = vcombine.low %v3044_v17, %v3052_v23 }
 0x7f0   :  { %9988 = vmatprep.subr.bf16.mxu1 %v15801_v54  ;;  %v15881_v54 = vcombine.high %v2853_v30, %v2861_v56  ;;  %v15928_v36 = vcombine.low %v2901_v20, %v2909_v24 }
 0x7f2   :  { %9852 = vmatpush1.bf16.msra.mxu0 %v15942_v62  ;;  %v16022_v62 = vcombine.low %v2996_v26, %v3004_v45  ;;  %v2933_v26 = vld [vmem:[#allocation17 + $0xab8] sm:$0xff] }
 0x7f3   :  { %9989 = vmatpush1.bf16.msra.mxu1 %v15800_v12  ;;  %9853 = vmatprep.subr.bf16.mxu0 %v15959_v63  ;;  %v15880_v12 = vcombine.low %v2853_v30, %v2861_v56  ;;  %v16039_v63 = vcombine.high %v3012_v57, %v3020_v58  ;;  %v2941_v45 = vld [vmem:[#allocation17 + $0xaf8] sm:$0xff] }
 0x7f4   :  { %9990 = vmatprep.subr.bf16.mxu1 %v15817_v0  ;;  %v15897_v0 = vcombine.high %v2869_v59, %v2877_v60 }
 0x7f6   :  { %9854 = vmatpush1.bf16.msra.mxu0 %v15958_v11  ;;  %v16038_v11 = vcombine.low %v3012_v57, %v3020_v58  ;;  %v2949_v57 = vld [vmem:[#allocation17 + $0xb38] sm:$0xff] }
 0x7f7   :  { %9991 = vmatpush1.bf16.msra.mxu1 %v15816_v13  ;;  %9855 = vmatprep.subr.bf16.mxu0 %v15975_v14  ;;  %v15896_v13 = vcombine.low %v2869_v59, %v2877_v60  ;;  %v16055_v14 = vcombine.high %v3028_v1, %v3036_v2  ;;  %v2957_v58 = vld [vmem:[#allocation17 + $0xb78] sm:$0xff]  ;;  %v15960_v60 = vcombine.low %v2933_v26, %v2941_v45 }
 0x7f8   :  { %9992 = vmatprep.subr.bf16.mxu1 %v15833_v16  ;;  %v15913_v16 = vcombine.high %v2885_v8, %v2893_v9 }
 0x7fa   :  { %9856 = vmatpush1.bf16.msra.mxu0 %v15974_v27  ;;  %v16054_v27 = vcombine.low %v3028_v1, %v3036_v2  ;;  %v2965_v1 = vld [vmem:[#allocation17 + $0xbb8] sm:$0xff] }
 0x7fb   :  { %9993 = vmatpush1.bf16.msra.mxu1 %v15832_v28  ;;  %9857 = vmatprep.subr.bf16.mxu0 %v15991_v31  ;;  %v15912_v28 = vcombine.low %v2885_v8, %v2893_v9  ;;  %v16071_v31 = vcombine.high %v3044_v17, %v3052_v23  ;;  %v2973_v2 = vld [vmem:[#allocation17 + $0xbf8] sm:$0xff]  ;;  %v15976_v9 = vcombine.low %v2949_v57, %v2957_v58 }
 0x7fc   :  { %9994 = vmatprep.subr.bf16.mxu1 %v15849_v32  ;;  %v3060_v32 = vld [vmem:[#allocation17 + $0xeb0] sm:$0xff]  ;;  %v2981_v17 = vld [vmem:[#allocation17 + $0xc38] sm:$0xff] }
 0x7fd   :  { %v16086_v30 = vcombine.low %v3060_v32, %v3068_v33  ;;  %v2989_v23 = vld [vmem:[#allocation17 + $0xc78] sm:$0xff] }
 0x7fe   :  { %9858 = vmatpush1.bf16.msra.mxu0 %v15990_v39  ;;  %v16087_v39 = vcombine.high %v3060_v32, %v3068_v33  ;;  %v2997_v32 = vld [vmem:[#allocation17 + $0xcb8] sm:$0xff] }
 0x7ff   :  { %9995 = vmatpush1.bf16.msra.mxu1 %v15848_v5  ;;  %9859 = vmatprep.subr.bf16.mxu0 %v16007_v37  ;;  %v3076_v37 = vld [vmem:[#allocation17 + $0xf30] sm:$0xff]  ;;  %v3005_v33 = vld [vmem:[#allocation17 + $0xcf8] sm:$0xff] }
 0x800   :  { %9996 = vmatprep.subr.bf16.mxu1 %v15865_v41  ;;  %v3084_v41 = vld [vmem:[#allocation17 + $0xf70] sm:$0xff] }
 0x801   :  { %v16102_v59 = vcombine.low %v3076_v37, %v3084_v41 }
 0x802   :  { %9860 = vmatpush1.bf16.msra.mxu0 %v16006_v49  ;;  %v16103_v49 = vcombine.high %v3076_v37, %v3084_v41  ;;  %v3013_v37 = vld [vmem:[#allocation17 + $0xd38] sm:$0xff] }
 0x803   :  { %9997 = vmatpush1.bf16.msra.mxu1 %v15864_v52  ;;  %9861 = vmatprep.subr.bf16.mxu0 %v16023_v53  ;;  %v15961_v52 = vcombine.high %v2933_v26, %v2941_v45  ;;  %v3092_v53 = vld [vmem:[#allocation17 + $0xfb0] sm:$0xff]  ;;  %v3021_v41 = vld [vmem:[#allocation17 + $0xd78] sm:$0xff]  ;;  %v16024_v45 = vcombine.low %v2997_v32, %v3005_v33 }
 0x804   :  { %10007 = vmatprep.subr.bf16.mxu1 %v15881_v54  ;;  %v3100_v54 = vld [vmem:[#allocation17 + $0xff0] sm:$0xff] }
 0x805   :  { %v16118_v8 = vcombine.low %v3092_v53, %v3100_v54 }
 0x806   :  { %9862 = vmatpush1.bf16.msra.mxu0 %v16022_v62  ;;  %9999 = vmatmul.mubr.bf16.vlgmr.msra.gmra.mrb[32].mxu1 %v21834_v22  ;;  %v15929_v22 = vcombine.high %v2901_v20, %v2909_v24  ;;  %v16119_v62 = vcombine.high %v3092_v53, %v3100_v54  ;;  %v15992_v24 = vcombine.low %v2965_v1, %v2973_v2  ;;  %v3029_v53 = vld [vmem:[#allocation17 + $0xdb8] sm:$0xff] }
 0x807   :  { %10008 = vmatpush1.bf16.msra.mxu1 %v15880_v12  ;;  %10039 = vmatprep.mubr.bf16.mxu1 %v21858_v61  ;;  %v2917_v61 = vld [vmem:[#allocation17 + $0xa38] sm:$0xff]  ;;  %v15977_v12 = vcombine.high %v2949_v57, %v2957_v58  ;;  %v16040_v58 = vcombine.low %v3013_v37, %v3021_v41 }
 0x808   :  { %9863 = vmatprep.subr.bf16.mxu0 %v16039_v63  ;;  %10009 = vmatprep.subr.bf16.mxu1 %v15897_v0  ;;  %v15945_v5 = vcombine.high %v2917_v61, %v2925_v34  ;;  %v15944_v56 = vcombine.low %v2917_v61, %v2925_v34  ;;  %v3108_v63 = vld [vmem:[#allocation17 + $0x1030] sm:$0xff]  ;;  %v16008_v34 = vcombine.low %v2981_v17, %v2989_v23  ;;  %v3037_v54 = vld [vmem:[#allocation17 + $0xdf8] sm:$0xff] }
 0x809   :  { %v3116_v0 = vld [vmem:[#allocation17 + $0x1070] sm:$0xff] }
 0x80a   :  { %9864 = vmatpush1.bf16.msra.mxu0 %v16038_v11  ;;  %v16135_v11 = vcombine.high %v3108_v63, %v3116_v0  ;;  %v16134_v20 = vcombine.low %v3108_v63, %v3116_v0  ;;  %v3045_v63 = vld [vmem:[#allocation17 + $0xe38] sm:$0xff] }
 0x80b   :  { %10010 = vmatpush1.bf16.msra.mxu1 %v15896_v13  ;;  %9865 = vmatprep.subr.bf16.mxu0 %v16055_v14  ;;  %v15993_v13 = vcombine.high %v2965_v1, %v2973_v2  ;;  %v3124_v14 = vld [vmem:[#allocation17 + $0x10b0] sm:$0xff]  ;;  %v3053_v0 = vld [vmem:[#allocation17 + $0xe78] sm:$0xff]  ;;  %v16056_v2 = vcombine.low %v3029_v53, %v3037_v54 }
 0x80c   :  { %10011 = vmatprep.subr.bf16.mxu1 %v15913_v16  ;;  %v3132_v16 = vld [vmem:[#allocation17 + $0x10f0] sm:$0xff] }
 0x80d   :  { %v16150_v61 = vcombine.low %v3124_v14, %v3132_v16 }
 0x80e   :  { %9866 = vmatpush1.bf16.msra.mxu0 %v16054_v27  ;;  %v16151_v27 = vcombine.high %v3124_v14, %v3132_v16  ;;  %v3061_v14 = vld [vmem:[#allocation17 + $0xeb8] sm:$0xff] }
 0x80f   :  { %10012 = vmatpush1.bf16.msra.mxu1 %v15912_v28  ;;  %9867 = vmatprep.subr.bf16.mxu0 %v16071_v31  ;;  %v16009_v28 = vcombine.high %v2981_v17, %v2989_v23  ;;  %v3140_v31 = vld [vmem:[#allocation17 + $0x1130] sm:$0xff]  ;;  %v3069_v16 = vld [vmem:[#allocation17 + $0xef8] sm:$0xff]  ;;  %v16072_v23 = vcombine.low %v3045_v63, %v3053_v0 }
 0x810   :  { %10013 = vmatprep.subr.bf16.mxu1 %v15929_v22  ;;  %v3148_v22 = vld [vmem:[#allocation17 + $0x1170] sm:$0xff] }
 0x811   :  { %v16166_v26 = vcombine.low %v3140_v31, %v3148_v22 }
 0x812   :  { %9868 = vmatpush1.bf16.msra.mxu0 %v16070_v35  ;;  %v16167_v35 = vcombine.high %v3140_v31, %v3148_v22  ;;  %v3077_v31 = vld [vmem:[#allocation17 + $0xf38] sm:$0xff] }
 0x813   :  { %10014 = vmatpush1.bf16.msra.mxu1 %v15928_v36  ;;  %9869 = vmatprep.subr.bf16.mxu0 %v16087_v39  ;;  %v16025_v36 = vcombine.high %v2997_v32, %v3005_v33  ;;  %v3156_v39 = vld [vmem:[#allocation17 + $0x11b0] sm:$0xff]  ;;  %v3085_v22 = vld [vmem:[#allocation17 + $0xf78] sm:$0xff]  ;;  %v16088_v33 = vcombine.low %v3061_v14, %v3069_v16 }
 0x814   :  { %10015 = vmatprep.subr.bf16.mxu1 %v15945_v5  ;;  %v3164_v5 = vld [vmem:[#allocation17 + $0x11f0] sm:$0xff] }
 0x815   :  { %v16182_v57 = vcombine.low %v3156_v39, %v3164_v5 }
 0x816   :  { %9870 = vmatpush1.bf16.msra.mxu0 %v16086_v30  ;;  %v16183_v30 = vcombine.high %v3156_v39, %v3164_v5  ;;  %v3093_v39 = vld [vmem:[#allocation17 + $0xfb8] sm:$0xff] }
 0x817   :  { %10016 = vmatpush1.bf16.msra.mxu1 %v15944_v56  ;;  %9871 = vmatprep.subr.bf16.mxu0 %v16103_v49  ;;  %v16041_v56 = vcombine.high %v3013_v37, %v3021_v41  ;;  %v3172_v49 = vld [vmem:[#allocation17 + $0x1230] sm:$0xff]  ;;  %v3101_v5 = vld [vmem:[#allocation17 + $0xff8] sm:$0xff]  ;;  %v16104_v41 = vcombine.low %v3077_v31, %v3085_v22 }
 0x818   :  { %10017 = vmatprep.subr.bf16.mxu1 %v15961_v52  ;;  %v3180_v52 = vld [vmem:[#allocation17 + $0x1270] sm:$0xff] }
 0x819   :  { %v16198_v1 = vcombine.low %v3172_v49, %v3180_v52 }
 0x81a   :  { %9872 = vmatpush1.bf16.msra.mxu0 %v16102_v59  ;;  %v16199_v59 = vcombine.high %v3172_v49, %v3180_v52  ;;  %v3109_v49 = vld [vmem:[#allocation17 + $0x1038] sm:$0xff] }
 0x81b   :  { %10018 = vmatpush1.bf16.msra.mxu1 %v15960_v60  ;;  %9873 = vmatprep.subr.bf16.mxu0 %v16119_v62  ;;  %v16057_v60 = vcombine.high %v3029_v53, %v3037_v54  ;;  %v3188_v62 = vld [vmem:[#allocation17 + $0x12b0] sm:$0xff]  ;;  %v3117_v52 = vld [vmem:[#allocation17 + $0x1078] sm:$0xff]  ;;  %v16120_v54 = vcombine.low %v3093_v39, %v3101_v5 }
 0x81c   :  { %10019 = vmatprep.subr.bf16.mxu1 %v15977_v12  ;;  %v3196_v12 = vld [vmem:[#allocation17 + $0x12f0] sm:$0xff] }
 0x81d   :  { %v16214_v17 = vcombine.low %v3188_v62, %v3196_v12 }
 0x81e   :  { %9874 = vmatpush1.bf16.msra.mxu0 %v16118_v8  ;;  %v16215_v8 = vcombine.high %v3188_v62, %v3196_v12  ;;  %v3125_v62 = vld [vmem:[#allocation17 + $0x10b8] sm:$0xff] }
 0x81f   :  { %10020 = vmatpush1.bf16.msra.mxu1 %v15976_v9  ;;  %9884 = vmatprep.subr.bf16.mxu0 %v16135_v11  ;;  %v16073_v9 = vcombine.high %v3045_v63, %v3053_v0  ;;  %v3204_v11 = vld [vmem:[#allocation17 + $0x1330] sm:$0xff]  ;;  %v3133_v12 = vld [vmem:[#allocation17 + $0x10f8] sm:$0xff]  ;;  %v16136_v0 = vcombine.low %v3109_v49, %v3117_v52 }
 0x820   :  { %10021 = vmatprep.subr.bf16.mxu1 %v15993_v13  ;;  %v3212_v13 = vld [vmem:[#allocation17 + $0x1370] sm:$0xff] }
 0x821   :  { %9876 = vmatmul.mubr.bf16.vlgmr.msra.gmra.mrb[24].mxu0 %v21860_v21  ;;  %v16230_v32 = vcombine.low %v3204_v11, %v3212_v13 }
 0x822   :  { %9885 = vmatpush1.bf16.msra.mxu0 %v16134_v20  ;;  %9916 = vmatprep.mubr.bf16.mxu0 %v21862_v25  ;;  %v16231_v20 = vcombine.high %v3204_v11, %v3212_v13  ;;  %v3141_v11 = vld [vmem:[#allocation17 + $0x1138] sm:$0xff] }
 0x823   :  { %10022 = vmatpush1.bf16.msra.mxu1 %v15992_v24  ;;  %9886 = vmatprep.subr.bf16.mxu0 %v16151_v27  ;;  %v16089_v24 = vcombine.high %v3061_v14, %v3069_v16  ;;  %v3220_v27 = vld [vmem:[#allocation17 + $0x13b0] sm:$0xff]  ;;  %v3149_v13 = vld [vmem:[#allocation17 + $0x1178] sm:$0xff]  ;;  %v16152_v16 = vcombine.low %v3125_v62, %v3133_v12 }
 0x824   :  { %10023 = vmatprep.subr.bf16.mxu1 %v16009_v28  ;;  %v3228_v28 = vld [vmem:[#allocation17 + $0x13f0] sm:$0xff] }
 0x825   :  { %v16246_v37 = vcombine.low %v3220_v27, %v3228_v28 }
 0x826   :  { %9887 = vmatpush1.bf16.msra.mxu0 %v16150_v61  ;;  %v16247_v61 = vcombine.high %v3220_v27, %v3228_v28  ;;  %v3157_v27 = vld [vmem:[#allocation17 + $0x11b8] sm:$0xff] }
 0x827   :  { %10024 = vmatpush1.bf16.msra.mxu1 %v16008_v34  ;;  %9888 = vmatprep.subr.bf16.mxu0 %v16167_v35  ;;  %v16105_v34 = vcombine.high %v3077_v31, %v3085_v22  ;;  %v3236_v35 = vld [vmem:[#allocation17 + $0x1430] sm:$0xff]  ;;  %v3165_v28 = vld [vmem:[#allocation17 + $0x11f8] sm:$0xff]  ;;  %v16168_v22 = vcombine.low %v3141_v11, %v3149_v13 }
 0x828   :  { %10025 = vmatprep.subr.bf16.mxu1 %v16025_v36  ;;  %v3244_v36 = vld [vmem:[#allocation17 + $0x1470] sm:$0xff] }
 0x829   :  { %v16262_v53 = vcombine.low %v3236_v35, %v3244_v36 }
 0x82a   :  { %9889 = vmatpush1.bf16.msra.mxu0 %v16166_v26  ;;  %v16263_v26 = vcombine.high %v3236_v35, %v3244_v36  ;;  %v16184_v36 = vcombine.low %v3157_v27, %v3165_v28 }
 0x82b   :  { %10026 = vmatpush1.bf16.msra.mxu1 %v16024_v45  ;;  %9890 = vmatprep.subr.bf16.mxu0 %v16183_v30  ;;  %v16121_v45 = vcombine.high %v3093_v39, %v3101_v5  ;;  %v3252_v30 = vld [vmem:[#allocation17 + $0x14b0] sm:$0xff] }
 0x82c   :  { %10027 = vmatprep.subr.bf16.mxu1 %v16041_v56  ;;  %v3260_v56 = vld [vmem:[#allocation17 + $0x14f0] sm:$0xff] }
 0x82d   :  { %v16278_v63 = vcombine.low %v3252_v30, %v3260_v56 }
 0x82e   :  { %9891 = vmatpush1.bf16.msra.mxu0 %v16182_v57  ;;  %v16279_v57 = vcombine.high %v3252_v30, %v3260_v56 }
 0x82f   :  { %10028 = vmatpush1.bf16.msra.mxu1 %v16040_v58  ;;  %9892 = vmatprep.subr.bf16.mxu0 %v16199_v59  ;;  %v16137_v58 = vcombine.high %v3109_v49, %v3117_v52  ;;  %v3268_v59 = vld [vmem:[#allocation17 + $0x1530] sm:$0xff] }
 0x830   :  { %10029 = vmatprep.subr.bf16.mxu1 %v16057_v60  ;;  %v3276_v60 = vld [vmem:[#allocation17 + $0x1570] sm:$0xff] }
 0x831   :  { %v16294_v14 = vcombine.low %v3268_v59, %v3276_v60 }
 0x832   :  { %9893 = vmatpush1.bf16.msra.mxu0 %v16198_v1  ;;  %v16295_v1 = vcombine.high %v3268_v59, %v3276_v60 }
 0x833   :  { %10030 = vmatpush1.bf16.msra.mxu1 %v16056_v2  ;;  %9894 = vmatprep.subr.bf16.mxu0 %v16215_v8  ;;  %v16153_v2 = vcombine.high %v3125_v62, %v3133_v12  ;;  %v3284_v8 = vld [vmem:[#allocation17 + $0x15b0] sm:$0xff] }
 0x834   :  { %10031 = vmatprep.subr.bf16.mxu1 %v16073_v9  ;;  %v3292_v9 = vld [vmem:[#allocation17 + $0x15f0] sm:$0xff] }
 0x835   :  { %v16310_v31 = vcombine.low %v3284_v8, %v3292_v9 }
 0x836   :  { %9895 = vmatpush1.bf16.msra.mxu0 %v16214_v17  ;;  %v16311_v17 = vcombine.high %v3284_v8, %v3292_v9 }
 0x837   :  { %10032 = vmatpush1.bf16.msra.mxu1 %v16072_v23  ;;  %9896 = vmatprep.subr.bf16.mxu0 %v16231_v20  ;;  %v16169_v23 = vcombine.high %v3141_v11, %v3149_v13  ;;  %v3300_v20 = vld [vmem:[#allocation17 + $0x1630] sm:$0xff] }
 0x838   :  { %10033 = vmatprep.subr.bf16.mxu1 %v16089_v24  ;;  %v3308_v24 = vld [vmem:[#allocation17 + $0x1670] sm:$0xff] }
 0x839   :  { %v16326_v35 = vcombine.low %v3300_v20, %v3308_v24 }
 0x83a   :  { %9897 = vmatpush1.bf16.msra.mxu0 %v16230_v32  ;;  %v16327_v32 = vcombine.high %v3300_v20, %v3308_v24 }
 0x83b   :  { %10034 = vmatpush1.bf16.msra.mxu1 %v16088_v33  ;;  %9898 = vmatprep.subr.bf16.mxu0 %v16247_v61  ;;  %v3316_v33 = vld [vmem:[#allocation17 + $0x16b0] sm:$0xff] }
 0x83c   :  { %10035 = vmatprep.subr.bf16.mxu1 %v16105_v34  ;;  %v3324_v61 = vld [vmem:[#allocation17 + $0x16f0] sm:$0xff]  ;;  %v3181_v34 = vld [vmem:[#allocation17 + $0x1278] sm:$0xff] }
 0x83d   :  { %v16343_v39 = vcombine.high %v3316_v33, %v3324_v61  ;;  %v16342_v30 = vcombine.low %v3316_v33, %v3324_v61 }
 0x83e   :  { %9899 = vmatpush1.bf16.msra.mxu0 %v16246_v37  ;;  %v3332_v37 = vld [vmem:[#allocation17 + $0x1730] sm:$0xff] }
 0x83f   :  { %10036 = vmatpush1.bf16.msra.mxu1 %v16104_v41  ;;  %9900 = vmatprep.subr.bf16.mxu0 %v16263_v26  ;;  %v3340_v41 = vld [vmem:[#allocation17 + $0x1770] sm:$0xff]  ;;  %v3189_v26 = vld [vmem:[#allocation17 + $0x12b8] sm:$0xff] }
 0x840   :  { %10037 = vmatprep.subr.bf16.mxu1 %v16121_v45  ;;  %v3197_v45 = vld [vmem:[#allocation17 + $0x12f8] sm:$0xff]  ;;  %v16359_v49 = vcombine.high %v3332_v37, %v3340_v41  ;;  %v16358_v59 = vcombine.low %v3332_v37, %v3340_v41 }
 0x841   :  { %v16217_v52 = vcombine.high %v3189_v26, %v3197_v45  ;;  %v16216_v60 = vcombine.low %v3189_v26, %v3197_v45 }
 0x842   :  { %9901 = vmatpush1.bf16.msra.mxu0 %v16262_v53  ;;  %v3348_v53 = vld [vmem:[#allocation17 + $0x17b0] sm:$0xff] }
 0x843   :  { %10038 = vmatpush1.bf16.msra.mxu1 %v16120_v54  ;;  %9902 = vmatprep.subr.bf16.mxu0 %v16279_v57  ;;  %v3356_v54 = vld [vmem:[#allocation17 + $0x17f0] sm:$0xff]  ;;  %v3205_v57 = vld [vmem:[#allocation17 + $0x1338] sm:$0xff] }
 0x844   :  { %10048 = vmatprep.subr.bf16.mxu1 %v16137_v58  ;;  %v3213_v58 = vld [vmem:[#allocation17 + $0x1378] sm:$0xff]  ;;  %v16375_v62 = vcombine.high %v3348_v53, %v3356_v54  ;;  %v16374_v8 = vcombine.low %v3348_v53, %v3356_v54 }
 0x845   :  { %v16233_v12 = vcombine.high %v3205_v57, %v3213_v58  ;;  %v16232_v9 = vcombine.low %v3205_v57, %v3213_v58 }
 0x846   :  { %9903 = vmatpush1.bf16.msra.mxu0 %v16278_v63  ;;  %10040 = vmatmul.mubr.bf16.vlgmr.msra.gmra.mrb[32].mxu1 %v21860_v21  ;;  %v16185_v21 = vcombine.high %v3157_v27, %v3165_v28  ;;  %v3364_v63 = vld [vmem:[#allocation17 + $0x1830] sm:$0xff] }
 0x847   :  { %10049 = vmatpush1.bf16.msra.mxu1 %v16136_v0  ;;  %10080 = vmatprep.mubr.bf16.mxu1 %v21862_v25  ;;  %v3173_v25 = vld [vmem:[#allocation17 + $0x1238] sm:$0xff]  ;;  %v3372_v0 = vld [vmem:[#allocation17 + $0x1870] sm:$0xff] }
 0x848   :  { %9904 = vmatprep.subr.bf16.mxu0 %v16295_v1  ;;  %10050 = vmatprep.subr.bf16.mxu1 %v16153_v2  ;;  %v16201_v5 = vcombine.high %v3173_v25, %v3181_v34  ;;  %v16200_v56 = vcombine.low %v3173_v25, %v3181_v34  ;;  %v3221_v1 = vld [vmem:[#allocation17 + $0x13b8] sm:$0xff]  ;;  %v16391_v11 = vcombine.high %v3364_v63, %v3372_v0 }
 0x849   :  { %v3229_v2 = vld [vmem:[#allocation17 + $0x13f8] sm:$0xff]  ;;  %v16390_v20 = vcombine.low %v3364_v63, %v3372_v0 }
 0x84a   :  { %9905 = vmatpush1.bf16.msra.mxu0 %v16294_v14  ;;  %v16249_v13 = vcombine.high %v3221_v1, %v3229_v2  ;;  %v3380_v14 = vld [vmem:[#allocation17 + $0x18b0] sm:$0xff]  ;;  %v16248_v24 = vcombine.low %v3221_v1, %v3229_v2 }
 0x84b   :  { %10051 = vmatpush1.bf16.msra.mxu1 %v16152_v16  ;;  %9906 = vmatprep.subr.bf16.mxu0 %v16311_v17  ;;  %v3388_v16 = vld [vmem:[#allocation17 + $0x18f0] sm:$0xff]  ;;  %v3237_v17 = vld [vmem:[#allocation17 + $0x1438] sm:$0xff] }
 0x84c   :  { %10052 = vmatprep.subr.bf16.mxu1 %v16169_v23  ;;  %v3245_v23 = vld [vmem:[#allocation17 + $0x1478] sm:$0xff]  ;;  %v16407_v27 = vcombine.high %v3380_v14, %v3388_v16  ;;  %v16406_v33 = vcombine.low %v3380_v14, %v3388_v16 }
 0x84d   :  { %v16265_v28 = vcombine.high %v3237_v17, %v3245_v23  ;;  %v16264_v61 = vcombine.low %v3237_v17, %v3245_v23 }
 0x84e   :  { %9907 = vmatpush1.bf16.msra.mxu0 %v16310_v31  ;;  %v3396_v31 = vld [vmem:[#allocation17 + $0x1930] sm:$0xff] }
 0x84f   :  { %10053 = vmatpush1.bf16.msra.mxu1 %v16168_v22  ;;  %9908 = vmatprep.subr.bf16.mxu0 %v16327_v32  ;;  %v3404_v22 = vld [vmem:[#allocation17 + $0x1970] sm:$0xff]  ;;  %v3253_v32 = vld [vmem:[#allocation17 + $0x14b8] sm:$0xff] }
 0x850   :  { %10054 = vmatprep.subr.bf16.mxu1 %v16185_v21  ;;  %v3261_v21 = vld [vmem:[#allocation17 + $0x14f8] sm:$0xff]  ;;  %v16423_v25 = vcombine.high %v3396_v31, %v3404_v22  ;;  %v16422_v37 = vcombine.low %v3396_v31, %v3404_v22 }
 0x851   :  { %v16281_v34 = vcombine.high %v3253_v32, %v3261_v21  ;;  %v16280_v41 = vcombine.low %v3253_v32, %v3261_v21  ;;  %v3333_v31 = vld [vmem:[#allocation17 + $0x1738] sm:$0xff] }
 0x852   :  { %9909 = vmatpush1.bf16.msra.mxu0 %v16326_v35  ;;  %v3412_v35 = vld [vmem:[#allocation17 + $0x19b0] sm:$0xff]  ;;  %v3341_v22 = vld [vmem:[#allocation17 + $0x1778] sm:$0xff] }
 0x853   :  { %10055 = vmatpush1.bf16.msra.mxu1 %v16184_v36  ;;  %9910 = vmatprep.subr.bf16.mxu0 %v16343_v39  ;;  %v3420_v36 = vld [vmem:[#allocation17 + $0x19f0] sm:$0xff]  ;;  %v3269_v39 = vld [vmem:[#allocation17 + $0x1538] sm:$0xff] }
 0x854   :  { %10056 = vmatprep.subr.bf16.mxu1 %v16201_v5  ;;  %v3277_v5 = vld [vmem:[#allocation17 + $0x1578] sm:$0xff]  ;;  %v16439_v26 = vcombine.high %v3412_v35, %v3420_v36  ;;  %v16438_v53 = vcombine.low %v3412_v35, %v3420_v36  ;;  %v3492_v35 = vld [vmem:[#allocation17 + $0x1c30] sm:$0xff] }
 0x855   :  { %v16297_v45 = vcombine.high %v3269_v39, %v3277_v5  ;;  %v16296_v54 = vcombine.low %v3269_v39, %v3277_v5  ;;  %v3500_v36 = vld [vmem:[#allocation17 + $0x1c70] sm:$0xff]  ;;  %v3349_v39 = vld [vmem:[#allocation17 + $0x17b8] sm:$0xff] }
 0x856   :  { %9911 = vmatpush1.bf16.msra.mxu0 %v16342_v30  ;;  %v3428_v30 = vld [vmem:[#allocation17 + $0x1a30] sm:$0xff]  ;;  %v3357_v5 = vld [vmem:[#allocation17 + $0x17f8] sm:$0xff] }
 0x857   :  { %10057 = vmatpush1.bf16.msra.mxu1 %v16200_v56  ;;  %9912 = vmatprep.subr.bf16.mxu0 %v16359_v49  ;;  %v3436_v56 = vld [vmem:[#allocation17 + $0x1a70] sm:$0xff]  ;;  %v3285_v49 = vld [vmem:[#allocation17 + $0x15b8] sm:$0xff] }
 0x858   :  { %10058 = vmatprep.subr.bf16.mxu1 %v16217_v52  ;;  %v3293_v52 = vld [vmem:[#allocation17 + $0x15f8] sm:$0xff]  ;;  %v16455_v57 = vcombine.high %v3428_v30, %v3436_v56  ;;  %v16454_v63 = vcombine.low %v3428_v30, %v3436_v56  ;;  %v3508_v30 = vld [vmem:[#allocation17 + $0x1cb0] sm:$0xff] }
 0x859   :  { %v16313_v58 = vcombine.high %v3285_v49, %v3293_v52  ;;  %v16312_v0 = vcombine.low %v3285_v49, %v3293_v52  ;;  %v3516_v56 = vld [vmem:[#allocation17 + $0x1cf0] sm:$0xff]  ;;  %v3365_v49 = vld [vmem:[#allocation17 + $0x1838] sm:$0xff] }
 0x85a   :  { %9913 = vmatpush1.bf16.msra.mxu0 %v16358_v59  ;;  %v3444_v59 = vld [vmem:[#allocation17 + $0x1ab0] sm:$0xff]  ;;  %v3373_v52 = vld [vmem:[#allocation17 + $0x1878] sm:$0xff] }
 0x85b   :  { %10059 = vmatpush1.bf16.msra.mxu1 %v16216_v60  ;;  %9914 = vmatprep.subr.bf16.mxu0 %v16375_v62  ;;  %v3452_v60 = vld [vmem:[#allocation17 + $0x1af0] sm:$0xff]  ;;  %v3301_v62 = vld [vmem:[#allocation17 + $0x1638] sm:$0xff] }
 0x85c   :  { %10060 = vmatprep.subr.bf16.mxu1 %v16233_v12  ;;  %v3309_v12 = vld [vmem:[#allocation17 + $0x1678] sm:$0xff]  ;;  %v16471_v1 = vcombine.high %v3444_v59, %v3452_v60  ;;  %v16470_v14 = vcombine.low %v3444_v59, %v3452_v60  ;;  %v3524_v59 = vld [vmem:[#allocation17 + $0x1d30] sm:$0xff] }
 0x85d   :  { %v16329_v2 = vcombine.high %v3301_v62, %v3309_v12  ;;  %v16328_v16 = vcombine.low %v3301_v62, %v3309_v12  ;;  %v3532_v60 = vld [vmem:[#allocation17 + $0x1d70] sm:$0xff]  ;;  %v3381_v62 = vld [vmem:[#allocation17 + $0x18b8] sm:$0xff] }
 0x85e   :  { %9915 = vmatpush1.bf16.msra.mxu0 %v16374_v8  ;;  %v3460_v8 = vld [vmem:[#allocation17 + $0x1b30] sm:$0xff]  ;;  %v3389_v12 = vld [vmem:[#allocation17 + $0x18f8] sm:$0xff] }
 0x85f   :  { %10061 = vmatpush1.bf16.msra.mxu1 %v16232_v9  ;;  %9925 = vmatprep.subr.bf16.mxu0 %v16391_v11  ;;  %v3468_v9 = vld [vmem:[#allocation17 + $0x1b70] sm:$0xff]  ;;  %v3317_v11 = vld [vmem:[#allocation17 + $0x16b8] sm:$0xff] }
 0x860   :  { %10062 = vmatprep.subr.bf16.mxu1 %v16249_v13  ;;  %v3325_v13 = vld [vmem:[#allocation17 + $0x16f8] sm:$0xff]  ;;  %v16487_v17 = vcombine.high %v3460_v8, %v3468_v9  ;;  %v16486_v21 = vcombine.low %v3460_v8, %v3468_v9  ;;  %v3540_v8 = vld [vmem:[#allocation17 + $0x1db0] sm:$0xff] }
 0x861   :  { %9917 = vmatmul.mubr.bf16.vlgmr.msra.gmra.mrb[24].mxu0 %v21879_v51  ;;  %v3548_v9 = vld [vmem:[#allocation17 + $0x1df0] sm:$0xff] }
 0x862   :  { %9926 = vmatpush1.bf16.msra.mxu0 %v16390_v20  ;;  %9957 = vmatprep.mubr.bf16.mxu0 %v21891_v42  ;;  %v16345_v20 = vcombine.high %v3317_v11, %v3325_v13 }
 0x863   :  { %10063 = vmatpush1.bf16.msra.mxu1 %v16248_v24  ;;  %9927 = vmatprep.subr.bf16.mxu0 %v16407_v27  ;;  %v3476_v24 = vld [vmem:[#allocation17 + $0x1bb0] sm:$0xff] }
 0x864   :  { %10064 = vmatprep.subr.bf16.mxu1 %v16265_v28  ;;  %v3484_v27 = vld [vmem:[#allocation17 + $0x1bf0] sm:$0xff] }
 0x866   :  { %9928 = vmatpush1.bf16.msra.mxu0 %v16406_v33 }
 0x867   :  { %10065 = vmatpush1.bf16.msra.mxu1 %v16264_v61  ;;  %9929 = vmatprep.subr.bf16.mxu0 %v16423_v25  ;;  %v16344_v61 = vcombine.low %v3317_v11, %v3325_v13  ;;  %v16503_v25 = vcombine.high %v3476_v24, %v3484_v27  ;;  %v3397_v11 = vld [vmem:[#allocation17 + $0x1938] sm:$0xff] }
 0x868   :  { %10066 = vmatprep.subr.bf16.mxu1 %v16281_v34  ;;  %v16361_v34 = vcombine.high %v3333_v31, %v3341_v22  ;;  %v3405_v13 = vld [vmem:[#allocation17 + $0x1978] sm:$0xff] }
 0x86a   :  { %9930 = vmatpush1.bf16.msra.mxu0 %v16422_v37  ;;  %v16502_v37 = vcombine.low %v3476_v24, %v3484_v27  ;;  %v3556_v24 = vld [vmem:[#allocation17 + $0x1e30] sm:$0xff] }
 0x86b   :  { %10067 = vmatpush1.bf16.msra.mxu1 %v16280_v41  ;;  %9931 = vmatprep.subr.bf16.mxu0 %v16439_v26  ;;  %v16360_v41 = vcombine.low %v3333_v31, %v3341_v22  ;;  %v16519_v26 = vcombine.high %v3492_v35, %v3500_v36  ;;  %v3564_v27 = vld [vmem:[#allocation17 + $0x1e70] sm:$0xff]  ;;  %v3413_v31 = vld [vmem:[#allocation17 + $0x19b8] sm:$0xff] }
 0x86c   :  { %10068 = vmatprep.subr.bf16.mxu1 %v16297_v45  ;;  %v16377_v45 = vcombine.high %v3349_v39, %v3357_v5  ;;  %v3421_v22 = vld [vmem:[#allocation17 + $0x19f8] sm:$0xff] }
 0x86e   :  { %9932 = vmatpush1.bf16.msra.mxu0 %v16438_v53  ;;  %v16518_v53 = vcombine.low %v3492_v35, %v3500_v36  ;;  %v16582_v35 = vcombine.low %v3556_v24, %v3564_v27  ;;  %v16440_v36 = vcombine.low %v3413_v31, %v3421_v22 }
 0x86f   :  { %10069 = vmatpush1.bf16.msra.mxu1 %v16296_v54  ;;  %9933 = vmatprep.subr.bf16.mxu0 %v16455_v57  ;;  %v16376_v54 = vcombine.low %v3349_v39, %v3357_v5  ;;  %v16535_v57 = vcombine.high %v3508_v30, %v3516_v56 }
 0x870   :  { %10070 = vmatprep.subr.bf16.mxu1 %v16313_v58  ;;  %v16393_v58 = vcombine.high %v3365_v49, %v3373_v52 }
 0x872   :  { %9934 = vmatpush1.bf16.msra.mxu0 %v16454_v63  ;;  %v16534_v63 = vcombine.low %v3508_v30, %v3516_v56 }
 0x873   :  { %10071 = vmatpush1.bf16.msra.mxu1 %v16312_v0  ;;  %9935 = vmatprep.subr.bf16.mxu0 %v16471_v1  ;;  %v16392_v0 = vcombine.low %v3365_v49, %v3373_v52  ;;  %v16551_v1 = vcombine.high %v3524_v59, %v3532_v60 }
 0x874   :  { %v21959_v23 = vpop.f32.mrb[20].mxu0  ;;  %10072 = vmatprep.subr.bf16.mxu1 %v16329_v2  ;;  %v16409_v2 = vcombine.high %v3381_v62, %v3389_v12 }
 0x875   :  { %v21961_v28 = vpop.f32.mrb[21].mxu0 }
 0x876   :  { %v9635_v32 = vpop.f32.mrb[22].mxu0  ;;  %9936 = vmatpush1.bf16.msra.mxu0 %v16470_v14  ;;  %v16550_v14 = vcombine.low %v3524_v59, %v3532_v60 }
 0x877   :  { %v9636_v33 = vpop.f32.mrb[23].mxu0  ;;  %10073 = vmatpush1.bf16.msra.mxu1 %v16328_v16  ;;  %9937 = vmatprep.subr.bf16.mxu0 %v16487_v17  ;;  %v16408_v16 = vcombine.low %v3381_v62, %v3389_v12  ;;  %v16567_v17 = vcombine.high %v3540_v8, %v3548_v9  ;;  %v16566_v32 = vcombine.low %v3540_v8, %v3548_v9 }
 0x878   :  { %10074 = vmatprep.subr.bf16.mxu1 %v16345_v20  ;;  %v16425_v20 = vcombine.high %v3397_v11, %v3405_v13  ;;  %v16583_v33 = vcombine.high %v3556_v24, %v3564_v27  ;;  %v3493_v24 = vld [vmem:[#allocation17 + $0x1c38] sm:$0xff] }
 0x879   :  { %v3501_v27 = vld [vmem:[#allocation17 + $0x1c78] sm:$0xff] }
 0x87a   :  { %9938 = vmatpush1.bf16.msra.mxu0 %v16486_v21  ;;  %v16424_v21 = vcombine.low %v3397_v11, %v3405_v13 }
 0x87b   :  { %10075 = vmatpush1.bf16.msra.mxu1 %v16344_v61  ;;  %9939 = vmatprep.subr.bf16.mxu0 %v16503_v25  ;;  %v3572_v61 = vld [vmem:[#allocation17 + $0x1eb0] sm:$0xff] }
 0x87c   :  { %10076 = vmatprep.subr.bf16.mxu1 %v16361_v34  ;;  %v3580_v25 = vld [vmem:[#allocation17 + $0x1ef0] sm:$0xff]  ;;  %v3437_v34 = vld [vmem:[#allocation17 + $0x1a78] sm:$0xff] }
 0x87d   :  { %v16599_v39 = vcombine.high %v3572_v61, %v3580_v25  ;;  %v16598_v30 = vcombine.low %v3572_v61, %v3580_v25  ;;  %v3517_v61 = vld [vmem:[#allocation17 + $0x1cf8] sm:$0xff]  ;;  %v19900_v25 = vld [vmem:[#allocation20 + $0x38] ss:$28 sps:$4 sm:$0xff]  }
 0x87e   :  { %9940 = vmatpush1.bf16.msra.mxu0 %v16502_v37  ;;  %v3588_v37 = vld [vmem:[#allocation17 + $0x1f30] sm:$0xff] }
 0x87f   :  { %10077 = vmatpush1.bf16.msra.mxu1 %v16360_v41  ;;  %9941 = vmatprep.subr.bf16.mxu0 %v16519_v26  ;;  %v3596_v41 = vld [vmem:[#allocation17 + $0x1f70] sm:$0xff]  ;;  %v3445_v26 = vld [vmem:[#allocation17 + $0x1ab8] sm:$0xff] }
 0x880   :  { %10078 = vmatprep.subr.bf16.mxu1 %v16377_v45  ;;  %v3453_v45 = vld [vmem:[#allocation17 + $0x1af8] sm:$0xff]  ;;  %v16615_v49 = vcombine.high %v3588_v37, %v3596_v41  ;;  %v16614_v59 = vcombine.low %v3588_v37, %v3596_v41 }
 0x881   :  { %v16473_v52 = vcombine.high %v3445_v26, %v3453_v45  ;;  %v16472_v60 = vcombine.low %v3445_v26, %v3453_v45  ;;  %v19904_v37 = vld [vmem:[#allocation20 + $0xac] ss:$28 sps:$4 sm:$0xff]  }
 0x882   :  { %9942 = vmatpush1.bf16.msra.mxu0 %v16518_v53  ;;  %v3604_v53 = vld [vmem:[#allocation17 + $0x1fb0] sm:$0xff]  ;;  %v3541_v26 = vld [vmem:[#allocation17 + $0x1db8] sm:$0xff] }
 0x883   :  { %10079 = vmatpush1.bf16.msra.mxu1 %v16376_v54  ;;  %9943 = vmatprep.subr.bf16.mxu0 %v16535_v57  ;;  %v3612_v54 = vld [vmem:[#allocation17 + $0x1ff0] sm:$0xff]  ;;  %v3461_v57 = vld [vmem:[#allocation17 + $0x1b38] sm:$0xff] }
 0x884   :  { %10089 = vmatprep.subr.bf16.mxu1 %v16393_v58  ;;  %v3469_v58 = vld [vmem:[#allocation17 + $0x1b78] sm:$0xff]  ;;  %v16631_v62 = vcombine.high %v3604_v53, %v3612_v54  ;;  %v16630_v9 = vcombine.low %v3604_v53, %v3612_v54 }
 0x885   :  { %v16489_v12 = vcombine.high %v3461_v57, %v3469_v58  ;;  %v16488_v13 = vcombine.low %v3461_v57, %v3469_v58  ;;  %v3549_v45 = vld [vmem:[#allocation17 + $0x1df8] sm:$0xff]  ;;  %v19909_v57 = vld [vmem:[#allocation20 + $0xe0] ss:$28 sps:$4 sm:$0xff]  }
 0x886   :  { %9944 = vmatpush1.bf16.msra.mxu0 %v16534_v63  ;;  %10081 = vmatmul.mubr.bf16.vlgmr.msra.gmra.mrb[32].mxu1 %v21879_v51  ;;  %v16441_v51 = vcombine.high %v3413_v31, %v3421_v22  ;;  %v21965_v63 = vld [vmem:[#allocation19] sm:$0xff]  ;;  %v19897_v31 = vld [vmem:[#allocation20] ss:$28 sps:$4 sm:$0xff]   ;;  %v3557_v53 = vld [vmem:[#allocation17 + $0x1e38] sm:$0xff]  ;;  %v16568_v58 = vcombine.low %v3541_v26, %v3549_v45 }
 0x887   :  { %10090 = vmatpush1.bf16.msra.mxu1 %v16392_v0  ;;  %10121 = vmatprep.mubr.bf16.mxu1 %v21891_v42  ;;  %v3429_v42 = vld [vmem:[#allocation17 + $0x1a38] sm:$0xff] }
 0x888   :  { %9945 = vmatprep.subr.bf16.mxu0 %v16551_v1  ;;  %10091 = vmatprep.subr.bf16.mxu1 %v16409_v2  ;;  %v16457_v5 = vcombine.high %v3429_v42, %v3437_v34  ;;  %v16456_v56 = vcombine.low %v3429_v42, %v3437_v34  ;;  %v3477_v1 = vld [vmem:[#allocation17 + $0x1bb8] sm:$0xff]  ;;  %v16520_v42 = vcombine.low %v3493_v24, %v3501_v27  ;;  %v19901_v34 = vld [vmem:[#allocation20 + $0x74] ss:$28 sps:$4 sm:$0xff]  }
 0x889   :  { %v3485_v2 = vld [vmem:[#allocation17 + $0x1bf8] sm:$0xff] }
 0x88a   :  { %9946 = vmatpush1.bf16.msra.mxu0 %v16550_v14  ;;  %v19895_v14 = vld [vmem:[#allocation20 + $0x4] ss:$28 sps:$4 sm:$0xff]   ;;  %v16504_v22 = vcombine.low %v3477_v1, %v3485_v2  ;;  %v3565_v54 = vld [vmem:[#allocation17 + $0x1e78] sm:$0xff] }
 0x88b   :  { %10092 = vmatpush1.bf16.msra.mxu1 %v16408_v16  ;;  %9947 = vmatprep.subr.bf16.mxu0 %v16567_v17  ;;  %v3625_v16 = vrot.slane %v21965_v63, %v21768_v6 }
 0x88c   :  { %10093 = vmatprep.subr.bf16.mxu1 %v16425_v20  ;;  %v16505_v20 = vcombine.high %v3477_v1, %v3485_v2  ;;  %v19912_v1 = vld [vmem:[#allocation20 + $0x118] ss:$28 sps:$4 sm:$0xff]   ;;  %v16584_v2 = vcombine.low %v3557_v53, %v3565_v54 }
 0x88e   :  { %9948 = vmatpush1.bf16.msra.mxu0 %v16566_v32  ;;  %v19898_v32 = vld [vmem:[#allocation20 + $0x3c] ss:$28 sps:$4 sm:$0xff]  }
 0x88f   :  { %10094 = vmatpush1.bf16.msra.mxu1 %v16424_v21  ;;  %9949 = vmatprep.subr.bf16.mxu0 %v16583_v33  ;;  %v21974_v21 = vadd.f32 %v21913_v47, %v3625_v16  ;;  %v16521_v33 = vcombine.high %v3493_v24, %v3501_v27  ;;  %v19903_v47 = vld [vmem:[#allocation20 + $0x70] ss:$28 sps:$4 sm:$0xff]  }
 0x890   :  { %10095 = vmatprep.subr.bf16.mxu1 %v16441_v51  ;;  %v3509_v51 = vld [vmem:[#allocation17 + $0x1cb8] sm:$0xff] }
 0x891   :  { %v19915_v16 = vld [vmem:[#allocation20 + $0x150] ss:$28 sps:$4 sm:$0xff]  }
 0x892   :  { %9950 = vmatpush1.bf16.msra.mxu0 %v16582_v35  ;;  %v16537_v35 = vcombine.high %v3509_v51, %v3517_v61  ;;  %v3605_v27 = vld [vmem:[#allocation17 + $0x1fb8] sm:$0xff] }
 0x893   :  { %10096 = vmatpush1.bf16.msra.mxu1 %v16440_v36  ;;  %9951 = vmatprep.subr.bf16.mxu0 %v16599_v39  ;;  %v3525_v36 = vld [vmem:[#allocation17 + $0x1d38] sm:$0xff] }
 0x894   :  { %10097 = vmatprep.subr.bf16.mxu1 %v16457_v5  ;;  %v3533_v39 = vld [vmem:[#allocation17 + $0x1d78] sm:$0xff]  ;;  %v16536_v5 = vcombine.low %v3509_v51, %v3517_v61  ;;  %v19921_v61 = vld [vmem:[#allocation20 + $0x1c0] ss:$28 sps:$4 sm:$0xff]  }
 0x895   :  { %v16553_v41 = vcombine.high %v3525_v36, %v3533_v39 }
 0x896   :  { %9952 = vmatpush1.bf16.msra.mxu0 %v16598_v30  ;;  %v19906_v30 = vld [vmem:[#allocation20 + $0xa8] ss:$28 sps:$4 sm:$0xff]  }
 0x897   :  { %10098 = vmatpush1.bf16.msra.mxu1 %v16456_v56  ;;  %9953 = vmatprep.subr.bf16.mxu0 %v16615_v49  ;;  %v16552_v56 = vcombine.low %v3525_v36, %v3533_v39  ;;  %v19907_v49 = vld [vmem:[#allocation20 + $0xe4] ss:$28 sps:$4 sm:$0xff]   ;;  %v19928_v39 = vld [vmem:[#allocation20 + $0x234] ss:$28 sps:$4 sm:$0xff]  }
 0x898   :  { %10099 = vmatprep.subr.bf16.mxu1 %v16473_v52  ;;  %v16569_v52 = vcombine.high %v3541_v26, %v3549_v45  ;;  %v19927_v36 = vld [vmem:[#allocation20 + $0x8] ss:$28 sps:$4 sm:$0xff]   ;;  %v19937_v26 = vld [vmem:[#allocation20 + $0x7c] ss:$28 sps:$4 sm:$0xff]  }
 0x899   :  { %v21967_v0 = vpop.f32.mrb[28].mxu1  ;;  %v19936_v45 = vld [vmem:[#allocation20 + $0x268] ss:$28 sps:$4 sm:$0xff]  }
 0x89a   :  { %v21969_v8 = vpop.f32.mrb[29].mxu1  ;;  %9954 = vmatpush1.bf16.msra.mxu0 %v16614_v59  ;;  %v19910_v59 = vld [vmem:[#allocation20 + $0x11c] ss:$28 sps:$4 sm:$0xff]  }
 0x89b   :  { %v9799_v11 = vpop.f32.mrb[30].mxu1  ;;  %10100 = vmatpush1.bf16.msra.mxu1 %v16472_v60  ;;  %9955 = vmatprep.subr.bf16.mxu0 %v16631_v62  ;;  %v16585_v60 = vcombine.high %v3557_v53, %v3565_v54  ;;  %v3573_v62 = vld [vmem:[#allocation17 + $0x1eb8] sm:$0xff]  ;;  %v19946_v53 = vld [vmem:[#allocation20 + $0x2dc] ss:$28 sps:$4 sm:$0xff]  }
 0x89c   :  { %v9800_v17 = vpop.f32.mrb[31].mxu1  ;;  %10101 = vmatprep.subr.bf16.mxu1 %v16489_v12  ;;  %v3581_v12 = vld [vmem:[#allocation17 + $0x1ef8] sm:$0xff] }
 0x89d   :  { %v16601_v11 = vcombine.high %v3573_v62, %v3581_v12  ;;  %v16600_v17 = vcombine.low %v3573_v62, %v3581_v12  ;;  %v19949_v54 = vld [vmem:[#allocation20 + $0xec] ss:$28 sps:$4 sm:$0xff]   ;;  %v19957_v12 = vld [vmem:[#allocation20 + $0x120] ss:$28 sps:$4 sm:$0xff]  }
 0x89e   :  { %9956 = vmatpush1.bf16.msra.mxu0 %v16630_v9  ;;  %v19913_v9 = vld [vmem:[#allocation20 + $0x154] ss:$28 sps:$4 sm:$0xff]  }
 0x89f   :  { %10102 = vmatpush1.bf16.msra.mxu1 %v16488_v13  ;;  %16943 = vmatprep.subr.bf16.mxu0 %v19895_v14  ;;  %v3589_v13 = vld [vmem:[#allocation17 + $0x1f38] sm:$0xff] }
 0x8a0   :  { %10103 = vmatprep.subr.bf16.mxu1 %v16505_v20  ;;  %v3597_v14 = vld [vmem:[#allocation17 + $0x1f78] sm:$0xff] }
 0x8a1   :  { %9958 = vmatmul.mubr.bf16.vlgmr.msra.gmra.mrb[24].mxu0 %v21893_v19  ;;  %v19916_v20 = vld [vmem:[#allocation20 + $0x18c] ss:$28 sps:$4 sm:$0xff]   ;;  %v16617_v24 = vcombine.high %v3589_v13, %v3597_v14 }
 0x8a2   :  { %16945 = vmatpush1.bf16.msra.mxu0 %v19897_v31  ;;  %13047 = vmatprep.mubr.f32.mxu0 %v21974_v21  ;;  %v3613_v31 = vld [vmem:[#allocation17 + $0x1ff8] sm:$0xff] }
 0x8a3   :  { %10104 = vmatpush1.bf16.msra.mxu1 %v16504_v22  ;;  %16947 = vmatprep.subr.bf16.mxu0 %v19898_v32  ;;  %v19918_v22 = vld [vmem:[#allocation20 + $0x188] ss:$28 sps:$4 sm:$0xff]   ;;  %v16616_v32 = vcombine.low %v3589_v13, %v3597_v14  ;;  %v16633_v51 = vcombine.high %v3605_v27, %v3613_v31  ;;  %v19954_v62 = vld [vmem:[#allocation20 + $0x310] ss:$28 sps:$4 sm:$0xff]   ;;  %v19963_v13 = vld [vmem:[#allocation20 + $0x158] ss:$28 sps:$4 sm:$0xff]  }
 0x8a4   :  { %10105 = vmatprep.subr.bf16.mxu1 %v16521_v33  ;;  %v19919_v33 = vld [vmem:[#allocation20 + $0x1c4] ss:$28 sps:$4 sm:$0xff]  }
 0x8a5   :  { %v19964_v14 = vld [vmem:[#allocation20 + $0x384] ss:$28 sps:$4 sm:$0xff]  }
 0x8a6   :  { %16949 = vmatpush1.bf16.msra.mxu0 %v19900_v25  ;;  %v16632_v25 = vcombine.low %v3605_v27, %v3613_v31  ;;  %v19969_v27 = vld [vmem:[#allocation20 + $0x190] ss:$28 sps:$4 sm:$0xff]   ;;  %v19970_v31 = vld [vmem:[#allocation20 + $0x3bc] ss:$28 sps:$4 sm:$0xff]  }
 0x8a7   :  { %10106 = vmatpush1.bf16.msra.mxu1 %v16520_v42  ;;  %16951 = vmatprep.subr.bf16.mxu0 %v19901_v34  ;;  %v19922_v42 = vld [vmem:[#allocation20 + $0x1fc] ss:$28 sps:$4 sm:$0xff]   ;;  %v19925_v34 = vld [vmem:[#allocation20 + $0xc] ss:$28 sps:$4 sm:$0xff]  }
 0x8a8   :  { %10107 = vmatprep.subr.bf16.mxu1 %v16537_v35  ;;  %v19924_v35 = vld [vmem:[#allocation20 + $0x1f8] ss:$28 sps:$4 sm:$0xff]  }
 0x8aa   :  { %16953 = vmatpush1.bf16.msra.mxu0 %v19903_v47  ;;  %v19931_v47 = vld [vmem:[#allocation20 + $0x44] ss:$28 sps:$4 sm:$0xff]  }
 0x8ab   :  { %10108 = vmatpush1.bf16.msra.mxu1 %v16536_v5  ;;  %16955 = vmatprep.subr.bf16.mxu0 %v19904_v37  ;;  %v19930_v5 = vld [vmem:[#allocation20 + $0x230] ss:$28 sps:$4 sm:$0xff]   ;;  %v19933_v37 = vld [vmem:[#allocation20 + $0x40] ss:$28 sps:$4 sm:$0xff]  }
 0x8ac   :  { %10109 = vmatprep.subr.bf16.mxu1 %v16553_v41  ;;  %v19934_v41 = vld [vmem:[#allocation20 + $0x26c] ss:$28 sps:$4 sm:$0xff]  }
 0x8ae   :  { %16957 = vmatpush1.bf16.msra.mxu0 %v19906_v30  ;;  %v19939_v30 = vld [vmem:[#allocation20 + $0x78] ss:$28 sps:$4 sm:$0xff]  }
 0x8af   :  { %10110 = vmatpush1.bf16.msra.mxu1 %v16552_v56  ;;  %16959 = vmatprep.subr.bf16.mxu0 %v19907_v49  ;;  %v19940_v56 = vld [vmem:[#allocation20 + $0x2a4] ss:$28 sps:$4 sm:$0xff]   ;;  %v19943_v49 = vld [vmem:[#allocation20 + $0xb4] ss:$28 sps:$4 sm:$0xff]  }
 0x8b0   :  { %10111 = vmatprep.subr.bf16.mxu1 %v16569_v52  ;;  %v19945_v52 = vld [vmem:[#allocation20 + $0xb0] ss:$28 sps:$4 sm:$0xff]  }
 0x8b2   :  { %16961 = vmatpush1.bf16.msra.mxu0 %v19909_v57  ;;  %v19948_v57 = vld [vmem:[#allocation20 + $0x2d8] ss:$28 sps:$4 sm:$0xff]  }
 0x8b3   :  { %10112 = vmatpush1.bf16.msra.mxu1 %v16568_v58  ;;  %16963 = vmatprep.subr.bf16.mxu0 %v19910_v59  ;;  %v19951_v58 = vld [vmem:[#allocation20 + $0xe8] ss:$28 sps:$4 sm:$0xff]   ;;  %v19952_v59 = vld [vmem:[#allocation20 + $0x314] ss:$28 sps:$4 sm:$0xff]  }
 0x8b4   :  { %10113 = vmatprep.subr.bf16.mxu1 %v16585_v60  ;;  %v19955_v60 = vld [vmem:[#allocation20 + $0x124] ss:$28 sps:$4 sm:$0xff]  }
 0x8b6   :  { %16965 = vmatpush1.bf16.msra.mxu0 %v19912_v1  ;;  %v19958_v1 = vld [vmem:[#allocation20 + $0x34c] ss:$28 sps:$4 sm:$0xff]  }
 0x8b7   :  { %10114 = vmatpush1.bf16.msra.mxu1 %v16584_v2  ;;  %16967 = vmatprep.subr.bf16.mxu0 %v19913_v9  ;;  %v19961_v2 = vld [vmem:[#allocation20 + $0x15c] ss:$28 sps:$4 sm:$0xff]   ;;  %v19960_v9 = vld [vmem:[#allocation20 + $0x348] ss:$28 sps:$4 sm:$0xff]  }
 0x8b8   :  { %10115 = vmatprep.subr.bf16.mxu1 %v16601_v11  ;;  %v3621_v11 = vrot.slane %v21965_v63, %v21763_v4 }
 0x8ba   :  { %16969 = vmatpush1.bf16.msra.mxu0 %v19915_v16  ;;  %v3633_v16 = vrot.slane %v21965_v63, %v21771_v7 }
 0x8bb   :  { %10116 = vmatpush1.bf16.msra.mxu1 %v16600_v17  ;;  %16971 = vmatprep.subr.bf16.mxu0 %v19916_v20  ;;  %v19967_v17 = vld [vmem:[#allocation20 + $0x194] ss:$28 sps:$4 sm:$0xff]   ;;  %v19966_v20 = vld [vmem:[#allocation20 + $0x380] ss:$28 sps:$4 sm:$0xff]  }
 0x8bc   :  { %10117 = vmatprep.subr.bf16.mxu1 %v16617_v24  ;;  %v21985_v24 = vadd.f32 %v21911_v48, %v3621_v11  ;;  %v19976_v48 = vld [vmem:[#allocation20 + $0x3f4] ss:$28 sps:$4 sm:$0xff]   ;;  %v20023_v11 = vld [vmem:[#allocation20 + $0x388] ss:$28 sps:$4 sm:$0xff]  }
 0x8be   :  { %16973 = vmatpush1.bf16.msra.mxu0 %v19918_v22  ;;  %v21988_v22 = vadd.f32 %v21919_v38, %v3633_v16  ;;  %v19981_v38 = vld [vmem:[#allocation20 + $0x200] ss:$28 sps:$4 sm:$0xff]   ;;  %v20026_v16 = vld [vmem:[#allocation20 + $0x5b0] ss:$28 sps:$4 sm:$0xff]  }
 0x8bf   :  { %10118 = vmatpush1.bf16.msra.mxu1 %v16616_v32  ;;  %16975 = vmatprep.subr.bf16.mxu0 %v19919_v33  ;;  %v19973_v32 = vld [vmem:[#allocation20 + $0x1cc] ss:$28 sps:$4 sm:$0xff]   ;;  %v19972_v33 = vld [vmem:[#allocation20 + $0x3b8] ss:$28 sps:$4 sm:$0xff]  }
 0x8c0   :  { %10119 = vmatprep.subr.bf16.mxu1 %v16633_v51  ;;  %v19975_v51 = vld [vmem:[#allocation20 + $0x1c8] ss:$28 sps:$4 sm:$0xff]  }
 0x8c2   :  { %16977 = vmatpush1.bf16.msra.mxu0 %v19921_v61  ;;  %v19979_v61 = vld [vmem:[#allocation20 + $0x204] ss:$28 sps:$4 sm:$0xff]  }
 0x8c3   :  { %10120 = vmatpush1.bf16.msra.mxu1 %v16632_v25  ;;  %16979 = vmatprep.subr.bf16.mxu0 %v19922_v42  ;;  %v19978_v25 = vld [vmem:[#allocation20 + $0x3f0] ss:$28 sps:$4 sm:$0xff]  }
 0x8c4   :  { %17455 = vmatprep.subr.bf16.mxu1 %v19925_v34  ;;  %v19982_v42 = vld [vmem:[#allocation20 + $0x42c] ss:$28 sps:$4 sm:$0xff]   ;;  %v19985_v34 = vld [vmem:[#allocation20 + $0x23c] ss:$28 sps:$4 sm:$0xff]  }
 0x8c6   :  { %10122 = vmatmul.mubr.bf16.vlgmr.msra.gmra.mrb[32].mxu1 %v21893_v19  ;;  %16981 = vmatpush1.bf16.msra.mxu0 %v19924_v35  ;;  %v19942_v19 = vld [vmem:[#allocation20 + $0x2a0] ss:$28 sps:$4 sm:$0xff]   ;;  %v19984_v35 = vld [vmem:[#allocation20 + $0x428] ss:$28 sps:$4 sm:$0xff]  }
 0x8c7   :  { %17457 = vmatpush1.bf16.msra.mxu1 %v19927_v36  ;;  %13615 = vmatprep.mubr.f32.mxu1 %v21974_v21  ;;  %v19987_v36 = vld [vmem:[#allocation20 + $0x238] ss:$28 sps:$4 sm:$0xff]  }
 0x8c8   :  { %16983 = vmatprep.subr.bf16.mxu0 %v19928_v39  ;;  %17459 = vmatprep.subr.bf16.mxu1 %v19931_v47  ;;  %v19988_v39 = vld [vmem:[#allocation20 + $0x464] ss:$28 sps:$4 sm:$0xff]   ;;  %v19991_v47 = vld [vmem:[#allocation20 + $0x274] ss:$28 sps:$4 sm:$0xff]  }
 0x8ca   :  { %16985 = vmatpush1.bf16.msra.mxu0 %v19930_v5  ;;  %v19990_v5 = vld [vmem:[#allocation20 + $0x460] ss:$28 sps:$4 sm:$0xff]  }
 0x8cb   :  { %17461 = vmatpush1.bf16.msra.mxu1 %v19933_v37  ;;  %16987 = vmatprep.subr.bf16.mxu0 %v19934_v41  ;;  %v19993_v37 = vld [vmem:[#allocation20 + $0x270] ss:$28 sps:$4 sm:$0xff]   ;;  %v19994_v41 = vld [vmem:[#allocation20 + $0x49c] ss:$28 sps:$4 sm:$0xff]  }
 0x8cc   :  { %17463 = vmatprep.subr.bf16.mxu1 %v19937_v26  ;;  %v19997_v26 = vld [vmem:[#allocation20 + $0x2ac] ss:$28 sps:$4 sm:$0xff]  }
 0x8ce   :  { %16989 = vmatpush1.bf16.msra.mxu0 %v19936_v45  ;;  %v19996_v45 = vld [vmem:[#allocation20 + $0x498] ss:$28 sps:$4 sm:$0xff]  }
 0x8cf   :  { %17465 = vmatpush1.bf16.msra.mxu1 %v19939_v30  ;;  %16991 = vmatprep.subr.bf16.mxu0 %v19940_v56  ;;  %v19999_v30 = vld [vmem:[#allocation20 + $0x2a8] ss:$28 sps:$4 sm:$0xff]   ;;  %v20000_v56 = vld [vmem:[#allocation20 + $0x4d4] ss:$28 sps:$4 sm:$0xff]  }
 0x8d0   :  { %17467 = vmatprep.subr.bf16.mxu1 %v19943_v49  ;;  %v20003_v49 = vld [vmem:[#allocation20 + $0x2e4] ss:$28 sps:$4 sm:$0xff]  }
 0x8d2   :  { %16993 = vmatpush1.bf16.msra.mxu0 %v19942_v19  ;;  %v20002_v19 = vld [vmem:[#allocation20 + $0x4d0] ss:$28 sps:$4 sm:$0xff]  }
 0x8d3   :  { %17469 = vmatpush1.bf16.msra.mxu1 %v19945_v52  ;;  %16995 = vmatprep.subr.bf16.mxu0 %v19946_v53  ;;  %v20005_v52 = vld [vmem:[#allocation20 + $0x2e0] ss:$28 sps:$4 sm:$0xff]   ;;  %v20006_v53 = vld [vmem:[#allocation20 + $0x50c] ss:$28 sps:$4 sm:$0xff]  }
 0x8d4   :  { %17471 = vmatprep.subr.bf16.mxu1 %v19949_v54  ;;  %v20009_v54 = vld [vmem:[#allocation20 + $0x31c] ss:$28 sps:$4 sm:$0xff]  }
 0x8d6   :  { %16997 = vmatpush1.bf16.msra.mxu0 %v19948_v57  ;;  %v20008_v57 = vld [vmem:[#allocation20 + $0x508] ss:$28 sps:$4 sm:$0xff]  }
 0x8d7   :  { %17473 = vmatpush1.bf16.msra.mxu1 %v19951_v58  ;;  %16999 = vmatprep.subr.bf16.mxu0 %v19952_v59  ;;  %v20011_v58 = vld [vmem:[#allocation20 + $0x318] ss:$28 sps:$4 sm:$0xff]   ;;  %v20012_v59 = vld [vmem:[#allocation20 + $0x544] ss:$28 sps:$4 sm:$0xff]  }
 0x8d8   :  { %17475 = vmatprep.subr.bf16.mxu1 %v19955_v60  ;;  %v20015_v60 = vld [vmem:[#allocation20 + $0x354] ss:$28 sps:$4 sm:$0xff]  }
 0x8da   :  { %17001 = vmatpush1.bf16.msra.mxu0 %v19954_v62  ;;  %v20014_v62 = vld [vmem:[#allocation20 + $0x540] ss:$28 sps:$4 sm:$0xff]  }
 0x8db   :  { %17477 = vmatpush1.bf16.msra.mxu1 %v19957_v12  ;;  %17003 = vmatprep.subr.bf16.mxu0 %v19958_v1  ;;  %v20017_v12 = vld [vmem:[#allocation20 + $0x350] ss:$28 sps:$4 sm:$0xff]   ;;  %v20018_v1 = vld [vmem:[#allocation20 + $0x57c] ss:$28 sps:$4 sm:$0xff]  }
 0x8dc   :  { %17479 = vmatprep.subr.bf16.mxu1 %v19961_v2  ;;  %v20021_v2 = vld [vmem:[#allocation20 + $0x38c] ss:$28 sps:$4 sm:$0xff]  }
 0x8de   :  { %17005 = vmatpush1.bf16.msra.mxu0 %v19960_v9  ;;  %v20020_v9 = vld [vmem:[#allocation20 + $0x578] ss:$28 sps:$4 sm:$0xff]  }
 0x8df   :  { %17481 = vmatpush1.bf16.msra.mxu1 %v19963_v13  ;;  %17007 = vmatprep.subr.bf16.mxu0 %v19964_v14  ;;  %v20024_v13 = vld [vmem:[#allocation20 + $0x5b4] ss:$28 sps:$4 sm:$0xff]   ;;  %v20027_v14 = vld [vmem:[#allocation20 + $0x3c4] ss:$28 sps:$4 sm:$0xff]  }
 0x8e0   :  { %17483 = vmatprep.subr.bf16.mxu1 %v19967_v17  ;;  %v20029_v17 = vld [vmem:[#allocation20 + $0x3c0] ss:$28 sps:$4 sm:$0xff]  }
 0x8e1   :  { %13048 = vmatmul.mubr.f32.vlgmr.msra.gmra.mrb[28].mxu0 %v21985_v24 }
 0x8e2   :  { %17009 = vmatpush1.bf16.msra.mxu0 %v19966_v20  ;;  %13118 = vmatprep.mubr.f32.mxu0 %v21988_v22  ;;  %v20030_v20 = vld [vmem:[#allocation20 + $0x5ec] ss:$28 sps:$4 sm:$0xff]  }
 0x8e3   :  { %17485 = vmatpush1.bf16.msra.mxu1 %v19969_v27  ;;  %17011 = vmatprep.subr.bf16.mxu0 %v19970_v31  ;;  %v20033_v27 = vld [vmem:[#allocation20 + $0x3fc] ss:$28 sps:$4 sm:$0xff]   ;;  %v20032_v31 = vld [vmem:[#allocation20 + $0x5e8] ss:$28 sps:$4 sm:$0xff]  }
 0x8e4   :  { %17487 = vmatprep.subr.bf16.mxu1 %v19973_v32  ;;  %v20035_v32 = vld [vmem:[#allocation20 + $0x3f8] ss:$28 sps:$4 sm:$0xff]  }
 0x8e6   :  { %17013 = vmatpush1.bf16.msra.mxu0 %v19972_v33  ;;  %v20036_v33 = vld [vmem:[#allocation20 + $0x624] ss:$28 sps:$4 sm:$0xff]  }
 0x8e7   :  { %17489 = vmatpush1.bf16.msra.mxu1 %v19975_v51  ;;  %17015 = vmatprep.subr.bf16.mxu0 %v19976_v48  ;;  %v20039_v51 = vld [vmem:[#allocation20 + $0x434] ss:$28 sps:$4 sm:$0xff]   ;;  %v20038_v48 = vld [vmem:[#allocation20 + $0x620] ss:$28 sps:$4 sm:$0xff]  }
 0x8e8   :  { %17491 = vmatprep.subr.bf16.mxu1 %v19979_v61  ;;  %v20041_v61 = vld [vmem:[#allocation20 + $0x430] ss:$28 sps:$4 sm:$0xff]  }
 0x8ea   :  { %17017 = vmatpush1.bf16.msra.mxu0 %v19978_v25  ;;  %v20042_v25 = vld [vmem:[#allocation20 + $0x65c] ss:$28 sps:$4 sm:$0xff]  }
 0x8eb   :  { %17493 = vmatpush1.bf16.msra.mxu1 %v19981_v38  ;;  %17019 = vmatprep.subr.bf16.mxu0 %v19982_v42  ;;  %v20045_v38 = vld [vmem:[#allocation20 + $0x46c] ss:$28 sps:$4 sm:$0xff]   ;;  %v20044_v42 = vld [vmem:[#allocation20 + $0x658] ss:$28 sps:$4 sm:$0xff]  }
 0x8ec   :  { %17495 = vmatprep.subr.bf16.mxu1 %v19985_v34  ;;  %v20047_v34 = vld [vmem:[#allocation20 + $0x468] ss:$28 sps:$4 sm:$0xff]  }
 0x8ee   :  { %17021 = vmatpush1.bf16.msra.mxu0 %v19984_v35  ;;  %v20048_v35 = vld [vmem:[#allocation20 + $0x694] ss:$28 sps:$4 sm:$0xff]  }
 0x8ef   :  { %17497 = vmatpush1.bf16.msra.mxu1 %v19987_v36  ;;  %17023 = vmatprep.subr.bf16.mxu0 %v19988_v39  ;;  %v20051_v36 = vld [vmem:[#allocation20 + $0x4a4] ss:$28 sps:$4 sm:$0xff]   ;;  %v20050_v39 = vld [vmem:[#allocation20 + $0x690] ss:$28 sps:$4 sm:$0xff]  }
 0x8f0   :  { %17499 = vmatprep.subr.bf16.mxu1 %v19991_v47  ;;  %v20053_v47 = vld [vmem:[#allocation20 + $0x4a0] ss:$28 sps:$4 sm:$0xff]  }
 0x8f2   :  { %17025 = vmatpush1.bf16.msra.mxu0 %v19990_v5  ;;  %v20054_v5 = vld [vmem:[#allocation20 + $0x6cc] ss:$28 sps:$4 sm:$0xff]  }
 0x8f3   :  { %17501 = vmatpush1.bf16.msra.mxu1 %v19993_v37  ;;  %17027 = vmatprep.subr.bf16.mxu0 %v19994_v41  ;;  %v20057_v37 = vld [vmem:[#allocation20 + $0x4dc] ss:$28 sps:$4 sm:$0xff]   ;;  %v20056_v41 = vld [vmem:[#allocation20 + $0x6c8] ss:$28 sps:$4 sm:$0xff]  }
 0x8f4   :  { %17503 = vmatprep.subr.bf16.mxu1 %v19997_v26  ;;  %v3629_v26 = vrot.slane %v21965_v63, %v21794_v15 }
 0x8f6   :  { %17029 = vmatpush1.bf16.msra.mxu0 %v19996_v45  ;;  %v20059_v45 = vld [vmem:[#allocation20 + $0x4d8] ss:$28 sps:$4 sm:$0xff]  }
 0x8f7   :  { %17505 = vmatpush1.bf16.msra.mxu1 %v19999_v30  ;;  %17031 = vmatprep.subr.bf16.mxu0 %v20000_v56  ;;  %v20060_v30 = vld [vmem:[#allocation20 + $0x704] ss:$28 sps:$4 sm:$0xff]   ;;  %v3641_v56 = vrot.slane %v21965_v63, %v21849_v46 }
 0x8f8   :  { %17507 = vmatprep.subr.bf16.mxu1 %v20003_v49  ;;  %v20063_v49 = vld [vmem:[#allocation20 + $0x514] ss:$28 sps:$4 sm:$0xff]  }
 0x8fa   :  { %17033 = vmatpush1.bf16.msra.mxu0 %v20002_v19  ;;  %v20062_v19 = vld [vmem:[#allocation20 + $0x700] ss:$28 sps:$4 sm:$0xff]  }
 0x8fb   :  { %17509 = vmatpush1.bf16.msra.mxu1 %v20005_v52  ;;  %17035 = vmatprep.subr.bf16.mxu0 %v20006_v53  ;;  %v21999_v52 = vadd.f32 %v21917_v29, %v3629_v26  ;;  %v20065_v53 = vld [vmem:[#allocation20 + $0x510] ss:$28 sps:$4 sm:$0xff]   ;;  %v20119_v26 = vld [vmem:[#allocation20 + $0x708] ss:$28 sps:$4 sm:$0xff]  }
 0x8fc   :  { %17511 = vmatprep.subr.bf16.mxu1 %v20009_v54  ;;  %v20066_v54 = vld [vmem:[#allocation20 + $0x73c] ss:$28 sps:$4 sm:$0xff]   ;;  %v20072_v29 = vld [vmem:[#allocation20 + $0x774] ss:$28 sps:$4 sm:$0xff]  }
 0x8fe   :  { %17037 = vmatpush1.bf16.msra.mxu0 %v20008_v57  ;;  %v22002_v57 = vadd.f32 %v21937_v44, %v3641_v56  ;;  %v20077_v44 = vld [vmem:[#allocation20 + $0x580] ss:$28 sps:$4 sm:$0xff]   ;;  %v20122_v56 = vld [vmem:[#allocation20 + $0x930] ss:$28 sps:$4 sm:$0xff]  }
 0x8ff   :  { %17513 = vmatpush1.bf16.msra.mxu1 %v20011_v58  ;;  %17039 = vmatprep.subr.bf16.mxu0 %v20012_v59  ;;  %v20069_v58 = vld [vmem:[#allocation20 + $0x54c] ss:$28 sps:$4 sm:$0xff]   ;;  %v20068_v59 = vld [vmem:[#allocation20 + $0x738] ss:$28 sps:$4 sm:$0xff]  }
 0x900   :  { %17515 = vmatprep.subr.bf16.mxu1 %v20015_v60  ;;  %v20071_v60 = vld [vmem:[#allocation20 + $0x548] ss:$28 sps:$4 sm:$0xff]  }
 0x902   :  { %17041 = vmatpush1.bf16.msra.mxu0 %v20014_v62  ;;  %v20075_v62 = vld [vmem:[#allocation20 + $0x584] ss:$28 sps:$4 sm:$0xff]  }
 0x903   :  { %17517 = vmatpush1.bf16.msra.mxu1 %v20017_v12  ;;  %17043 = vmatprep.subr.bf16.mxu0 %v20018_v1  ;;  %v20074_v12 = vld [vmem:[#allocation20 + $0x770] ss:$28 sps:$4 sm:$0xff]  }
 0x904   :  { %17519 = vmatprep.subr.bf16.mxu1 %v20021_v2  ;;  %v20078_v1 = vld [vmem:[#allocation20 + $0x7ac] ss:$28 sps:$4 sm:$0xff]   ;;  %v20081_v2 = vld [vmem:[#allocation20 + $0x5bc] ss:$28 sps:$4 sm:$0xff]  }
 0x906   :  { %17045 = vmatpush1.bf16.msra.mxu0 %v20020_v9  ;;  %13616 = vmatmul.mubr.f32.vlgmr.msra.gmra.mrb[36].mxu1 %v21985_v24  ;;  %v20080_v9 = vld [vmem:[#allocation20 + $0x7a8] ss:$28 sps:$4 sm:$0xff]  }
 0x907   :  { %17521 = vmatpush1.bf16.msra.mxu1 %v20023_v11  ;;  %13686 = vmatprep.mubr.f32.mxu1 %v21988_v22  ;;  %v20083_v11 = vld [vmem:[#allocation20 + $0x5b8] ss:$28 sps:$4 sm:$0xff]  }
 0x908   :  { %17047 = vmatprep.subr.bf16.mxu0 %v20024_v13  ;;  %17523 = vmatprep.subr.bf16.mxu1 %v20027_v14  ;;  %v20084_v13 = vld [vmem:[#allocation20 + $0x7e4] ss:$28 sps:$4 sm:$0xff]   ;;  %v20087_v14 = vld [vmem:[#allocation20 + $0x5f4] ss:$28 sps:$4 sm:$0xff]  }
 0x90a   :  { %17049 = vmatpush1.bf16.msra.mxu0 %v20026_v16  ;;  %v20086_v16 = vld [vmem:[#allocation20 + $0x7e0] ss:$28 sps:$4 sm:$0xff]  }
 0x90b   :  { %17525 = vmatpush1.bf16.msra.mxu1 %v20029_v17  ;;  %17051 = vmatprep.subr.bf16.mxu0 %v20030_v20  ;;  %v20089_v17 = vld [vmem:[#allocation20 + $0x5f0] ss:$28 sps:$4 sm:$0xff]   ;;  %v20090_v20 = vld [vmem:[#allocation20 + $0x81c] ss:$28 sps:$4 sm:$0xff]  }
 0x90c   :  { %17527 = vmatprep.subr.bf16.mxu1 %v20033_v27  ;;  %v20093_v27 = vld [vmem:[#allocation20 + $0x62c] ss:$28 sps:$4 sm:$0xff]  }
 0x90e   :  { %17053 = vmatpush1.bf16.msra.mxu0 %v20032_v31  ;;  %v20092_v31 = vld [vmem:[#allocation20 + $0x818] ss:$28 sps:$4 sm:$0xff]  }
 0x90f   :  { %17529 = vmatpush1.bf16.msra.mxu1 %v20035_v32  ;;  %17055 = vmatprep.subr.bf16.mxu0 %v20036_v33  ;;  %v20095_v32 = vld [vmem:[#allocation20 + $0x628] ss:$28 sps:$4 sm:$0xff]   ;;  %v20096_v33 = vld [vmem:[#allocation20 + $0x854] ss:$28 sps:$4 sm:$0xff]  }
 0x910   :  { %17531 = vmatprep.subr.bf16.mxu1 %v20039_v51  ;;  %v20099_v51 = vld [vmem:[#allocation20 + $0x664] ss:$28 sps:$4 sm:$0xff]  }
 0x912   :  { %17057 = vmatpush1.bf16.msra.mxu0 %v20038_v48  ;;  %v20098_v48 = vld [vmem:[#allocation20 + $0x850] ss:$28 sps:$4 sm:$0xff]  }
 0x913   :  { %17533 = vmatpush1.bf16.msra.mxu1 %v20041_v61  ;;  %17059 = vmatprep.subr.bf16.mxu0 %v20042_v25  ;;  %v20101_v61 = vld [vmem:[#allocation20 + $0x660] ss:$28 sps:$4 sm:$0xff]   ;;  %v20102_v25 = vld [vmem:[#allocation20 + $0x88c] ss:$28 sps:$4 sm:$0xff]  }
 0x914   :  { %17535 = vmatprep.subr.bf16.mxu1 %v20045_v38  ;;  %v20105_v38 = vld [vmem:[#allocation20 + $0x69c] ss:$28 sps:$4 sm:$0xff]  }
 0x916   :  { %17061 = vmatpush1.bf16.msra.mxu0 %v20044_v42  ;;  %v20104_v42 = vld [vmem:[#allocation20 + $0x888] ss:$28 sps:$4 sm:$0xff]  }
 0x917   :  { %17537 = vmatpush1.bf16.msra.mxu1 %v20047_v34  ;;  %17063 = vmatprep.subr.bf16.mxu0 %v20048_v35  ;;  %v20107_v34 = vld [vmem:[#allocation20 + $0x698] ss:$28 sps:$4 sm:$0xff]   ;;  %v20108_v35 = vld [vmem:[#allocation20 + $0x8c4] ss:$28 sps:$4 sm:$0xff]  }
 0x918   :  { %17539 = vmatprep.subr.bf16.mxu1 %v20051_v36  ;;  %v20111_v36 = vld [vmem:[#allocation20 + $0x6d4] ss:$28 sps:$4 sm:$0xff]  }
 0x91a   :  { %17065 = vmatpush1.bf16.msra.mxu0 %v20050_v39  ;;  %v20110_v39 = vld [vmem:[#allocation20 + $0x8c0] ss:$28 sps:$4 sm:$0xff]  }
 0x91b   :  { %17541 = vmatpush1.bf16.msra.mxu1 %v20053_v47  ;;  %17067 = vmatprep.subr.bf16.mxu0 %v20054_v5  ;;  %v20113_v47 = vld [vmem:[#allocation20 + $0x6d0] ss:$28 sps:$4 sm:$0xff]   ;;  %v20114_v5 = vld [vmem:[#allocation20 + $0x8fc] ss:$28 sps:$4 sm:$0xff]  }
 0x91c   :  { %17543 = vmatprep.subr.bf16.mxu1 %v20057_v37  ;;  %v20117_v37 = vld [vmem:[#allocation20 + $0x70c] ss:$28 sps:$4 sm:$0xff]  }
 0x91e   :  { %17069 = vmatpush1.bf16.msra.mxu0 %v20056_v41  ;;  %v20116_v41 = vld [vmem:[#allocation20 + $0x8f8] ss:$28 sps:$4 sm:$0xff]  }
 0x91f   :  { %17545 = vmatpush1.bf16.msra.mxu1 %v20059_v45  ;;  %17071 = vmatprep.subr.bf16.mxu0 %v20060_v30  ;;  %v20120_v45 = vld [vmem:[#allocation20 + $0x934] ss:$28 sps:$4 sm:$0xff]   ;;  %v20123_v30 = vld [vmem:[#allocation20 + $0x744] ss:$28 sps:$4 sm:$0xff]  }
 0x920   :  { %17547 = vmatprep.subr.bf16.mxu1 %v20063_v49  ;;  %v20125_v49 = vld [vmem:[#allocation20 + $0x740] ss:$28 sps:$4 sm:$0xff]  }
 0x921   :  { %13119 = vmatmul.mubr.f32.vlgmr.msra.gmra.mrb[28].mxu0 %v21999_v52 }
 0x922   :  { %17073 = vmatpush1.bf16.msra.mxu0 %v20062_v19  ;;  %13189 = vmatprep.mubr.f32.mxu0 %v22002_v57  ;;  %v20126_v19 = vld [vmem:[#allocation20 + $0x96c] ss:$28 sps:$4 sm:$0xff]  }
 0x923   :  { %17549 = vmatpush1.bf16.msra.mxu1 %v20065_v53  ;;  %17075 = vmatprep.subr.bf16.mxu0 %v20066_v54  ;;  %v20129_v53 = vld [vmem:[#allocation20 + $0x77c] ss:$28 sps:$4 sm:$0xff]   ;;  %v20128_v54 = vld [vmem:[#allocation20 + $0x968] ss:$28 sps:$4 sm:$0xff]  }
 0x924   :  { %17551 = vmatprep.subr.bf16.mxu1 %v20069_v58  ;;  %v20131_v58 = vld [vmem:[#allocation20 + $0x778] ss:$28 sps:$4 sm:$0xff]  }
 0x926   :  { %17077 = vmatpush1.bf16.msra.mxu0 %v20068_v59  ;;  %v20132_v59 = vld [vmem:[#allocation20 + $0x9a4] ss:$28 sps:$4 sm:$0xff]  }
 0x927   :  { %17553 = vmatpush1.bf16.msra.mxu1 %v20071_v60  ;;  %17079 = vmatprep.subr.bf16.mxu0 %v20072_v29  ;;  %v20135_v60 = vld [vmem:[#allocation20 + $0x7b4] ss:$28 sps:$4 sm:$0xff]   ;;  %v20134_v29 = vld [vmem:[#allocation20 + $0x9a0] ss:$28 sps:$4 sm:$0xff]  }
 0x928   :  { %17555 = vmatprep.subr.bf16.mxu1 %v20075_v62  ;;  %v20137_v62 = vld [vmem:[#allocation20 + $0x7b0] ss:$28 sps:$4 sm:$0xff]  }
 0x92a   :  { %17081 = vmatpush1.bf16.msra.mxu0 %v20074_v12  ;;  %v20138_v12 = vld [vmem:[#allocation20 + $0x9dc] ss:$28 sps:$4 sm:$0xff]  }
 0x92b   :  { %17557 = vmatpush1.bf16.msra.mxu1 %v20077_v44  ;;  %17083 = vmatprep.subr.bf16.mxu0 %v20078_v1  ;;  %v20141_v44 = vld [vmem:[#allocation20 + $0x7ec] ss:$28 sps:$4 sm:$0xff]   ;;  %v20140_v1 = vld [vmem:[#allocation20 + $0x9d8] ss:$28 sps:$4 sm:$0xff]  }
 0x92c   :  { %17559 = vmatprep.subr.bf16.mxu1 %v20081_v2  ;;  %v20143_v2 = vld [vmem:[#allocation20 + $0x7e8] ss:$28 sps:$4 sm:$0xff]  }
 0x92e   :  { %17085 = vmatpush1.bf16.msra.mxu0 %v20080_v9  ;;  %v20144_v9 = vld [vmem:[#allocation20 + $0xa14] ss:$28 sps:$4 sm:$0xff]  }
 0x92f   :  { %17561 = vmatpush1.bf16.msra.mxu1 %v20083_v11  ;;  %17087 = vmatprep.subr.bf16.mxu0 %v20084_v13  ;;  %v20147_v11 = vld [vmem:[#allocation20 + $0x824] ss:$28 sps:$4 sm:$0xff]   ;;  %v20146_v13 = vld [vmem:[#allocation20 + $0xa10] ss:$28 sps:$4 sm:$0xff]  }
 0x930   :  { %17563 = vmatprep.subr.bf16.mxu1 %v20087_v14  ;;  %v20149_v14 = vld [vmem:[#allocation20 + $0x820] ss:$28 sps:$4 sm:$0xff]  }
 0x932   :  { %17089 = vmatpush1.bf16.msra.mxu0 %v20086_v16  ;;  %v20150_v16 = vld [vmem:[#allocation20 + $0xa4c] ss:$28 sps:$4 sm:$0xff]  }
 0x933   :  { %17565 = vmatpush1.bf16.msra.mxu1 %v20089_v17  ;;  %17091 = vmatprep.subr.bf16.mxu0 %v20090_v20  ;;  %v20153_v17 = vld [vmem:[#allocation20 + $0x85c] ss:$28 sps:$4 sm:$0xff]   ;;  %v20152_v20 = vld [vmem:[#allocation20 + $0xa48] ss:$28 sps:$4 sm:$0xff]  }
 0x934   :  { %17567 = vmatprep.subr.bf16.mxu1 %v20093_v27  ;;  %v3637_v27 = vrot.slane %v21965_v63, %v21874_v10 }
 0x936   :  { %17093 = vmatpush1.bf16.msra.mxu0 %v20092_v31  ;;  %v20155_v31 = vld [vmem:[#allocation20 + $0x858] ss:$28 sps:$4 sm:$0xff]  }
 0x937   :  { %17569 = vmatpush1.bf16.msra.mxu1 %v20095_v32  ;;  %17095 = vmatprep.subr.bf16.mxu0 %v20096_v33  ;;  %v20156_v32 = vld [vmem:[#allocation20 + $0xa84] ss:$28 sps:$4 sm:$0xff]   ;;  %v3649_v33 = vrot.slane %v21965_v63, %v21887_v55  ;;  %v20164_v63 = vld [vmem:[#allocation20 + $0xab8] ss:$28 sps:$4 sm:$0xff]  }
 0x938   :  { %17571 = vmatprep.subr.bf16.mxu1 %v20099_v51  ;;  %v20159_v51 = vld [vmem:[#allocation20 + $0x894] ss:$28 sps:$4 sm:$0xff]  }
 0x93a   :  { %17097 = vmatpush1.bf16.msra.mxu0 %v20098_v48  ;;  %v20158_v48 = vld [vmem:[#allocation20 + $0xa80] ss:$28 sps:$4 sm:$0xff]  }
 0x93b   :  { %17573 = vmatpush1.bf16.msra.mxu1 %v20101_v61  ;;  %17099 = vmatprep.subr.bf16.mxu0 %v20102_v25  ;;  %v22013_v61 = vadd.f32 %v21935_v43, %v3637_v27  ;;  %v20161_v25 = vld [vmem:[#allocation20 + $0x890] ss:$28 sps:$4 sm:$0xff]   ;;  %v20210_v27 = vld [vmem:[#allocation20 + $0xc7c] ss:$28 sps:$4 sm:$0xff]  }
 0x93c   :  { %17575 = vmatprep.subr.bf16.mxu1 %v20105_v38  ;;  %v20162_v38 = vld [vmem:[#allocation20 + $0xabc] ss:$28 sps:$4 sm:$0xff]   ;;  %v20168_v43 = vld [vmem:[#allocation20 + $0xaf4] ss:$28 sps:$4 sm:$0xff]  }
 0x93e   :  { %17101 = vmatpush1.bf16.msra.mxu0 %v20104_v42  ;;  %v22016_v42 = vadd.f32 %v21943_v18, %v3649_v33  ;;  %v20173_v18 = vld [vmem:[#allocation20 + $0x900] ss:$28 sps:$4 sm:$0xff]   ;;  %v20215_v33 = vld [vmem:[#allocation20 + $0xa88] ss:$28 sps:$4 sm:$0xff]  }
 0x93f   :  { %17577 = vmatpush1.bf16.msra.mxu1 %v20107_v34  ;;  %17103 = vmatprep.subr.bf16.mxu0 %v20108_v35  ;;  %v20165_v34 = vld [vmem:[#allocation20 + $0x8cc] ss:$28 sps:$4 sm:$0xff]  }
 0x940   :  { %17579 = vmatprep.subr.bf16.mxu1 %v20111_v36  ;;  %v20167_v35 = vld [vmem:[#allocation20 + $0x8c8] ss:$28 sps:$4 sm:$0xff]  }
 0x941   :  { %v20171_v36 = vld [vmem:[#allocation20 + $0x904] ss:$28 sps:$4 sm:$0xff]  }
 0x942   :  { %17105 = vmatpush1.bf16.msra.mxu0 %v20110_v39  ;;  %v20170_v39 = vld [vmem:[#allocation20 + $0xaf0] ss:$28 sps:$4 sm:$0xff]  }
 0x943   :  { %17581 = vmatpush1.bf16.msra.mxu1 %v20113_v47  ;;  %17107 = vmatprep.subr.bf16.mxu0 %v20114_v5  ;;  %v20174_v47 = vld [vmem:[#allocation20 + $0xb2c] ss:$28 sps:$4 sm:$0xff]   ;;  %v20177_v5 = vld [vmem:[#allocation20 + $0x93c] ss:$28 sps:$4 sm:$0xff]  }
 0x944   :  { %17583 = vmatprep.subr.bf16.mxu1 %v20117_v37  ;;  %v20176_v37 = vld [vmem:[#allocation20 + $0xb28] ss:$28 sps:$4 sm:$0xff]  }
 0x946   :  { %17109 = vmatpush1.bf16.msra.mxu0 %v20116_v41  ;;  %13687 = vmatmul.mubr.f32.vlgmr.msra.gmra.mrb[36].mxu1 %v21999_v52  ;;  %v20179_v41 = vld [vmem:[#allocation20 + $0x938] ss:$28 sps:$4 sm:$0xff]  }
 0x947   :  { %17585 = vmatpush1.bf16.msra.mxu1 %v20119_v26  ;;  %13757 = vmatprep.mubr.f32.mxu1 %v22002_v57  ;;  %v20180_v26 = vld [vmem:[#allocation20 + $0xb64] ss:$28 sps:$4 sm:$0xff]  }
 0x948   :  { %17111 = vmatprep.subr.bf16.mxu0 %v20120_v45  ;;  %17587 = vmatprep.subr.bf16.mxu1 %v20123_v30  ;;  %v20183_v45 = vld [vmem:[#allocation20 + $0x974] ss:$28 sps:$4 sm:$0xff]   ;;  %v20182_v30 = vld [vmem:[#allocation20 + $0xb60] ss:$28 sps:$4 sm:$0xff]  }
 0x94a   :  { %17113 = vmatpush1.bf16.msra.mxu0 %v20122_v56  ;;  %v20185_v56 = vld [vmem:[#allocation20 + $0x970] ss:$28 sps:$4 sm:$0xff]  }
 0x94b   :  { %17589 = vmatpush1.bf16.msra.mxu1 %v20125_v49  ;;  %17115 = vmatprep.subr.bf16.mxu0 %v20126_v19  ;;  %v20186_v49 = vld [vmem:[#allocation20 + $0xb9c] ss:$28 sps:$4 sm:$0xff]   ;;  %v20189_v19 = vld [vmem:[#allocation20 + $0x9ac] ss:$28 sps:$4 sm:$0xff]  }
 0x94c   :  { %17591 = vmatprep.subr.bf16.mxu1 %v20129_v53  ;;  %v20188_v53 = vld [vmem:[#allocation20 + $0xb98] ss:$28 sps:$4 sm:$0xff]  }
 0x94e   :  { %17117 = vmatpush1.bf16.msra.mxu0 %v20128_v54  ;;  %v20191_v54 = vld [vmem:[#allocation20 + $0x9a8] ss:$28 sps:$4 sm:$0xff]  }
 0x94f   :  { %17593 = vmatpush1.bf16.msra.mxu1 %v20131_v58  ;;  %17119 = vmatprep.subr.bf16.mxu0 %v20132_v59  ;;  %v20192_v58 = vld [vmem:[#allocation20 + $0xbd4] ss:$28 sps:$4 sm:$0xff]  }
 0x950   :  { %17595 = vmatprep.subr.bf16.mxu1 %v20135_v60  ;;  %v20195_v60 = vld [vmem:[#allocation20 + $0x9e4] ss:$28 sps:$4 sm:$0xff]  }
 0x952   :  { %17121 = vmatpush1.bf16.msra.mxu0 %v20134_v29 }
 0x953   :  { %17597 = vmatpush1.bf16.msra.mxu1 %v20137_v62  ;;  %17123 = vmatprep.subr.bf16.mxu0 %v20138_v12  ;;  %v20194_v12 = vld [vmem:[#allocation20 + $0xbd0] ss:$28 sps:$4 sm:$0xff]  }
 0x954   :  { %17599 = vmatprep.subr.bf16.mxu1 %v20141_v44 }
 0x956   :  { %17125 = vmatpush1.bf16.msra.mxu0 %v20140_v1  ;;  %v20197_v1 = vld [vmem:[#allocation20 + $0x9e0] ss:$28 sps:$4 sm:$0xff]  }
 0x957   :  { %17601 = vmatpush1.bf16.msra.mxu1 %v20143_v2  ;;  %17127 = vmatprep.subr.bf16.mxu0 %v20144_v9  ;;  %v20198_v2 = vld [vmem:[#allocation20 + $0xc0c] ss:$28 sps:$4 sm:$0xff]   ;;  %v20201_v9 = vld [vmem:[#allocation20 + $0xa1c] ss:$28 sps:$4 sm:$0xff]  }
 0x958   :  { %17603 = vmatprep.subr.bf16.mxu1 %v20147_v11  ;;  %v20200_v11 = vld [vmem:[#allocation20 + $0xc08] ss:$28 sps:$4 sm:$0xff]  }
 0x95a   :  { %17129 = vmatpush1.bf16.msra.mxu0 %v20146_v13  ;;  %v20203_v13 = vld [vmem:[#allocation20 + $0xa18] ss:$28 sps:$4 sm:$0xff]  }
 0x95b   :  { %17605 = vmatpush1.bf16.msra.mxu1 %v20149_v14  ;;  %17131 = vmatprep.subr.bf16.mxu0 %v20150_v16  ;;  %v20204_v14 = vld [vmem:[#allocation20 + $0xc44] ss:$28 sps:$4 sm:$0xff]   ;;  %v20207_v16 = vld [vmem:[#allocation20 + $0xa54] ss:$28 sps:$4 sm:$0xff]  }
 0x95c   :  { %17607 = vmatprep.subr.bf16.mxu1 %v20153_v17  ;;  %v20206_v17 = vld [vmem:[#allocation20 + $0xc40] ss:$28 sps:$4 sm:$0xff]  }
 0x95e   :  { %17133 = vmatpush1.bf16.msra.mxu0 %v20152_v20  ;;  %v20209_v20 = vld [vmem:[#allocation20 + $0xa50] ss:$28 sps:$4 sm:$0xff]  }
 0x95f   :  { %17609 = vmatpush1.bf16.msra.mxu1 %v20155_v31  ;;  %17135 = vmatprep.subr.bf16.mxu0 %v20156_v32  ;;  %v20213_v31 = vld [vmem:[#allocation20 + $0xa8c] ss:$28 sps:$4 sm:$0xff]   ;;  %v20212_v32 = vld [vmem:[#allocation20 + $0xc78] ss:$28 sps:$4 sm:$0xff]  }
 0x960   :  { %17611 = vmatprep.subr.bf16.mxu1 %v20159_v51  ;;  %v20216_v51 = vld [vmem:[#allocation20 + $0xcb4] ss:$28 sps:$4 sm:$0xff]  }
 0x961   :  { %13190 = vmatmul.mubr.f32.vlgmr.msra.gmra.mrb[28].mxu0 %v22013_v61 }
 0x962   :  { %17137 = vmatpush1.bf16.msra.mxu0 %v20158_v48  ;;  %13260 = vmatprep.mubr.f32.mxu0 %v22016_v42  ;;  %v20219_v48 = vld [vmem:[#allocation20 + $0xac4] ss:$28 sps:$4 sm:$0xff]  }
 0x963   :  { %17613 = vmatpush1.bf16.msra.mxu1 %v20161_v25  ;;  %17139 = vmatprep.subr.bf16.mxu0 %v20162_v38  ;;  %v20218_v25 = vld [vmem:[#allocation20 + $0xcb0] ss:$28 sps:$4 sm:$0xff]   ;;  %v20221_v38 = vld [vmem:[#allocation20 + $0xac0] ss:$28 sps:$4 sm:$0xff]  }
 0x964   :  { %17615 = vmatprep.subr.bf16.mxu1 %v20165_v34  ;;  %v20222_v34 = vld [vmem:[#allocation20 + $0xcec] ss:$28 sps:$4 sm:$0xff]  }
 0x966   :  { %17141 = vmatpush1.bf16.msra.mxu0 %v20164_v63  ;;  %v20225_v63 = vld [vmem:[#allocation20 + $0xafc] ss:$28 sps:$4 sm:$0xff]  }
 0x967   :  { %17617 = vmatpush1.bf16.msra.mxu1 %v20167_v35  ;;  %17143 = vmatprep.subr.bf16.mxu0 %v20168_v43  ;;  %v20224_v35 = vld [vmem:[#allocation20 + $0xce8] ss:$28 sps:$4 sm:$0xff]   ;;  %v20227_v43 = vld [vmem:[#allocation20 + $0xaf8] ss:$28 sps:$4 sm:$0xff]  }
 0x968   :  { %17619 = vmatprep.subr.bf16.mxu1 %v20171_v36  ;;  %v20228_v36 = vld [vmem:[#allocation20 + $0xd24] ss:$28 sps:$4 sm:$0xff]  }
 0x96a   :  { %17145 = vmatpush1.bf16.msra.mxu0 %v20170_v39  ;;  %v20231_v39 = vld [vmem:[#allocation20 + $0xb34] ss:$28 sps:$4 sm:$0xff]  }
 0x96b   :  { %17621 = vmatpush1.bf16.msra.mxu1 %v20173_v18  ;;  %17147 = vmatprep.subr.bf16.mxu0 %v20174_v47  ;;  %v20230_v18 = vld [vmem:[#allocation20 + $0xd20] ss:$28 sps:$4 sm:$0xff]   ;;  %v20233_v47 = vld [vmem:[#allocation20 + $0xb30] ss:$28 sps:$4 sm:$0xff]  }
 0x96c   :  { %17623 = vmatprep.subr.bf16.mxu1 %v20177_v5  ;;  %v20234_v5 = vld [vmem:[#allocation20 + $0xd5c] ss:$28 sps:$4 sm:$0xff]  }
 0x96e   :  { %17149 = vmatpush1.bf16.msra.mxu0 %v20176_v37  ;;  %v20237_v37 = vld [vmem:[#allocation20 + $0xb6c] ss:$28 sps:$4 sm:$0xff]  }
 0x96f   :  { %17625 = vmatpush1.bf16.msra.mxu1 %v20179_v41  ;;  %17151 = vmatprep.subr.bf16.mxu0 %v20180_v26  ;;  %v20236_v41 = vld [vmem:[#allocation20 + $0xd58] ss:$28 sps:$4 sm:$0xff]   ;;  %v20239_v26 = vld [vmem:[#allocation20 + $0xb68] ss:$28 sps:$4 sm:$0xff]  }
 0x970   :  { %17627 = vmatprep.subr.bf16.mxu1 %v20183_v45  ;;  %v20240_v45 = vld [vmem:[#allocation20 + $0xd94] ss:$28 sps:$4 sm:$0xff]  }
 0x972   :  { %17153 = vmatpush1.bf16.msra.mxu0 %v20182_v30  ;;  %v20243_v30 = vld [vmem:[#allocation20 + $0xba4] ss:$28 sps:$4 sm:$0xff]  }
 0x973   :  { %17629 = vmatpush1.bf16.msra.mxu1 %v20185_v56  ;;  %17155 = vmatprep.subr.bf16.mxu0 %v20186_v49  ;;  %v20242_v56 = vld [vmem:[#allocation20 + $0xd90] ss:$28 sps:$4 sm:$0xff]   ;;  %v20245_v49 = vld [vmem:[#allocation20 + $0xba0] ss:$28 sps:$4 sm:$0xff]  }
 0x974   :  { %v22020_v59 = vpop.f32.mrb[24].mxu0  ;;  %17631 = vmatprep.subr.bf16.mxu1 %v20189_v19  ;;  %v20246_v19 = vld [vmem:[#allocation20 + $0xdcc] ss:$28 sps:$4 sm:$0xff]  }
 0x975   :  { %v22022_v29 = vpop.f32.mrb[25].mxu0 }
 0x976   :  { %v9963_v62 = vpop.f32.mrb[26].mxu0  ;;  %17157 = vmatpush1.bf16.msra.mxu0 %v20188_v53  ;;  %v20249_v53 = vld [vmem:[#allocation20 + $0xbdc] ss:$28 sps:$4 sm:$0xff]  }
 0x977   :  { %v9964_v44 = vpop.f32.mrb[27].mxu0  ;;  %17633 = vmatpush1.bf16.msra.mxu1 %v20191_v54  ;;  %17159 = vmatprep.subr.bf16.mxu0 %v20192_v58  ;;  %v22026_v54 = vld [vmem:[#allocation19 + $0x8] sm:$0xff]  ;;  %v20248_v62 = vld [vmem:[#allocation20 + $0xdc8] ss:$28 sps:$4 sm:$0xff]  }
 0x978   :  { %17635 = vmatprep.subr.bf16.mxu1 %v20195_v60 }
 0x97a   :  { %17161 = vmatpush1.bf16.msra.mxu0 %v20194_v12  ;;  %v21176_v12 = vld [vmem:[#allocation19] sm:$0xff] }
 0x97b   :  { %17637 = vmatpush1.bf16.msra.mxu1 %v20197_v1  ;;  %17163 = vmatprep.subr.bf16.mxu0 %v20198_v2  ;;  %v3645_v44 = vrot.slane %v21176_v12, %v21884_v50  ;;  %v20251_v2 = vld [vmem:[#allocation20 + $0xbd8] ss:$28 sps:$4 sm:$0xff]   ;;  %v20300_v12 = vld [vmem:[#allocation20 + $0xfc4] ss:$28 sps:$4 sm:$0xff]  }
 0x97c   :  { %17639 = vmatprep.subr.bf16.mxu1 %v20201_v9  ;;  %v20252_v9 = vld [vmem:[#allocation20 + $0xe04] ss:$28 sps:$4 sm:$0xff]  }
 0x97e   :  { %17165 = vmatpush1.bf16.msra.mxu0 %v20200_v11  ;;  %v3657_v11 = vrot.slane %v22026_v54, %v21768_v6 }
 0x97f   :  { %17641 = vmatpush1.bf16.msra.mxu1 %v20203_v13  ;;  %17167 = vmatprep.subr.bf16.mxu0 %v20204_v14  ;;  %v20255_v14 = vld [vmem:[#allocation20 + $0xc14] ss:$28 sps:$4 sm:$0xff]  }
 0x980   :  { %17643 = vmatprep.subr.bf16.mxu1 %v20207_v16  ;;  %v20254_v16 = vld [vmem:[#allocation20 + $0xe00] ss:$28 sps:$4 sm:$0xff]  }
 0x982   :  { %17169 = vmatpush1.bf16.msra.mxu0 %v20206_v17  ;;  %v22036_v17 = vadd.f32 %v21941_v40, %v3645_v44  ;;  %v20264_v40 = vld [vmem:[#allocation20 + $0xe74] ss:$28 sps:$4 sm:$0xff]  }
 0x983   :  { %17645 = vmatpush1.bf16.msra.mxu1 %v20209_v20  ;;  %17171 = vmatprep.subr.bf16.mxu0 %v20210_v27  ;;  %v20257_v20 = vld [vmem:[#allocation20 + $0xc10] ss:$28 sps:$4 sm:$0xff]   ;;  %v20258_v27 = vld [vmem:[#allocation20 + $0xe3c] ss:$28 sps:$4 sm:$0xff]  }
 0x984   :  { %17647 = vmatprep.subr.bf16.mxu1 %v20213_v31  ;;  %v22039_v31 = vadd.f32 %v21961_v28, %v3657_v11  ;;  %v20269_v28 = vld [vmem:[#allocation20 + $0xc80] ss:$28 sps:$4 sm:$0xff]   ;;  %v20303_v44 = vld [vmem:[#allocation20 + $0xdd4] ss:$28 sps:$4 sm:$0xff]   ;;  %v20309_v11 = vld [vmem:[#allocation20 + $0xe0c] ss:$28 sps:$4 sm:$0xff]  }
 0x986   :  { %17173 = vmatpush1.bf16.msra.mxu0 %v20212_v32  ;;  %13758 = vmatmul.mubr.f32.vlgmr.msra.gmra.mrb[36].mxu1 %v22013_v61  ;;  %v20261_v32 = vld [vmem:[#allocation20 + $0xc4c] ss:$28 sps:$4 sm:$0xff]  }
 0x987   :  { %17649 = vmatpush1.bf16.msra.mxu1 %v20215_v33  ;;  %13828 = vmatprep.mubr.f32.mxu1 %v22016_v42  ;;  %v20260_v33 = vld [vmem:[#allocation20 + $0xe38] ss:$28 sps:$4 sm:$0xff]  }
 0x988   :  { %17175 = vmatprep.subr.bf16.mxu0 %v20216_v51  ;;  %17651 = vmatprep.subr.bf16.mxu1 %v20219_v48  ;;  %v20263_v51 = vld [vmem:[#allocation20 + $0xc48] ss:$28 sps:$4 sm:$0xff]  }
 0x989   :  { %v20267_v48 = vld [vmem:[#allocation20 + $0xc84] ss:$28 sps:$4 sm:$0xff]  }
 0x98a   :  { %17177 = vmatpush1.bf16.msra.mxu0 %v20218_v25  ;;  %v20266_v25 = vld [vmem:[#allocation20 + $0xe70] ss:$28 sps:$4 sm:$0xff]  }
 0x98b   :  { %17653 = vmatpush1.bf16.msra.mxu1 %v20221_v38  ;;  %17179 = vmatprep.subr.bf16.mxu0 %v20222_v34  ;;  %v20270_v38 = vld [vmem:[#allocation20 + $0xeac] ss:$28 sps:$4 sm:$0xff]   ;;  %v20273_v34 = vld [vmem:[#allocation20 + $0xcbc] ss:$28 sps:$4 sm:$0xff]  }
 0x98c   :  { %17655 = vmatprep.subr.bf16.mxu1 %v20225_v63  ;;  %v20272_v63 = vld [vmem:[#allocation20 + $0xea8] ss:$28 sps:$4 sm:$0xff]  }
 0x98e   :  { %17181 = vmatpush1.bf16.msra.mxu0 %v20224_v35  ;;  %v20275_v35 = vld [vmem:[#allocation20 + $0xcb8] ss:$28 sps:$4 sm:$0xff]  }
 0x98f   :  { %17657 = vmatpush1.bf16.msra.mxu1 %v20227_v43  ;;  %17183 = vmatprep.subr.bf16.mxu0 %v20228_v36  ;;  %v20276_v43 = vld [vmem:[#allocation20 + $0xee4] ss:$28 sps:$4 sm:$0xff]   ;;  %v20279_v36 = vld [vmem:[#allocation20 + $0xcf4] ss:$28 sps:$4 sm:$0xff]  }
 0x990   :  { %17659 = vmatprep.subr.bf16.mxu1 %v20231_v39  ;;  %v20278_v39 = vld [vmem:[#allocation20 + $0xee0] ss:$28 sps:$4 sm:$0xff]  }
 0x992   :  { %17185 = vmatpush1.bf16.msra.mxu0 %v20230_v18  ;;  %v20281_v18 = vld [vmem:[#allocation20 + $0xcf0] ss:$28 sps:$4 sm:$0xff]  }
 0x993   :  { %17661 = vmatpush1.bf16.msra.mxu1 %v20233_v47  ;;  %17187 = vmatprep.subr.bf16.mxu0 %v20234_v5  ;;  %v20282_v47 = vld [vmem:[#allocation20 + $0xf1c] ss:$28 sps:$4 sm:$0xff]   ;;  %v20285_v5 = vld [vmem:[#allocation20 + $0xd2c] ss:$28 sps:$4 sm:$0xff]  }
 0x994   :  { %17663 = vmatprep.subr.bf16.mxu1 %v20237_v37  ;;  %v20284_v37 = vld [vmem:[#allocation20 + $0xf18] ss:$28 sps:$4 sm:$0xff]  }
 0x996   :  { %17189 = vmatpush1.bf16.msra.mxu0 %v20236_v41  ;;  %v20287_v41 = vld [vmem:[#allocation20 + $0xd28] ss:$28 sps:$4 sm:$0xff]  }
 0x997   :  { %17665 = vmatpush1.bf16.msra.mxu1 %v20239_v26  ;;  %17191 = vmatprep.subr.bf16.mxu0 %v20240_v45  ;;  %v20288_v26 = vld [vmem:[#allocation20 + $0xf54] ss:$28 sps:$4 sm:$0xff]   ;;  %v20291_v45 = vld [vmem:[#allocation20 + $0xd64] ss:$28 sps:$4 sm:$0xff]  }
 0x998   :  { %17667 = vmatprep.subr.bf16.mxu1 %v20243_v30  ;;  %v20290_v30 = vld [vmem:[#allocation20 + $0xf50] ss:$28 sps:$4 sm:$0xff]  }
 0x999   :  { %v22028_v58 = vpop.f32.mrb[32].mxu1 }
 0x99a   :  { %v22030_v60 = vpop.f32.mrb[33].mxu1  ;;  %17193 = vmatpush1.bf16.msra.mxu0 %v20242_v56  ;;  %v20293_v56 = vld [vmem:[#allocation20 + $0xd60] ss:$28 sps:$4 sm:$0xff]  }
 0x99b   :  { %v10127_v1 = vpop.f32.mrb[34].mxu1  ;;  %17669 = vmatpush1.bf16.msra.mxu1 %v20245_v49  ;;  %17195 = vmatprep.subr.bf16.mxu0 %v20246_v19  ;;  %v20294_v49 = vld [vmem:[#allocation20 + $0xf8c] ss:$28 sps:$4 sm:$0xff]   ;;  %v20297_v19 = vld [vmem:[#allocation20 + $0xd9c] ss:$28 sps:$4 sm:$0xff]  }
 0x99c   :  { %v10128_v13 = vpop.f32.mrb[35].mxu1  ;;  %17671 = vmatprep.subr.bf16.mxu1 %v20249_v53  ;;  %v20296_v53 = vld [vmem:[#allocation20 + $0xf88] ss:$28 sps:$4 sm:$0xff]   ;;  %v20302_v1 = vld [vmem:[#allocation20 + $0xfc0] ss:$28 sps:$4 sm:$0xff]  }
 0x99d   :  { %v20308_v13 = vld [vmem:[#allocation20 + $0xff8] ss:$28 sps:$4 sm:$0xff]  }
 0x99e   :  { %17197 = vmatpush1.bf16.msra.mxu0 %v20248_v62  ;;  %v20299_v62 = vld [vmem:[#allocation20 + $0xd98] ss:$28 sps:$4 sm:$0xff]  }
 0x99f   :  { %17673 = vmatpush1.bf16.msra.mxu1 %v20251_v2  ;;  %17199 = vmatprep.subr.bf16.mxu0 %v20252_v9  ;;  %v20305_v2 = vld [vmem:[#allocation20 + $0xdd0] ss:$28 sps:$4 sm:$0xff]   ;;  %v20306_v9 = vld [vmem:[#allocation20 + $0xffc] ss:$28 sps:$4 sm:$0xff]  }
 0x9a0   :  { %17675 = vmatprep.subr.bf16.mxu1 %v20255_v14  ;;  %v20311_v14 = vld [vmem:[#allocation20 + $0xe08] ss:$28 sps:$4 sm:$0xff]  }
 0x9a1   :  { %13261 = vmatmul.mubr.f32.vlgmr.msra.gmra.mrb[28].mxu0 %v22036_v17 }
 0x9a2   :  { %17201 = vmatpush1.bf16.msra.mxu0 %v20254_v16  ;;  %13331 = vmatprep.mubr.f32.mxu0 %v22039_v31  ;;  %v20312_v16 = vld [vmem:[#allocation20 + $0x1034] ss:$28 sps:$4 sm:$0xff]  }
 0x9a3   :  { %17677 = vmatpush1.bf16.msra.mxu1 %v20257_v20  ;;  %17203 = vmatprep.subr.bf16.mxu0 %v20258_v27  ;;  %v20315_v20 = vld [vmem:[#allocation20 + $0xe44] ss:$28 sps:$4 sm:$0xff]   ;;  %v20314_v27 = vld [vmem:[#allocation20 + $0x1030] ss:$28 sps:$4 sm:$0xff]  }
 0x9a4   :  { %17679 = vmatprep.subr.bf16.mxu1 %v20261_v32  ;;  %v20317_v32 = vld [vmem:[#allocation20 + $0xe40] ss:$28 sps:$4 sm:$0xff]  }
 0x9a6   :  { %17205 = vmatpush1.bf16.msra.mxu0 %v20260_v33  ;;  %v20318_v33 = vld [vmem:[#allocation20 + $0x106c] ss:$28 sps:$4 sm:$0xff]  }
 0x9a7   :  { %17681 = vmatpush1.bf16.msra.mxu1 %v20263_v51  ;;  %17207 = vmatprep.subr.bf16.mxu0 %v20264_v40  ;;  %v20321_v51 = vld [vmem:[#allocation20 + $0xe7c] ss:$28 sps:$4 sm:$0xff]   ;;  %v20320_v40 = vld [vmem:[#allocation20 + $0x1068] ss:$28 sps:$4 sm:$0xff]  }
 0x9a8   :  { %17683 = vmatprep.subr.bf16.mxu1 %v20267_v48  ;;  %v20323_v48 = vld [vmem:[#allocation20 + $0xe78] ss:$28 sps:$4 sm:$0xff]  }
 0x9aa   :  { %17209 = vmatpush1.bf16.msra.mxu0 %v20266_v25  ;;  %v20324_v25 = vld [vmem:[#allocation20 + $0x10a4] ss:$28 sps:$4 sm:$0xff]  }
 0x9ab   :  { %17685 = vmatpush1.bf16.msra.mxu1 %v20269_v28  ;;  %17211 = vmatprep.subr.bf16.mxu0 %v20270_v38  ;;  %v20327_v28 = vld [vmem:[#allocation20 + $0xeb4] ss:$28 sps:$4 sm:$0xff]   ;;  %v20326_v38 = vld [vmem:[#allocation20 + $0x10a0] ss:$28 sps:$4 sm:$0xff]  }
 0x9ac   :  { %17687 = vmatprep.subr.bf16.mxu1 %v20273_v34  ;;  %v20329_v34 = vld [vmem:[#allocation20 + $0xeb0] ss:$28 sps:$4 sm:$0xff]  }
 0x9ae   :  { %17213 = vmatpush1.bf16.msra.mxu0 %v20272_v63  ;;  %v20330_v63 = vld [vmem:[#allocation20 + $0x10dc] ss:$28 sps:$4 sm:$0xff]  }
 0x9af   :  { %17689 = vmatpush1.bf16.msra.mxu1 %v20275_v35  ;;  %17215 = vmatprep.subr.bf16.mxu0 %v20276_v43  ;;  %v20333_v35 = vld [vmem:[#allocation20 + $0xeec] ss:$28 sps:$4 sm:$0xff]   ;;  %v20332_v43 = vld [vmem:[#allocation20 + $0x10d8] ss:$28 sps:$4 sm:$0xff]  }
 0x9b0   :  { %17691 = vmatprep.subr.bf16.mxu1 %v20279_v36  ;;  %v20335_v36 = vld [vmem:[#allocation20 + $0xee8] ss:$28 sps:$4 sm:$0xff]  }
 0x9b2   :  { %17217 = vmatpush1.bf16.msra.mxu0 %v20278_v39  ;;  %v20336_v39 = vld [vmem:[#allocation20 + $0x1114] ss:$28 sps:$4 sm:$0xff]  }
 0x9b3   :  { %17693 = vmatpush1.bf16.msra.mxu1 %v20281_v18  ;;  %17219 = vmatprep.subr.bf16.mxu0 %v20282_v47  ;;  %v20339_v18 = vld [vmem:[#allocation20 + $0xf24] ss:$28 sps:$4 sm:$0xff]   ;;  %v20338_v47 = vld [vmem:[#allocation20 + $0x1110] ss:$28 sps:$4 sm:$0xff]  }
 0x9b4   :  { %17695 = vmatprep.subr.bf16.mxu1 %v20285_v5  ;;  %v20341_v5 = vld [vmem:[#allocation20 + $0xf20] ss:$28 sps:$4 sm:$0xff]  }
 0x9b6   :  { %17221 = vmatpush1.bf16.msra.mxu0 %v20284_v37  ;;  %v20342_v37 = vld [vmem:[#allocation20 + $0x114c] ss:$28 sps:$4 sm:$0xff]  }
 0x9b7   :  { %17697 = vmatpush1.bf16.msra.mxu1 %v20287_v41  ;;  %17223 = vmatprep.subr.bf16.mxu0 %v20288_v26  ;;  %v20345_v41 = vld [vmem:[#allocation20 + $0xf5c] ss:$28 sps:$4 sm:$0xff]   ;;  %v20344_v26 = vld [vmem:[#allocation20 + $0x1148] ss:$28 sps:$4 sm:$0xff]  }
 0x9b8   :  { %17699 = vmatprep.subr.bf16.mxu1 %v20291_v45  ;;  %v3653_v45 = vrot.slane %v22026_v54, %v21763_v4 }
 0x9ba   :  { %17225 = vmatpush1.bf16.msra.mxu0 %v20290_v30  ;;  %v20347_v30 = vld [vmem:[#allocation20 + $0xf58] ss:$28 sps:$4 sm:$0xff]  }
 0x9bb   :  { %17701 = vmatpush1.bf16.msra.mxu1 %v20293_v56  ;;  %17227 = vmatprep.subr.bf16.mxu0 %v20294_v49  ;;  %v20348_v56 = vld [vmem:[#allocation20 + $0x1184] ss:$28 sps:$4 sm:$0xff]   ;;  %v3665_v49 = vrot.slane %v22026_v54, %v21771_v7 }
 0x9bc   :  { %17703 = vmatprep.subr.bf16.mxu1 %v20297_v19  ;;  %v20351_v19 = vld [vmem:[#allocation20 + $0xf94] ss:$28 sps:$4 sm:$0xff]  }
 0x9be   :  { %17229 = vmatpush1.bf16.msra.mxu0 %v20296_v53  ;;  %v20350_v53 = vld [vmem:[#allocation20 + $0x1180] ss:$28 sps:$4 sm:$0xff]  }
 0x9bf   :  { %17705 = vmatpush1.bf16.msra.mxu1 %v20299_v62  ;;  %17231 = vmatprep.subr.bf16.mxu0 %v20300_v12  ;;  %v22050_v62 = vadd.f32 %v21959_v23, %v3653_v45  ;;  %v20353_v12 = vld [vmem:[#allocation20 + $0xf90] ss:$28 sps:$4 sm:$0xff]  }
 0x9c0   :  { %17707 = vmatprep.subr.bf16.mxu1 %v20303_v44  ;;  %v20354_v44 = vld [vmem:[#allocation20 + $0x11bc] ss:$28 sps:$4 sm:$0xff]   ;;  %v20360_v23 = vld [vmem:[#allocation20 + $0x11f4] ss:$28 sps:$4 sm:$0xff]  }
 0x9c1   :  { %v20401_v45 = vld [vmem:[#allocation20 + $0x1150] ss:$28 sps:$4 sm:$0xff]  }
 0x9c2   :  { %17233 = vmatpush1.bf16.msra.mxu0 %v20302_v1  ;;  %v22053_v1 = vadd.f32 %v21969_v8, %v3665_v49  ;;  %v20365_v8 = vld [vmem:[#allocation20 + $0x1000] ss:$28 sps:$4 sm:$0xff]   ;;  %v20404_v49 = vld [vmem:[#allocation20 + $0x1378] ss:$28 sps:$4 sm:$0xff]  }
 0x9c3   :  { %17709 = vmatpush1.bf16.msra.mxu1 %v20305_v2  ;;  %17235 = vmatprep.subr.bf16.mxu0 %v20306_v9  ;;  %v20357_v2 = vld [vmem:[#allocation20 + $0xfcc] ss:$28 sps:$4 sm:$0xff]   ;;  %v20356_v9 = vld [vmem:[#allocation20 + $0x11b8] ss:$28 sps:$4 sm:$0xff]  }
 0x9c4   :  { %17711 = vmatprep.subr.bf16.mxu1 %v20309_v11  ;;  %v20359_v11 = vld [vmem:[#allocation20 + $0xfc8] ss:$28 sps:$4 sm:$0xff]  }
 0x9c6   :  { %17237 = vmatpush1.bf16.msra.mxu0 %v20308_v13  ;;  %13829 = vmatmul.mubr.f32.vlgmr.msra.gmra.mrb[36].mxu1 %v22036_v17  ;;  %v20363_v13 = vld [vmem:[#allocation20 + $0x1004] ss:$28 sps:$4 sm:$0xff]  }
 0x9c7   :  { %17713 = vmatpush1.bf16.msra.mxu1 %v20311_v14  ;;  %13899 = vmatprep.mubr.f32.mxu1 %v22039_v31  ;;  %v20362_v14 = vld [vmem:[#allocation20 + $0x11f0] ss:$28 sps:$4 sm:$0xff]  }
 0x9c8   :  { %17239 = vmatprep.subr.bf16.mxu0 %v20312_v16  ;;  %17715 = vmatprep.subr.bf16.mxu1 %v20315_v20  ;;  %v20366_v16 = vld [vmem:[#allocation20 + $0x122c] ss:$28 sps:$4 sm:$0xff]   ;;  %v20369_v20 = vld [vmem:[#allocation20 + $0x103c] ss:$28 sps:$4 sm:$0xff]  }
 0x9ca   :  { %17241 = vmatpush1.bf16.msra.mxu0 %v20314_v27  ;;  %v20368_v27 = vld [vmem:[#allocation20 + $0x1228] ss:$28 sps:$4 sm:$0xff]  }
 0x9cb   :  { %17717 = vmatpush1.bf16.msra.mxu1 %v20317_v32  ;;  %17243 = vmatprep.subr.bf16.mxu0 %v20318_v33  ;;  %v20371_v32 = vld [vmem:[#allocation20 + $0x1038] ss:$28 sps:$4 sm:$0xff]   ;;  %v20372_v33 = vld [vmem:[#allocation20 + $0x1264] ss:$28 sps:$4 sm:$0xff]  }
 0x9cc   :  { %17719 = vmatprep.subr.bf16.mxu1 %v20321_v51  ;;  %v20375_v51 = vld [vmem:[#allocation20 + $0x1074] ss:$28 sps:$4 sm:$0xff]  }
 0x9ce   :  { %17245 = vmatpush1.bf16.msra.mxu0 %v20320_v40  ;;  %v20374_v40 = vld [vmem:[#allocation20 + $0x1260] ss:$28 sps:$4 sm:$0xff]  }
 0x9cf   :  { %17721 = vmatpush1.bf16.msra.mxu1 %v20323_v48  ;;  %17247 = vmatprep.subr.bf16.mxu0 %v20324_v25  ;;  %v20377_v48 = vld [vmem:[#allocation20 + $0x1070] ss:$28 sps:$4 sm:$0xff]   ;;  %v20378_v25 = vld [vmem:[#allocation20 + $0x129c] ss:$28 sps:$4 sm:$0xff]  }
 0x9d0   :  { %17723 = vmatprep.subr.bf16.mxu1 %v20327_v28  ;;  %v20381_v28 = vld [vmem:[#allocation20 + $0x10ac] ss:$28 sps:$4 sm:$0xff]  }
 0x9d2   :  { %17249 = vmatpush1.bf16.msra.mxu0 %v20326_v38  ;;  %v20380_v38 = vld [vmem:[#allocation20 + $0x1298] ss:$28 sps:$4 sm:$0xff]  }
 0x9d3   :  { %17725 = vmatpush1.bf16.msra.mxu1 %v20329_v34  ;;  %17251 = vmatprep.subr.bf16.mxu0 %v20330_v63  ;;  %v20383_v34 = vld [vmem:[#allocation20 + $0x10a8] ss:$28 sps:$4 sm:$0xff]   ;;  %v20384_v63 = vld [vmem:[#allocation20 + $0x12d4] ss:$28 sps:$4 sm:$0xff]  }
 0x9d4   :  { %17727 = vmatprep.subr.bf16.mxu1 %v20333_v35  ;;  %v20387_v35 = vld [vmem:[#allocation20 + $0x10e4] ss:$28 sps:$4 sm:$0xff]  }
 0x9d6   :  { %17253 = vmatpush1.bf16.msra.mxu0 %v20332_v43  ;;  %v20386_v43 = vld [vmem:[#allocation20 + $0x12d0] ss:$28 sps:$4 sm:$0xff]  }
 0x9d7   :  { %17729 = vmatpush1.bf16.msra.mxu1 %v20335_v36  ;;  %17255 = vmatprep.subr.bf16.mxu0 %v20336_v39  ;;  %v20389_v36 = vld [vmem:[#allocation20 + $0x10e0] ss:$28 sps:$4 sm:$0xff]   ;;  %v20390_v39 = vld [vmem:[#allocation20 + $0x130c] ss:$28 sps:$4 sm:$0xff]  }
 0x9d8   :  { %17731 = vmatprep.subr.bf16.mxu1 %v20339_v18  ;;  %v20393_v18 = vld [vmem:[#allocation20 + $0x111c] ss:$28 sps:$4 sm:$0xff]  }
 0x9da   :  { %17257 = vmatpush1.bf16.msra.mxu0 %v20338_v47  ;;  %v20392_v47 = vld [vmem:[#allocation20 + $0x1308] ss:$28 sps:$4 sm:$0xff]  }
 0x9db   :  { %17733 = vmatpush1.bf16.msra.mxu1 %v20341_v5  ;;  %17259 = vmatprep.subr.bf16.mxu0 %v20342_v37  ;;  %v20395_v5 = vld [vmem:[#allocation20 + $0x1118] ss:$28 sps:$4 sm:$0xff]   ;;  %v20396_v37 = vld [vmem:[#allocation20 + $0x1344] ss:$28 sps:$4 sm:$0xff]  }
 0x9dc   :  { %17735 = vmatprep.subr.bf16.mxu1 %v20345_v41  ;;  %v20399_v41 = vld [vmem:[#allocation20 + $0x1154] ss:$28 sps:$4 sm:$0xff]  }
 0x9de   :  { %17261 = vmatpush1.bf16.msra.mxu0 %v20344_v26  ;;  %v20398_v26 = vld [vmem:[#allocation20 + $0x1340] ss:$28 sps:$4 sm:$0xff]  }
 0x9df   :  { %17737 = vmatpush1.bf16.msra.mxu1 %v20347_v30  ;;  %17263 = vmatprep.subr.bf16.mxu0 %v20348_v56  ;;  %v20402_v30 = vld [vmem:[#allocation20 + $0x137c] ss:$28 sps:$4 sm:$0xff]   ;;  %v20405_v56 = vld [vmem:[#allocation20 + $0x118c] ss:$28 sps:$4 sm:$0xff]  }
 0x9e0   :  { %17739 = vmatprep.subr.bf16.mxu1 %v20351_v19  ;;  %v20407_v19 = vld [vmem:[#allocation20 + $0x1188] ss:$28 sps:$4 sm:$0xff]  }
 0x9e1   :  { %13332 = vmatmul.mubr.f32.vlgmr.msra.gmra.mrb[28].mxu0 %v22050_v62 }
 0x9e2   :  { %17265 = vmatpush1.bf16.msra.mxu0 %v20350_v53  ;;  %13402 = vmatprep.mubr.f32.mxu0 %v22053_v1  ;;  %v20408_v53 = vld [vmem:[#allocation20 + $0x13b4] ss:$28 sps:$4 sm:$0xff]  }
 0x9e3   :  { %17741 = vmatpush1.bf16.msra.mxu1 %v20353_v12  ;;  %17267 = vmatprep.subr.bf16.mxu0 %v20354_v44  ;;  %v20411_v12 = vld [vmem:[#allocation20 + $0x11c4] ss:$28 sps:$4 sm:$0xff]   ;;  %v20410_v44 = vld [vmem:[#allocation20 + $0x13b0] ss:$28 sps:$4 sm:$0xff]  }
 0x9e4   :  { %17743 = vmatprep.subr.bf16.mxu1 %v20357_v2  ;;  %v20413_v2 = vld [vmem:[#allocation20 + $0x11c0] ss:$28 sps:$4 sm:$0xff]  }
 0x9e6   :  { %17269 = vmatpush1.bf16.msra.mxu0 %v20356_v9  ;;  %v20414_v9 = vld [vmem:[#allocation20 + $0x13ec] ss:$28 sps:$4 sm:$0xff]  }
 0x9e7   :  { %17745 = vmatpush1.bf16.msra.mxu1 %v20359_v11  ;;  %17271 = vmatprep.subr.bf16.mxu0 %v20360_v23  ;;  %v20417_v11 = vld [vmem:[#allocation20 + $0x11fc] ss:$28 sps:$4 sm:$0xff]   ;;  %v20416_v23 = vld [vmem:[#allocation20 + $0x13e8] ss:$28 sps:$4 sm:$0xff]  }
 0x9e8   :  { %17747 = vmatprep.subr.bf16.mxu1 %v20363_v13  ;;  %v20419_v13 = vld [vmem:[#allocation20 + $0x11f8] ss:$28 sps:$4 sm:$0xff]  }
 0x9ea   :  { %17273 = vmatpush1.bf16.msra.mxu0 %v20362_v14  ;;  %v20420_v14 = vld [vmem:[#allocation20 + $0x1424] ss:$28 sps:$4 sm:$0xff]  }
 0x9eb   :  { %17749 = vmatpush1.bf16.msra.mxu1 %v20365_v8  ;;  %17275 = vmatprep.subr.bf16.mxu0 %v20366_v16  ;;  %v20423_v8 = vld [vmem:[#allocation20 + $0x1234] ss:$28 sps:$4 sm:$0xff]   ;;  %v20422_v16 = vld [vmem:[#allocation20 + $0x1420] ss:$28 sps:$4 sm:$0xff]  }
 0x9ec   :  { %17751 = vmatprep.subr.bf16.mxu1 %v20369_v20  ;;  %v20425_v20 = vld [vmem:[#allocation20 + $0x1230] ss:$28 sps:$4 sm:$0xff]  }
 0x9ee   :  { %17277 = vmatpush1.bf16.msra.mxu0 %v20368_v27  ;;  %v20426_v27 = vld [vmem:[#allocation20 + $0x145c] ss:$28 sps:$4 sm:$0xff]  }
 0x9ef   :  { %17753 = vmatpush1.bf16.msra.mxu1 %v20371_v32  ;;  %17279 = vmatprep.subr.bf16.mxu0 %v20372_v33  ;;  %v20429_v32 = vld [vmem:[#allocation20 + $0x126c] ss:$28 sps:$4 sm:$0xff]   ;;  %v20428_v33 = vld [vmem:[#allocation20 + $0x1458] ss:$28 sps:$4 sm:$0xff]  }
 0x9f0   :  { %17755 = vmatprep.subr.bf16.mxu1 %v20375_v51  ;;  %v20431_v51 = vld [vmem:[#allocation20 + $0x1268] ss:$28 sps:$4 sm:$0xff]  }
 0x9f2   :  { %17281 = vmatpush1.bf16.msra.mxu0 %v20374_v40  ;;  %v20432_v40 = vld [vmem:[#allocation20 + $0x1494] ss:$28 sps:$4 sm:$0xff]  }
 0x9f3   :  { %17757 = vmatpush1.bf16.msra.mxu1 %v20377_v48  ;;  %17283 = vmatprep.subr.bf16.mxu0 %v20378_v25  ;;  %v20435_v48 = vld [vmem:[#allocation20 + $0x12a4] ss:$28 sps:$4 sm:$0xff]   ;;  %v20434_v25 = vld [vmem:[#allocation20 + $0x1490] ss:$28 sps:$4 sm:$0xff]  }
 0x9f4   :  { %17759 = vmatprep.subr.bf16.mxu1 %v20381_v28  ;;  %v20437_v28 = vld [vmem:[#allocation20 + $0x12a0] ss:$28 sps:$4 sm:$0xff]  }
 0x9f6   :  { %17285 = vmatpush1.bf16.msra.mxu0 %v20380_v38  ;;  %v20438_v38 = vld [vmem:[#allocation20 + $0x14cc] ss:$28 sps:$4 sm:$0xff]  }
 0x9f7   :  { %17761 = vmatpush1.bf16.msra.mxu1 %v20383_v34  ;;  %17287 = vmatprep.subr.bf16.mxu0 %v20384_v63  ;;  %v20441_v34 = vld [vmem:[#allocation20 + $0x12dc] ss:$28 sps:$4 sm:$0xff]   ;;  %v20440_v63 = vld [vmem:[#allocation20 + $0x14c8] ss:$28 sps:$4 sm:$0xff]  }
 0x9f8   :  { %17763 = vmatprep.subr.bf16.mxu1 %v20387_v35  ;;  %v3661_v35 = vrot.slane %v22026_v54, %v21794_v15 }
 0x9fa   :  { %17289 = vmatpush1.bf16.msra.mxu0 %v20386_v43  ;;  %v20443_v43 = vld [vmem:[#allocation20 + $0x12d8] ss:$28 sps:$4 sm:$0xff]  }
 0x9fb   :  { %17765 = vmatpush1.bf16.msra.mxu1 %v20389_v36  ;;  %17291 = vmatprep.subr.bf16.mxu0 %v20390_v39  ;;  %v20444_v36 = vld [vmem:[#allocation20 + $0x1504] ss:$28 sps:$4 sm:$0xff]   ;;  %v3673_v39 = vrot.slane %v22026_v54, %v21849_v46 }
 0x9fc   :  { %17767 = vmatprep.subr.bf16.mxu1 %v20393_v18  ;;  %v20447_v18 = vld [vmem:[#allocation20 + $0x1314] ss:$28 sps:$4 sm:$0xff]  }
 0x9fe   :  { %17293 = vmatpush1.bf16.msra.mxu0 %v20392_v47  ;;  %v20446_v47 = vld [vmem:[#allocation20 + $0x1500] ss:$28 sps:$4 sm:$0xff]  }
 0x9ff   :  { %17769 = vmatpush1.bf16.msra.mxu1 %v20395_v5  ;;  %17295 = vmatprep.subr.bf16.mxu0 %v20396_v37  ;;  %v22064_v5 = vadd.f32 %v21967_v0, %v3661_v35  ;;  %v20449_v37 = vld [vmem:[#allocation20 + $0x1310] ss:$28 sps:$4 sm:$0xff]  }
 0xa00   :  { %17771 = vmatprep.subr.bf16.mxu1 %v20399_v41  ;;  %v20450_v41 = vld [vmem:[#allocation20 + $0x153c] ss:$28 sps:$4 sm:$0xff]   ;;  %v20456_v0 = vld [vmem:[#allocation20 + $0x1574] ss:$28 sps:$4 sm:$0xff]  }
 0xa01   :  { %v20497_v35 = vld [vmem:[#allocation20 + $0x14d0] ss:$28 sps:$4 sm:$0xff]  }
 0xa02   :  { %17297 = vmatpush1.bf16.msra.mxu0 %v20398_v26  ;;  %v22067_v26 = vadd.f32 %v22022_v29, %v3673_v39  ;;  %v20461_v29 = vld [vmem:[#allocation20 + $0x1380] ss:$28 sps:$4 sm:$0xff]   ;;  %v20500_v39 = vld [vmem:[#allocation20 + $0x16f8] ss:$28 sps:$4 sm:$0xff]  }
 0xa03   :  { %17773 = vmatpush1.bf16.msra.mxu1 %v20401_v45  ;;  %17299 = vmatprep.subr.bf16.mxu0 %v20402_v30  ;;  %v20453_v45 = vld [vmem:[#allocation20 + $0x134c] ss:$28 sps:$4 sm:$0xff]   ;;  %v20452_v30 = vld [vmem:[#allocation20 + $0x1538] ss:$28 sps:$4 sm:$0xff]  }
 0xa04   :  { %17775 = vmatprep.subr.bf16.mxu1 %v20405_v56  ;;  %v20455_v56 = vld [vmem:[#allocation20 + $0x1348] ss:$28 sps:$4 sm:$0xff]  }
 0xa06   :  { %17301 = vmatpush1.bf16.msra.mxu0 %v20404_v49  ;;  %13900 = vmatmul.mubr.f32.vlgmr.msra.gmra.mrb[36].mxu1 %v22050_v62  ;;  %v20459_v49 = vld [vmem:[#allocation20 + $0x1384] ss:$28 sps:$4 sm:$0xff]  }
 0xa07   :  { %17777 = vmatpush1.bf16.msra.mxu1 %v20407_v19  ;;  %13970 = vmatprep.mubr.f32.mxu1 %v22053_v1  ;;  %v20458_v19 = vld [vmem:[#allocation20 + $0x1570] ss:$28 sps:$4 sm:$0xff]  }
 0xa08   :  { %17303 = vmatprep.subr.bf16.mxu0 %v20408_v53  ;;  %17779 = vmatprep.subr.bf16.mxu1 %v20411_v12  ;;  %v20462_v53 = vld [vmem:[#allocation20 + $0x15ac] ss:$28 sps:$4 sm:$0xff]   ;;  %v20465_v12 = vld [vmem:[#allocation20 + $0x13bc] ss:$28 sps:$4 sm:$0xff]  }
 0xa0a   :  { %17305 = vmatpush1.bf16.msra.mxu0 %v20410_v44  ;;  %v20464_v44 = vld [vmem:[#allocation20 + $0x15a8] ss:$28 sps:$4 sm:$0xff]  }
 0xa0b   :  { %17781 = vmatpush1.bf16.msra.mxu1 %v20413_v2  ;;  %17307 = vmatprep.subr.bf16.mxu0 %v20414_v9  ;;  %v20467_v2 = vld [vmem:[#allocation20 + $0x13b8] ss:$28 sps:$4 sm:$0xff]   ;;  %v20468_v9 = vld [vmem:[#allocation20 + $0x15e4] ss:$28 sps:$4 sm:$0xff]  }
 0xa0c   :  { %17783 = vmatprep.subr.bf16.mxu1 %v20417_v11  ;;  %v20471_v11 = vld [vmem:[#allocation20 + $0x13f4] ss:$28 sps:$4 sm:$0xff]  }
 0xa0e   :  { %17309 = vmatpush1.bf16.msra.mxu0 %v20416_v23  ;;  %v20470_v23 = vld [vmem:[#allocation20 + $0x15e0] ss:$28 sps:$4 sm:$0xff]  }
 0xa0f   :  { %17785 = vmatpush1.bf16.msra.mxu1 %v20419_v13  ;;  %17311 = vmatprep.subr.bf16.mxu0 %v20420_v14  ;;  %v20473_v13 = vld [vmem:[#allocation20 + $0x13f0] ss:$28 sps:$4 sm:$0xff]   ;;  %v20474_v14 = vld [vmem:[#allocation20 + $0x161c] ss:$28 sps:$4 sm:$0xff]  }
 0xa10   :  { %17787 = vmatprep.subr.bf16.mxu1 %v20423_v8  ;;  %v20477_v8 = vld [vmem:[#allocation20 + $0x142c] ss:$28 sps:$4 sm:$0xff]  }
 0xa12   :  { %17313 = vmatpush1.bf16.msra.mxu0 %v20422_v16  ;;  %v20476_v16 = vld [vmem:[#allocation20 + $0x1618] ss:$28 sps:$4 sm:$0xff]  }
 0xa13   :  { %17789 = vmatpush1.bf16.msra.mxu1 %v20425_v20  ;;  %17315 = vmatprep.subr.bf16.mxu0 %v20426_v27  ;;  %v20479_v20 = vld [vmem:[#allocation20 + $0x1428] ss:$28 sps:$4 sm:$0xff]   ;;  %v20480_v27 = vld [vmem:[#allocation20 + $0x1654] ss:$28 sps:$4 sm:$0xff]  }
 0xa14   :  { %17791 = vmatprep.subr.bf16.mxu1 %v20429_v32  ;;  %v20483_v32 = vld [vmem:[#allocation20 + $0x1464] ss:$28 sps:$4 sm:$0xff]  }
 0xa16   :  { %17317 = vmatpush1.bf16.msra.mxu0 %v20428_v33  ;;  %v20482_v33 = vld [vmem:[#allocation20 + $0x1650] ss:$28 sps:$4 sm:$0xff]  }
 0xa17   :  { %17793 = vmatpush1.bf16.msra.mxu1 %v20431_v51  ;;  %17319 = vmatprep.subr.bf16.mxu0 %v20432_v40  ;;  %v20485_v51 = vld [vmem:[#allocation20 + $0x1460] ss:$28 sps:$4 sm:$0xff]   ;;  %v20486_v40 = vld [vmem:[#allocation20 + $0x168c] ss:$28 sps:$4 sm:$0xff]  }
 0xa18   :  { %17795 = vmatprep.subr.bf16.mxu1 %v20435_v48  ;;  %v20489_v48 = vld [vmem:[#allocation20 + $0x149c] ss:$28 sps:$4 sm:$0xff]  }
 0xa1a   :  { %17321 = vmatpush1.bf16.msra.mxu0 %v20434_v25  ;;  %v20488_v25 = vld [vmem:[#allocation20 + $0x1688] ss:$28 sps:$4 sm:$0xff]  }
 0xa1b   :  { %17797 = vmatpush1.bf16.msra.mxu1 %v20437_v28  ;;  %17323 = vmatprep.subr.bf16.mxu0 %v20438_v38  ;;  %v20491_v28 = vld [vmem:[#allocation20 + $0x1498] ss:$28 sps:$4 sm:$0xff]   ;;  %v20492_v38 = vld [vmem:[#allocation20 + $0x16c4] ss:$28 sps:$4 sm:$0xff]  }
 0xa1c   :  { %17799 = vmatprep.subr.bf16.mxu1 %v20441_v34  ;;  %v20495_v34 = vld [vmem:[#allocation20 + $0x14d4] ss:$28 sps:$4 sm:$0xff]  }
 0xa1e   :  { %17325 = vmatpush1.bf16.msra.mxu0 %v20440_v63  ;;  %v20494_v63 = vld [vmem:[#allocation20 + $0x16c0] ss:$28 sps:$4 sm:$0xff]  }
 0xa1f   :  { %17801 = vmatpush1.bf16.msra.mxu1 %v20443_v43  ;;  %17327 = vmatprep.subr.bf16.mxu0 %v20444_v36  ;;  %v20498_v43 = vld [vmem:[#allocation20 + $0x16fc] ss:$28 sps:$4 sm:$0xff]   ;;  %v20501_v36 = vld [vmem:[#allocation20 + $0x150c] ss:$28 sps:$4 sm:$0xff]  }
 0xa20   :  { %17803 = vmatprep.subr.bf16.mxu1 %v20447_v18  ;;  %v20503_v18 = vld [vmem:[#allocation20 + $0x1508] ss:$28 sps:$4 sm:$0xff]  }
 0xa21   :  { %13403 = vmatmul.mubr.f32.vlgmr.msra.gmra.mrb[28].mxu0 %v22064_v5 }
 0xa22   :  { %17329 = vmatpush1.bf16.msra.mxu0 %v20446_v47  ;;  %13473 = vmatprep.mubr.f32.mxu0 %v22067_v26  ;;  %v20504_v47 = vld [vmem:[#allocation20 + $0x1734] ss:$28 sps:$4 sm:$0xff]  }
 0xa23   :  { %17805 = vmatpush1.bf16.msra.mxu1 %v20449_v37  ;;  %17331 = vmatprep.subr.bf16.mxu0 %v20450_v41  ;;  %v20507_v37 = vld [vmem:[#allocation20 + $0x1544] ss:$28 sps:$4 sm:$0xff]   ;;  %v20506_v41 = vld [vmem:[#allocation20 + $0x1730] ss:$28 sps:$4 sm:$0xff]  }
 0xa24   :  { %17807 = vmatprep.subr.bf16.mxu1 %v20453_v45  ;;  %v20509_v45 = vld [vmem:[#allocation20 + $0x1540] ss:$28 sps:$4 sm:$0xff]  }
 0xa26   :  { %17333 = vmatpush1.bf16.msra.mxu0 %v20452_v30  ;;  %v20510_v30 = vld [vmem:[#allocation20 + $0x176c] ss:$28 sps:$4 sm:$0xff]  }
 0xa27   :  { %17809 = vmatpush1.bf16.msra.mxu1 %v20455_v56  ;;  %17335 = vmatprep.subr.bf16.mxu0 %v20456_v0  ;;  %v20513_v56 = vld [vmem:[#allocation20 + $0x157c] ss:$28 sps:$4 sm:$0xff]   ;;  %v20512_v0 = vld [vmem:[#allocation20 + $0x1768] ss:$28 sps:$4 sm:$0xff]  }
 0xa28   :  { %17811 = vmatprep.subr.bf16.mxu1 %v20459_v49  ;;  %v20515_v49 = vld [vmem:[#allocation20 + $0x1578] ss:$28 sps:$4 sm:$0xff]  }
 0xa2a   :  { %17337 = vmatpush1.bf16.msra.mxu0 %v20458_v19  ;;  %v20516_v19 = vld [vmem:[#allocation20 + $0x17a4] ss:$28 sps:$4 sm:$0xff]  }
 0xa2b   :  { %17813 = vmatpush1.bf16.msra.mxu1 %v20461_v29  ;;  %17339 = vmatprep.subr.bf16.mxu0 %v20462_v53  ;;  %v20519_v29 = vld [vmem:[#allocation20 + $0x15b4] ss:$28 sps:$4 sm:$0xff]   ;;  %v20518_v53 = vld [vmem:[#allocation20 + $0x17a0] ss:$28 sps:$4 sm:$0xff]  }
 0xa2c   :  { %17815 = vmatprep.subr.bf16.mxu1 %v20465_v12  ;;  %v20521_v12 = vld [vmem:[#allocation20 + $0x15b0] ss:$28 sps:$4 sm:$0xff]  }
 0xa2e   :  { %17341 = vmatpush1.bf16.msra.mxu0 %v20464_v44  ;;  %v20522_v44 = vld [vmem:[#allocation20 + $0x17dc] ss:$28 sps:$4 sm:$0xff]  }
 0xa2f   :  { %17817 = vmatpush1.bf16.msra.mxu1 %v20467_v2  ;;  %17343 = vmatprep.subr.bf16.mxu0 %v20468_v9  ;;  %v20525_v2 = vld [vmem:[#allocation20 + $0x15ec] ss:$28 sps:$4 sm:$0xff]   ;;  %v20524_v9 = vld [vmem:[#allocation20 + $0x17d8] ss:$28 sps:$4 sm:$0xff]  }
 0xa30   :  { %17819 = vmatprep.subr.bf16.mxu1 %v20471_v11  ;;  %v20527_v11 = vld [vmem:[#allocation20 + $0x15e8] ss:$28 sps:$4 sm:$0xff]  }
 0xa32   :  { %17345 = vmatpush1.bf16.msra.mxu0 %v20470_v23  ;;  %v20528_v23 = vld [vmem:[#allocation20 + $0x1814] ss:$28 sps:$4 sm:$0xff]  }
 0xa33   :  { %17821 = vmatpush1.bf16.msra.mxu1 %v20473_v13  ;;  %17347 = vmatprep.subr.bf16.mxu0 %v20474_v14  ;;  %v20531_v13 = vld [vmem:[#allocation20 + $0x1624] ss:$28 sps:$4 sm:$0xff]   ;;  %v20530_v14 = vld [vmem:[#allocation20 + $0x1810] ss:$28 sps:$4 sm:$0xff]  }
 0xa34   :  { %17823 = vmatprep.subr.bf16.mxu1 %v20477_v8  ;;  %v20533_v8 = vld [vmem:[#allocation20 + $0x1620] ss:$28 sps:$4 sm:$0xff]  }
 0xa36   :  { %17349 = vmatpush1.bf16.msra.mxu0 %v20476_v16  ;;  %v20534_v16 = vld [vmem:[#allocation20 + $0x184c] ss:$28 sps:$4 sm:$0xff]  }
 0xa37   :  { %17825 = vmatpush1.bf16.msra.mxu1 %v20479_v20  ;;  %17351 = vmatprep.subr.bf16.mxu0 %v20480_v27  ;;  %v20537_v20 = vld [vmem:[#allocation20 + $0x165c] ss:$28 sps:$4 sm:$0xff]   ;;  %v20536_v27 = vld [vmem:[#allocation20 + $0x1848] ss:$28 sps:$4 sm:$0xff]  }
 0xa38   :  { %17827 = vmatprep.subr.bf16.mxu1 %v20483_v32  ;;  %v3669_v32 = vrot.slane %v22026_v54, %v21874_v10 }
 0xa3a   :  { %17353 = vmatpush1.bf16.msra.mxu0 %v20482_v33  ;;  %v20539_v33 = vld [vmem:[#allocation20 + $0x1658] ss:$28 sps:$4 sm:$0xff]  }
 0xa3b   :  { %17829 = vmatpush1.bf16.msra.mxu1 %v20485_v51  ;;  %17355 = vmatprep.subr.bf16.mxu0 %v20486_v40  ;;  %v20540_v51 = vld [vmem:[#allocation20 + $0x1884] ss:$28 sps:$4 sm:$0xff]   ;;  %v3681_v40 = vrot.slane %v22026_v54, %v21887_v55  ;;  %v20548_v55 = vld [vmem:[#allocation20 + $0x18b8] ss:$28 sps:$4 sm:$0xff]  }
 0xa3c   :  { %17831 = vmatprep.subr.bf16.mxu1 %v20489_v48  ;;  %v20543_v48 = vld [vmem:[#allocation20 + $0x1694] ss:$28 sps:$4 sm:$0xff]   ;;  %v20551_v54 = vld [vmem:[#allocation20 + $0x16c8] ss:$28 sps:$4 sm:$0xff]  }
 0xa3e   :  { %17357 = vmatpush1.bf16.msra.mxu0 %v20488_v25  ;;  %v20542_v25 = vld [vmem:[#allocation20 + $0x1880] ss:$28 sps:$4 sm:$0xff]  }
 0xa3f   :  { %17833 = vmatpush1.bf16.msra.mxu1 %v20491_v28  ;;  %17359 = vmatprep.subr.bf16.mxu0 %v20492_v38  ;;  %v22078_v28 = vadd.f32 %v22020_v59, %v3669_v32  ;;  %v20545_v38 = vld [vmem:[#allocation20 + $0x1690] ss:$28 sps:$4 sm:$0xff]  }
 0xa40   :  { %17835 = vmatprep.subr.bf16.mxu1 %v20495_v34  ;;  %v20546_v34 = vld [vmem:[#allocation20 + $0x18bc] ss:$28 sps:$4 sm:$0xff]   ;;  %v20552_v59 = vld [vmem:[#allocation20 + $0x18f4] ss:$28 sps:$4 sm:$0xff]   ;;  %v20597_v32 = vld [vmem:[#allocation20 + $0x188c] ss:$28 sps:$4 sm:$0xff]  }
 0xa42   :  { %17361 = vmatpush1.bf16.msra.mxu0 %v20494_v63  ;;  %v22081_v63 = vadd.f32 %v22030_v60, %v3681_v40  ;;  %v20557_v60 = vld [vmem:[#allocation20 + $0x1700] ss:$28 sps:$4 sm:$0xff]   ;;  %v20600_v40 = vld [vmem:[#allocation20 + $0x1ab4] ss:$28 sps:$4 sm:$0xff]  }
 0xa43   :  { %17837 = vmatpush1.bf16.msra.mxu1 %v20497_v35  ;;  %17363 = vmatprep.subr.bf16.mxu0 %v20498_v43  ;;  %v20549_v35 = vld [vmem:[#allocation20 + $0x16cc] ss:$28 sps:$4 sm:$0xff]   ;;  %v20555_v43 = vld [vmem:[#allocation20 + $0x1704] ss:$28 sps:$4 sm:$0xff]  }
 0xa44   :  { %17839 = vmatprep.subr.bf16.mxu1 %v20501_v36  ;;  %v20554_v36 = vld [vmem:[#allocation20 + $0x18f0] ss:$28 sps:$4 sm:$0xff]  }
 0xa46   :  { %17365 = vmatpush1.bf16.msra.mxu0 %v20500_v39  ;;  %13971 = vmatmul.mubr.f32.vlgmr.msra.gmra.mrb[36].mxu1 %v22064_v5  ;;  %v20558_v39 = vld [vmem:[#allocation20 + $0x192c] ss:$28 sps:$4 sm:$0xff]  }
 0xa47   :  { %17841 = vmatpush1.bf16.msra.mxu1 %v20503_v18  ;;  %14041 = vmatprep.mubr.f32.mxu1 %v22067_v26  ;;  %v20561_v18 = vld [vmem:[#allocation20 + $0x173c] ss:$28 sps:$4 sm:$0xff]  }
 0xa48   :  { %17367 = vmatprep.subr.bf16.mxu0 %v20504_v47  ;;  %17843 = vmatprep.subr.bf16.mxu1 %v20507_v37  ;;  %v20560_v47 = vld [vmem:[#allocation20 + $0x1928] ss:$28 sps:$4 sm:$0xff]   ;;  %v20563_v37 = vld [vmem:[#allocation20 + $0x1738] ss:$28 sps:$4 sm:$0xff]  }
 0xa4a   :  { %17369 = vmatpush1.bf16.msra.mxu0 %v20506_v41  ;;  %v20564_v41 = vld [vmem:[#allocation20 + $0x1964] ss:$28 sps:$4 sm:$0xff]  }
 0xa4b   :  { %17845 = vmatpush1.bf16.msra.mxu1 %v20509_v45  ;;  %17371 = vmatprep.subr.bf16.mxu0 %v20510_v30  ;;  %v20567_v45 = vld [vmem:[#allocation20 + $0x1774] ss:$28 sps:$4 sm:$0xff]   ;;  %v20566_v30 = vld [vmem:[#allocation20 + $0x1960] ss:$28 sps:$4 sm:$0xff]  }
 0xa4c   :  { %17847 = vmatprep.subr.bf16.mxu1 %v20513_v56  ;;  %v20569_v56 = vld [vmem:[#allocation20 + $0x1770] ss:$28 sps:$4 sm:$0xff]  }
 0xa4e   :  { %17373 = vmatpush1.bf16.msra.mxu0 %v20512_v0  ;;  %v20570_v0 = vld [vmem:[#allocation20 + $0x199c] ss:$28 sps:$4 sm:$0xff]  }
 0xa4f   :  { %17849 = vmatpush1.bf16.msra.mxu1 %v20515_v49  ;;  %17375 = vmatprep.subr.bf16.mxu0 %v20516_v19  ;;  %v20573_v49 = vld [vmem:[#allocation20 + $0x17ac] ss:$28 sps:$4 sm:$0xff]   ;;  %v20572_v19 = vld [vmem:[#allocation20 + $0x1998] ss:$28 sps:$4 sm:$0xff]  }
 0xa50   :  { %17851 = vmatprep.subr.bf16.mxu1 %v20519_v29  ;;  %v20575_v29 = vld [vmem:[#allocation20 + $0x17a8] ss:$28 sps:$4 sm:$0xff]  }
 0xa52   :  { %17377 = vmatpush1.bf16.msra.mxu0 %v20518_v53  ;;  %v20576_v53 = vld [vmem:[#allocation20 + $0x19d4] ss:$28 sps:$4 sm:$0xff]  }
 0xa53   :  { %17853 = vmatpush1.bf16.msra.mxu1 %v20521_v12  ;;  %17379 = vmatprep.subr.bf16.mxu0 %v20522_v44  ;;  %v20579_v12 = vld [vmem:[#allocation20 + $0x17e4] ss:$28 sps:$4 sm:$0xff]   ;;  %v20578_v44 = vld [vmem:[#allocation20 + $0x19d0] ss:$28 sps:$4 sm:$0xff]  }
 0xa54   :  { %17855 = vmatprep.subr.bf16.mxu1 %v20525_v2  ;;  %v20581_v2 = vld [vmem:[#allocation20 + $0x17e0] ss:$28 sps:$4 sm:$0xff]  }
 0xa56   :  { %17381 = vmatpush1.bf16.msra.mxu0 %v20524_v9  ;;  %v20582_v9 = vld [vmem:[#allocation20 + $0x1a0c] ss:$28 sps:$4 sm:$0xff]  }
 0xa57   :  { %17857 = vmatpush1.bf16.msra.mxu1 %v20527_v11  ;;  %17383 = vmatprep.subr.bf16.mxu0 %v20528_v23  ;;  %v20585_v11 = vld [vmem:[#allocation20 + $0x181c] ss:$28 sps:$4 sm:$0xff]   ;;  %v20584_v23 = vld [vmem:[#allocation20 + $0x1a08] ss:$28 sps:$4 sm:$0xff]  }
 0xa58   :  { %17859 = vmatprep.subr.bf16.mxu1 %v20531_v13  ;;  %v20587_v13 = vld [vmem:[#allocation20 + $0x1818] ss:$28 sps:$4 sm:$0xff]  }
 0xa5a   :  { %17385 = vmatpush1.bf16.msra.mxu0 %v20530_v14  ;;  %v20588_v14 = vld [vmem:[#allocation20 + $0x1a44] ss:$28 sps:$4 sm:$0xff]  }
 0xa5b   :  { %17861 = vmatpush1.bf16.msra.mxu1 %v20533_v8  ;;  %17387 = vmatprep.subr.bf16.mxu0 %v20534_v16  ;;  %v20591_v8 = vld [vmem:[#allocation20 + $0x1854] ss:$28 sps:$4 sm:$0xff]   ;;  %v20590_v16 = vld [vmem:[#allocation20 + $0x1a40] ss:$28 sps:$4 sm:$0xff]  }
 0xa5c   :  { %17863 = vmatprep.subr.bf16.mxu1 %v20537_v20  ;;  %v20593_v20 = vld [vmem:[#allocation20 + $0x1850] ss:$28 sps:$4 sm:$0xff]  }
 0xa5e   :  { %17389 = vmatpush1.bf16.msra.mxu0 %v20536_v27  ;;  %v20594_v27 = vld [vmem:[#allocation20 + $0x1a7c] ss:$28 sps:$4 sm:$0xff]  }
 0xa5f   :  { %17865 = vmatpush1.bf16.msra.mxu1 %v20539_v33  ;;  %17391 = vmatprep.subr.bf16.mxu0 %v20540_v51  ;;  %v20596_v33 = vld [vmem:[#allocation20 + $0x1a78] ss:$28 sps:$4 sm:$0xff]   ;;  %v20599_v51 = vld [vmem:[#allocation20 + $0x1888] ss:$28 sps:$4 sm:$0xff]  }
 0xa60   :  { %17867 = vmatprep.subr.bf16.mxu1 %v20543_v48  ;;  %v20603_v48 = vld [vmem:[#allocation20 + $0x18c4] ss:$28 sps:$4 sm:$0xff]  }
 0xa61   :  { %13474 = vmatmul.mubr.f32.vlgmr.msra.gmra.mrb[28].mxu0 %v22078_v28 }
 0xa62   :  { %17393 = vmatpush1.bf16.msra.mxu0 %v20542_v25  ;;  %13544 = vmatprep.mubr.f32.mxu0 %v22081_v63  ;;  %v20602_v25 = vld [vmem:[#allocation20 + $0x1ab0] ss:$28 sps:$4 sm:$0xff]  }
 0xa63   :  { %17869 = vmatpush1.bf16.msra.mxu1 %v20545_v38  ;;  %17395 = vmatprep.subr.bf16.mxu0 %v20546_v34  ;;  %v20605_v38 = vld [vmem:[#allocation20 + $0x18c0] ss:$28 sps:$4 sm:$0xff]   ;;  %v20606_v34 = vld [vmem:[#allocation20 + $0x1aec] ss:$28 sps:$4 sm:$0xff]  }
 0xa64   :  { %17871 = vmatprep.subr.bf16.mxu1 %v20549_v35  ;;  %v20609_v35 = vld [vmem:[#allocation20 + $0x18fc] ss:$28 sps:$4 sm:$0xff]  }
 0xa66   :  { %17397 = vmatpush1.bf16.msra.mxu0 %v20548_v55  ;;  %v20608_v55 = vld [vmem:[#allocation20 + $0x1ae8] ss:$28 sps:$4 sm:$0xff]  }
 0xa67   :  { %17873 = vmatpush1.bf16.msra.mxu1 %v20551_v54  ;;  %17399 = vmatprep.subr.bf16.mxu0 %v20552_v59  ;;  %v20611_v54 = vld [vmem:[#allocation20 + $0x18f8] ss:$28 sps:$4 sm:$0xff]   ;;  %v20612_v59 = vld [vmem:[#allocation20 + $0x1b24] ss:$28 sps:$4 sm:$0xff]  }
 0xa68   :  { %17875 = vmatprep.subr.bf16.mxu1 %v20555_v43  ;;  %v20615_v43 = vld [vmem:[#allocation20 + $0x1934] ss:$28 sps:$4 sm:$0xff]  }
 0xa6a   :  { %17401 = vmatpush1.bf16.msra.mxu0 %v20554_v36  ;;  %v20614_v36 = vld [vmem:[#allocation20 + $0x1b20] ss:$28 sps:$4 sm:$0xff]  }
 0xa6b   :  { %17877 = vmatpush1.bf16.msra.mxu1 %v20557_v60  ;;  %17403 = vmatprep.subr.bf16.mxu0 %v20558_v39  ;;  %v20617_v60 = vld [vmem:[#allocation20 + $0x1930] ss:$28 sps:$4 sm:$0xff]   ;;  %v20618_v39 = vld [vmem:[#allocation20 + $0x1b5c] ss:$28 sps:$4 sm:$0xff]  }
 0xa6c   :  { %17879 = vmatprep.subr.bf16.mxu1 %v20561_v18  ;;  %v20621_v18 = vld [vmem:[#allocation20 + $0x196c] ss:$28 sps:$4 sm:$0xff]  }
 0xa6e   :  { %17405 = vmatpush1.bf16.msra.mxu0 %v20560_v47  ;;  %v20620_v47 = vld [vmem:[#allocation20 + $0x1b58] ss:$28 sps:$4 sm:$0xff]  }
 0xa6f   :  { %17881 = vmatpush1.bf16.msra.mxu1 %v20563_v37  ;;  %17407 = vmatprep.subr.bf16.mxu0 %v20564_v41  ;;  %v20623_v37 = vld [vmem:[#allocation20 + $0x1968] ss:$28 sps:$4 sm:$0xff]   ;;  %v20624_v41 = vld [vmem:[#allocation20 + $0x1b94] ss:$28 sps:$4 sm:$0xff]  }
 0xa70   :  { %17883 = vmatprep.subr.bf16.mxu1 %v20567_v45  ;;  %v20627_v45 = vld [vmem:[#allocation20 + $0x19a4] ss:$28 sps:$4 sm:$0xff]  }
 0xa72   :  { %17409 = vmatpush1.bf16.msra.mxu0 %v20566_v30  ;;  %v20626_v30 = vld [vmem:[#allocation20 + $0x1b90] ss:$28 sps:$4 sm:$0xff]  }
 0xa73   :  { %17885 = vmatpush1.bf16.msra.mxu1 %v20569_v56  ;;  %17411 = vmatprep.subr.bf16.mxu0 %v20570_v0  ;;  %v20629_v56 = vld [vmem:[#allocation20 + $0x19a0] ss:$28 sps:$4 sm:$0xff]   ;;  %v20630_v0 = vld [vmem:[#allocation20 + $0x1bcc] ss:$28 sps:$4 sm:$0xff]  }
 0xa74   :  { %17887 = vmatprep.subr.bf16.mxu1 %v20573_v49  ;;  %v20633_v49 = vld [vmem:[#allocation20 + $0x19dc] ss:$28 sps:$4 sm:$0xff]  }
 0xa76   :  { %17413 = vmatpush1.bf16.msra.mxu0 %v20572_v19  ;;  %v20632_v19 = vld [vmem:[#allocation20 + $0x1bc8] ss:$28 sps:$4 sm:$0xff]  }
 0xa77   :  { %17889 = vmatpush1.bf16.msra.mxu1 %v20575_v29  ;;  %17415 = vmatprep.subr.bf16.mxu0 %v20576_v53  ;;  %v21177_v29 = vld [vmem:[#allocation19 + $0x8] sm:$0xff] }
 0xa78   :  { %17891 = vmatprep.subr.bf16.mxu1 %v20579_v12  ;;  %v3677_v53 = vrot.slane %v21177_v29, %v21884_v50  ;;  %v20635_v12 = vld [vmem:[#allocation20 + $0x19d8] ss:$28 sps:$4 sm:$0xff]  }
 0xa79   :  { %v20693_v29 = vld [vmem:[#allocation20 + $0x1d8] ss:$28 sps:$4 sm:$0xff]  }
 0xa7a   :  { %17417 = vmatpush1.bf16.msra.mxu0 %v20578_v44  ;;  %v20636_v44 = vld [vmem:[#allocation20 + $0x14] ss:$28 sps:$4 sm:$0xff]  }
 0xa7b   :  { %17893 = vmatpush1.bf16.msra.mxu1 %v20581_v2  ;;  %17419 = vmatprep.subr.bf16.mxu0 %v20582_v9  ;;  %v20639_v2 = vld [vmem:[#allocation20 + $0x1a14] ss:$28 sps:$4 sm:$0xff]  }
 0xa7c   :  { %17895 = vmatprep.subr.bf16.mxu1 %v20585_v11  ;;  %v20638_v9 = vld [vmem:[#allocation20 + $0x10] ss:$28 sps:$4 sm:$0xff]   ;;  %v22089_v11 = vadd.f32 %v22028_v58, %v3677_v53  ;;  %v20650_v58 = vld [vmem:[#allocation20 + $0x80] ss:$28 sps:$4 sm:$0xff]   ;;  %v20692_v53 = vld [vmem:[#allocation20 + $0x208] ss:$28 sps:$4 sm:$0xff]  }
 0xa7e   :  { %17421 = vmatpush1.bf16.msra.mxu0 %v20584_v23  ;;  %v20641_v23 = vld [vmem:[#allocation20 + $0x1a10] ss:$28 sps:$4 sm:$0xff]  }
 0xa7f   :  { %17897 = vmatpush1.bf16.msra.mxu1 %v20587_v13  ;;  %17423 = vmatprep.subr.bf16.mxu0 %v20588_v14  ;;  %v20642_v13 = vld [vmem:[#allocation20 + $0x4c] ss:$28 sps:$4 sm:$0xff]  }
 0xa80   :  { %17899 = vmatprep.subr.bf16.mxu1 %v20591_v8  ;;  %v20645_v14 = vld [vmem:[#allocation20 + $0x1a4c] ss:$28 sps:$4 sm:$0xff]  }
 0xa81   :  { %v20644_v8 = vld [vmem:[#allocation20 + $0x48] ss:$28 sps:$4 sm:$0xff]  }
 0xa82   :  { %17425 = vmatpush1.bf16.msra.mxu0 %v20590_v16  ;;  %v20647_v16 = vld [vmem:[#allocation20 + $0x1a48] ss:$28 sps:$4 sm:$0xff]  }
 0xa83   :  { %17901 = vmatpush1.bf16.msra.mxu1 %v20593_v20  ;;  %17427 = vmatprep.subr.bf16.mxu0 %v20594_v27  ;;  %v20648_v20 = vld [vmem:[#allocation20 + $0x84] ss:$28 sps:$4 sm:$0xff]  }
 0xa84   :  { %17903 = vmatprep.subr.bf16.mxu1 %v20597_v32  ;;  %v20651_v27 = vld [vmem:[#allocation20 + $0x1a84] ss:$28 sps:$4 sm:$0xff]  }
 0xa85   :  { %v20653_v32 = vld [vmem:[#allocation20 + $0x1a80] ss:$28 sps:$4 sm:$0xff]  }
 0xa86   :  { %17429 = vmatpush1.bf16.msra.mxu0 %v20596_v33  ;;  %14042 = vmatmul.mubr.f32.vlgmr.msra.gmra.mrb[36].mxu1 %v22078_v28  ;;  %v20654_v33 = vld [vmem:[#allocation20 + $0xbc] ss:$28 sps:$4 sm:$0xff]  }
 0xa87   :  { %17905 = vmatpush1.bf16.msra.mxu1 %v20599_v51  ;;  %14112 = vmatprep.mubr.f32.mxu1 %v22081_v63  ;;  %v20657_v51 = vld [vmem:[#allocation20 + $0x1abc] ss:$28 sps:$4 sm:$0xff]  }
 0xa88   :  { %17431 = vmatprep.subr.bf16.mxu0 %v20600_v40  ;;  %17907 = vmatprep.subr.bf16.mxu1 %v20603_v48  ;;  %v20656_v40 = vld [vmem:[#allocation20 + $0xb8] ss:$28 sps:$4 sm:$0xff]  }
 0xa89   :  { %v20659_v48 = vld [vmem:[#allocation20 + $0x1ab8] ss:$28 sps:$4 sm:$0xff]  }
 0xa8a   :  { %17433 = vmatpush1.bf16.msra.mxu0 %v20602_v25  ;;  %v20660_v25 = vld [vmem:[#allocation20 + $0xf4] ss:$28 sps:$4 sm:$0xff]  }
 0xa8b   :  { %17909 = vmatpush1.bf16.msra.mxu1 %v20605_v38  ;;  %17435 = vmatprep.subr.bf16.mxu0 %v20606_v34  ;;  %v20663_v38 = vld [vmem:[#allocation20 + $0x1af4] ss:$28 sps:$4 sm:$0xff]  }
 0xa8c   :  { %17911 = vmatprep.subr.bf16.mxu1 %v20609_v35  ;;  %v20662_v34 = vld [vmem:[#allocation20 + $0xf0] ss:$28 sps:$4 sm:$0xff]  }
 0xa8d   :  { %v20665_v35 = vld [vmem:[#allocation20 + $0x1af0] ss:$28 sps:$4 sm:$0xff]  }
 0xa8e   :  { %17437 = vmatpush1.bf16.msra.mxu0 %v20608_v55  ;;  %v20666_v55 = vld [vmem:[#allocation20 + $0x12c] ss:$28 sps:$4 sm:$0xff]  }
 0xa8f   :  { %17913 = vmatpush1.bf16.msra.mxu1 %v20611_v54  ;;  %17439 = vmatprep.subr.bf16.mxu0 %v20612_v59  ;;  %v20669_v54 = vld [vmem:[#allocation20 + $0x1b2c] ss:$28 sps:$4 sm:$0xff]  }
 0xa90   :  { %17915 = vmatprep.subr.bf16.mxu1 %v20615_v43  ;;  %v20668_v59 = vld [vmem:[#allocation20 + $0x128] ss:$28 sps:$4 sm:$0xff]  }
 0xa91   :  { %v20671_v43 = vld [vmem:[#allocation20 + $0x1b28] ss:$28 sps:$4 sm:$0xff]  }
 0xa92   :  { %17441 = vmatpush1.bf16.msra.mxu0 %v20614_v36  ;;  %v20672_v36 = vld [vmem:[#allocation20 + $0x164] ss:$28 sps:$4 sm:$0xff]  }
 0xa93   :  { %17917 = vmatpush1.bf16.msra.mxu1 %v20617_v60  ;;  %17443 = vmatprep.subr.bf16.mxu0 %v20618_v39  ;;  %v20675_v60 = vld [vmem:[#allocation20 + $0x1b64] ss:$28 sps:$4 sm:$0xff]  }
 0xa94   :  { %17919 = vmatprep.subr.bf16.mxu1 %v20621_v18  ;;  %v20674_v39 = vld [vmem:[#allocation20 + $0x160] ss:$28 sps:$4 sm:$0xff]  }
 0xa95   :  { %v20677_v18 = vld [vmem:[#allocation20 + $0x1b60] ss:$28 sps:$4 sm:$0xff]  }
 0xa96   :  { %17445 = vmatpush1.bf16.msra.mxu0 %v20620_v47  ;;  %v20678_v47 = vld [vmem:[#allocation20 + $0x19c] ss:$28 sps:$4 sm:$0xff]  }
 0xa97   :  { %17921 = vmatpush1.bf16.msra.mxu1 %v20623_v37  ;;  %17447 = vmatprep.subr.bf16.mxu0 %v20624_v41  ;;  %v20681_v37 = vld [vmem:[#allocation20 + $0x1b9c] ss:$28 sps:$4 sm:$0xff]  }
 0xa98   :  { %17923 = vmatprep.subr.bf16.mxu1 %v20627_v45  ;;  %v20680_v41 = vld [vmem:[#allocation20 + $0x198] ss:$28 sps:$4 sm:$0xff]  }
 0xa99   :  { %v20683_v45 = vld [vmem:[#allocation20 + $0x1b98] ss:$28 sps:$4 sm:$0xff]  }
 0xa9a   :  { %17449 = vmatpush1.bf16.msra.mxu0 %v20626_v30  ;;  %v20684_v30 = vld [vmem:[#allocation20 + $0x1d4] ss:$28 sps:$4 sm:$0xff]  }
 0xa9b   :  { %17925 = vmatpush1.bf16.msra.mxu1 %v20629_v56  ;;  %17451 = vmatprep.subr.bf16.mxu0 %v20630_v0  ;;  %v20687_v56 = vld [vmem:[#allocation20 + $0x1bd4] ss:$28 sps:$4 sm:$0xff]  }
 0xa9c   :  { %17927 = vmatprep.subr.bf16.mxu1 %v20633_v49  ;;  %v20686_v0 = vld [vmem:[#allocation20 + $0x1d0] ss:$28 sps:$4 sm:$0xff]  }
 0xa9d   :  { %v20689_v49 = vld [vmem:[#allocation20 + $0x1bd0] ss:$28 sps:$4 sm:$0xff]  }
 0xa9e   :  { %17453 = vmatpush1.bf16.msra.mxu0 %v20632_v19  ;;  %v20690_v19 = vld [vmem:[#allocation20 + $0x20c] ss:$28 sps:$4 sm:$0xff]  }
 0xa9f   :  { %17929 = vmatpush1.bf16.msra.mxu1 %v20635_v12  ;;  %17967 = vmatprep.subr.bf16.mxu0 %v20636_v44  ;;  %v20694_v12 = vld [vmem:[#allocation20 + $0x18] ss:$28 sps:$4 sm:$0xff]   ;;  %v20695_v44 = vld [vmem:[#allocation20 + $0x244] ss:$28 sps:$4 sm:$0xff]  }
 0xaa0   :  { %17931 = vmatprep.subr.bf16.mxu1 %v20639_v2  ;;  %v20698_v2 = vld [vmem:[#allocation20 + $0x210] ss:$28 sps:$4 sm:$0xff]  }
 0xaa1   :  { %13545 = vmatmul.mubr.f32.vlgmr.msra.gmra.mrb[28].mxu0 %v22089_v11 }
 0xaa2   :  { %17969 = vmatpush1.bf16.msra.mxu0 %v20638_v9  ;;  %14183 = vmatprep.mubr.f32.mxu0 %v21974_v21  ;;  %v20697_v9 = vld [vmem:[#allocation20 + $0x240] ss:$28 sps:$4 sm:$0xff]  }
 0xaa3   :  { %17933 = vmatpush1.bf16.msra.mxu1 %v20641_v23  ;;  %17971 = vmatprep.subr.bf16.mxu0 %v20642_v13  ;;  %v20699_v23 = vld [vmem:[#allocation20 + $0x50] ss:$28 sps:$4 sm:$0xff]   ;;  %v20700_v13 = vld [vmem:[#allocation20 + $0x27c] ss:$28 sps:$4 sm:$0xff]  }
 0xaa4   :  { %17935 = vmatprep.subr.bf16.mxu1 %v20645_v14  ;;  %v20703_v14 = vld [vmem:[#allocation20 + $0x248] ss:$28 sps:$4 sm:$0xff]  }
 0xaa6   :  { %17973 = vmatpush1.bf16.msra.mxu0 %v20644_v8  ;;  %v20702_v8 = vld [vmem:[#allocation20 + $0x278] ss:$28 sps:$4 sm:$0xff]  }
 0xaa7   :  { %17937 = vmatpush1.bf16.msra.mxu1 %v20647_v16  ;;  %17975 = vmatprep.subr.bf16.mxu0 %v20648_v20  ;;  %v20704_v16 = vld [vmem:[#allocation20 + $0x88] ss:$28 sps:$4 sm:$0xff]   ;;  %v20705_v20 = vld [vmem:[#allocation20 + $0x2b4] ss:$28 sps:$4 sm:$0xff]  }
 0xaa8   :  { %17939 = vmatprep.subr.bf16.mxu1 %v20651_v27  ;;  %v20708_v27 = vld [vmem:[#allocation20 + $0x280] ss:$28 sps:$4 sm:$0xff]  }
 0xaaa   :  { %17977 = vmatpush1.bf16.msra.mxu0 %v20650_v58  ;;  %v20707_v58 = vld [vmem:[#allocation20 + $0x2b0] ss:$28 sps:$4 sm:$0xff]  }
 0xaab   :  { %17941 = vmatpush1.bf16.msra.mxu1 %v20653_v32  ;;  %17979 = vmatprep.subr.bf16.mxu0 %v20654_v33  ;;  %v20709_v32 = vld [vmem:[#allocation20 + $0xc0] ss:$28 sps:$4 sm:$0xff]   ;;  %v20710_v33 = vld [vmem:[#allocation20 + $0x2ec] ss:$28 sps:$4 sm:$0xff]  }
 0xaac   :  { %17943 = vmatprep.subr.bf16.mxu1 %v20657_v51  ;;  %v20712_v51 = vld [vmem:[#allocation20 + $0x2e8] ss:$28 sps:$4 sm:$0xff]  }
 0xaae   :  { %17981 = vmatpush1.bf16.msra.mxu0 %v20656_v40  ;;  %v20714_v40 = vld [vmem:[#allocation20 + $0xf8] ss:$28 sps:$4 sm:$0xff]  }
 0xaaf   :  { %17945 = vmatpush1.bf16.msra.mxu1 %v20659_v48  ;;  %17983 = vmatprep.subr.bf16.mxu0 %v20660_v25  ;;  %v20715_v48 = vld [vmem:[#allocation20 + $0x324] ss:$28 sps:$4 sm:$0xff]   ;;  %v20718_v25 = vld [vmem:[#allocation20 + $0x2f0] ss:$28 sps:$4 sm:$0xff]  }
 0xab0   :  { %17947 = vmatprep.subr.bf16.mxu1 %v20663_v38  ;;  %v20717_v38 = vld [vmem:[#allocation20 + $0x320] ss:$28 sps:$4 sm:$0xff]  }
 0xab2   :  { %17985 = vmatpush1.bf16.msra.mxu0 %v20662_v34  ;;  %v20719_v34 = vld [vmem:[#allocation20 + $0x130] ss:$28 sps:$4 sm:$0xff]  }
 0xab3   :  { %17949 = vmatpush1.bf16.msra.mxu1 %v20665_v35  ;;  %17987 = vmatprep.subr.bf16.mxu0 %v20666_v55  ;;  %v20720_v35 = vld [vmem:[#allocation20 + $0x35c] ss:$28 sps:$4 sm:$0xff]   ;;  %v20723_v55 = vld [vmem:[#allocation20 + $0x328] ss:$28 sps:$4 sm:$0xff]  }
 0xab4   :  { %17951 = vmatprep.subr.bf16.mxu1 %v20669_v54  ;;  %v20722_v54 = vld [vmem:[#allocation20 + $0x358] ss:$28 sps:$4 sm:$0xff]  }
 0xab6   :  { %17989 = vmatpush1.bf16.msra.mxu0 %v20668_v59  ;;  %v20724_v59 = vld [vmem:[#allocation20 + $0x168] ss:$28 sps:$4 sm:$0xff]  }
 0xab7   :  { %17953 = vmatpush1.bf16.msra.mxu1 %v20671_v43  ;;  %17991 = vmatprep.subr.bf16.mxu0 %v20672_v36  ;;  %v20725_v43 = vld [vmem:[#allocation20 + $0x394] ss:$28 sps:$4 sm:$0xff]   ;;  %v20728_v36 = vld [vmem:[#allocation20 + $0x360] ss:$28 sps:$4 sm:$0xff]  }
 0xab8   :  { %17955 = vmatprep.subr.bf16.mxu1 %v20675_v60  ;;  %v20727_v60 = vld [vmem:[#allocation20 + $0x390] ss:$28 sps:$4 sm:$0xff]  }
 0xaba   :  { %17993 = vmatpush1.bf16.msra.mxu0 %v20674_v39  ;;  %v20729_v39 = vld [vmem:[#allocation20 + $0x1a0] ss:$28 sps:$4 sm:$0xff]  }
 0xabb   :  { %17957 = vmatpush1.bf16.msra.mxu1 %v20677_v18  ;;  %17995 = vmatprep.subr.bf16.mxu0 %v20678_v47  ;;  %v20730_v18 = vld [vmem:[#allocation20 + $0x3cc] ss:$28 sps:$4 sm:$0xff]   ;;  %v20733_v47 = vld [vmem:[#allocation20 + $0x558] ss:$28 sps:$4 sm:$0xff]  }
 0xabc   :  { %17959 = vmatprep.subr.bf16.mxu1 %v20681_v37  ;;  %v20732_v37 = vld [vmem:[#allocation20 + $0x3c8] ss:$28 sps:$4 sm:$0xff]  }
 0xabe   :  { %17997 = vmatpush1.bf16.msra.mxu0 %v20680_v41  ;;  %v20734_v41 = vld [vmem:[#allocation20 + $0x398] ss:$28 sps:$4 sm:$0xff]  }
 0xabf   :  { %17961 = vmatpush1.bf16.msra.mxu1 %v20683_v45  ;;  %17999 = vmatprep.subr.bf16.mxu0 %v20684_v30  ;;  %v20735_v45 = vld [vmem:[#allocation20 + $0x404] ss:$28 sps:$4 sm:$0xff]   ;;  %v20738_v30 = vld [vmem:[#allocation20 + $0x590] ss:$28 sps:$4 sm:$0xff]  }
 0xac0   :  { %17963 = vmatprep.subr.bf16.mxu1 %v20687_v56  ;;  %v20737_v56 = vld [vmem:[#allocation20 + $0x400] ss:$28 sps:$4 sm:$0xff]  }
 0xac2   :  { %18001 = vmatpush1.bf16.msra.mxu0 %v20686_v0  ;;  %v20739_v0 = vld [vmem:[#allocation20 + $0x3d0] ss:$28 sps:$4 sm:$0xff]  }
 0xac3   :  { %17965 = vmatpush1.bf16.msra.mxu1 %v20689_v49  ;;  %18003 = vmatprep.subr.bf16.mxu0 %v20690_v19  ;;  %v20740_v49 = vld [vmem:[#allocation20 + $0x43c] ss:$28 sps:$4 sm:$0xff]   ;;  %v20743_v19 = vld [vmem:[#allocation20 + $0x5c8] ss:$28 sps:$4 sm:$0xff]  }
 0xac4   :  { %18479 = vmatprep.subr.bf16.mxu1 %v20693_v29  ;;  %v20742_v29 = vld [vmem:[#allocation20 + $0x438] ss:$28 sps:$4 sm:$0xff]  }
 0xac6   :  { %14113 = vmatmul.mubr.f32.vlgmr.msra.gmra.mrb[36].mxu1 %v22089_v11  ;;  %18005 = vmatpush1.bf16.msra.mxu0 %v20692_v53  ;;  %v20744_v53 = vld [vmem:[#allocation20 + $0x408] ss:$28 sps:$4 sm:$0xff]  }
 0xac7   :  { %18481 = vmatpush3.bf16.msra.mxu1 %v20694_v12  ;;  %14751 = vmatprep.mubr.f32.mxu1 %v21974_v21  ;;  %v20713_v21 = vld [vmem:[#allocation20 + $0x2b8] ss:$28 sps:$4 sm:$0xff]  }
 0xac8   :  { %18007 = vmatprep.subr.bf16.mxu0 %v20695_v44  ;;  %18483 = vmatprep.subr.bf16.mxu1 %v20698_v2  ;;  %v20745_v12 = vld [vmem:[#allocation20 + $0x474] ss:$28 sps:$4 sm:$0xff]   ;;  %v20748_v44 = vld [vmem:[#allocation20 + $0x600] ss:$28 sps:$4 sm:$0xff]  }
 0xac9   :  { %v20747_v2 = vld [vmem:[#allocation20 + $0x470] ss:$28 sps:$4 sm:$0xff]  }
 0xaca   :  { %18009 = vmatpush1.bf16.msra.mxu0 %v20697_v9  ;;  %v20750_v9 = vld [vmem:[#allocation20 + $0x4ac] ss:$28 sps:$4 sm:$0xff]  }
 0xacb   :  { %18485 = vmatpush3.bf16.msra.mxu1 %v20699_v23  ;;  %18011 = vmatprep.subr.bf16.mxu0 %v20700_v13  ;;  %v20752_v23 = vld [vmem:[#allocation20 + $0x4a8] ss:$28 sps:$4 sm:$0xff]   ;;  %v20754_v13 = vld [vmem:[#allocation20 + $0x478] ss:$28 sps:$4 sm:$0xff]  }
 0xacc   :  { %18487 = vmatprep.subr.bf16.mxu1 %v20703_v14  ;;  %v20755_v14 = vld [vmem:[#allocation20 + $0x4e4] ss:$28 sps:$4 sm:$0xff]  }
 0xace   :  { %18013 = vmatpush1.bf16.msra.mxu0 %v20702_v8  ;;  %v20758_v8 = vld [vmem:[#allocation20 + $0x670] ss:$28 sps:$4 sm:$0xff]  }
 0xacf   :  { %18489 = vmatpush3.bf16.msra.mxu1 %v20704_v16  ;;  %18015 = vmatprep.subr.bf16.mxu0 %v20705_v20  ;;  %v20757_v16 = vld [vmem:[#allocation20 + $0x4e0] ss:$28 sps:$4 sm:$0xff]   ;;  %v20759_v20 = vld [vmem:[#allocation20 + $0x4b0] ss:$28 sps:$4 sm:$0xff]  }
 0xad0   :  { %18491 = vmatprep.subr.bf16.mxu1 %v20708_v27  ;;  %v20760_v27 = vld [vmem:[#allocation20 + $0x51c] ss:$28 sps:$4 sm:$0xff]  }
 0xad2   :  { %18017 = vmatpush1.bf16.msra.mxu0 %v20707_v58  ;;  %v20763_v58 = vld [vmem:[#allocation20 + $0x6a8] ss:$28 sps:$4 sm:$0xff]  }
 0xad3   :  { %18493 = vmatpush3.bf16.msra.mxu1 %v20709_v32  ;;  %18019 = vmatprep.subr.bf16.mxu0 %v20710_v33  ;;  %v20762_v32 = vld [vmem:[#allocation20 + $0x518] ss:$28 sps:$4 sm:$0xff]   ;;  %v20764_v33 = vld [vmem:[#allocation20 + $0x4e8] ss:$28 sps:$4 sm:$0xff]  }
 0xad4   :  { %18495 = vmatprep.subr.bf16.mxu1 %v20713_v21  ;;  %v20765_v21 = vld [vmem:[#allocation20 + $0x554] ss:$28 sps:$4 sm:$0xff]  }
 0xad6   :  { %18021 = vmatpush1.bf16.msra.mxu0 %v20712_v51  ;;  %v20768_v51 = vld [vmem:[#allocation20 + $0x6e0] ss:$28 sps:$4 sm:$0xff]  }
 0xad7   :  { %18497 = vmatpush3.bf16.msra.mxu1 %v20714_v40  ;;  %18023 = vmatprep.subr.bf16.mxu0 %v20715_v48  ;;  %v20767_v40 = vld [vmem:[#allocation20 + $0x550] ss:$28 sps:$4 sm:$0xff]   ;;  %v20769_v48 = vld [vmem:[#allocation20 + $0x520] ss:$28 sps:$4 sm:$0xff]  }
 0xad8   :  { %18499 = vmatprep.subr.bf16.mxu1 %v20718_v25  ;;  %v20770_v25 = vld [vmem:[#allocation20 + $0x58c] ss:$28 sps:$4 sm:$0xff]  }
 0xada   :  { %18025 = vmatpush1.bf16.msra.mxu0 %v20717_v38  ;;  %v20773_v38 = vld [vmem:[#allocation20 + $0x8d8] ss:$28 sps:$4 sm:$0xff]  }
 0xadb   :  { %18501 = vmatpush3.bf16.msra.mxu1 %v20719_v34  ;;  %18027 = vmatprep.subr.bf16.mxu0 %v20720_v35  ;;  %v20772_v34 = vld [vmem:[#allocation20 + $0x588] ss:$28 sps:$4 sm:$0xff]   ;;  %v20774_v35 = vld [vmem:[#allocation20 + $0x718] ss:$28 sps:$4 sm:$0xff]  }
 0xadc   :  { %18503 = vmatprep.subr.bf16.mxu1 %v20723_v55  ;;  %v20775_v55 = vld [vmem:[#allocation20 + $0x5c4] ss:$28 sps:$4 sm:$0xff]  }
 0xade   :  { %18029 = vmatpush1.bf16.msra.mxu0 %v20722_v54  ;;  %v20778_v54 = vld [vmem:[#allocation20 + $0x910] ss:$28 sps:$4 sm:$0xff]  }
 0xadf   :  { %18505 = vmatpush3.bf16.msra.mxu1 %v20724_v59  ;;  %18031 = vmatprep.subr.bf16.mxu0 %v20725_v43  ;;  %v20777_v59 = vld [vmem:[#allocation20 + $0x5c0] ss:$28 sps:$4 sm:$0xff]   ;;  %v20779_v43 = vld [vmem:[#allocation20 + $0x750] ss:$28 sps:$4 sm:$0xff]  }
 0xae0   :  { %18507 = vmatprep.subr.bf16.mxu1 %v20728_v36  ;;  %v20780_v36 = vld [vmem:[#allocation20 + $0x5fc] ss:$28 sps:$4 sm:$0xff]  }
 0xae1   :  { %14184 = vmatmul.mubr.f32.vlgmr.msra.gmra.mrb[30].mxu0 %v21985_v24 }
 0xae2   :  { %18033 = vmatpush1.bf16.msra.mxu0 %v20727_v60  ;;  %14254 = vmatprep.mubr.f32.mxu0 %v21988_v22  ;;  %v20783_v60 = vld [vmem:[#allocation20 + $0x948] ss:$28 sps:$4 sm:$0xff]  }
 0xae3   :  { %18509 = vmatpush3.bf16.msra.mxu1 %v20729_v39  ;;  %18035 = vmatprep.subr.bf16.mxu0 %v20730_v18  ;;  %v20782_v39 = vld [vmem:[#allocation20 + $0x5f8] ss:$28 sps:$4 sm:$0xff]   ;;  %v20784_v18 = vld [vmem:[#allocation20 + $0x788] ss:$28 sps:$4 sm:$0xff]  }
 0xae4   :  { %18511 = vmatprep.subr.bf16.mxu1 %v20733_v47  ;;  %v20785_v47 = vld [vmem:[#allocation20 + $0x634] ss:$28 sps:$4 sm:$0xff]  }
 0xae6   :  { %18037 = vmatpush1.bf16.msra.mxu0 %v20732_v37  ;;  %14752 = vmatmul.mubr.f32.vlgmr.msra.gmra.mrb[38].mxu1 %v21985_v24  ;;  %v20749_v24 = vld [vmem:[#allocation20 + $0x440] ss:$28 sps:$4 sm:$0xff]  }
 0xae7   :  { %18513 = vmatpush3.bf16.msra.mxu1 %v20734_v41  ;;  %14821 = vmatprep.mubr.f32.mxu1 %v21988_v22  ;;  %v20753_v22 = vld [vmem:[#allocation20 + $0x638] ss:$28 sps:$4 sm:$0xff]   ;;  %v20788_v37 = vld [vmem:[#allocation20 + $0x980] ss:$28 sps:$4 sm:$0xff]   ;;  %v20787_v41 = vld [vmem:[#allocation20 + $0x630] ss:$28 sps:$4 sm:$0xff]  }
 0xae8   :  { %18039 = vmatprep.subr.bf16.mxu0 %v20735_v45  ;;  %18515 = vmatprep.subr.bf16.mxu1 %v20738_v30  ;;  %v20789_v45 = vld [vmem:[#allocation20 + $0x7c0] ss:$28 sps:$4 sm:$0xff]   ;;  %v20790_v30 = vld [vmem:[#allocation20 + $0x66c] ss:$28 sps:$4 sm:$0xff]  }
 0xaea   :  { %18041 = vmatpush1.bf16.msra.mxu0 %v20737_v56  ;;  %v20793_v56 = vld [vmem:[#allocation20 + $0x9b8] ss:$28 sps:$4 sm:$0xff]  }
 0xaeb   :  { %18517 = vmatpush3.bf16.msra.mxu1 %v20739_v0  ;;  %18043 = vmatprep.subr.bf16.mxu0 %v20740_v49  ;;  %v20792_v0 = vld [vmem:[#allocation20 + $0x668] ss:$28 sps:$4 sm:$0xff]   ;;  %v20794_v49 = vld [vmem:[#allocation20 + $0x7f8] ss:$28 sps:$4 sm:$0xff]  }
 0xaec   :  { %18519 = vmatprep.subr.bf16.mxu1 %v20743_v19  ;;  %v20795_v19 = vld [vmem:[#allocation20 + $0x6a4] ss:$28 sps:$4 sm:$0xff]  }
 0xaee   :  { %18045 = vmatpush1.bf16.msra.mxu0 %v20742_v29  ;;  %v20798_v29 = vld [vmem:[#allocation20 + $0x9f0] ss:$28 sps:$4 sm:$0xff]  }
 0xaef   :  { %18521 = vmatpush3.bf16.msra.mxu1 %v20744_v53  ;;  %18047 = vmatprep.subr.bf16.mxu0 %v20745_v12  ;;  %v20797_v53 = vld [vmem:[#allocation20 + $0x6a0] ss:$28 sps:$4 sm:$0xff]   ;;  %v20799_v12 = vld [vmem:[#allocation20 + $0x830] ss:$28 sps:$4 sm:$0xff]  }
 0xaf0   :  { %18523 = vmatprep.subr.bf16.mxu1 %v20748_v44  ;;  %v20800_v44 = vld [vmem:[#allocation20 + $0x6dc] ss:$28 sps:$4 sm:$0xff]  }
 0xaf2   :  { %18049 = vmatpush1.bf16.msra.mxu0 %v20747_v2  ;;  %v20803_v2 = vld [vmem:[#allocation20 + $0xa28] ss:$28 sps:$4 sm:$0xff]  }
 0xaf3   :  { %18525 = vmatpush3.bf16.msra.mxu1 %v20749_v24  ;;  %18051 = vmatprep.subr.bf16.mxu0 %v20750_v9  ;;  %v20802_v24 = vld [vmem:[#allocation20 + $0x6d8] ss:$28 sps:$4 sm:$0xff]   ;;  %v20804_v9 = vld [vmem:[#allocation20 + $0x868] ss:$28 sps:$4 sm:$0xff]  }
 0xaf4   :  { %18527 = vmatprep.subr.bf16.mxu1 %v20753_v22  ;;  %v20805_v22 = vld [vmem:[#allocation20 + $0x714] ss:$28 sps:$4 sm:$0xff]  }
 0xaf6   :  { %18053 = vmatpush1.bf16.msra.mxu0 %v20752_v23  ;;  %v20808_v23 = vld [vmem:[#allocation20 + $0xa60] ss:$28 sps:$4 sm:$0xff]  }
 0xaf7   :  { %18529 = vmatpush3.bf16.msra.mxu1 %v20754_v13  ;;  %18055 = vmatprep.subr.bf16.mxu0 %v20755_v14  ;;  %v20807_v13 = vld [vmem:[#allocation20 + $0x710] ss:$28 sps:$4 sm:$0xff]   ;;  %v20809_v14 = vld [vmem:[#allocation20 + $0x8a0] ss:$28 sps:$4 sm:$0xff]  }
 0xaf8   :  { %18531 = vmatprep.subr.bf16.mxu1 %v20758_v8  ;;  %v20810_v8 = vld [vmem:[#allocation20 + $0x74c] ss:$28 sps:$4 sm:$0xff]  }
 0xafa   :  { %18057 = vmatpush1.bf16.msra.mxu0 %v20757_v16  ;;  %v20813_v16 = vld [vmem:[#allocation20 + $0xc58] ss:$28 sps:$4 sm:$0xff]  }
 0xafb   :  { %18533 = vmatpush3.bf16.msra.mxu1 %v20759_v20  ;;  %18059 = vmatprep.subr.bf16.mxu0 %v20760_v27  ;;  %v20812_v20 = vld [vmem:[#allocation20 + $0x748] ss:$28 sps:$4 sm:$0xff]   ;;  %v20814_v27 = vld [vmem:[#allocation20 + $0xa98] ss:$28 sps:$4 sm:$0xff]  }
 0xafc   :  { %18535 = vmatprep.subr.bf16.mxu1 %v20763_v58  ;;  %v20815_v58 = vld [vmem:[#allocation20 + $0x784] ss:$28 sps:$4 sm:$0xff]  }
 0xafe   :  { %18061 = vmatpush1.bf16.msra.mxu0 %v20762_v32  ;;  %v20818_v32 = vld [vmem:[#allocation20 + $0xc90] ss:$28 sps:$4 sm:$0xff]  }
 0xaff   :  { %18537 = vmatpush3.bf16.msra.mxu1 %v20764_v33  ;;  %18063 = vmatprep.subr.bf16.mxu0 %v20765_v21  ;;  %v20817_v33 = vld [vmem:[#allocation20 + $0x780] ss:$28 sps:$4 sm:$0xff]   ;;  %v20819_v21 = vld [vmem:[#allocation20 + $0xad0] ss:$28 sps:$4 sm:$0xff]  }
 0xb00   :  { %18539 = vmatprep.subr.bf16.mxu1 %v20768_v51  ;;  %v20820_v51 = vld [vmem:[#allocation20 + $0x7bc] ss:$28 sps:$4 sm:$0xff]  }
 0xb02   :  { %18065 = vmatpush1.bf16.msra.mxu0 %v20767_v40  ;;  %v20824_v40 = vld [vmem:[#allocation20 + $0xb08] ss:$28 sps:$4 sm:$0xff]  }
 0xb03   :  { %18541 = vmatpush3.bf16.msra.mxu1 %v20769_v48  ;;  %18067 = vmatprep.subr.bf16.mxu0 %v20770_v25  ;;  %v20825_v48 = vld [vmem:[#allocation20 + $0x7f4] ss:$28 sps:$4 sm:$0xff]   ;;  %v20828_v25 = vld [vmem:[#allocation20 + $0xd00] ss:$28 sps:$4 sm:$0xff]  }
 0xb04   :  { %18543 = vmatprep.subr.bf16.mxu1 %v20773_v38  ;;  %v20827_v38 = vld [vmem:[#allocation20 + $0x7f0] ss:$28 sps:$4 sm:$0xff]  }
 0xb06   :  { %18069 = vmatpush1.bf16.msra.mxu0 %v20772_v34  ;;  %14822 = vmatmul.mubr.f32.vlgmr.msra.gmra.mrb[40].mxu1 %v21999_v52  ;;  %v20829_v34 = vld [vmem:[#allocation20 + $0xb40] ss:$28 sps:$4 sm:$0xff]  }
 0xb07   :  { %18545 = vmatpush3.bf16.msra.mxu1 %v20774_v35  ;;  %14891 = vmatprep.mubr.f32.mxu1 %v22002_v57  ;;  %v20830_v35 = vld [vmem:[#allocation20 + $0x82c] ss:$28 sps:$4 sm:$0xff]  }
 0xb08   :  { %18071 = vmatprep.subr.bf16.mxu0 %v20775_v55  ;;  %18547 = vmatprep.subr.bf16.mxu1 %v20778_v54  ;;  %v20833_v55 = vld [vmem:[#allocation20 + $0xd38] ss:$28 sps:$4 sm:$0xff]   ;;  %v20832_v54 = vld [vmem:[#allocation20 + $0x828] ss:$28 sps:$4 sm:$0xff]  }
 0xb0a   :  { %18073 = vmatpush1.bf16.msra.mxu0 %v20777_v59  ;;  %v20834_v59 = vld [vmem:[#allocation20 + $0xb78] ss:$28 sps:$4 sm:$0xff]  }
 0xb0b   :  { %18549 = vmatpush3.bf16.msra.mxu1 %v20779_v43  ;;  %18075 = vmatprep.subr.bf16.mxu0 %v20780_v36  ;;  %v20835_v43 = vld [vmem:[#allocation20 + $0x864] ss:$28 sps:$4 sm:$0xff]   ;;  %v20838_v36 = vld [vmem:[#allocation20 + $0xd70] ss:$28 sps:$4 sm:$0xff]  }
 0xb0c   :  { %18551 = vmatprep.subr.bf16.mxu1 %v20783_v60  ;;  %v20837_v60 = vld [vmem:[#allocation20 + $0x860] ss:$28 sps:$4 sm:$0xff]  }
 0xb0e   :  { %18077 = vmatpush1.bf16.msra.mxu0 %v20782_v39  ;;  %v20839_v39 = vld [vmem:[#allocation20 + $0xbb0] ss:$28 sps:$4 sm:$0xff]  }
 0xb0f   :  { %18553 = vmatpush3.bf16.msra.mxu1 %v20784_v18  ;;  %18079 = vmatprep.subr.bf16.mxu0 %v20785_v47  ;;  %v20840_v18 = vld [vmem:[#allocation20 + $0x89c] ss:$28 sps:$4 sm:$0xff]   ;;  %v20843_v47 = vld [vmem:[#allocation20 + $0xda8] ss:$28 sps:$4 sm:$0xff]  }
 0xb10   :  { %18555 = vmatprep.subr.bf16.mxu1 %v20788_v37  ;;  %v20842_v37 = vld [vmem:[#allocation20 + $0x898] ss:$28 sps:$4 sm:$0xff]  }
 0xb12   :  { %18081 = vmatpush1.bf16.msra.mxu0 %v20787_v41  ;;  %v20844_v41 = vld [vmem:[#allocation20 + $0xbe8] ss:$28 sps:$4 sm:$0xff]  }
 0xb13   :  { %18557 = vmatpush3.bf16.msra.mxu1 %v20789_v45  ;;  %18083 = vmatprep.subr.bf16.mxu0 %v20790_v30  ;;  %v20845_v45 = vld [vmem:[#allocation20 + $0x8d4] ss:$28 sps:$4 sm:$0xff]   ;;  %v20848_v30 = vld [vmem:[#allocation20 + $0xde0] ss:$28 sps:$4 sm:$0xff]  }
 0xb14   :  { %18559 = vmatprep.subr.bf16.mxu1 %v20793_v56  ;;  %v20847_v56 = vld [vmem:[#allocation20 + $0x8d0] ss:$28 sps:$4 sm:$0xff]  }
 0xb16   :  { %18085 = vmatpush1.bf16.msra.mxu0 %v20792_v0  ;;  %v20849_v0 = vld [vmem:[#allocation20 + $0xc20] ss:$28 sps:$4 sm:$0xff]  }
 0xb17   :  { %18561 = vmatpush3.bf16.msra.mxu1 %v20794_v49  ;;  %18087 = vmatprep.subr.bf16.mxu0 %v20795_v19  ;;  %v20850_v49 = vld [vmem:[#allocation20 + $0x90c] ss:$28 sps:$4 sm:$0xff]   ;;  %v20853_v19 = vld [vmem:[#allocation20 + $0xfd8] ss:$28 sps:$4 sm:$0xff]  }
 0xb18   :  { %18563 = vmatprep.subr.bf16.mxu1 %v20798_v29  ;;  %v20852_v29 = vld [vmem:[#allocation20 + $0x908] ss:$28 sps:$4 sm:$0xff]  }
 0xb1a   :  { %18089 = vmatpush1.bf16.msra.mxu0 %v20797_v53  ;;  %v20854_v53 = vld [vmem:[#allocation20 + $0xe18] ss:$28 sps:$4 sm:$0xff]  }
 0xb1b   :  { %18565 = vmatpush3.bf16.msra.mxu1 %v20799_v12  ;;  %18091 = vmatprep.subr.bf16.mxu0 %v20800_v44  ;;  %v20855_v12 = vld [vmem:[#allocation20 + $0x944] ss:$28 sps:$4 sm:$0xff]   ;;  %v20858_v44 = vld [vmem:[#allocation20 + $0x1010] ss:$28 sps:$4 sm:$0xff]  }
 0xb1c   :  { %18567 = vmatprep.subr.bf16.mxu1 %v20803_v2  ;;  %v20857_v2 = vld [vmem:[#allocation20 + $0x940] ss:$28 sps:$4 sm:$0xff]  }
 0xb1e   :  { %18093 = vmatpush1.bf16.msra.mxu0 %v20802_v24  ;;  %v20859_v24 = vld [vmem:[#allocation20 + $0xe50] ss:$28 sps:$4 sm:$0xff]  }
 0xb1f   :  { %18569 = vmatpush3.bf16.msra.mxu1 %v20804_v9  ;;  %18095 = vmatprep.subr.bf16.mxu0 %v20805_v22  ;;  %v20860_v9 = vld [vmem:[#allocation20 + $0x97c] ss:$28 sps:$4 sm:$0xff]   ;;  %v20863_v22 = vld [vmem:[#allocation20 + $0x1048] ss:$28 sps:$4 sm:$0xff]  }
 0xb20   :  { %18571 = vmatprep.subr.bf16.mxu1 %v20808_v23  ;;  %v20862_v23 = vld [vmem:[#allocation20 + $0x978] ss:$28 sps:$4 sm:$0xff]  }
 0xb21   :  { %14255 = vmatmul.mubr.f32.vlgmr.msra.gmra.mrb[30].mxu0 %v21999_v52  ;;  %v20823_v52 = vld [vmem:[#allocation20 + $0xcc8] ss:$28 sps:$4 sm:$0xff]  }
 0xb22   :  { %18097 = vmatpush1.bf16.msra.mxu0 %v20807_v13  ;;  %14325 = vmatprep.mubr.f32.mxu0 %v22002_v57  ;;  %v20822_v57 = vld [vmem:[#allocation20 + $0x7b8] ss:$28 sps:$4 sm:$0xff]   ;;  %v20864_v13 = vld [vmem:[#allocation20 + $0xe88] ss:$28 sps:$4 sm:$0xff]  }
 0xb23   :  { %18573 = vmatpush3.bf16.msra.mxu1 %v20809_v14  ;;  %18099 = vmatprep.subr.bf16.mxu0 %v20810_v8  ;;  %v20865_v14 = vld [vmem:[#allocation20 + $0x9b4] ss:$28 sps:$4 sm:$0xff]   ;;  %v20868_v8 = vld [vmem:[#allocation20 + $0x1080] ss:$28 sps:$4 sm:$0xff]  }
 0xb24   :  { %18575 = vmatprep.subr.bf16.mxu1 %v20813_v16  ;;  %v20867_v16 = vld [vmem:[#allocation20 + $0x9b0] ss:$28 sps:$4 sm:$0xff]  }
 0xb26   :  { %18101 = vmatpush1.bf16.msra.mxu0 %v20812_v20  ;;  %14892 = vmatmul.mubr.f32.vlgmr.msra.gmra.mrb[42].mxu1 %v22013_v61  ;;  %v20869_v20 = vld [vmem:[#allocation20 + $0xec0] ss:$28 sps:$4 sm:$0xff]  }
 0xb27   :  { %18577 = vmatpush3.bf16.msra.mxu1 %v20814_v27  ;;  %14961 = vmatprep.mubr.f32.mxu1 %v22016_v42  ;;  %v20870_v27 = vld [vmem:[#allocation20 + $0x9ec] ss:$28 sps:$4 sm:$0xff]  }
 0xb28   :  { %18103 = vmatprep.subr.bf16.mxu0 %v20815_v58  ;;  %18579 = vmatprep.subr.bf16.mxu1 %v20818_v32  ;;  %v20873_v58 = vld [vmem:[#allocation20 + $0x10b8] ss:$28 sps:$4 sm:$0xff]   ;;  %v20872_v32 = vld [vmem:[#allocation20 + $0x9e8] ss:$28 sps:$4 sm:$0xff]  }
 0xb2a   :  { %18105 = vmatpush1.bf16.msra.mxu0 %v20817_v33  ;;  %v20874_v33 = vld [vmem:[#allocation20 + $0xef8] ss:$28 sps:$4 sm:$0xff]  }
 0xb2b   :  { %18581 = vmatpush3.bf16.msra.mxu1 %v20819_v21  ;;  %18107 = vmatprep.subr.bf16.mxu0 %v20820_v51  ;;  %v20875_v21 = vld [vmem:[#allocation20 + $0xa24] ss:$28 sps:$4 sm:$0xff]   ;;  %v20878_v51 = vld [vmem:[#allocation20 + $0x10f0] ss:$28 sps:$4 sm:$0xff]  }
 0xb2c   :  { %18583 = vmatprep.subr.bf16.mxu1 %v20823_v52  ;;  %v20877_v52 = vld [vmem:[#allocation20 + $0xa20] ss:$28 sps:$4 sm:$0xff]  }
 0xb2e   :  { %18109 = vmatpush1.bf16.msra.mxu0 %v20822_v57  ;;  %v20879_v57 = vld [vmem:[#allocation20 + $0xf30] ss:$28 sps:$4 sm:$0xff]  }
 0xb2f   :  { %18585 = vmatpush3.bf16.msra.mxu1 %v20824_v40  ;;  %18111 = vmatprep.subr.bf16.mxu0 %v20825_v48  ;;  %v20880_v40 = vld [vmem:[#allocation20 + $0xa5c] ss:$28 sps:$4 sm:$0xff]   ;;  %v20883_v48 = vld [vmem:[#allocation20 + $0x1128] ss:$28 sps:$4 sm:$0xff]  }
 0xb30   :  { %18587 = vmatprep.subr.bf16.mxu1 %v20828_v25  ;;  %v20882_v25 = vld [vmem:[#allocation20 + $0xa58] ss:$28 sps:$4 sm:$0xff]  }
 0xb32   :  { %18113 = vmatpush1.bf16.msra.mxu0 %v20827_v38  ;;  %v20884_v38 = vld [vmem:[#allocation20 + $0xf68] ss:$28 sps:$4 sm:$0xff]  }
 0xb33   :  { %18589 = vmatpush3.bf16.msra.mxu1 %v20829_v34  ;;  %18115 = vmatprep.subr.bf16.mxu0 %v20830_v35  ;;  %v20885_v34 = vld [vmem:[#allocation20 + $0xa94] ss:$28 sps:$4 sm:$0xff]   ;;  %v20888_v35 = vld [vmem:[#allocation20 + $0x1160] ss:$28 sps:$4 sm:$0xff]  }
 0xb34   :  { %18591 = vmatprep.subr.bf16.mxu1 %v20833_v55  ;;  %v20887_v55 = vld [vmem:[#allocation20 + $0xa90] ss:$28 sps:$4 sm:$0xff]  }
 0xb36   :  { %18117 = vmatpush1.bf16.msra.mxu0 %v20832_v54  ;;  %v20889_v54 = vld [vmem:[#allocation20 + $0xfa0] ss:$28 sps:$4 sm:$0xff]  }
 0xb37   :  { %18593 = vmatpush3.bf16.msra.mxu1 %v20834_v59  ;;  %18119 = vmatprep.subr.bf16.mxu0 %v20835_v43  ;;  %v20890_v59 = vld [vmem:[#allocation20 + $0xacc] ss:$28 sps:$4 sm:$0xff]   ;;  %v20893_v43 = vld [vmem:[#allocation20 + $0x1358] ss:$28 sps:$4 sm:$0xff]  }
 0xb38   :  { %18595 = vmatprep.subr.bf16.mxu1 %v20838_v36  ;;  %v20892_v36 = vld [vmem:[#allocation20 + $0xac8] ss:$28 sps:$4 sm:$0xff]  }
 0xb3a   :  { %18121 = vmatpush1.bf16.msra.mxu0 %v20837_v60  ;;  %v20894_v60 = vld [vmem:[#allocation20 + $0x1198] ss:$28 sps:$4 sm:$0xff]  }
 0xb3b   :  { %18597 = vmatpush3.bf16.msra.mxu1 %v20839_v39  ;;  %18123 = vmatprep.subr.bf16.mxu0 %v20840_v18  ;;  %v20895_v39 = vld [vmem:[#allocation20 + $0xb04] ss:$28 sps:$4 sm:$0xff]   ;;  %v20898_v18 = vld [vmem:[#allocation20 + $0x1390] ss:$28 sps:$4 sm:$0xff]  }
 0xb3c   :  { %18599 = vmatprep.subr.bf16.mxu1 %v20843_v47  ;;  %v20897_v47 = vld [vmem:[#allocation20 + $0xb00] ss:$28 sps:$4 sm:$0xff]  }
 0xb3e   :  { %18125 = vmatpush1.bf16.msra.mxu0 %v20842_v37  ;;  %v20899_v37 = vld [vmem:[#allocation20 + $0x11d0] ss:$28 sps:$4 sm:$0xff]  }
 0xb3f   :  { %18601 = vmatpush3.bf16.msra.mxu1 %v20844_v41  ;;  %18127 = vmatprep.subr.bf16.mxu0 %v20845_v45  ;;  %v20900_v41 = vld [vmem:[#allocation20 + $0xb3c] ss:$28 sps:$4 sm:$0xff]   ;;  %v20904_v45 = vld [vmem:[#allocation20 + $0x1208] ss:$28 sps:$4 sm:$0xff]  }
 0xb40   :  { %18603 = vmatprep.subr.bf16.mxu1 %v20848_v30  ;;  %v20905_v30 = vld [vmem:[#allocation20 + $0xb74] ss:$28 sps:$4 sm:$0xff]  }
 0xb42   :  { %18129 = vmatpush1.bf16.msra.mxu0 %v20847_v56  ;;  %v20908_v56 = vld [vmem:[#allocation20 + $0x1400] ss:$28 sps:$4 sm:$0xff]  }
 0xb43   :  { %18605 = vmatpush3.bf16.msra.mxu1 %v20849_v0  ;;  %18131 = vmatprep.subr.bf16.mxu0 %v20850_v49  ;;  %v20907_v0 = vld [vmem:[#allocation20 + $0xb70] ss:$28 sps:$4 sm:$0xff]   ;;  %v22111_v49 = vld [vmem:[#allocation22] sm:$0xff] }
 0xb44   :  { %18607 = vmatprep.subr.bf16.mxu1 %v20853_v19  ;;  %v20909_v19 = vld [vmem:[#allocation20 + $0x1240] ss:$28 sps:$4 sm:$0xff]  }
 0xb46   :  { %18133 = vmatpush1.bf16.msra.mxu0 %v20852_v29  ;;  %14962 = vmatmul.mubr.f32.vlgmr.msra.gmra.mrb[44].mxu1 %v22036_v17  ;;  %v20910_v29 = vld [vmem:[#allocation20 + $0xbac] ss:$28 sps:$4 sm:$0xff]  }
 0xb47   :  { %18609 = vmatpush3.bf16.msra.mxu1 %v20854_v53  ;;  %15031 = vmatprep.mubr.f32.mxu1 %v22039_v31  ;;  %v20913_v53 = vld [vmem:[#allocation20 + $0x1438] ss:$28 sps:$4 sm:$0xff]  }
 0xb48   :  { %18135 = vmatprep.subr.bf16.mxu0 %v20855_v12  ;;  %18611 = vmatprep.subr.bf16.mxu1 %v20858_v44  ;;  %v12951_v12 = vrot.slane %v22111_v49, %v21763_v4  ;;  %v12955_v44 = vrot.slane %v22111_v49, %v21768_v6  ;;  %v20919_v4 = vld [vmem:[#allocation20 + $0x12b0] ss:$28 sps:$4 sm:$0xff]  }
 0xb4a   :  { %18137 = vmatpush1.bf16.msra.mxu0 %v20857_v2  ;;  %v20912_v2 = vld [vmem:[#allocation20 + $0xba8] ss:$28 sps:$4 sm:$0xff]  }
 0xb4b   :  { %18613 = vmatpush3.bf16.msra.mxu1 %v20859_v24  ;;  %18139 = vmatprep.subr.bf16.mxu0 %v20860_v9  ;;  %v20914_v24 = vld [vmem:[#allocation20 + $0x1278] ss:$28 sps:$4 sm:$0xff]   ;;  %v20915_v9 = vld [vmem:[#allocation20 + $0xbe4] ss:$28 sps:$4 sm:$0xff]  }
 0xb4c   :  { %18615 = vmatprep.subr.bf16.mxu1 %v20863_v22 }
 0xb4e   :  { %18141 = vmatpush1.bf16.msra.mxu0 %v20862_v23  ;;  %v20918_v23 = vld [vmem:[#allocation20 + $0x1470] ss:$28 sps:$4 sm:$0xff]  }
 0xb4f   :  { %18617 = vmatpush3.bf16.msra.mxu1 %v20864_v13  ;;  %18143 = vmatprep.subr.bf16.mxu0 %v20865_v14 }
 0xb50   :  { %18619 = vmatprep.subr.bf16.mxu1 %v20868_v8 }
 0xb52   :  { %18145 = vmatpush1.bf16.msra.mxu0 %v20867_v16  ;;  %v20917_v16 = vld [vmem:[#allocation20 + $0xbe0] ss:$28 sps:$4 sm:$0xff]  }
 0xb53   :  { %18621 = vmatpush3.bf16.msra.mxu1 %v20869_v20  ;;  %18147 = vmatprep.subr.bf16.mxu0 %v20870_v27  ;;  %v20920_v20 = vld [vmem:[#allocation20 + $0xc1c] ss:$28 sps:$4 sm:$0xff]   ;;  %v20923_v27 = vld [vmem:[#allocation20 + $0x14a8] ss:$28 sps:$4 sm:$0xff]  }
 0xb54   :  { %18623 = vmatprep.subr.bf16.mxu1 %v20873_v58  ;;  %v20922_v58 = vld [vmem:[#allocation20 + $0xc18] ss:$28 sps:$4 sm:$0xff]  }
 0xb56   :  { %18149 = vmatpush1.bf16.msra.mxu0 %v20872_v32  ;;  %v20924_v32 = vld [vmem:[#allocation20 + $0x12e8] ss:$28 sps:$4 sm:$0xff]  }
 0xb57   :  { %18625 = vmatpush3.bf16.msra.mxu1 %v20874_v33  ;;  %18151 = vmatprep.subr.bf16.mxu0 %v20875_v21  ;;  %v20925_v33 = vld [vmem:[#allocation20 + $0xc54] ss:$28 sps:$4 sm:$0xff]   ;;  %v20928_v21 = vld [vmem:[#allocation20 + $0x14e0] ss:$28 sps:$4 sm:$0xff]  }
 0xb58   :  { %18627 = vmatprep.subr.bf16.mxu1 %v20878_v51  ;;  %v20927_v51 = vld [vmem:[#allocation20 + $0xc50] ss:$28 sps:$4 sm:$0xff]  }
 0xb5a   :  { %18153 = vmatpush1.bf16.msra.mxu0 %v20877_v52  ;;  %v20929_v52 = vld [vmem:[#allocation20 + $0x1320] ss:$28 sps:$4 sm:$0xff]  }
 0xb5b   :  { %18629 = vmatpush3.bf16.msra.mxu1 %v20879_v57  ;;  %18155 = vmatprep.subr.bf16.mxu0 %v20880_v40  ;;  %v20930_v57 = vld [vmem:[#allocation20 + $0xc8c] ss:$28 sps:$4 sm:$0xff]   ;;  %v20933_v40 = vld [vmem:[#allocation20 + $0x16d8] ss:$28 sps:$4 sm:$0xff]  }
 0xb5c   :  { %18631 = vmatprep.subr.bf16.mxu1 %v20883_v48  ;;  %v20932_v48 = vld [vmem:[#allocation20 + $0xc88] ss:$28 sps:$4 sm:$0xff]  }
 0xb5e   :  { %18157 = vmatpush1.bf16.msra.mxu0 %v20882_v25  ;;  %v20934_v25 = vld [vmem:[#allocation20 + $0x1518] ss:$28 sps:$4 sm:$0xff]  }
 0xb5f   :  { %18633 = vmatpush3.bf16.msra.mxu1 %v20884_v38  ;;  %18159 = vmatprep.subr.bf16.mxu0 %v20885_v34  ;;  %v20935_v38 = vld [vmem:[#allocation20 + $0xcc4] ss:$28 sps:$4 sm:$0xff]   ;;  %v20938_v34 = vld [vmem:[#allocation20 + $0x1710] ss:$28 sps:$4 sm:$0xff]  }
 0xb60   :  { %18635 = vmatprep.subr.bf16.mxu1 %v20888_v35  ;;  %v20937_v35 = vld [vmem:[#allocation20 + $0xcc0] ss:$28 sps:$4 sm:$0xff]  }
 0xb61   :  { %14326 = vmatmul.mubr.f32.vlgmr.msra.gmra.mrb[30].mxu0 %v22013_v61  ;;  %v20903_v61 = vld [vmem:[#allocation20 + $0x13c8] ss:$28 sps:$4 sm:$0xff]  }
 0xb62   :  { %18161 = vmatpush1.bf16.msra.mxu0 %v20887_v55  ;;  %14396 = vmatprep.mubr.f32.mxu0 %v22016_v42  ;;  %v20902_v42 = vld [vmem:[#allocation20 + $0xb38] ss:$28 sps:$4 sm:$0xff]   ;;  %v20939_v55 = vld [vmem:[#allocation20 + $0x1550] ss:$28 sps:$4 sm:$0xff]  }
 0xb63   :  { %18637 = vmatpush3.bf16.msra.mxu1 %v20889_v54  ;;  %18163 = vmatprep.subr.bf16.mxu0 %v20890_v59  ;;  %v20940_v54 = vld [vmem:[#allocation20 + $0xcfc] ss:$28 sps:$4 sm:$0xff]   ;;  %v20943_v59 = vld [vmem:[#allocation20 + $0x1748] ss:$28 sps:$4 sm:$0xff]  }
 0xb64   :  { %18639 = vmatprep.subr.bf16.mxu1 %v20893_v43  ;;  %v20942_v43 = vld [vmem:[#allocation20 + $0xcf8] ss:$28 sps:$4 sm:$0xff]  }
 0xb66   :  { %18165 = vmatpush1.bf16.msra.mxu0 %v20892_v36  ;;  %15032 = vmatmul.mubr.f32.vlgmr.msra.gmra.mrb[46].mxu1 %v22050_v62  ;;  %v20944_v36 = vld [vmem:[#allocation20 + $0x1588] ss:$28 sps:$4 sm:$0xff]  }
 0xb67   :  { %18641 = vmatpush3.bf16.msra.mxu1 %v20894_v60  ;;  %15101 = vmatprep.mubr.f32.mxu1 %v22053_v1  ;;  %v20945_v60 = vld [vmem:[#allocation20 + $0xd34] ss:$28 sps:$4 sm:$0xff]  }
 0xb68   :  { %18167 = vmatprep.subr.bf16.mxu0 %v20895_v39  ;;  %18643 = vmatprep.subr.bf16.mxu1 %v20898_v18  ;;  %v20948_v39 = vld [vmem:[#allocation20 + $0x1780] ss:$28 sps:$4 sm:$0xff]   ;;  %v20947_v18 = vld [vmem:[#allocation20 + $0xd30] ss:$28 sps:$4 sm:$0xff]  }
 0xb6a   :  { %18169 = vmatpush1.bf16.msra.mxu0 %v20897_v47  ;;  %v20949_v47 = vld [vmem:[#allocation20 + $0x15c0] ss:$28 sps:$4 sm:$0xff]  }
 0xb6b   :  { %18645 = vmatpush3.bf16.msra.mxu1 %v20899_v37  ;;  %18171 = vmatprep.subr.bf16.mxu0 %v20900_v41  ;;  %v20950_v37 = vld [vmem:[#allocation20 + $0xd6c] ss:$28 sps:$4 sm:$0xff]   ;;  %v20953_v41 = vld [vmem:[#allocation20 + $0x17b8] ss:$28 sps:$4 sm:$0xff]  }
 0xb6c   :  { %18647 = vmatprep.subr.bf16.mxu1 %v20903_v61  ;;  %v20952_v61 = vld [vmem:[#allocation20 + $0xd68] ss:$28 sps:$4 sm:$0xff]  }
 0xb6e   :  { %18173 = vmatpush1.bf16.msra.mxu0 %v20902_v42  ;;  %v21527_v42 = vmov 1983009808  }
 0xb6f   :  { %18649 = vmatpush3.bf16.msra.mxu1 %v20904_v45  ;;  %18175 = vmatprep.subr.bf16.mxu0 %v20905_v30  ;;  %v15257_v45 = vunpack.c.l.s4 %v21527_v42  ;;  %v20954_v30 = vld [vmem:[#allocation20 + $0x15f8] ss:$28 sps:$4 sm:$0xff]  }
 0xb70   :  { %18651 = vmatprep.subr.bf16.mxu1 %v20908_v56  ;;  %v20955_v56 = vld [vmem:[#allocation20 + $0xda4] ss:$28 sps:$4 sm:$0xff]  }
 0xb72   :  { %18177 = vmatpush1.bf16.msra.mxu0 %v20907_v0  ;;  %v20958_v0 = vld [vmem:[#allocation20 + $0x17f0] ss:$28 sps:$4 sm:$0xff]  }
 0xb73   :  { %18653 = vmatpush3.bf16.msra.mxu1 %v20909_v19  ;;  %18179 = vmatprep.subr.bf16.mxu0 %v20910_v29  ;;  %v12959_v19 = vrot.slane %v22111_v49, %v21794_v15  ;;  %v20957_v29 = vld [vmem:[#allocation20 + $0xda0] ss:$28 sps:$4 sm:$0xff]  }
 0xb74   :  { %v13546_v22 = vpop.f32.mrb[28].mxu0  ;;  %18655 = vmatprep.subr.bf16.mxu1 %v20913_v53  ;;  %v15258_v53 = vunpack.c.0.s8 %v15257_v45 }
 0xb75   :  { %v22117_v13 = vadd.f32 %v13546_v22, %v12951_v12  ;;  %v13548_v14 = vpop.f32.mrb[29].mxu0  ;;  %v12963_v12 = vrot.slane %v22111_v49, %v21771_v7 }
 0xb76   :  { %v22119_v8 = vadd.f32 %v13548_v14, %v12955_v44  ;;  %18181 = vmatpush1.bf16.msra.mxu0 %v20912_v2  ;;  %v20959_v44 = vld [vmem:[#allocation20 + $0x1630] ss:$28 sps:$4 sm:$0xff]   ;;  %v20960_v2 = vld [vmem:[#allocation20 + $0xddc] ss:$28 sps:$4 sm:$0xff]  }
 0xb77   :  { %18657 = vmatpush3.bf16.msra.mxu1 %v20914_v24  ;;  %18183 = vmatprep.subr.bf16.mxu0 %v20915_v9  ;;  %v20963_v24 = vld [vmem:[#allocation20 + $0x1828] ss:$28 sps:$4 sm:$0xff]   ;;  %v20962_v14 = vld [vmem:[#allocation20 + $0xdd8] ss:$28 sps:$4 sm:$0xff]  }
 0xb78   :  { %v15254_v6 = vcombine.low %v22117_v13, %v22119_v8  ;;  %18659 = vmatprep.subr.bf16.mxu1 %v20918_v23  ;;  %v20975_v13 = vld [vmem:[#allocation20 + $0xe84] ss:$28 sps:$4 sm:$0xff]   ;;  %v20978_v8 = vld [vmem:[#allocation20 + $0x1a90] ss:$28 sps:$4 sm:$0xff]  }
 0xb7a   :  { %18185 = vmatpush1.bf16.msra.mxu0 %v20917_v16  ;;  %v22130_v16 = vsub.s32 %v15258_v53, %v21760_v3  ;;  %v20969_v3 = vld [vmem:[#allocation20 + $0x16a0] ss:$28 sps:$4 sm:$0xff]   ;;  %v21007_v53 = vld [vmem:[#allocation20 + $0xfd0] ss:$28 sps:$4 sm:$0xff]  }
 0xb7b   :  { %18661 = vmatpush3.bf16.msra.mxu1 %v20919_v4  ;;  %18187 = vmatprep.subr.bf16.mxu0 %v20920_v20  ;;  %v20964_v4 = vld [vmem:[#allocation20 + $0x1668] ss:$28 sps:$4 sm:$0xff]   ;;  %v20965_v20 = vld [vmem:[#allocation20 + $0xe14] ss:$28 sps:$4 sm:$0xff]  }
 0xb7c   :  { %18663 = vmatprep.subr.bf16.mxu1 %v20923_v27  ;;  %v20968_v27 = vld [vmem:[#allocation20 + $0x1860] ss:$28 sps:$4 sm:$0xff]  }
 0xb7e   :  { %18189 = vmatpush1.bf16.msra.mxu0 %v20922_v58  ;;  %v20967_v58 = vld [vmem:[#allocation20 + $0xe10] ss:$28 sps:$4 sm:$0xff]  }
 0xb7f   :  { %18665 = vmatpush3.bf16.msra.mxu1 %v20924_v32  ;;  %18191 = vmatprep.subr.bf16.mxu0 %v20925_v33  ;;  %v15262_v32 = vrot.slane %v15254_v6, %v22130_v16  ;;  %v20977_v6 = vld [vmem:[#allocation20 + $0xe80] ss:$28 sps:$4 sm:$0xff]  }
 0xb80   :  { %18667 = vmatprep.subr.bf16.mxu1 %v20928_v21  ;;  %v20970_v21 = vld [vmem:[#allocation20 + $0xe4c] ss:$28 sps:$4 sm:$0xff]  }
 0xb82   :  { %18193 = vmatpush1.bf16.msra.mxu0 %v20927_v51  ;;  %v20973_v51 = vld [vmem:[#allocation20 + $0x1a58] ss:$28 sps:$4 sm:$0xff]  }
 0xb83   :  { %18669 = vmatpush3.bf16.msra.mxu1 %v20929_v52  ;;  %18195 = vmatprep.subr.bf16.mxu0 %v20930_v57  ;;  %v20972_v57 = vld [vmem:[#allocation20 + $0xe48] ss:$28 sps:$4 sm:$0xff]  }
 0xb84   :  { %18671 = vmatprep.subr.bf16.mxu1 %v20933_v40  ;;  %v20974_v40 = vld [vmem:[#allocation20 + $0x1898] ss:$28 sps:$4 sm:$0xff]  }
 0xb86   :  { %18197 = vmatpush1.bf16.msra.mxu0 %v20932_v48  ;;  %15102 = vmatmul.mubr.f32.vlgmr.msra.gmra.mrb[48].mxu1 %v22064_v5  ;;  %v20980_v48 = vld [vmem:[#allocation20 + $0xebc] ss:$28 sps:$4 sm:$0xff]  }
 0xb87   :  { %18673 = vmatpush3.bf16.msra.mxu1 %v20934_v25  ;;  %15171 = vmatprep.mubr.f32.mxu1 %v22067_v26  ;;  %v20982_v25 = vld [vmem:[#allocation20 + $0xeb8] ss:$28 sps:$4 sm:$0xff]  }
 0xb88   :  { %18199 = vmatprep.subr.bf16.mxu0 %v20935_v38  ;;  %18675 = vmatprep.subr.bf16.mxu1 %v20938_v34  ;;  %v20984_v38 = vld [vmem:[#allocation20 + $0x1908] ss:$28 sps:$4 sm:$0xff]   ;;  %v20985_v34 = vld [vmem:[#allocation20 + $0xef4] ss:$28 sps:$4 sm:$0xff]  }
 0xb8a   :  { %18201 = vmatpush1.bf16.msra.mxu0 %v20937_v35  ;;  %v20988_v35 = vld [vmem:[#allocation20 + $0x1b00] ss:$28 sps:$4 sm:$0xff]  }
 0xb8b   :  { %18677 = vmatpush3.bf16.msra.mxu1 %v20939_v55  ;;  %18203 = vmatprep.subr.bf16.mxu0 %v20940_v54  ;;  %v20987_v55 = vld [vmem:[#allocation20 + $0xef0] ss:$28 sps:$4 sm:$0xff]   ;;  %v20989_v54 = vld [vmem:[#allocation20 + $0x1940] ss:$28 sps:$4 sm:$0xff]  }
 0xb8c   :  { %18679 = vmatprep.subr.bf16.mxu1 %v20943_v59  ;;  %v20990_v59 = vld [vmem:[#allocation20 + $0xf2c] ss:$28 sps:$4 sm:$0xff]  }
 0xb8e   :  { %18205 = vmatpush1.bf16.msra.mxu0 %v20942_v43  ;;  %v20993_v43 = vld [vmem:[#allocation20 + $0x1b38] ss:$28 sps:$4 sm:$0xff]  }
 0xb8f   :  { %18681 = vmatpush3.bf16.msra.mxu1 %v20944_v36  ;;  %18207 = vmatprep.subr.bf16.mxu0 %v20945_v60  ;;  %v20992_v36 = vld [vmem:[#allocation20 + $0xf28] ss:$28 sps:$4 sm:$0xff]   ;;  %v20994_v60 = vld [vmem:[#allocation20 + $0x1978] ss:$28 sps:$4 sm:$0xff]  }
 0xb90   :  { %18683 = vmatprep.subr.bf16.mxu1 %v20948_v39  ;;  %v20995_v39 = vld [vmem:[#allocation20 + $0xf64] ss:$28 sps:$4 sm:$0xff]  }
 0xb92   :  { %18209 = vmatpush1.bf16.msra.mxu0 %v20947_v18  ;;  %v20998_v18 = vld [vmem:[#allocation20 + $0x1b70] ss:$28 sps:$4 sm:$0xff]  }
 0xb93   :  { %18685 = vmatpush3.bf16.msra.mxu1 %v20949_v47  ;;  %18211 = vmatprep.subr.bf16.mxu0 %v20950_v37  ;;  %v20997_v47 = vld [vmem:[#allocation20 + $0xf60] ss:$28 sps:$4 sm:$0xff]   ;;  %v20999_v37 = vld [vmem:[#allocation20 + $0x19b0] ss:$28 sps:$4 sm:$0xff]  }
 0xb94   :  { %18687 = vmatprep.subr.bf16.mxu1 %v20953_v41  ;;  %v21000_v41 = vld [vmem:[#allocation20 + $0xf9c] ss:$28 sps:$4 sm:$0xff]  }
 0xb96   :  { %18213 = vmatpush1.bf16.msra.mxu0 %v20952_v61  ;;  %v21003_v61 = vld [vmem:[#allocation20 + $0x1ba8] ss:$28 sps:$4 sm:$0xff]  }
 0xb97   :  { %18689 = vmatpush3.bf16.msra.mxu1 %v20954_v30  ;;  %18215 = vmatprep.subr.bf16.mxu0 %v20955_v56  ;;  %v21002_v30 = vld [vmem:[#allocation20 + $0xf98] ss:$28 sps:$4 sm:$0xff]  }
 0xb98   :  { %18691 = vmatprep.subr.bf16.mxu1 %v20958_v0  ;;  %v21004_v0 = vld [vmem:[#allocation20 + $0x19e8] ss:$28 sps:$4 sm:$0xff]  }
 0xb99   :  { %v14114_v9 = vpop.f32.mrb[36].mxu1 }
 0xb9a   :  { %v18760_v22 = vadd.f32 %v14114_v9, %v12959_v19  ;;  %v14116_v23 = vpop.f32.mrb[37].mxu1  ;;  %18217 = vmatpush1.bf16.msra.mxu0 %v20957_v29  ;;  %v21005_v19 = vld [vmem:[#allocation20 + $0xfd4] ss:$28 sps:$4 sm:$0xff]   ;;  %v21008_v29 = vld [vmem:[#allocation20 + $0x1be0] ss:$28 sps:$4 sm:$0xff]  }
 0xb9b   :  { %v18761_v15 = vadd.f32 %v14116_v23, %v12963_v12  ;;  %18693 = vmatpush3.bf16.msra.mxu1 %v20959_v44  ;;  %18219 = vmatprep.subr.bf16.mxu0 %v20960_v2  ;;  %v21009_v12 = vld [vmem:[#allocation20 + $0x1a20] ss:$28 sps:$4 sm:$0xff]   ;;  %v21010_v44 = vld [vmem:[#allocation20 + $0x100c] ss:$28 sps:$4 sm:$0xff]   ;;  %v21018_v23 = vld [vmem:[#allocation20 + $0x1078] ss:$28 sps:$4 sm:$0xff]  }
 0xb9c   :  { %18695 = vmatprep.subr.bf16.mxu1 %v20963_v24  ;;  %v21012_v2 = vld [vmem:[#allocation20 + $0x1008] ss:$28 sps:$4 sm:$0xff]   ;;  %v21015_v9 = vld [vmem:[#allocation20 + $0x1040] ss:$28 sps:$4 sm:$0xff]  }
 0xb9d   :  { %v15255_v7 = vcombine.low %v18760_v22, %v18761_v15  ;;  %v21013_v24 = vld [vmem:[#allocation20 + $0x1044] ss:$28 sps:$4 sm:$0xff]   ;;  %v21016_v22 = vld [vmem:[#allocation20 + $0x107c] ss:$28 sps:$4 sm:$0xff]   ;;  %v21021_v15 = vld [vmem:[#allocation20 + $0x10b0] ss:$28 sps:$4 sm:$0xff]  }
 0xb9e   :  { %18221 = vmatpush1.bf16.msra.mxu0 %v20962_v14  ;;  %v21019_v14 = vld [vmem:[#allocation20 + $0x10b4] ss:$28 sps:$4 sm:$0xff]  }
 0xb9f   :  { %v15269_v33 = vrot.slane %v15255_v7, %v22130_v16  ;;  %18697 = vmatpush3.bf16.msra.mxu1 %v20964_v4  ;;  %18223 = vmatprep.subr.bf16.mxu0 %v20965_v20  ;;  %v21022_v4 = vld [vmem:[#allocation20 + $0x10ec] ss:$28 sps:$4 sm:$0xff]   ;;  %v21027_v7 = vld [vmem:[#allocation20 + $0x1120] ss:$28 sps:$4 sm:$0xff]  }
 0xba0   :  { %18699 = vmatprep.subr.bf16.mxu1 %v20968_v27  ;;  %v21024_v20 = vld [vmem:[#allocation20 + $0x10e8] ss:$28 sps:$4 sm:$0xff]  }
 0xba1   :  { %14397 = vmatmul.mubr.f32.vlgmr.msra.gmra.mrb[30].mxu0 %v22036_v17  ;;  %v15270_v52 = vcombine.low %v15262_v32, %v15269_v33  ;;  %v20979_v17 = vld [vmem:[#allocation20 + $0x18d0] ss:$28 sps:$4 sm:$0xff]   ;;  %v21025_v27 = vld [vmem:[#allocation20 + $0x1124] ss:$28 sps:$4 sm:$0xff]   ;;  %v21028_v32 = vld [vmem:[#allocation20 + $0x115c] ss:$28 sps:$4 sm:$0xff]  }
 0xba2   :  { %18225 = vmatpush1.bf16.msra.mxu0 %v20967_v58  ;;  %14467 = vmatprep.mubr.f32.mxu0 %v22039_v31  ;;  %v20983_v31 = vld [vmem:[#allocation20 + $0x1ac8] ss:$28 sps:$4 sm:$0xff]   ;;  %v12975_v58 = vrot.slane %v22111_v49, %v21884_v50 }
 0xba3   :  { %18701 = vmatpush3.bf16.msra.mxu1 %v20969_v3  ;;  %18227 = vmatprep.subr.bf16.mxu0 %v20970_v21  ;;  %15289 = vst [vmem:[#allocation23] sm:$0xff] %v15270_v52  ;;  %v21030_v21 = vld [vmem:[#allocation20 + $0x1158] ss:$28 sps:$4 sm:$0xff]   ;;  %v21036_v50 = vld [vmem:[#allocation20 + $0x11c8] ss:$28 sps:$4 sm:$0xff]  }
 0xba4   :  { %18703 = vmatprep.subr.bf16.mxu1 %v20973_v51 }
 0xba6   :  { %18229 = vmatpush1.bf16.msra.mxu0 %v20972_v57  ;;  %15172 = vmatmul.mubr.f32.vlgmr.msra.gmra.mrb[50].mxu1 %v22078_v28  ;;  %v21031_v57 = vld [vmem:[#allocation20 + $0x1194] ss:$28 sps:$4 sm:$0xff]  }
 0xba7   :  { %18705 = vmatpush3.bf16.msra.mxu1 %v20974_v40  ;;  %15241 = vmatprep.mubr.f32.mxu1 %v22081_v63 }
 0xba8   :  { %18231 = vmatprep.subr.bf16.mxu0 %v20975_v13  ;;  %18707 = vmatprep.subr.bf16.mxu1 %v20978_v8  ;;  %v21033_v13 = vld [vmem:[#allocation20 + $0x1190] ss:$28 sps:$4 sm:$0xff]  }
 0xba9   :  { %v21034_v8 = vld [vmem:[#allocation20 + $0x11cc] ss:$28 sps:$4 sm:$0xff]  }
 0xbaa   :  { %18233 = vmatpush1.bf16.msra.mxu0 %v20977_v6  ;;  %v21037_v6 = vld [vmem:[#allocation20 + $0x1204] ss:$28 sps:$4 sm:$0xff]  }
 0xbab   :  { %18709 = vmatpush3.bf16.msra.mxu1 %v20979_v17  ;;  %18235 = vmatprep.subr.bf16.mxu0 %v20980_v48  ;;  %v21039_v17 = vld [vmem:[#allocation20 + $0x1200] ss:$28 sps:$4 sm:$0xff]  }
 0xbac   :  { %18711 = vmatprep.subr.bf16.mxu1 %v20983_v31  ;;  %v21040_v48 = vld [vmem:[#allocation20 + $0x123c] ss:$28 sps:$4 sm:$0xff]  }
 0xbad   :  { %v21042_v31 = vld [vmem:[#allocation20 + $0x1238] ss:$28 sps:$4 sm:$0xff]  }
 0xbae   :  { %18237 = vmatpush1.bf16.msra.mxu0 %v20982_v25  ;;  %v21043_v25 = vld [vmem:[#allocation20 + $0x1274] ss:$28 sps:$4 sm:$0xff]  }
 0xbaf   :  { %18713 = vmatpush3.bf16.msra.mxu1 %v20984_v38  ;;  %18239 = vmatprep.subr.bf16.mxu0 %v20985_v34  ;;  %v21045_v38 = vld [vmem:[#allocation20 + $0x1270] ss:$28 sps:$4 sm:$0xff]  }
 0xbb0   :  { %18715 = vmatprep.subr.bf16.mxu1 %v20988_v35  ;;  %v21046_v34 = vld [vmem:[#allocation20 + $0x12ac] ss:$28 sps:$4 sm:$0xff]   ;;  %v21049_v35 = vld [vmem:[#allocation20 + $0x12e4] ss:$28 sps:$4 sm:$0xff]  }
 0xbb2   :  { %18241 = vmatpush1.bf16.msra.mxu0 %v20987_v55  ;;  %v21052_v55 = vld [vmem:[#allocation20 + $0x131c] ss:$28 sps:$4 sm:$0xff]  }
 0xbb3   :  { %18717 = vmatpush3.bf16.msra.mxu1 %v20989_v54  ;;  %18243 = vmatprep.subr.bf16.mxu0 %v20990_v59 }
 0xbb4   :  { %18719 = vmatprep.subr.bf16.mxu1 %v20993_v43  ;;  %v21054_v43 = vld [vmem:[#allocation20 + $0x1318] ss:$28 sps:$4 sm:$0xff]  }
 0xbb6   :  { %18245 = vmatpush1.bf16.msra.mxu0 %v20992_v36 }
 0xbb7   :  { %18721 = vmatpush3.bf16.msra.mxu1 %v20994_v60  ;;  %18247 = vmatprep.subr.bf16.mxu0 %v20995_v39  ;;  %v21055_v60 = vld [vmem:[#allocation20 + $0x1354] ss:$28 sps:$4 sm:$0xff]  }
 0xbb8   :  { %18723 = vmatprep.subr.bf16.mxu1 %v20998_v18  ;;  %v21057_v18 = vld [vmem:[#allocation20 + $0x1350] ss:$28 sps:$4 sm:$0xff]  }
 0xbb9   :  { %v16674_v42 = vpop.f32.mrb[38].mxu1 }
 0xbba   :  { %18249 = vmatpush1.bf16.msra.mxu0 %v20997_v47  ;;  %v16675_v45 = vpop.f32.mrb[39].mxu1  ;;  %v21058_v47 = vld [vmem:[#allocation20 + $0x138c] ss:$28 sps:$4 sm:$0xff]  }
 0xbbb   :  { %v16676_v56 = vadd.f32 %v16675_v45, %v16674_v42  ;;  %18725 = vmatpush3.bf16.msra.mxu1 %v20999_v37  ;;  %18251 = vmatprep.subr.bf16.mxu0 %v21000_v41  ;;  %v21060_v37 = vld [vmem:[#allocation20 + $0x1388] ss:$28 sps:$4 sm:$0xff]   ;;  %v21064_v42 = vld [vmem:[#allocation20 + $0x13fc] ss:$28 sps:$4 sm:$0xff]  }
 0xbbc   :  { %18727 = vmatprep.subr.bf16.mxu1 %v21003_v61  ;;  %v21061_v41 = vld [vmem:[#allocation20 + $0x13c4] ss:$28 sps:$4 sm:$0xff]   ;;  %v21066_v45 = vld [vmem:[#allocation20 + $0x13f8] ss:$28 sps:$4 sm:$0xff]  }
 0xbbd   :  { %v14754_v51 = vadd.f32 %v16676_v56, %v12975_v58  ;;  %v21063_v61 = vld [vmem:[#allocation20 + $0x13c0] ss:$28 sps:$4 sm:$0xff]   ;;  %v21069_v56 = vld [vmem:[#allocation20 + $0x1430] ss:$28 sps:$4 sm:$0xff]   ;;  %v21090_v58 = vld [vmem:[#allocation20 + $0x15b8] ss:$28 sps:$4 sm:$0xff]  }
 0xbbe   :  { %18253 = vmatpush1.bf16.msra.mxu0 %v21002_v30  ;;  %v21067_v30 = vld [vmem:[#allocation20 + $0x1434] ss:$28 sps:$4 sm:$0xff]  }
 0xbbf   :  { %18729 = vmatpush3.bf16.msra.mxu1 %v21004_v0  ;;  %18255 = vmatprep.subr.bf16.mxu0 %v21005_v19  ;;  %v21070_v0 = vld [vmem:[#allocation20 + $0x146c] ss:$28 sps:$4 sm:$0xff]  }
 0xbc0   :  { %18731 = vmatprep.subr.bf16.mxu1 %v21008_v29  ;;  %v21072_v19 = vld [vmem:[#allocation20 + $0x1468] ss:$28 sps:$4 sm:$0xff]  }
 0xbc1   :  { %v21073_v29 = vld [vmem:[#allocation20 + $0x14a4] ss:$28 sps:$4 sm:$0xff]  }
 0xbc2   :  { %18257 = vmatpush1.bf16.msra.mxu0 %v21007_v53  ;;  %v21075_v53 = vld [vmem:[#allocation20 + $0x14a0] ss:$28 sps:$4 sm:$0xff]  }
 0xbc3   :  { %18733 = vmatpush3.bf16.msra.mxu1 %v21009_v12  ;;  %18259 = vmatprep.subr.bf16.mxu0 %v21010_v44  ;;  %v21076_v12 = vld [vmem:[#allocation20 + $0x14dc] ss:$28 sps:$4 sm:$0xff]  }
 0xbc6   :  { %18261 = vmatpush1.bf16.msra.mxu0 %v21012_v2  ;;  %15242 = vmatmul.mubr.f32.vlgmr.msra.gmra.mrb[52].mxu1 %v22089_v11 }
 0xbc7   :  { %18263 = vmatprep.subr.bf16.mxu0 %v21013_v24  ;;  %v21078_v24 = vld [vmem:[#allocation20 + $0x14d8] ss:$28 sps:$4 sm:$0xff]  }
 0xbca   :  { %18265 = vmatpush1.bf16.msra.mxu0 %v21015_v9 }
 0xbcb   :  { %18267 = vmatprep.subr.bf16.mxu0 %v21016_v22  ;;  %v21079_v22 = vld [vmem:[#allocation20 + $0x1514] ss:$28 sps:$4 sm:$0xff]  }
 0xbce   :  { %18269 = vmatpush1.bf16.msra.mxu0 %v21018_v23 }
 0xbcf   :  { %18271 = vmatprep.subr.bf16.mxu0 %v21019_v14  ;;  %v21081_v14 = vld [vmem:[#allocation20 + $0x1510] ss:$28 sps:$4 sm:$0xff]  }
 0xbd2   :  { %18273 = vmatpush1.bf16.msra.mxu0 %v21021_v15  ;;  %v21082_v15 = vld [vmem:[#allocation20 + $0x154c] ss:$28 sps:$4 sm:$0xff]  }
 0xbd3   :  { %18275 = vmatprep.subr.bf16.mxu0 %v21022_v4  ;;  %v21084_v4 = vld [vmem:[#allocation20 + $0x1548] ss:$28 sps:$4 sm:$0xff]  }
 0xbd6   :  { %18277 = vmatpush1.bf16.msra.mxu0 %v21024_v20  ;;  %v21085_v20 = vld [vmem:[#allocation20 + $0x1584] ss:$28 sps:$4 sm:$0xff]  }
 0xbd7   :  { %18279 = vmatprep.subr.bf16.mxu0 %v21025_v27  ;;  %v21087_v27 = vld [vmem:[#allocation20 + $0x1580] ss:$28 sps:$4 sm:$0xff]  }
 0xbd9   :  { %v16709_v33 = vpop.f32.mrb[40].mxu1 }
 0xbda   :  { %18281 = vmatpush1.bf16.msra.mxu0 %v21027_v7  ;;  %v16710_v3 = vpop.f32.mrb[41].mxu1  ;;  %v21088_v7 = vld [vmem:[#allocation20 + $0x15bc] ss:$28 sps:$4 sm:$0xff]  }
 0xbdb   :  { %v16711_v52 = vadd.f32 %v16710_v3, %v16709_v33  ;;  %18283 = vmatprep.subr.bf16.mxu0 %v21028_v32  ;;  %v21091_v32 = vld [vmem:[#allocation20 + $0x15f4] ss:$28 sps:$4 sm:$0xff]   ;;  %v21094_v3 = vld [vmem:[#allocation20 + $0x162c] ss:$28 sps:$4 sm:$0xff]  }
 0xbdc   :  { %v21093_v33 = vld [vmem:[#allocation20 + $0x15f0] ss:$28 sps:$4 sm:$0xff]  }
 0xbdd   :  { %v14824_v40 = vadd.f32 %v16711_v52, %v14754_v51  ;;  %v21100_v51 = vld [vmem:[#allocation20 + $0x169c] ss:$28 sps:$4 sm:$0xff]  }
 0xbde   :  { %18285 = vmatpush1.bf16.msra.mxu0 %v21030_v21  ;;  %v21097_v21 = vld [vmem:[#allocation20 + $0x1664] ss:$28 sps:$4 sm:$0xff]  }
 0xbdf   :  { %18287 = vmatprep.subr.bf16.mxu0 %v21031_v57 }
 0xbe1   :  { %14468 = vmatmul.mubr.f32.vlgmr.msra.gmra.mrb[30].mxu0 %v22050_v62  ;;  %v21048_v62 = vld [vmem:[#allocation20 + $0x12a8] ss:$28 sps:$4 sm:$0xff]  }
 0xbe2   :  { %18289 = vmatpush1.bf16.msra.mxu0 %v21033_v13  ;;  %14538 = vmatprep.mubr.f32.mxu0 %v22053_v1  ;;  %v21051_v1 = vld [vmem:[#allocation20 + $0x12e0] ss:$28 sps:$4 sm:$0xff]  }
 0xbe3   :  { %18291 = vmatprep.subr.bf16.mxu0 %v21034_v8  ;;  %v21103_v8 = vld [vmem:[#allocation20 + $0x16d4] ss:$28 sps:$4 sm:$0xff]  }
 0xbe6   :  { %18293 = vmatpush1.bf16.msra.mxu0 %v21036_v50 }
 0xbe7   :  { %18295 = vmatprep.subr.bf16.mxu0 %v21037_v6  ;;  %v21105_v6 = vld [vmem:[#allocation20 + $0x16d0] ss:$28 sps:$4 sm:$0xff]  }
 0xbea   :  { %18297 = vmatpush1.bf16.msra.mxu0 %v21039_v17  ;;  %v21106_v17 = vld [vmem:[#allocation20 + $0x170c] ss:$28 sps:$4 sm:$0xff]  }
 0xbeb   :  { %18299 = vmatprep.subr.bf16.mxu0 %v21040_v48  ;;  %v21108_v48 = vld [vmem:[#allocation20 + $0x1708] ss:$28 sps:$4 sm:$0xff]  }
 0xbee   :  { %18301 = vmatpush1.bf16.msra.mxu0 %v21042_v31  ;;  %v21109_v31 = vld [vmem:[#allocation20 + $0x1744] ss:$28 sps:$4 sm:$0xff]  }
 0xbef   :  { %18303 = vmatprep.subr.bf16.mxu0 %v21043_v25  ;;  %v21111_v25 = vld [vmem:[#allocation20 + $0x1740] ss:$28 sps:$4 sm:$0xff]  }
 0xbf2   :  { %18305 = vmatpush1.bf16.msra.mxu0 %v21045_v38  ;;  %v21112_v38 = vld [vmem:[#allocation20 + $0x177c] ss:$28 sps:$4 sm:$0xff]  }
 0xbf3   :  { %18307 = vmatprep.subr.bf16.mxu0 %v21046_v34  ;;  %v21114_v34 = vld [vmem:[#allocation20 + $0x1778] ss:$28 sps:$4 sm:$0xff]  }
 0xbf6   :  { %18309 = vmatpush1.bf16.msra.mxu0 %v21048_v62  ;;  %v21115_v62 = vld [vmem:[#allocation20 + $0x17b4] ss:$28 sps:$4 sm:$0xff]  }
 0xbf7   :  { %18311 = vmatprep.subr.bf16.mxu0 %v21049_v35  ;;  %v21117_v35 = vld [vmem:[#allocation20 + $0x17b0] ss:$28 sps:$4 sm:$0xff]  }
 0xbf9   :  { %v16744_v54 = vpop.f32.mrb[42].mxu1 }
 0xbfa   :  { %18313 = vmatpush1.bf16.msra.mxu0 %v21051_v1  ;;  %v16745_v59 = vpop.f32.mrb[43].mxu1  ;;  %v21118_v1 = vld [vmem:[#allocation20 + $0x17ec] ss:$28 sps:$4 sm:$0xff]  }
 0xbfb   :  { %v16746_v36 = vadd.f32 %v16745_v59, %v16744_v54  ;;  %18315 = vmatprep.subr.bf16.mxu0 %v21052_v55  ;;  %v21120_v55 = vld [vmem:[#allocation20 + $0x17e8] ss:$28 sps:$4 sm:$0xff]   ;;  %v21123_v59 = vld [vmem:[#allocation20 + $0x1820] ss:$28 sps:$4 sm:$0xff]  }
 0xbfc   :  { %v21121_v54 = vld [vmem:[#allocation20 + $0x1824] ss:$28 sps:$4 sm:$0xff]  }
 0xbfd   :  { %v14894_v39 = vadd.f32 %v16746_v36, %v14824_v40  ;;  %v21102_v40 = vld [vmem:[#allocation20 + $0x1698] ss:$28 sps:$4 sm:$0xff]  }
 0xbfe   :  { %18317 = vmatpush1.bf16.msra.mxu0 %v21054_v43  ;;  %v21124_v43 = vld [vmem:[#allocation20 + $0x185c] ss:$28 sps:$4 sm:$0xff]  }
 0xbff   :  { %18319 = vmatprep.subr.bf16.mxu0 %v21055_v60 }
 0xc02   :  { %18321 = vmatpush1.bf16.msra.mxu0 %v21057_v18 }
 0xc03   :  { %18323 = vmatprep.subr.bf16.mxu0 %v21058_v47  ;;  %v21127_v47 = vld [vmem:[#allocation20 + $0x1894] ss:$28 sps:$4 sm:$0xff]  }
 0xc06   :  { %18325 = vmatpush1.bf16.msra.mxu0 %v21060_v37 }
 0xc07   :  { %18327 = vmatprep.subr.bf16.mxu0 %v21061_v41  ;;  %v21129_v41 = vld [vmem:[#allocation20 + $0x1890] ss:$28 sps:$4 sm:$0xff]  }
 0xc0a   :  { %18329 = vmatpush1.bf16.msra.mxu0 %v21063_v61  ;;  %v21130_v61 = vld [vmem:[#allocation20 + $0x18cc] ss:$28 sps:$4 sm:$0xff]  }
 0xc0b   :  { %18331 = vmatprep.subr.bf16.mxu0 %v21064_v42  ;;  %v21132_v42 = vld [vmem:[#allocation20 + $0x18c8] ss:$28 sps:$4 sm:$0xff]  }
 0xc0e   :  { %18333 = vmatpush1.bf16.msra.mxu0 %v21066_v45  ;;  %v21133_v45 = vld [vmem:[#allocation20 + $0x1904] ss:$28 sps:$4 sm:$0xff]  }
 0xc0f   :  { %18335 = vmatprep.subr.bf16.mxu0 %v21067_v30  ;;  %v21135_v30 = vld [vmem:[#allocation20 + $0x1900] ss:$28 sps:$4 sm:$0xff]  }
 0xc12   :  { %18337 = vmatpush1.bf16.msra.mxu0 %v21069_v56  ;;  %v21136_v56 = vld [vmem:[#allocation20 + $0x193c] ss:$28 sps:$4 sm:$0xff]  }
 0xc13   :  { %18339 = vmatprep.subr.bf16.mxu0 %v21070_v0  ;;  %v21138_v0 = vld [vmem:[#allocation20 + $0x1938] ss:$28 sps:$4 sm:$0xff]  }
 0xc16   :  { %18341 = vmatpush1.bf16.msra.mxu0 %v21072_v19  ;;  %v21139_v19 = vld [vmem:[#allocation20 + $0x1974] ss:$28 sps:$4 sm:$0xff]  }
 0xc17   :  { %18343 = vmatprep.subr.bf16.mxu0 %v21073_v29  ;;  %v21141_v29 = vld [vmem:[#allocation20 + $0x1970] ss:$28 sps:$4 sm:$0xff]  }
 0xc19   :  { %v16779_v44 = vpop.f32.mrb[44].mxu1 }
 0xc1a   :  { %18345 = vmatpush1.bf16.msra.mxu0 %v21075_v53  ;;  %v16780_v2 = vpop.f32.mrb[45].mxu1  ;;  %v21142_v53 = vld [vmem:[#allocation20 + $0x19ac] ss:$28 sps:$4 sm:$0xff]  }
 0xc1b   :  { %v16781_v9 = vadd.f32 %v16780_v2, %v16779_v44  ;;  %18347 = vmatprep.subr.bf16.mxu0 %v21076_v12  ;;  %v21145_v12 = vld [vmem:[#allocation20 + $0x19e4] ss:$28 sps:$4 sm:$0xff]   ;;  %v21148_v44 = vld [vmem:[#allocation20 + $0x1a1c] ss:$28 sps:$4 sm:$0xff]  }
 0xc1d   :  { %v14964_v23 = vadd.f32 %v16781_v9, %v14894_v39  ;;  %v21126_v39 = vld [vmem:[#allocation20 + $0x1858] ss:$28 sps:$4 sm:$0xff]  }
 0xc1e   :  { %18349 = vmatpush1.bf16.msra.mxu0 %v21078_v24  ;;  %v21150_v9 = vld [vmem:[#allocation20 + $0x1a18] ss:$28 sps:$4 sm:$0xff]  }
 0xc1f   :  { %18351 = vmatprep.subr.bf16.mxu0 %v21079_v22 }
 0xc21   :  { %14539 = vmatmul.mubr.f32.vlgmr.msra.gmra.mrb[30].mxu0 %v22064_v5  ;;  %v21096_v5 = vld [vmem:[#allocation20 + $0x1628] ss:$28 sps:$4 sm:$0xff]  }
 0xc22   :  { %18353 = vmatpush1.bf16.msra.mxu0 %v21081_v14  ;;  %14609 = vmatprep.mubr.f32.mxu0 %v22067_v26  ;;  %v21099_v26 = vld [vmem:[#allocation20 + $0x1660] ss:$28 sps:$4 sm:$0xff]  }
 0xc23   :  { %18355 = vmatprep.subr.bf16.mxu0 %v21082_v15  ;;  %v21153_v15 = vld [vmem:[#allocation20 + $0x1a50] ss:$28 sps:$4 sm:$0xff]  }
 0xc26   :  { %18357 = vmatpush1.bf16.msra.mxu0 %v21084_v4  ;;  %v21154_v4 = vld [vmem:[#allocation20 + $0x1a8c] ss:$28 sps:$4 sm:$0xff]  }
 0xc27   :  { %18359 = vmatprep.subr.bf16.mxu0 %v21085_v20  ;;  %v21156_v20 = vld [vmem:[#allocation20 + $0x1a88] ss:$28 sps:$4 sm:$0xff]  }
 0xc2a   :  { %18361 = vmatpush1.bf16.msra.mxu0 %v21087_v27  ;;  %v21157_v27 = vld [vmem:[#allocation20 + $0x1ac4] ss:$28 sps:$4 sm:$0xff]  }
 0xc2b   :  { %18363 = vmatprep.subr.bf16.mxu0 %v21088_v7  ;;  %v21159_v7 = vld [vmem:[#allocation20 + $0x1ac0] ss:$28 sps:$4 sm:$0xff]  }
 0xc2e   :  { %18365 = vmatpush1.bf16.msra.mxu0 %v21090_v58  ;;  %v21160_v58 = vld [vmem:[#allocation20 + $0x1afc] ss:$28 sps:$4 sm:$0xff]  }
 0xc2f   :  { %18367 = vmatprep.subr.bf16.mxu0 %v21091_v32  ;;  %v21162_v32 = vld [vmem:[#allocation20 + $0x1af8] ss:$28 sps:$4 sm:$0xff]  }
 0xc32   :  { %18369 = vmatpush1.bf16.msra.mxu0 %v21093_v33  ;;  %v21163_v33 = vld [vmem:[#allocation20 + $0x1b34] ss:$28 sps:$4 sm:$0xff]  }
 0xc33   :  { %18371 = vmatprep.subr.bf16.mxu0 %v21094_v3  ;;  %v21165_v3 = vld [vmem:[#allocation20 + $0x1b30] ss:$28 sps:$4 sm:$0xff]  }
 0xc36   :  { %18373 = vmatpush1.bf16.msra.mxu0 %v21096_v5  ;;  %v21166_v5 = vld [vmem:[#allocation20 + $0x1b6c] ss:$28 sps:$4 sm:$0xff]  }
 0xc37   :  { %18375 = vmatprep.subr.bf16.mxu0 %v21097_v21  ;;  %v21168_v21 = vld [vmem:[#allocation20 + $0x1b68] ss:$28 sps:$4 sm:$0xff]  }
 0xc39   :  { %v16814_v52 = vpop.f32.mrb[46].mxu1 }
 0xc3a   :  { %18377 = vmatpush1.bf16.msra.mxu0 %v21099_v26  ;;  %v16815_v57 = vpop.f32.mrb[47].mxu1  ;;  %v21169_v26 = vld [vmem:[#allocation20 + $0x1ba4] ss:$28 sps:$4 sm:$0xff]  }
 0xc3b   :  { %v16816_v13 = vadd.f32 %v16815_v57, %v16814_v52  ;;  %18379 = vmatprep.subr.bf16.mxu0 %v21100_v51  ;;  %v21171_v51 = vld [vmem:[#allocation20 + $0x1ba0] ss:$28 sps:$4 sm:$0xff]  }
 0xc3c   :  { %v21172_v52 = vld [vmem:[#allocation20 + $0x1bdc] ss:$28 sps:$4 sm:$0xff]  }
 0xc3d   :  { %v15034_v50 = vadd.f32 %v16816_v13, %v14964_v23  ;;  %v21151_v23 = vld [vmem:[#allocation20 + $0x1a54] ss:$28 sps:$4 sm:$0xff]  }
 0xc3e   :  { %18381 = vmatpush1.bf16.msra.mxu0 %v21102_v40  ;;  %v21174_v13 = vld [vmem:[#allocation20 + $0x1bd8] ss:$28 sps:$4 sm:$0xff]  }
 0xc3f   :  { %18383 = vmatprep.subr.bf16.mxu0 %v21103_v8 }
 0xc42   :  { %18385 = vmatpush1.bf16.msra.mxu0 %v21105_v6  ;;  %v12967_v6 = vrot.slane %v22111_v49, %v21874_v10 }
 0xc43   :  { %18387 = vmatprep.subr.bf16.mxu0 %v21106_v17  ;;  %v12971_v17 = vrot.slane %v22111_v49, %v21849_v46 }
 0xc46   :  { %18389 = vmatpush1.bf16.msra.mxu0 %v21108_v48 }
 0xc47   :  { %18391 = vmatprep.subr.bf16.mxu0 %v21109_v31 }
 0xc4a   :  { %18393 = vmatpush1.bf16.msra.mxu0 %v21111_v25 }
 0xc4b   :  { %18395 = vmatprep.subr.bf16.mxu0 %v21112_v38 }
 0xc4e   :  { %18397 = vmatpush1.bf16.msra.mxu0 %v21114_v34 }
 0xc4f   :  { %18399 = vmatprep.subr.bf16.mxu0 %v21115_v62 }
 0xc52   :  { %18401 = vmatpush1.bf16.msra.mxu0 %v21117_v35 }
 0xc53   :  { %18403 = vmatprep.subr.bf16.mxu0 %v21118_v1 }
 0xc56   :  { %18405 = vmatpush1.bf16.msra.mxu0 %v21120_v55 }
 0xc57   :  { %18407 = vmatprep.subr.bf16.mxu0 %v21121_v54 }
 0xc59   :  { %v16849_v36 = vpop.f32.mrb[48].mxu1 }
 0xc5a   :  { %18409 = vmatpush1.bf16.msra.mxu0 %v21123_v59  ;;  %v16850_v60 = vpop.f32.mrb[49].mxu1 }
 0xc5b   :  { %v16851_v18 = vadd.f32 %v16850_v60, %v16849_v36  ;;  %18411 = vmatprep.subr.bf16.mxu0 %v21124_v43 }
 0xc5d   :  { %v15104_v37 = vadd.f32 %v16851_v18, %v15034_v50 }
 0xc5e   :  { %18413 = vmatpush1.bf16.msra.mxu0 %v21126_v39 }
 0xc5f   :  { %18415 = vmatprep.subr.bf16.mxu0 %v21127_v47 }
 0xc61   :  { %14610 = vmatmul.mubr.f32.vlgmr.msra.gmra.mrb[30].mxu0 %v22078_v28  ;;  %v21144_v28 = vld [vmem:[#allocation20 + $0x19a8] ss:$28 sps:$4 sm:$0xff]  }
 0xc62   :  { %18417 = vmatpush1.bf16.msra.mxu0 %v21129_v41  ;;  %14680 = vmatprep.mubr.f32.mxu0 %v22081_v63  ;;  %v21147_v63 = vld [vmem:[#allocation20 + $0x19e0] ss:$28 sps:$4 sm:$0xff]  }
 0xc63   :  { %18419 = vmatprep.subr.bf16.mxu0 %v21130_v61 }
 0xc66   :  { %18421 = vmatpush1.bf16.msra.mxu0 %v21132_v42 }
 0xc67   :  { %18423 = vmatprep.subr.bf16.mxu0 %v21133_v45 }
 0xc6a   :  { %18425 = vmatpush1.bf16.msra.mxu0 %v21135_v30 }
 0xc6b   :  { %18427 = vmatprep.subr.bf16.mxu0 %v21136_v56 }
 0xc6e   :  { %18429 = vmatpush1.bf16.msra.mxu0 %v21138_v0 }
 0xc6f   :  { %18431 = vmatprep.subr.bf16.mxu0 %v21139_v19 }
 0xc72   :  { %18433 = vmatpush1.bf16.msra.mxu0 %v21141_v29 }
 0xc73   :  { %18435 = vmatprep.subr.bf16.mxu0 %v21142_v53 }
 0xc76   :  { %18437 = vmatpush1.bf16.msra.mxu0 %v21144_v28 }
 0xc77   :  { %18439 = vmatprep.subr.bf16.mxu0 %v21145_v12 }
 0xc79   :  { %v16884_v2 = vpop.f32.mrb[50].mxu1 }
 0xc7a   :  { %18441 = vmatpush1.bf16.msra.mxu0 %v21147_v63  ;;  %v16885_v24 = vpop.f32.mrb[51].mxu1 }
 0xc7b   :  { %v16886_v22 = vadd.f32 %v16885_v24, %v16884_v2  ;;  %18443 = vmatprep.subr.bf16.mxu0 %v21148_v44 }
 0xc7d   :  { %v15174_v14 = vadd.f32 %v16886_v22, %v15104_v37 }
 0xc7e   :  { %18445 = vmatpush1.bf16.msra.mxu0 %v21150_v9 }
 0xc7f   :  { %18447 = vmatprep.subr.bf16.mxu0 %v21151_v23 }
 0xc82   :  { %18449 = vmatpush1.bf16.msra.mxu0 %v21153_v15 }
 0xc83   :  { %18451 = vmatprep.subr.bf16.mxu0 %v21154_v4 }
 0xc86   :  { %18453 = vmatpush1.bf16.msra.mxu0 %v21156_v20 }
 0xc87   :  { %18455 = vmatprep.subr.bf16.mxu0 %v21157_v27 }
 0xc8a   :  { %18457 = vmatpush1.bf16.msra.mxu0 %v21159_v7 }
 0xc8b   :  { %18459 = vmatprep.subr.bf16.mxu0 %v21160_v58 }
 0xc8e   :  { %18461 = vmatpush1.bf16.msra.mxu0 %v21162_v32 }
 0xc8f   :  { %18463 = vmatprep.subr.bf16.mxu0 %v21163_v33 }
 0xc92   :  { %18465 = vmatpush1.bf16.msra.mxu0 %v21165_v3 }
 0xc93   :  { %18467 = vmatprep.subr.bf16.mxu0 %v21166_v5 }
 0xc96   :  { %18469 = vmatpush1.bf16.msra.mxu0 %v21168_v21 }
 0xc97   :  { %18471 = vmatprep.subr.bf16.mxu0 %v21169_v26 }
 0xc99   :  { %v16919_v57 = vpop.f32.mrb[52].mxu1 }
 0xc9a   :  { %18473 = vmatpush1.bf16.msra.mxu0 %v21171_v51  ;;  %v16920_v40 = vpop.f32.mrb[53].mxu1 }
 0xc9b   :  { %v16921_v8 = vadd.f32 %v16920_v40, %v16919_v57  ;;  %18475 = vmatprep.subr.bf16.mxu0 %v21172_v52 }
 0xc9d   :  { %v15244_v50 = vadd.f32 %v16921_v8, %v15174_v14 }
 0xc9e   :  { %18477 = vmatpush1.bf16.msra.mxu0 %v21174_v13 }
 0xc9f   :  { %v15285_v62 = vrot.slane %v15244_v50, %v22130_v16 }
 0xca1   :  { %14681 = vmatmul.mubr.f32.vlgmr.msra.gmra.mrb[30].mxu0 %v22089_v11 }
 0xd74   :  { %v14682_v48 = vpop.f32.mrb[30].mxu0 }
 0xd75   :  { %v18762_v31 = vadd.f32 %v14682_v48, %v12967_v6  ;;  %v14684_v25 = vpop.f32.mrb[31].mxu0 }
 0xd76   :  { %v18763_v38 = vadd.f32 %v14684_v25, %v12971_v17 }
 0xd78   :  { %v15271_v34 = vcombine.low %v18762_v31, %v18763_v38 }
 0xd7a   :  { %v15278_v35 = vrot.slane %v15271_v34, %v22130_v16 }
 0xd7c   :  { %v15286_v1 = vcombine.low %v15278_v35, %v15285_v62 }
 0xd7e   :  { %15290 = vst [vmem:[#allocation23 + $0x8] sm:$0x3f] %v15286_v1 }
 0xd7f   :  { %21475 = shalt.err (!%p21472_p10)
}
 0xd80   :  { %s21476_s7 = scalar_lea.hbm %s22182_s13, 224 }
 0xd81   :  { %p21477_p11 = scmp.ne.s32.totalorder %s22182_s13, %s21476_s7  ;;  %p21480_p12 = scmp.lt.u32.totalorder %s21476_s7, %s22182_s13 }
 0xd83   :  { %p21482_p13 = pnand %p21480_p12, %p21477_p11 }
 0xd85   :  { %21485 = shalt.err (!%p21482_p13)
}
 0xd86   :  { %15300 = dma.vmem_to_hbm [thread:$0]  %s15298_s5, 224, %s22182_s13, [#allocation4]  }
 0xd87   :  { %21500 = dma.done.wait [#allocation4], 224  }
 0xd88   :  { %21501 = vsyncadd [#allocation4], 4294967072 }
 0xd89   :  { %15304 = vsyncpa [#allocation3], 1 }
 0xd8a   :  { %15305 = vsyncpa [#allocation6], 1 }
 0xd8b   :  { %15306 = vsyncpa [#allocation9], 1 }
 0xd8c   :  { %15307 = vsyncpa [#allocation12], 1 }
 0xd8d   :  { %15308 = vsyncpa [#allocation15], 1 }
 0xd8e   :  { %15309 = vsyncpa [#allocation18], 1 }
 0xd8f   :  { %15310 = vsyncpa [#allocation21], 1 }
 0xd90   :  { %15311 = vsyncpa [#allocation4], 1 }

</bundles_post_ra>
